<compile_context>
chip_gen: v7x
topology: tpu7x:2x2x1
jax: 0.10.0
libtpu: 0.0.40
codegen_flags: <defaults>
</compile_context>

<pallas_src>
import jax
import jax.numpy as jnp
from jax import lax
from jax.experimental import pallas as pl
from jax.experimental.pallas import tpu as pltpu

LOW_T = 50.0                  # cv2.Canny low threshold
HIGH_T = 150.0                # cv2.Canny high threshold
TAN22 = 0.4142135623730951    # tan(22.5 deg) for direction quantization
CHECK_EVERY = 8               # dilation steps between convergence checks


def _masked_shift(x, dy, dx, masks):
    """result[i, j] = x[i - dy, j - dx], zero outside the image (dy, dx static).

    `masks` are precomputed 0/1 f32 border masks (rows>=1, rows<=H-2, cols>=1,
    cols<=W-2) hoisted by the caller so no iota is re-materialized here.
    """
    mr_lo, mr_hi, mc_lo, mc_hi = masks
    H, W = x.shape
    y = x
    m = None
    if dy != 0:
        y = pltpu.roll(y, dy % H, axis=0)
        m = mr_lo if dy > 0 else mr_hi
    if dx != 0:
        y = pltpu.roll(y, dx % W, axis=1)
        mx = mc_lo if dx > 0 else mc_hi
        m = mx if m is None else m * mx
    return y if m is None else y * m


def _geodesic_dilate(seed, constraint, masks, max_iters):
    """Grow 0/1 map `seed` by 3x3 dilation restricted to `constraint` until fixpoint."""
    mr_lo, mr_hi, mc_lo, mc_hi = masks
    H, W = seed.shape

    def dilate_step(x):
        # Separable 3x3 max: row pass then column pass (4 rolls total).
        rowmax = jnp.maximum(
            x, jnp.maximum(pltpu.roll(x, 1, axis=1) * mc_lo,
                           pltpu.roll(x, W - 1, axis=1) * mc_hi))
        grown = jnp.maximum(
            rowmax, jnp.maximum(pltpu.roll(rowmax, 1, axis=0) * mr_lo,
                                pltpu.roll(rowmax, H - 1, axis=0) * mr_hi))
        return grown * constraint          # 0/1 maps: multiply == logical AND

    def cond_fn(state):
        it, _, changed = state
        return jnp.logical_and(changed, it < max_iters)

    def body_fn(state):
        it, x, _ = state
        y = x
        for _ in range(CHECK_EVERY):       # unrolled at trace time
            y = dilate_step(y)
        changed = jnp.max(y - x) > 0.5     # monotone growth -> diff is 0 or 1
        return it + CHECK_EVERY, y, changed

    _, out, _ = lax.while_loop(
        cond_fn, body_fn, (jnp.int32(0), seed, jnp.array(True)))
    return out


def _remove_inner_contours_kernel(img_ref, out_ref):
    img = img_ref[...].astype(jnp.float32)
    H, W = img.shape

    # ---- static border masks, built once and reused everywhere ----
    rows = lax.broadcasted_iota(jnp.int32, (H, W), 0)
    cols = lax.broadcasted_iota(jnp.int32, (H, W), 1)
    mr_lo = (rows >= 1).astype(jnp.float32)
    mr_hi = (rows <= H - 2).astype(jnp.float32)
    mc_lo = (cols >= 1).astype(jnp.float32)
    mc_hi = (cols <= W - 2).astype(jnp.float32)
    masks = (mr_lo, mr_hi, mc_lo, mc_hi)
    border01 = 1.0 - mr_lo * mr_hi * mc_lo * mc_hi

    # ---- Sobel 3x3 (aperture=3), separable, zero border ----
    # (cv2 uses BORDER_REPLICATE; border rows/cols differ slightly.)
    sx = 2.0 * img + _masked_shift(img, 0, 1, masks) + _masked_shift(img, 0, -1, masks)
    sy = 2.0 * img + _masked_shift(img, 1, 0, masks) + _masked_shift(img, -1, 0, masks)
    gx = _masked_shift(sy, 0, -1, masks) - _masked_shift(sy, 0, 1, masks)
    gy = _masked_shift(sx, -1, 0, masks) - _masked_shift(sx, 1, 0, masks)

    adx = jnp.abs(gx)
    ady = jnp.abs(gy)
    mag = adx + ady                        # L1 magnitude (cv2 default, L2gradient=False)

    # ---- non-maximum suppression along the quantized gradient direction ----
    is_horiz = ady <= TAN22 * adx
    is_vert = adx <= TAN22 * ady
    same_sign = (gx * gy) >= 0.0

    n1 = jnp.where(is_horiz, _masked_shift(mag, 0, 1, masks),
         jnp.where(is_vert,  _masked_shift(mag, 1, 0, masks),
         jnp.where(same_sign, _masked_shift(mag, 1, 1, masks),
                   _masked_shift(mag, 1, -1, masks))))
    n2 = jnp.where(is_horiz, _masked_shift(mag, 0, -1, masks),
         jnp.where(is_vert,  _masked_shift(mag, -1, 0, masks),
         jnp.where(same_sign, _masked_shift(mag, -1, -1, masks),
                   _masked_shift(mag, -1, 1, masks))))
    keep = jnp.logical_and(mag >= n1, mag >= n2)
    nms = jnp.where(keep, mag, 0.0)

    # ---- double threshold + hysteresis (geodesic dilation to fixpoint) ----
    strong = (nms > HIGH_T).astype(jnp.float32)
    weak = (nms > LOW_T).astype(jnp.float32)
    max_iters = H * W                      # safety bound; while_loop exits early
    edges01 = _geodesic_dilate(strong, weak, masks, max_iters)

    # ---- outer-contour filled mask (approximation) ----
    # TODO(synk): exact cv2.findContours(RETR_TREE)+drawContours hierarchy walk is a
    # sequential contour-tracing algorithm; approximated as the complement of a
    # border-connected background flood fill over non-edge pixels.
    not_edge = 1.0 - edges01
    bg = _geodesic_dilate(border01 * not_edge, not_edge, masks, max_iters)
    mask01 = 1.0 - bg                      # filled outer-contour regions

    # result = cv2.bitwise_and(edges, mask) for 0/255 maps
    out_ref[...] = (edges01 * mask01 * 255.0).astype(jnp.uint8)


@jax.jit
def remove_inner_contours(sample_u8):
    """sample_u8: uint8 grayscale image of shape (H, W). Returns uint8 (H, W)."""
    H, W = sample_u8.shape
    return pl.pallas_call(
        _remove_inner_contours_kernel,
        out_shape=jax.ShapeDtypeStruct((H, W), jnp.uint8),
        in_specs=[pl.BlockSpec((H, W), lambda: (0, 0))],
        out_specs=pl.BlockSpec((H, W), lambda: (0, 0)),
        compiler_params=pltpu.CompilerParams(vmem_limit_bytes=32 << 20),
    )(sample_u8)


if __name__ == "__main__":
    key = jax.random.PRNGKey(0)
    H, W = 128, 128

    # Deterministic synthetic grayscale image: a bright outer rectangle with a
    # smaller (inner) rectangle inside it, plus mild noise.
    rows = jnp.arange(H, dtype=jnp.int32)[:, None]
    cols = jnp.arange(W, dtype=jnp.int32)[None, :]
    outer = ((rows > 20) & (rows < 100) & (cols > 20) & (cols < 100)).astype(jnp.float32) * 180.0
    inner = ((rows > 52) & (rows < 76) & (cols > 52) & (cols < 76)).astype(jnp.float32) * 60.0
    noise = jax.random.uniform(key, (H, W), minval=0.0, maxval=6.0)
    sample = jnp.clip(outer + inner + noise, 0.0, 255.0).astype(jnp.uint8)

    result = remove_inner_contours(sample)
    result = jax.block_until_ready(result)

    assert result.shape == (H, W)
    assert result.dtype == jnp.uint8
    # result values are 0 or 255 only
    assert bool(jnp.all(jnp.logical_or(result == 0, result == 255)))
    print("KERNEL_OK")
</pallas_src>

<mosaic_0001>
module attributes {stable_mosaic.version = 11 : i64} {
  func.func @_remove_inner_contours_kernel(%arg0: memref<128x128xi8, #tpu.memory_space<vmem>>, %arg1: memref<128x128xi8, #tpu.memory_space<vmem>>) attributes {dimension_semantics = [], scalar_prefetch = 0 : i64, scratch_operands = 0 : i64, tpu.core_type = #tpu.core_type<tc>} {
    %c0 = arith.constant 0 : index
    %c0_0 = arith.constant 0 : index
    %0 = vector.load %arg0[%c0, %c0_0] : memref<128x128xi8, #tpu.memory_space<vmem>>, vector<128x128xi8>
    %1 = arith.uitofp %0 : vector<128x128xi8> to vector<128x128xf32>
    %2 = tpu.iota {dimensions = array<i32: 0>} : vector<128x128xi32>
    %3 = tpu.iota {dimensions = array<i32: 1>} : vector<128x128xi32>
    %c1_i32 = arith.constant 1 : i32
    %4 = vector.broadcast %c1_i32 : i32 to vector<128x128xi32>
    %5 = arith.cmpi sge, %2, %4 : vector<128x128xi32>
    %6 = arith.extui %5 : vector<128x128xi1> to vector<128x128xi32>
    %7 = arith.sitofp %6 : vector<128x128xi32> to vector<128x128xf32>
    %c126_i32 = arith.constant 126 : i32
    %8 = vector.broadcast %c126_i32 : i32 to vector<128x128xi32>
    %9 = arith.cmpi sle, %2, %8 : vector<128x128xi32>
    %10 = arith.extui %9 : vector<128x128xi1> to vector<128x128xi32>
    %11 = arith.sitofp %10 : vector<128x128xi32> to vector<128x128xf32>
    %c1_i32_1 = arith.constant 1 : i32
    %12 = vector.broadcast %c1_i32_1 : i32 to vector<128x128xi32>
    %13 = arith.cmpi sge, %3, %12 : vector<128x128xi32>
    %14 = arith.extui %13 : vector<128x128xi1> to vector<128x128xi32>
    %15 = arith.sitofp %14 : vector<128x128xi32> to vector<128x128xf32>
    %c126_i32_2 = arith.constant 126 : i32
    %16 = vector.broadcast %c126_i32_2 : i32 to vector<128x128xi32>
    %17 = arith.cmpi sle, %3, %16 : vector<128x128xi32>
    %18 = arith.extui %17 : vector<128x128xi1> to vector<128x128xi32>
    %19 = arith.sitofp %18 : vector<128x128xi32> to vector<128x128xf32>
    %20 = arith.mulf %7, %11 : vector<128x128xf32>
    %21 = arith.mulf %20, %15 : vector<128x128xf32>
    %22 = arith.mulf %21, %19 : vector<128x128xf32>
    %cst = arith.constant 1.000000e+00 : f32
    %23 = vector.broadcast %cst : f32 to vector<128x128xf32>
    %24 = arith.subf %23, %22 : vector<128x128xf32>
    %cst_3 = arith.constant 2.000000e+00 : f32
    %25 = vector.broadcast %cst_3 : f32 to vector<128x128xf32>
    %26 = arith.mulf %25, %1 : vector<128x128xf32>
    %c1_i32_4 = arith.constant 1 : i32
    %27 = tpu.dynamic_rotate %1 by %c1_i32_4 dim 1 : vector<128x128xf32>, i32 -> vector<128x128xf32>
    %28 = arith.mulf %27, %15 : vector<128x128xf32>
    %29 = arith.addf %26, %28 : vector<128x128xf32>
    %c127_i32 = arith.constant 127 : i32
    %30 = tpu.dynamic_rotate %1 by %c127_i32 dim 1 : vector<128x128xf32>, i32 -> vector<128x128xf32>
    %31 = arith.mulf %30, %19 : vector<128x128xf32>
    %32 = arith.addf %29, %31 : vector<128x128xf32>
    %cst_5 = arith.constant 2.000000e+00 : f32
    %33 = vector.broadcast %cst_5 : f32 to vector<128x128xf32>
    %34 = arith.mulf %33, %1 : vector<128x128xf32>
    %c1_i32_6 = arith.constant 1 : i32
    %35 = tpu.dynamic_rotate %1 by %c1_i32_6 dim 0 : vector<128x128xf32>, i32 -> vector<128x128xf32>
    %36 = arith.mulf %35, %7 : vector<128x128xf32>
    %37 = arith.addf %34, %36 : vector<128x128xf32>
    %c127_i32_7 = arith.constant 127 : i32
    %38 = tpu.dynamic_rotate %1 by %c127_i32_7 dim 0 : vector<128x128xf32>, i32 -> vector<128x128xf32>
    %39 = arith.mulf %38, %11 : vector<128x128xf32>
    %40 = arith.addf %37, %39 : vector<128x128xf32>
    %c127_i32_8 = arith.constant 127 : i32
    %41 = tpu.dynamic_rotate %40 by %c127_i32_8 dim 1 : vector<128x128xf32>, i32 -> vector<128x128xf32>
    %42 = arith.mulf %41, %19 : vector<128x128xf32>
    %c1_i32_9 = arith.constant 1 : i32
    %43 = tpu.dynamic_rotate %40 by %c1_i32_9 dim 1 : vector<128x128xf32>, i32 -> vector<128x128xf32>
    %44 = arith.mulf %43, %15 : vector<128x128xf32>
    %45 = arith.subf %42, %44 : vector<128x128xf32>
    %c127_i32_10 = arith.constant 127 : i32
    %46 = tpu.dynamic_rotate %32 by %c127_i32_10 dim 0 : vector<128x128xf32>, i32 -> vector<128x128xf32>
    %47 = arith.mulf %46, %11 : vector<128x128xf32>
    %c1_i32_11 = arith.constant 1 : i32
    %48 = tpu.dynamic_rotate %32 by %c1_i32_11 dim 0 : vector<128x128xf32>, i32 -> vector<128x128xf32>
    %49 = arith.mulf %48, %7 : vector<128x128xf32>
    %50 = arith.subf %47, %49 : vector<128x128xf32>
    %51 = math.absf %45 : vector<128x128xf32>
    %52 = math.absf %50 : vector<128x128xf32>
    %53 = arith.addf %51, %52 : vector<128x128xf32>
    %cst_12 = arith.constant 0.414213568 : f32
    %54 = vector.broadcast %cst_12 : f32 to vector<128x128xf32>
    %55 = arith.mulf %54, %51 : vector<128x128xf32>
    %56 = arith.cmpf ole, %52, %55 : vector<128x128xf32>
    %cst_13 = arith.constant 0.414213568 : f32
    %57 = vector.broadcast %cst_13 : f32 to vector<128x128xf32>
    %58 = arith.mulf %57, %52 : vector<128x128xf32>
    %59 = arith.cmpf ole, %51, %58 : vector<128x128xf32>
    %60 = arith.mulf %45, %50 : vector<128x128xf32>
    %cst_14 = arith.constant 0.000000e+00 : f32
    %61 = vector.broadcast %cst_14 : f32 to vector<128x128xf32>
    %62 = arith.cmpf oge, %60, %61 : vector<128x128xf32>
    %c1_i32_15 = arith.constant 1 : i32
    %63 = tpu.dynamic_rotate %53 by %c1_i32_15 dim 1 : vector<128x128xf32>, i32 -> vector<128x128xf32>
    %64 = arith.mulf %63, %15 : vector<128x128xf32>
    %c1_i32_16 = arith.constant 1 : i32
    %65 = tpu.dynamic_rotate %53 by %c1_i32_16 dim 0 : vector<128x128xf32>, i32 -> vector<128x128xf32>
    %66 = arith.mulf %65, %7 : vector<128x128xf32>
    %c1_i32_17 = arith.constant 1 : i32
    %67 = tpu.dynamic_rotate %53 by %c1_i32_17 dim 0 : vector<128x128xf32>, i32 -> vector<128x128xf32>
    %c1_i32_18 = arith.constant 1 : i32
    %68 = tpu.dynamic_rotate %67 by %c1_i32_18 dim 1 : vector<128x128xf32>, i32 -> vector<128x128xf32>
    %69 = arith.mulf %7, %15 : vector<128x128xf32>
    %70 = arith.mulf %68, %69 : vector<128x128xf32>
    %c1_i32_19 = arith.constant 1 : i32
    %71 = tpu.dynamic_rotate %53 by %c1_i32_19 dim 0 : vector<128x128xf32>, i32 -> vector<128x128xf32>
    %c127_i32_20 = arith.constant 127 : i32
    %72 = tpu.dynamic_rotate %71 by %c127_i32_20 dim 1 : vector<128x128xf32>, i32 -> vector<128x128xf32>
    %73 = arith.mulf %7, %19 : vector<128x128xf32>
    %74 = arith.mulf %72, %73 : vector<128x128xf32>
    %75 = arith.select %62, %70, %74 : vector<128x128xi1>, vector<128x128xf32>
    %76 = arith.select %59, %66, %75 : vector<128x128xi1>, vector<128x128xf32>
    %77 = arith.select %56, %64, %76 : vector<128x128xi1>, vector<128x128xf32>
    %c127_i32_21 = arith.constant 127 : i32
    %78 = tpu.dynamic_rotate %53 by %c127_i32_21 dim 1 : vector<128x128xf32>, i32 -> vector<128x128xf32>
    %79 = arith.mulf %78, %19 : vector<128x128xf32>
    %c127_i32_22 = arith.constant 127 : i32
    %80 = tpu.dynamic_rotate %53 by %c127_i32_22 dim 0 : vector<128x128xf32>, i32 -> vector<128x128xf32>
    %81 = arith.mulf %80, %11 : vector<128x128xf32>
    %c127_i32_23 = arith.constant 127 : i32
    %82 = tpu.dynamic_rotate %53 by %c127_i32_23 dim 0 : vector<128x128xf32>, i32 -> vector<128x128xf32>
    %c127_i32_24 = arith.constant 127 : i32
    %83 = tpu.dynamic_rotate %82 by %c127_i32_24 dim 1 : vector<128x128xf32>, i32 -> vector<128x128xf32>
    %84 = arith.mulf %11, %19 : vector<128x128xf32>
    %85 = arith.mulf %83, %84 : vector<128x128xf32>
    %c127_i32_25 = arith.constant 127 : i32
    %86 = tpu.dynamic_rotate %53 by %c127_i32_25 dim 0 : vector<128x128xf32>, i32 -> vector<128x128xf32>
    %c1_i32_26 = arith.constant 1 : i32
    %87 = tpu.dynamic_rotate %86 by %c1_i32_26 dim 1 : vector<128x128xf32>, i32 -> vector<128x128xf32>
    %88 = arith.mulf %11, %15 : vector<128x128xf32>
    %89 = arith.mulf %87, %88 : vector<128x128xf32>
    %90 = arith.select %62, %85, %89 : vector<128x128xi1>, vector<128x128xf32>
    %91 = arith.select %59, %81, %90 : vector<128x128xi1>, vector<128x128xf32>
    %92 = arith.select %56, %79, %91 : vector<128x128xi1>, vector<128x128xf32>
    %93 = arith.cmpf oge, %53, %77 : vector<128x128xf32>
    %94 = arith.cmpf oge, %53, %92 : vector<128x128xf32>
    %95 = arith.andi %93, %94 : vector<128x128xi1>
    %cst_27 = arith.constant 0.000000e+00 : f32
    %96 = vector.broadcast %cst_27 : f32 to vector<128x128xf32>
    %97 = arith.select %95, %53, %96 : vector<128x128xi1>, vector<128x128xf32>
    %cst_28 = arith.constant 1.500000e+02 : f32
    %98 = vector.broadcast %cst_28 : f32 to vector<128x128xf32>
    %99 = arith.cmpf ogt, %97, %98 : vector<128x128xf32>
    %100 = arith.extui %99 : vector<128x128xi1> to vector<128x128xi32>
    %101 = arith.sitofp %100 : vector<128x128xi32> to vector<128x128xf32>
    %cst_29 = arith.constant 5.000000e+01 : f32
    %102 = vector.broadcast %cst_29 : f32 to vector<128x128xf32>
    %103 = arith.cmpf ogt, %97, %102 : vector<128x128xf32>
    %104 = arith.extui %103 : vector<128x128xi1> to vector<128x128xi32>
    %105 = arith.sitofp %104 : vector<128x128xi32> to vector<128x128xf32>
    %c0_i32 = arith.constant 0 : i32
    %true = arith.constant true
    %106:3 = scf.while (%arg2 = %c0_i32, %arg3 = %101, %arg4 = %true) : (i32, vector<128x128xf32>, i1) -> (i32, vector<128x128xf32>, i1) {
      %c16384_i32 = arith.constant 16384 : i32
      %118 = arith.cmpi slt, %arg2, %c16384_i32 : i32
      %119 = arith.andi %arg4, %118 : i1
      scf.condition(%119) %arg2, %arg3, %arg4 : i32, vector<128x128xf32>, i1
    } do {
    ^bb0(%arg2: i32, %arg3: vector<128x128xf32>, %arg4: i1):
      %c1_i32_37 = arith.constant 1 : i32
      %118 = tpu.dynamic_rotate %arg3 by %c1_i32_37 dim 1 : vector<128x128xf32>, i32 -> vector<128x128xf32>
      %119 = arith.mulf %118, %15 : vector<128x128xf32>
      %c127_i32_38 = arith.constant 127 : i32
      %120 = tpu.dynamic_rotate %arg3 by %c127_i32_38 dim 1 : vector<128x128xf32>, i32 -> vector<128x128xf32>
      %121 = arith.mulf %120, %19 : vector<128x128xf32>
      %122 = arith.maximumf %119, %121 : vector<128x128xf32>
      %123 = arith.maximumf %arg3, %122 : vector<128x128xf32>
      %c1_i32_39 = arith.constant 1 : i32
      %124 = tpu.dynamic_rotate %123 by %c1_i32_39 dim 0 : vector<128x128xf32>, i32 -> vector<128x128xf32>
      %125 = arith.mulf %124, %7 : vector<128x128xf32>
      %c127_i32_40 = arith.constant 127 : i32
      %126 = tpu.dynamic_rotate %123 by %c127_i32_40 dim 0 : vector<128x128xf32>, i32 -> vector<128x128xf32>
      %127 = arith.mulf %126, %11 : vector<128x128xf32>
      %128 = arith.maximumf %125, %127 : vector<128x128xf32>
      %129 = arith.maximumf %123, %128 : vector<128x128xf32>
      %130 = arith.mulf %129, %105 : vector<128x128xf32>
      %c1_i32_41 = arith.constant 1 : i32
      %131 = tpu.dynamic_rotate %130 by %c1_i32_41 dim 1 : vector<128x128xf32>, i32 -> vector<128x128xf32>
      %132 = arith.mulf %131, %15 : vector<128x128xf32>
      %c127_i32_42 = arith.constant 127 : i32
      %133 = tpu.dynamic_rotate %130 by %c127_i32_42 dim 1 : vector<128x128xf32>, i32 -> vector<128x128xf32>
      %134 = arith.mulf %133, %19 : vector<128x128xf32>
      %135 = arith.maximumf %132, %134 : vector<128x128xf32>
      %136 = arith.maximumf %130, %135 : vector<128x128xf32>
      %c1_i32_43 = arith.constant 1 : i32
      %137 = tpu.dynamic_rotate %136 by %c1_i32_43 dim 0 : vector<128x128xf32>, i32 -> vector<128x128xf32>
      %138 = arith.mulf %137, %7 : vector<128x128xf32>
      %c127_i32_44 = arith.constant 127 : i32
      %139 = tpu.dynamic_rotate %136 by %c127_i32_44 dim 0 : vector<128x128xf32>, i32 -> vector<128x128xf32>
      %140 = arith.mulf %139, %11 : vector<128x128xf32>
      %141 = arith.maximumf %138, %140 : vector<128x128xf32>
      %142 = arith.maximumf %136, %141 : vector<128x128xf32>
      %143 = arith.mulf %142, %105 : vector<128x128xf32>
      %c1_i32_45 = arith.constant 1 : i32
      %144 = tpu.dynamic_rotate %143 by %c1_i32_45 dim 1 : vector<128x128xf32>, i32 -> vector<128x128xf32>
      %145 = arith.mulf %144, %15 : vector<128x128xf32>
      %c127_i32_46 = arith.constant 127 : i32
      %146 = tpu.dynamic_rotate %143 by %c127_i32_46 dim 1 : vector<128x128xf32>, i32 -> vector<128x128xf32>
      %147 = arith.mulf %146, %19 : vector<128x128xf32>
      %148 = arith.maximumf %145, %147 : vector<128x128xf32>
      %149 = arith.maximumf %143, %148 : vector<128x128xf32>
      %c1_i32_47 = arith.constant 1 : i32
      %150 = tpu.dynamic_rotate %149 by %c1_i32_47 dim 0 : vector<128x128xf32>, i32 -> vector<128x128xf32>
      %151 = arith.mulf %150, %7 : vector<128x128xf32>
      %c127_i32_48 = arith.constant 127 : i32
      %152 = tpu.dynamic_rotate %149 by %c127_i32_48 dim 0 : vector<128x128xf32>, i32 -> vector<128x128xf32>
      %153 = arith.mulf %152, %11 : vector<128x128xf32>
      %154 = arith.maximumf %151, %153 : vector<128x128xf32>
      %155 = arith.maximumf %149, %154 : vector<128x128xf32>
      %156 = arith.mulf %155, %105 : vector<128x128xf32>
      %c1_i32_49 = arith.constant 1 : i32
      %157 = tpu.dynamic_rotate %156 by %c1_i32_49 dim 1 : vector<128x128xf32>, i32 -> vector<128x128xf32>
      %158 = arith.mulf %157, %15 : vector<128x128xf32>
      %c127_i32_50 = arith.constant 127 : i32
      %159 = tpu.dynamic_rotate %156 by %c127_i32_50 dim 1 : vector<128x128xf32>, i32 -> vector<128x128xf32>
      %160 = arith.mulf %159, %19 : vector<128x128xf32>
      %161 = arith.maximumf %158, %160 : vector<128x128xf32>
      %162 = arith.maximumf %156, %161 : vector<128x128xf32>
      %c1_i32_51 = arith.constant 1 : i32
      %163 = tpu.dynamic_rotate %162 by %c1_i32_51 dim 0 : vector<128x128xf32>, i32 -> vector<128x128xf32>
      %164 = arith.mulf %163, %7 : vector<128x128xf32>
      %c127_i32_52 = arith.constant 127 : i32
      %165 = tpu.dynamic_rotate %162 by %c127_i32_52 dim 0 : vector<128x128xf32>, i32 -> vector<128x128xf32>
      %166 = arith.mulf %165, %11 : vector<128x128xf32>
      %167 = arith.maximumf %164, %166 : vector<128x128xf32>
      %168 = arith.maximumf %162, %167 : vector<128x128xf32>
      %169 = arith.mulf %168, %105 : vector<128x128xf32>
      %c1_i32_53 = arith.constant 1 : i32
      %170 = tpu.dynamic_rotate %169 by %c1_i32_53 dim 1 : vector<128x128xf32>, i32 -> vector<128x128xf32>
      %171 = arith.mulf %170, %15 : vector<128x128xf32>
      %c127_i32_54 = arith.constant 127 : i32
      %172 = tpu.dynamic_rotate %169 by %c127_i32_54 dim 1 : vector<128x128xf32>, i32 -> vector<128x128xf32>
      %173 = arith.mulf %172, %19 : vector<128x128xf32>
      %174 = arith.maximumf %171, %173 : vector<128x128xf32>
      %175 = arith.maximumf %169, %174 : vector<128x128xf32>
      %c1_i32_55 = arith.constant 1 : i32
      %176 = tpu.dynamic_rotate %175 by %c1_i32_55 dim 0 : vector<128x128xf32>, i32 -> vector<128x128xf32>
      %177 = arith.mulf %176, %7 : vector<128x128xf32>
      %c127_i32_56 = arith.constant 127 : i32
      %178 = tpu.dynamic_rotate %175 by %c127_i32_56 dim 0 : vector<128x128xf32>, i32 -> vector<128x128xf32>
      %179 = arith.mulf %178, %11 : vector<128x128xf32>
      %180 = arith.maximumf %177, %179 : vector<128x128xf32>
      %181 = arith.maximumf %175, %180 : vector<128x128xf32>
      %182 = arith.mulf %181, %105 : vector<128x128xf32>
      %c1_i32_57 = arith.constant 1 : i32
      %183 = tpu.dynamic_rotate %182 by %c1_i32_57 dim 1 : vector<128x128xf32>, i32 -> vector<128x128xf32>
      %184 = arith.mulf %183, %15 : vector<128x128xf32>
      %c127_i32_58 = arith.constant 127 : i32
      %185 = tpu.dynamic_rotate %182 by %c127_i32_58 dim 1 : vector<128x128xf32>, i32 -> vector<128x128xf32>
      %186 = arith.mulf %185, %19 : vector<128x128xf32>
      %187 = arith.maximumf %184, %186 : vector<128x128xf32>
      %188 = arith.maximumf %182, %187 : vector<128x128xf32>
      %c1_i32_59 = arith.constant 1 : i32
      %189 = tpu.dynamic_rotate %188 by %c1_i32_59 dim 0 : vector<128x128xf32>, i32 -> vector<128x128xf32>
      %190 = arith.mulf %189, %7 : vector<128x128xf32>
      %c127_i32_60 = arith.constant 127 : i32
      %191 = tpu.dynamic_rotate %188 by %c127_i32_60 dim 0 : vector<128x128xf32>, i32 -> vector<128x128xf32>
      %192 = arith.mulf %191, %11 : vector<128x128xf32>
      %193 = arith.maximumf %190, %192 : vector<128x128xf32>
      %194 = arith.maximumf %188, %193 : vector<128x128xf32>
      %195 = arith.mulf %194, %105 : vector<128x128xf32>
      %c1_i32_61 = arith.constant 1 : i32
      %196 = tpu.dynamic_rotate %195 by %c1_i32_61 dim 1 : vector<128x128xf32>, i32 -> vector<128x128xf32>
      %197 = arith.mulf %196, %15 : vector<128x128xf32>
      %c127_i32_62 = arith.constant 127 : i32
      %198 = tpu.dynamic_rotate %195 by %c127_i32_62 dim 1 : vector<128x128xf32>, i32 -> vector<128x128xf32>
      %199 = arith.mulf %198, %19 : vector<128x128xf32>
      %200 = arith.maximumf %197, %199 : vector<128x128xf32>
      %201 = arith.maximumf %195, %200 : vector<128x128xf32>
      %c1_i32_63 = arith.constant 1 : i32
      %202 = tpu.dynamic_rotate %201 by %c1_i32_63 dim 0 : vector<128x128xf32>, i32 -> vector<128x128xf32>
      %203 = arith.mulf %202, %7 : vector<128x128xf32>
      %c127_i32_64 = arith.constant 127 : i32
      %204 = tpu.dynamic_rotate %201 by %c127_i32_64 dim 0 : vector<128x128xf32>, i32 -> vector<128x128xf32>
      %205 = arith.mulf %204, %11 : vector<128x128xf32>
      %206 = arith.maximumf %203, %205 : vector<128x128xf32>
      %207 = arith.maximumf %201, %206 : vector<128x128xf32>
      %208 = arith.mulf %207, %105 : vector<128x128xf32>
      %c1_i32_65 = arith.constant 1 : i32
      %209 = tpu.dynamic_rotate %208 by %c1_i32_65 dim 1 : vector<128x128xf32>, i32 -> vector<128x128xf32>
      %210 = arith.mulf %209, %15 : vector<128x128xf32>
      %c127_i32_66 = arith.constant 127 : i32
      %211 = tpu.dynamic_rotate %208 by %c127_i32_66 dim 1 : vector<128x128xf32>, i32 -> vector<128x128xf32>
      %212 = arith.mulf %211, %19 : vector<128x128xf32>
      %213 = arith.maximumf %210, %212 : vector<128x128xf32>
      %214 = arith.maximumf %208, %213 : vector<128x128xf32>
      %c1_i32_67 = arith.constant 1 : i32
      %215 = tpu.dynamic_rotate %214 by %c1_i32_67 dim 0 : vector<128x128xf32>, i32 -> vector<128x128xf32>
      %216 = arith.mulf %215, %7 : vector<128x128xf32>
      %c127_i32_68 = arith.constant 127 : i32
      %217 = tpu.dynamic_rotate %214 by %c127_i32_68 dim 0 : vector<128x128xf32>, i32 -> vector<128x128xf32>
      %218 = arith.mulf %217, %11 : vector<128x128xf32>
      %219 = arith.maximumf %216, %218 : vector<128x128xf32>
      %220 = arith.maximumf %214, %219 : vector<128x128xf32>
      %221 = arith.mulf %220, %105 : vector<128x128xf32>
      %222 = arith.subf %221, %arg3 : vector<128x128xf32>
      %223 = vector.shape_cast %222 : vector<128x128xf32> to vector<1x128x128xf32>
      %cst_69 = arith.constant dense<0xFF800000> : vector<1xf32>
      %224 = vector.multi_reduction <maximumf>, %223, %cst_69 [1, 2] : vector<1x128x128xf32> to vector<1xf32>
      %225 = vector.shape_cast %224 : vector<1xf32> to vector<1x1x1xf32>
      %226 = vector.extract %225[0, 0, 0] : f32 from vector<1x1x1xf32>
      %cst_70 = arith.constant 5.000000e-01 : f32
      %227 = arith.cmpf ogt, %226, %cst_70 : f32
      %c8_i32 = arith.constant 8 : i32
      %228 = arith.addi %arg2, %c8_i32 : i32
      scf.yield %228, %221, %227 : i32, vector<128x128xf32>, i1
    }
    %cst_30 = arith.constant 1.000000e+00 : f32
    %107 = vector.broadcast %cst_30 : f32 to vector<128x128xf32>
    %108 = arith.subf %107, %106#1 : vector<128x128xf32>
    %109 = arith.mulf %24, %108 : vector<128x128xf32>
    %c0_i32_31 = arith.constant 0 : i32
    %true_32 = arith.constant true
    %110:3 = scf.while (%arg2 = %c0_i32_31, %arg3 = %109, %arg4 = %true_32) : (i32, vector<128x128xf32>, i1) -> (i32, vector<128x128xf32>, i1) {
      %c16384_i32 = arith.constant 16384 : i32
      %118 = arith.cmpi slt, %arg2, %c16384_i32 : i32
      %119 = arith.andi %arg4, %118 : i1
      scf.condition(%119) %arg2, %arg3, %arg4 : i32, vector<128x128xf32>, i1
    } do {
    ^bb0(%arg2: i32, %arg3: vector<128x128xf32>, %arg4: i1):
      %c1_i32_37 = arith.constant 1 : i32
      %118 = tpu.dynamic_rotate %arg3 by %c1_i32_37 dim 1 : vector<128x128xf32>, i32 -> vector<128x128xf32>
      %119 = arith.mulf %118, %15 : vector<128x128xf32>
      %c127_i32_38 = arith.constant 127 : i32
      %120 = tpu.dynamic_rotate %arg3 by %c127_i32_38 dim 1 : vector<128x128xf32>, i32 -> vector<128x128xf32>
      %121 = arith.mulf %120, %19 : vector<128x128xf32>
      %122 = arith.maximumf %119, %121 : vector<128x128xf32>
      %123 = arith.maximumf %arg3, %122 : vector<128x128xf32>
      %c1_i32_39 = arith.constant 1 : i32
      %124 = tpu.dynamic_rotate %123 by %c1_i32_39 dim 0 : vector<128x128xf32>, i32 -> vector<128x128xf32>
      %125 = arith.mulf %124, %7 : vector<128x128xf32>
      %c127_i32_40 = arith.constant 127 : i32
      %126 = tpu.dynamic_rotate %123 by %c127_i32_40 dim 0 : vector<128x128xf32>, i32 -> vector<128x128xf32>
      %127 = arith.mulf %126, %11 : vector<128x128xf32>
      %128 = arith.maximumf %125, %127 : vector<128x128xf32>
      %129 = arith.maximumf %123, %128 : vector<128x128xf32>
      %130 = arith.mulf %129, %108 : vector<128x128xf32>
      %c1_i32_41 = arith.constant 1 : i32
      %131 = tpu.dynamic_rotate %130 by %c1_i32_41 dim 1 : vector<128x128xf32>, i32 -> vector<128x128xf32>
      %132 = arith.mulf %131, %15 : vector<128x128xf32>
      %c127_i32_42 = arith.constant 127 : i32
      %133 = tpu.dynamic_rotate %130 by %c127_i32_42 dim 1 : vector<128x128xf32>, i32 -> vector<128x128xf32>
      %134 = arith.mulf %133, %19 : vector<128x128xf32>
      %135 = arith.maximumf %132, %134 : vector<128x128xf32>
      %136 = arith.maximumf %130, %135 : vector<128x128xf32>
      %c1_i32_43 = arith.constant 1 : i32
      %137 = tpu.dynamic_rotate %136 by %c1_i32_43 dim 0 : vector<128x128xf32>, i32 -> vector<128x128xf32>
      %138 = arith.mulf %137, %7 : vector<128x128xf32>
      %c127_i32_44 = arith.constant 127 : i32
      %139 = tpu.dynamic_rotate %136 by %c127_i32_44 dim 0 : vector<128x128xf32>, i32 -> vector<128x128xf32>
      %140 = arith.mulf %139, %11 : vector<128x128xf32>
      %141 = arith.maximumf %138, %140 : vector<128x128xf32>
      %142 = arith.maximumf %136, %141 : vector<128x128xf32>
      %143 = arith.mulf %142, %108 : vector<128x128xf32>
      %c1_i32_45 = arith.constant 1 : i32
      %144 = tpu.dynamic_rotate %143 by %c1_i32_45 dim 1 : vector<128x128xf32>, i32 -> vector<128x128xf32>
      %145 = arith.mulf %144, %15 : vector<128x128xf32>
      %c127_i32_46 = arith.constant 127 : i32
      %146 = tpu.dynamic_rotate %143 by %c127_i32_46 dim 1 : vector<128x128xf32>, i32 -> vector<128x128xf32>
      %147 = arith.mulf %146, %19 : vector<128x128xf32>
      %148 = arith.maximumf %145, %147 : vector<128x128xf32>
      %149 = arith.maximumf %143, %148 : vector<128x128xf32>
      %c1_i32_47 = arith.constant 1 : i32
      %150 = tpu.dynamic_rotate %149 by %c1_i32_47 dim 0 : vector<128x128xf32>, i32 -> vector<128x128xf32>
      %151 = arith.mulf %150, %7 : vector<128x128xf32>
      %c127_i32_48 = arith.constant 127 : i32
      %152 = tpu.dynamic_rotate %149 by %c127_i32_48 dim 0 : vector<128x128xf32>, i32 -> vector<128x128xf32>
      %153 = arith.mulf %152, %11 : vector<128x128xf32>
      %154 = arith.maximumf %151, %153 : vector<128x128xf32>
      %155 = arith.maximumf %149, %154 : vector<128x128xf32>
      %156 = arith.mulf %155, %108 : vector<128x128xf32>
      %c1_i32_49 = arith.constant 1 : i32
      %157 = tpu.dynamic_rotate %156 by %c1_i32_49 dim 1 : vector<128x128xf32>, i32 -> vector<128x128xf32>
      %158 = arith.mulf %157, %15 : vector<128x128xf32>
      %c127_i32_50 = arith.constant 127 : i32
      %159 = tpu.dynamic_rotate %156 by %c127_i32_50 dim 1 : vector<128x128xf32>, i32 -> vector<128x128xf32>
      %160 = arith.mulf %159, %19 : vector<128x128xf32>
      %161 = arith.maximumf %158, %160 : vector<128x128xf32>
      %162 = arith.maximumf %156, %161 : vector<128x128xf32>
      %c1_i32_51 = arith.constant 1 : i32
      %163 = tpu.dynamic_rotate %162 by %c1_i32_51 dim 0 : vector<128x128xf32>, i32 -> vector<128x128xf32>
      %164 = arith.mulf %163, %7 : vector<128x128xf32>
      %c127_i32_52 = arith.constant 127 : i32
      %165 = tpu.dynamic_rotate %162 by %c127_i32_52 dim 0 : vector<128x128xf32>, i32 -> vector<128x128xf32>
      %166 = arith.mulf %165, %11 : vector<128x128xf32>
      %167 = arith.maximumf %164, %166 : vector<128x128xf32>
      %168 = arith.maximumf %162, %167 : vector<128x128xf32>
      %169 = arith.mulf %168, %108 : vector<128x128xf32>
      %c1_i32_53 = arith.constant 1 : i32
      %170 = tpu.dynamic_rotate %169 by %c1_i32_53 dim 1 : vector<128x128xf32>, i32 -> vector<128x128xf32>
      %171 = arith.mulf %170, %15 : vector<128x128xf32>
      %c127_i32_54 = arith.constant 127 : i32
      %172 = tpu.dynamic_rotate %169 by %c127_i32_54 dim 1 : vector<128x128xf32>, i32 -> vector<128x128xf32>
      %173 = arith.mulf %172, %19 : vector<128x128xf32>
      %174 = arith.maximumf %171, %173 : vector<128x128xf32>
      %175 = arith.maximumf %169, %174 : vector<128x128xf32>
      %c1_i32_55 = arith.constant 1 : i32
      %176 = tpu.dynamic_rotate %175 by %c1_i32_55 dim 0 : vector<128x128xf32>, i32 -> vector<128x128xf32>
      %177 = arith.mulf %176, %7 : vector<128x128xf32>
      %c127_i32_56 = arith.constant 127 : i32
      %178 = tpu.dynamic_rotate %175 by %c127_i32_56 dim 0 : vector<128x128xf32>, i32 -> vector<128x128xf32>
      %179 = arith.mulf %178, %11 : vector<128x128xf32>
      %180 = arith.maximumf %177, %179 : vector<128x128xf32>
      %181 = arith.maximumf %175, %180 : vector<128x128xf32>
      %182 = arith.mulf %181, %108 : vector<128x128xf32>
      %c1_i32_57 = arith.constant 1 : i32
      %183 = tpu.dynamic_rotate %182 by %c1_i32_57 dim 1 : vector<128x128xf32>, i32 -> vector<128x128xf32>
      %184 = arith.mulf %183, %15 : vector<128x128xf32>
      %c127_i32_58 = arith.constant 127 : i32
      %185 = tpu.dynamic_rotate %182 by %c127_i32_58 dim 1 : vector<128x128xf32>, i32 -> vector<128x128xf32>
      %186 = arith.mulf %185, %19 : vector<128x128xf32>
      %187 = arith.maximumf %184, %186 : vector<128x128xf32>
      %188 = arith.maximumf %182, %187 : vector<128x128xf32>
      %c1_i32_59 = arith.constant 1 : i32
      %189 = tpu.dynamic_rotate %188 by %c1_i32_59 dim 0 : vector<128x128xf32>, i32 -> vector<128x128xf32>
      %190 = arith.mulf %189, %7 : vector<128x128xf32>
      %c127_i32_60 = arith.constant 127 : i32
      %191 = tpu.dynamic_rotate %188 by %c127_i32_60 dim 0 : vector<128x128xf32>, i32 -> vector<128x128xf32>
      %192 = arith.mulf %191, %11 : vector<128x128xf32>
      %193 = arith.maximumf %190, %192 : vector<128x128xf32>
      %194 = arith.maximumf %188, %193 : vector<128x128xf32>
      %195 = arith.mulf %194, %108 : vector<128x128xf32>
      %c1_i32_61 = arith.constant 1 : i32
      %196 = tpu.dynamic_rotate %195 by %c1_i32_61 dim 1 : vector<128x128xf32>, i32 -> vector<128x128xf32>
      %197 = arith.mulf %196, %15 : vector<128x128xf32>
      %c127_i32_62 = arith.constant 127 : i32
      %198 = tpu.dynamic_rotate %195 by %c127_i32_62 dim 1 : vector<128x128xf32>, i32 -> vector<128x128xf32>
      %199 = arith.mulf %198, %19 : vector<128x128xf32>
      %200 = arith.maximumf %197, %199 : vector<128x128xf32>
      %201 = arith.maximumf %195, %200 : vector<128x128xf32>
      %c1_i32_63 = arith.constant 1 : i32
      %202 = tpu.dynamic_rotate %201 by %c1_i32_63 dim 0 : vector<128x128xf32>, i32 -> vector<128x128xf32>
      %203 = arith.mulf %202, %7 : vector<128x128xf32>
      %c127_i32_64 = arith.constant 127 : i32
      %204 = tpu.dynamic_rotate %201 by %c127_i32_64 dim 0 : vector<128x128xf32>, i32 -> vector<128x128xf32>
      %205 = arith.mulf %204, %11 : vector<128x128xf32>
      %206 = arith.maximumf %203, %205 : vector<128x128xf32>
      %207 = arith.maximumf %201, %206 : vector<128x128xf32>
      %208 = arith.mulf %207, %108 : vector<128x128xf32>
      %c1_i32_65 = arith.constant 1 : i32
      %209 = tpu.dynamic_rotate %208 by %c1_i32_65 dim 1 : vector<128x128xf32>, i32 -> vector<128x128xf32>
      %210 = arith.mulf %209, %15 : vector<128x128xf32>
      %c127_i32_66 = arith.constant 127 : i32
      %211 = tpu.dynamic_rotate %208 by %c127_i32_66 dim 1 : vector<128x128xf32>, i32 -> vector<128x128xf32>
      %212 = arith.mulf %211, %19 : vector<128x128xf32>
      %213 = arith.maximumf %210, %212 : vector<128x128xf32>
      %214 = arith.maximumf %208, %213 : vector<128x128xf32>
      %c1_i32_67 = arith.constant 1 : i32
      %215 = tpu.dynamic_rotate %214 by %c1_i32_67 dim 0 : vector<128x128xf32>, i32 -> vector<128x128xf32>
      %216 = arith.mulf %215, %7 : vector<128x128xf32>
      %c127_i32_68 = arith.constant 127 : i32
      %217 = tpu.dynamic_rotate %214 by %c127_i32_68 dim 0 : vector<128x128xf32>, i32 -> vector<128x128xf32>
      %218 = arith.mulf %217, %11 : vector<128x128xf32>
      %219 = arith.maximumf %216, %218 : vector<128x128xf32>
      %220 = arith.maximumf %214, %219 : vector<128x128xf32>
      %221 = arith.mulf %220, %108 : vector<128x128xf32>
      %222 = arith.subf %221, %arg3 : vector<128x128xf32>
      %223 = vector.shape_cast %222 : vector<128x128xf32> to vector<1x128x128xf32>
      %cst_69 = arith.constant dense<0xFF800000> : vector<1xf32>
      %224 = vector.multi_reduction <maximumf>, %223, %cst_69 [1, 2] : vector<1x128x128xf32> to vector<1xf32>
      %225 = vector.shape_cast %224 : vector<1xf32> to vector<1x1x1xf32>
      %226 = vector.extract %225[0, 0, 0] : f32 from vector<1x1x1xf32>
      %cst_70 = arith.constant 5.000000e-01 : f32
      %227 = arith.cmpf ogt, %226, %cst_70 : f32
      %c8_i32 = arith.constant 8 : i32
      %228 = arith.addi %arg2, %c8_i32 : i32
      scf.yield %228, %221, %227 : i32, vector<128x128xf32>, i1
    }
    %cst_33 = arith.constant 1.000000e+00 : f32
    %111 = vector.broadcast %cst_33 : f32 to vector<128x128xf32>
    %112 = arith.subf %111, %110#1 : vector<128x128xf32>
    %113 = arith.mulf %106#1, %112 : vector<128x128xf32>
    %cst_34 = arith.constant 2.550000e+02 : f32
    %114 = vector.broadcast %cst_34 : f32 to vector<128x128xf32>
    %115 = arith.mulf %113, %114 : vector<128x128xf32>
    %116 = arith.fptoui %115 : vector<128x128xf32> to vector<128x128xi8>
    %c0_35 = arith.constant 0 : index
    %c0_36 = arith.constant 0 : index
    %117 = vector.load %arg1[%c0_35, %c0_36] : memref<128x128xi8, #tpu.memory_space<vmem>>, vector<128x128xi8>
    tpu.vector_store %arg1[%c0_35, %c0_36], %116 {strides = array<i32>} : memref<128x128xi8, #tpu.memory_space<vmem>>, vector<128x128xi8>,
    return
  }
}

</mosaic_0001>

<bundles_post_ra>
// kernel: remove_inner_contours.1
= control target key start
LH: loop header
LB: loop body
LE: loop exit
PB: predicated region body
PF: predicated region fallthrough
CT: control target
= control target key end

     0   :  { %6 = vsyncpa [#allocation3], 0  ;;  %s14738_s0 = inlined_call_operand.hbm [shape: u8[128,128], index: 0, kind: input, shape index: {}]   ;;  %s14739_s1 = inlined_call_operand.hbm [shape: u8[128,128], index: 1, kind: output, shape index: {}]  }
   0x1   :  { %7 = vsyncpa [#allocation4], 0  ;;  %s7000_s6 = smov [#allocation2]   ;;  %s6680_s10 = scalar_lea.hbm %s14738_s0, 512 }
   0x2   :  { %s13_s7 = sshll.u32 %s7000_s6, 4  ;;  %p6681_p0 = scmp.ne.s32.totalorder %s14738_s0, %s6680_s10  ;;  %s14_s7 = int_to_ptr.vmem [resolvable:$true] %s13_s7 }
   0x3   :  { %p6684_p1 = scmp.lt.u32.totalorder %s6680_s10, %s14738_s0 }
   0x5   :  { %p6686_p2 = pnand %p6684_p1, %p6681_p0 }
   0x7   :  { %6689 = shalt.err (!%p6686_p2)
}
   0x8   :  { %s6690_s15 = scalar_lea.vmem %s14_s7, 512  ;;  %p6695_p4 = scmp.lt.s32.totalorder %s14_s7, %s14_s7 }
   0x9   :  { %p6691_p3 = scmp.ne.s32.totalorder %s14_s7, %s6690_s15  ;;  %p6696_p5 = scmp.lt.s32.totalorder %s6690_s15, %s6690_s15 }
   0xb   :  { %p6697_p6 = por %p6696_p5, %p6695_p4 }
   0xd   :  { %p6698_p7 = pnand %p6697_p6, %p6691_p3 }
   0xf   :  { %6701 = shalt.err (!%p6698_p7)
}
  0x10   :  { %s7001_s16 = smov 128   ;;  %s7002_s17 = smov 8  }
  0x11   :  { %19 = dma.hbm_to_vmem [thread:$0]  %s14738_s0, 512, %s14_s7, [#allocation3], %s7001_s16, %s7001_s16, %s7002_s17  }
  0x12   :  { %6860 = dma.done.wait [#allocation3], 512  }
  0x13   :  { %6861 = vsyncadd [#allocation3], 4294966784  ;;  %v23_v0 = vld [vmem:[#allocation2] sm:$0xff]  ;;  %v24_v1 = vld [vmem:[#allocation2 + $0x8] sm:$0xff]  ;;  %s7003_s0 = smov 1   ;;  %s7004_s20 = smov 127   ;;  %v75_v52 = vlaneseq }
  0x14   :  { %v29_v2 = vunpack.c.2.s8 %v23_v0  ;;  %v27_v3 = vunpack.c.0.s8 %v23_v0  ;;  %v30_v4 = vunpack.c.3.s8 %v23_v0  ;;  %v28_v5 = vunpack.c.1.s8 %v23_v0  ;;  %v25_v20 = vld [vmem:[#allocation2 + $0x10] sm:$0xff]  ;;  %v26_v33 = vld [vmem:[#allocation2 + $0x18] sm:$0xff]  ;;  %s9275_s21 = smov 0  }
  0x15   :  { %v32_v6 = vunpack.c.1.s8 %v24_v1  ;;  %v31_v7 = vunpack.c.0.s8 %v24_v1  ;;  %v34_v14 = vunpack.c.3.s8 %v24_v1  ;;  %v33_v15 = vunpack.c.2.s8 %v24_v1 }
  0x16   :  { %v45_v8 = vand.u32 255, %v29_v2  ;;  %v43_v9 = vand.u32 255, %v27_v3  ;;  %v46_v10 = vand.u32 255, %v30_v4  ;;  %v44_v11 = vand.u32 255, %v28_v5 }
  0x17   :  { %v48_v18 = vand.u32 255, %v32_v6  ;;  %v47_v19 = vand.u32 255, %v31_v7  ;;  %v50_v21 = vand.u32 255, %v34_v14  ;;  %v49_v22 = vand.u32 255, %v33_v15 }
  0x18   :  { %v7036_v12 = vcvt.s32.f32 %v45_v8  ;;  %v7038_v13 = vcvt.s32.f32 %v43_v9  ;;  %v7044_v16 = vcvt.s32.f32 %v46_v10  ;;  %v7046_v17 = vcvt.s32.f32 %v44_v11 }
  0x19   :  { %v7052_v23 = vcvt.s32.f32 %v48_v18  ;;  %v7054_v24 = vcvt.s32.f32 %v47_v19  ;;  %v36_v25 = vunpack.c.1.s8 %v25_v20  ;;  %v35_v26 = vunpack.c.0.s8 %v25_v20 }
  0x1a   :  { %280 = vrot.lane.b32.xlu1 %v7036_v12, %s7003_s0  ;;  %276 = vrot.lane.b32.xlu0 %v7038_v13, %s7003_s0  ;;  %v7056_v27 = vcvt.s32.f32 %v50_v21  ;;  %v7058_v28 = vcvt.s32.f32 %v49_v22  ;;  %v38_v31 = vunpack.c.3.s8 %v25_v20  ;;  %v37_v32 = vunpack.c.2.s8 %v25_v20 }
  0x1b   :  { %v52_v29 = vand.u32 255, %v36_v25  ;;  %v51_v30 = vand.u32 255, %v35_v26  ;;  %v40_v34 = vunpack.c.1.s8 %v26_v33  ;;  %v39_v35 = vunpack.c.0.s8 %v26_v33 }
  0x1c   :  { %v54_v38 = vand.u32 255, %v38_v31  ;;  %v53_v39 = vand.u32 255, %v37_v32  ;;  %v42_v40 = vunpack.c.3.s8 %v26_v33  ;;  %v41_v41 = vunpack.c.2.s8 %v26_v33 }
  0x1d   :  { %v7068_v36 = vcvt.s32.f32 %v52_v29  ;;  %v7070_v37 = vcvt.s32.f32 %v51_v30  ;;  %v56_v44 = vand.u32 255, %v40_v34  ;;  %v55_v45 = vand.u32 255, %v39_v35 }
  0x1e   :  { %282 = vrot.lane.b32.xlu1 %v7044_v16, %s7003_s0  ;;  %278 = vrot.lane.b32.xlu0 %v7046_v17, %s7003_s0  ;;  %v7076_v42 = vcvt.s32.f32 %v54_v38  ;;  %v7078_v43 = vcvt.s32.f32 %v53_v39  ;;  %v58_v48 = vand.u32 255, %v42_v40  ;;  %v57_v49 = vand.u32 255, %v41_v41 }
  0x1f   :  { %v7084_v46 = vcvt.s32.f32 %v56_v44  ;;  %v7086_v47 = vcvt.s32.f32 %v55_v45  ;;  %v7113_v53 = vshrl.u32 %v75_v52, 7  ;;  %v404_v54 = vrot.slane %v7038_v13, 7 }
  0x20   :  { %v7092_v50 = vcvt.s32.f32 %v58_v48  ;;  %v7094_v51 = vcvt.s32.f32 %v57_v49  ;;  %v405_v56 = vrot.slane %v7046_v17, 7  ;;  %v14744_v57 = vmov 0.0  }
  0x21   :  { %15184 = vst [vmem:[#allocation8_spill] sm:$0xff] %v7113_v53  ;;  %vm14884_vm0 = vcmp.lt.s32.totalorder %v7113_v53, 1  ;;  %vm94_vm1 = vcmp.ge.s32.totalorder %v7113_v53, 1  ;;  %v7136_v60 = vmul.f32 2.0, %v7046_v17  ;;  %vm14885_vm2 = vcmp.lt.s32.totalorder %v7113_v53, 7 }
  0x22   :  { %286 = vrot.lane.b32.xlu1 %v7052_v23, %s7003_s0  ;;  %284 = vrot.lane.b32.xlu0 %v7054_v24, %s7003_s0  ;;  %v419_v55 = vrot.slane %v7092_v50, 7  ;;  %v7129_v58 = vsel %vm94_vm1, 1.0, %v14744_v57  ;;  %v470_v61 = vrot.slane %v7046_v17, 1  ;;  %v471_v62 = vrot.slane %v7036_v12, 1 }
  0x23   :  { %15185 = vst [vmem:[#allocation9_spill] sm:$0xff] %v7129_v58  ;;  %v7142_v63 = vmul.f32 2.0, %v7038_v13  ;;  %v469_v0 = vrot.slane %v7038_v13, 1  ;;  %v435_v1 = vsel %vm14884_vm0, %v404_v54, %v405_v56  ;;  %v406_v3 = vrot.slane %v7036_v12, 7 }
  0x24   :  { %v436_v59 = vsel %vm14884_vm0, %v419_v55, %v404_v54  ;;  %v407_v4 = vrot.slane %v7044_v16, 7  ;;  %v7155_v5 = vmul.f32 2.0, %v7044_v16  ;;  %v408_v6 = vrot.slane %v7054_v24, 7 }
  0x25   :  { %v437_v2 = vmul.f32 %v7129_v58, %v436_v59  ;;  %v409_v7 = vrot.slane %v7052_v23, 7  ;;  %v454_v8 = vadd.f32 %v435_v1, %v7136_v60  ;;  %v499_v9 = vsel %vm14885_vm2, %v470_v61, %v471_v62 }
  0x26   :  { %290 = vrot.lane.b32.xlu1 %v7056_v27, %s7003_s0  ;;  %288 = vrot.lane.b32.xlu0 %v7058_v28, %s7003_s0  ;;  %v472_v10 = vrot.slane %v7044_v16, 1  ;;  %v473_v11 = vrot.slane %v7054_v24, 1  ;;  %v500_v15 = vsel %vm14885_vm2, %v469_v0, %v470_v61  ;;  %v434_v18 = vsel %vm14884_vm0, %v405_v56, %v406_v3 }
  0x27   :  { %v453_v14 = vadd.f32 %v437_v2, %v7142_v63  ;;  %v7181_v19 = vmul.f32 2.0, %v7052_v23  ;;  %v474_v20 = vrot.slane %v7052_v23, 1  ;;  %v475_v21 = vrot.slane %v7058_v28, 1 }
  0x28   :  { %v431_v22 = vsel %vm14884_vm0, %v408_v6, %v409_v7  ;;  %v410_v25 = vrot.slane %v7058_v28, 7  ;;  %v411_v26 = vrot.slane %v7056_v27, 7  ;;  %v7189_v29 = vadd.f32 %v499_v9, %v454_v8 }
  0x29   :  { %v497_v30 = vsel %vm14885_vm2, %v472_v10, %v473_v11  ;;  %v498_v32 = vsel %vm14885_vm2, %v471_v62, %v472_v10  ;;  %v7204_v33 = vmul.f32 2.0, %v7054_v24  ;;  %v458_v34 = vadd.f32 %v431_v22, %v7181_v19 }
  0x2a   :  { %294 = vrot.lane.b32.xlu1 %v7068_v36, %s7003_s0  ;;  %292 = vrot.lane.b32.xlu0 %v7070_v37, %s7003_s0  ;;  %v495_v35 = vsel %vm14885_vm2, %v474_v20, %v475_v21  ;;  %v432_v38 = vsel %vm14884_vm0, %v407_v4, %v408_v6  ;;  %v7212_v39 = vmul.f32 2.0, %v7056_v27  ;;  %v429_v40 = vsel %vm14884_vm0, %v410_v25, %v411_v26 }
  0x2b   :  { %v476_v41 = vrot.slane %v7056_v27, 1  ;;  %v477_v44 = vrot.slane %v7070_v37, 1  ;;  %v430_v45 = vsel %vm14884_vm0, %v409_v7, %v410_v25  ;;  %v412_v48 = vrot.slane %v7070_v37, 7 }
  0x2c   :  { %v413_v49 = vrot.slane %v7068_v36, 7  ;;  %v7234_v56 = vadd.f32 %v495_v35, %v458_v34  ;;  %v496_v59 = vsel %vm14885_vm2, %v473_v11, %v474_v20  ;;  %v460_v61 = vadd.f32 %v429_v40, %v7212_v39 }
  0x2d   :  { %v493_v62 = vsel %vm14885_vm2, %v476_v41, %v477_v44  ;;  %v7243_v2 = vmul.f32 2.0, %v7068_v36  ;;  %v478_v6 = vrot.slane %v7068_v36, 1  ;;  %v479_v7 = vrot.slane %v7078_v43, 1 }
  0x2e   :  { %298 = vrot.lane.b32.xlu1 %v7076_v42, %s7003_s0  ;;  %296 = vrot.lane.b32.xlu0 %v7078_v43, %s7003_s0  ;;  %v428_v8 = vsel %vm14884_vm0, %v411_v26, %v412_v48  ;;  %v414_v10 = vrot.slane %v7078_v43, 7  ;;  %v7264_v11 = vadd.f32 %v493_v62, %v460_v61  ;;  %v481_v20 = vrot.slane %v7086_v47, 1 }
  0x2f   :  { %v492_v25 = vsel %vm14885_vm2, %v477_v44, %v478_v6  ;;  %v7278_v26 = vmul.f32 2.0, %v7078_v43  ;;  %v418_v61 = vrot.slane %v7094_v51, 7 }
  0x32   :  { %302 = vrot.lane.b32.xlu1 %v7084_v46, %s7003_s0  ;;  %300 = vrot.lane.b32.xlu0 %v7086_v47, %s7003_s0 }
  0x36   :  { %306 = vrot.lane.b32.xlu1 %v7092_v50, %s7003_s0  ;;  %304 = vrot.lane.b32.xlu0 %v7094_v51, %s7003_s0 }
  0x3a   :  { %342 = vrot.lane.b32.xlu1 %v7046_v17, %s7004_s20  ;;  %340 = vrot.lane.b32.xlu0 %v7038_v13, %s7004_s20  ;;  %v433_v17 = vsel %vm14884_vm0, %v406_v3, %v407_v4  ;;  %v7246_v3 = vmul.f32 2.0, %v7070_v37  ;;  %v427_v4 = vsel %vm14884_vm0, %v412_v48, %v413_v49 }
  0x3e   :  { %346 = vrot.lane.b32.xlu1 %v7044_v16, %s7004_s20  ;;  %344 = vrot.lane.b32.xlu0 %v7036_v12, %s7004_s20  ;;  %v7176_v16 = vmul.f32 2.0, %v7036_v12  ;;  %v456_v12 = vadd.f32 %v433_v17, %v7155_v5  ;;  %v461_v17 = vadd.f32 %v428_v8, %v7246_v3  ;;  %v7323_v8 = vmul.f32 2.0, %v7092_v50 }
  0x40   :  { %v455_v31 = vadd.f32 %v434_v18, %v7176_v16  ;;  %v7229_v54 = vadd.f32 %v497_v30, %v456_v12  ;;  %v480_v18 = vrot.slane %v7076_v42, 1  ;;  %v426_v12 = vsel %vm14884_vm0, %v413_v49, %v414_v10 }
  0x41   :  { %v416_v30 = vrot.slane %v7086_v47, 7  ;;  %v526_v34 = vadd.f32 %v492_v25, %v461_v17  ;;  %v482_v49 = vrot.slane %v7084_v46, 1 }
  0x42   :  { %350 = vrot.lane.b32.xlu1 %v7052_v23, %s7004_s20  ;;  %348 = vrot.lane.b32.xlu0 %v7054_v24, %s7004_s20  ;;  %v7198_v23 = vadd.f32 %v500_v15, %v453_v14  ;;  %v7219_v24 = vmul.f32 2.0, %v7058_v28  ;;  %v7267_v14 = vmul.f32 2.0, %v7076_v42  ;;  %v462_v15 = vadd.f32 %v427_v4, %v7243_v2 }
  0x43   :  { %v489_v35 = vsel %vm14885_vm2, %v480_v18, %v481_v20  ;;  %v490_v44 = vsel %vm14885_vm2, %v479_v7, %v480_v18 }
  0x44   :  { %v459_v1 = vadd.f32 %v430_v45, %v7219_v24  ;;  %v7301_v45 = vmul.f32 2.0, %v7086_v47 }
  0x46   :  { %354 = vrot.lane.b32.xlu1 %v7056_v27, %s7004_s20  ;;  %352 = vrot.lane.b32.xlu0 %v7058_v28, %s7004_s20  ;;  %v7231_v27 = vadd.f32 %v498_v32, %v455_v31  ;;  %v457_v28 = vadd.f32 %v432_v38, %v7204_v33  ;;  %v417_v31 = vrot.slane %v7084_v46, 7  ;;  %v91_v32 = vadd.s32 120, %v7113_v53 }
  0x47   :  { %v7294_v38 = vmul.f32 2.0, %v7084_v46 }
  0x48   :  { %v7258_v9 = vadd.f32 %v496_v59, %v457_v28  ;;  %v423_v48 = vsel %vm14884_vm0, %v416_v30, %v417_v31  ;;  %v483_v28 = vrot.slane %v7094_v51, 1  ;;  %vm157_vm3 = vcmp.le.s32.totalorder %v91_v32, 126 }
  0x49   :  { %v466_v4 = vadd.f32 %v423_v48, %v7294_v38  ;;  %v422_v17 = vsel %vm14884_vm0, %v417_v31, %v418_v61 }
  0x4a   :  { %358 = vrot.lane.b32.xlu1 %v7068_v36, %s7004_s20  ;;  %356 = vrot.lane.b32.xlu0 %v7070_v37, %s7004_s20  ;;  %v494_v37 = vsel %vm14885_vm2, %v475_v21, %v476_v41  ;;  %v415_v36 = vrot.slane %v7076_v42, 7  ;;  %v491_v21 = vsel %vm14885_vm2, %v478_v6, %v479_v7  ;;  %v463_v41 = vadd.f32 %v426_v12, %v7278_v26 }
  0x4b   :  { %v524_v22 = vadd.f32 %v494_v37, %v459_v1  ;;  %v488_v7 = vsel %vm14885_vm2, %v481_v20, %v482_v49  ;;  %v7326_v37 = vmul.f32 2.0, %v7094_v51 }
  0x4c   :  { %v424_v59 = vsel %vm14884_vm0, %v415_v36, %v416_v30  ;;  %v528_v1 = vadd.f32 %v490_v44, %v463_v41 }
  0x4d   :  { %v465_v6 = vadd.f32 %v424_v59, %v7301_v45 }
  0x4e   :  { %362 = vrot.lane.b32.xlu1 %v7076_v42, %s7004_s20  ;;  %360 = vrot.lane.b32.xlu0 %v7078_v43, %s7004_s20  ;;  %v425_v42 = vsel %vm14884_vm0, %v414_v10, %v415_v36  ;;  %v527_v43 = vadd.f32 %v491_v21, %v462_v15  ;;  %v7329_v10 = vsel %vm157_vm3, 1.0, %v14744_v57  ;;  %v421_v36 = vsel %vm14884_vm0, %v418_v61, %v419_v55 }
  0x4f   :  { %v464_v40 = vadd.f32 %v425_v42, %v7267_v14  ;;  %15186 = vst [vmem:[#allocation10_spill] sm:$0xff] %v7329_v10  ;;  %v530_v20 = vadd.f32 %v488_v7, %v465_v6  ;;  %v467_v55 = vadd.f32 %v422_v17, %v7326_v37 }
  0x51   :  { %v529_v62 = vadd.f32 %v489_v35, %v464_v40 }
  0x52   :  { %366 = vrot.lane.b32.xlu1 %v7084_v46, %s7004_s20  ;;  %364 = vrot.lane.b32.xlu0 %v7086_v47, %s7004_s20  ;;  %v484_v47 = vrot.slane %v7092_v50, 1  ;;  %v487_v46 = vsel %vm14885_vm2, %v482_v49, %v483_v28 }
  0x53   :  { %v531_v18 = vadd.f32 %v487_v46, %v466_v4  ;;  %v93_v4 = vand.u32 127, %v75_v52 }
  0x54   :  { %v501_v15 = vsel %vm14885_vm2, %v484_v47, %v469_v0  ;;  %v486_v13 = vsel %vm14885_vm2, %v483_v28, %v484_v47 }
  0x55   :  { %v532_v21 = vadd.f32 %v486_v13, %v467_v55  ;;  %vm190_vm4 = vcmp.ge.s32.totalorder %v93_v4, 1  ;;  %vm193_vm5 = vcmp.le.s32.totalorder %v93_v4, 126 }
  0x56   :  { %370 = vrot.lane.b32.xlu1 %v7092_v50, %s7004_s20  ;;  %368 = vrot.lane.b32.xlu0 %v7094_v51, %s7004_s20  ;;  %v468_v51 = vadd.f32 %v421_v36, %v7323_v8  ;;  %v517_v50 = vmul.f32 %v7329_v10, %v501_v15  ;;  %v7401_v15 = vsel %vm190_vm4, 1.0, %v14744_v57 }
  0x58   :  { %v533_v0 = vadd.f32 %v517_v50, %v468_v51  ;;  %v7411_v50 = vsel %vm193_vm5, 1.0, %v14744_v57 }
  0x5a   :  { %536 = vrot.lane.b32.xlu1 %v7189_v29, %s7004_s20  ;;  %534 = vrot.lane.b32.xlu0 %v7198_v23, %s7004_s20 }
  0x5e   :  { %540 = vrot.lane.b32.xlu1 %v7229_v54, %s7004_s20  ;;  %538 = vrot.lane.b32.xlu0 %v7231_v27, %s7004_s20 }
  0x62   :  { %544 = vrot.lane.b32.xlu1 %v7234_v56, %s7004_s20  ;;  %542 = vrot.lane.b32.xlu0 %v7258_v9, %s7004_s20 }
  0x66   :  { %548 = vrot.lane.b32.xlu1 %v7264_v11, %s7004_s20  ;;  %546 = vrot.lane.b32.xlu0 %v524_v22, %s7004_s20 }
  0x6a   :  { %552 = vrot.lane.b32.xlu1 %v527_v43, %s7004_s20  ;;  %550 = vrot.lane.b32.xlu0 %v526_v34, %s7004_s20 }
  0x6e   :  { %556 = vrot.lane.b32.xlu1 %v529_v62, %s7004_s20  ;;  %554 = vrot.lane.b32.xlu0 %v528_v1, %s7004_s20 }
  0x72   :  { %560 = vrot.lane.b32.xlu1 %v531_v18, %s7004_s20  ;;  %558 = vrot.lane.b32.xlu0 %v530_v20, %s7004_s20 }
  0x76   :  { %564 = vrot.lane.b32.xlu1 %v533_v0, %s7004_s20  ;;  %562 = vrot.lane.b32.xlu0 %v532_v21, %s7004_s20 }
  0x7a   :  { %584 = vrot.lane.b32.xlu1 %v7189_v29, %s7003_s0  ;;  %582 = vrot.lane.b32.xlu0 %v7198_v23, %s7003_s0 }
  0x7e   :  { %588 = vrot.lane.b32.xlu1 %v7229_v54, %s7003_s0  ;;  %586 = vrot.lane.b32.xlu0 %v7231_v27, %s7003_s0 }
  0x82   :  { %592 = vrot.lane.b32.xlu1 %v7234_v56, %s7003_s0  ;;  %590 = vrot.lane.b32.xlu0 %v7258_v9, %s7003_s0 }
  0x86   :  { %596 = vrot.lane.b32.xlu1 %v7264_v11, %s7003_s0  ;;  %594 = vrot.lane.b32.xlu0 %v524_v22, %s7003_s0 }
  0x8a   :  { %600 = vrot.lane.b32.xlu1 %v527_v43, %s7003_s0  ;;  %598 = vrot.lane.b32.xlu0 %v526_v34, %s7003_s0 }
  0x8c   :  { %v281_v29 = vpop.permute.xlu1 %280  ;;  %v277_v23 = vpop.permute.xlu0 %276 }
  0x8d   :  { %v310_v17 = vmul.f32 %v7401_v15, %v281_v29  ;;  %v308_v52 = vmul.f32 %v7401_v15, %v277_v23 }
  0x8e   :  { %604 = vrot.lane.b32.xlu1 %v529_v62, %s7003_s0  ;;  %602 = vrot.lane.b32.xlu0 %v528_v1, %s7003_s0 }
  0x8f   :  { %v326_v13 = vadd.f32 %v310_v17, %v7176_v16  ;;  %v324_v10 = vadd.f32 %v308_v52, %v7142_v63 }
  0x90   :  { %v283_v54 = vpop.permute.xlu1 %282  ;;  %v279_v27 = vpop.permute.xlu0 %278 }
  0x91   :  { %v311_v51 = vmul.f32 %v7401_v15, %v283_v54  ;;  %v309_v55 = vmul.f32 %v7401_v15, %v279_v27 }
  0x92   :  { %608 = vrot.lane.b32.xlu1 %v531_v18, %s7003_s0  ;;  %606 = vrot.lane.b32.xlu0 %v530_v20, %s7003_s0 }
  0x93   :  { %v327_v23 = vadd.f32 %v311_v51, %v7155_v5  ;;  %v325_v27 = vadd.f32 %v309_v55, %v7136_v60 }
  0x94   :  { %v287_v56 = vpop.permute.xlu1 %286  ;;  %v285_v9 = vpop.permute.xlu0 %284 }
  0x96   :  { %612 = vrot.lane.b32.xlu1 %v533_v0, %s7003_s0  ;;  %610 = vrot.lane.b32.xlu0 %v532_v21, %s7003_s0  ;;  %v313_v0 = vmul.f32 %v7401_v15, %v287_v56  ;;  %v312_v21 = vmul.f32 %v7401_v15, %v285_v9 }
  0x98   :  { %v291_v11 = vpop.permute.xlu1 %290  ;;  %v289_v22 = vpop.permute.xlu0 %288 }
  0x99   :  { %v315_v54 = vmul.f32 %v7401_v15, %v291_v11  ;;  %v314_v16 = vmul.f32 %v7401_v15, %v289_v22  ;;  %v329_v11 = vadd.f32 %v313_v0, %v7181_v19 }
  0x9c   :  { %v295_v25 = vpop.permute.xlu1 %294  ;;  %v293_v42 = vpop.permute.xlu0 %292 }
  0x9d   :  { %v317_v56 = vmul.f32 %v7401_v15, %v295_v25  ;;  %v316_v17 = vmul.f32 %v7401_v15, %v293_v42  ;;  %v331_v42 = vadd.f32 %v315_v54, %v7212_v39 }
  0x9f   :  { %v333_v19 = vadd.f32 %v317_v56, %v7243_v2 }
  0xa0   :  { %v299_v12 = vpop.permute.xlu1 %298  ;;  %v297_v30 = vpop.permute.xlu0 %296 }
  0xa1   :  { %v318_v63 = vmul.f32 %v7401_v15, %v297_v30 }
  0xa3   :  { %v7454_v39 = vadd.f32 %v318_v63, %v7278_v26 }
  0xa4   :  { %v303_v31 = vpop.permute.xlu1 %302  ;;  %v7375_v32 = vpop.permute.xlu0 %300 }
  0xa5   :  { %v321_v60 = vmul.f32 %v7401_v15, %v303_v31 }
  0xa8   :  { %v7377_v43 = vpop.permute.xlu1 %306  ;;  %v7379_v34 = vpop.permute.xlu0 %304 }
  0xa9   :  { %v323_v2 = vmul.f32 %v7401_v15, %v7377_v43 }
  0xac   :  { %v343_v35 = vpop.permute.xlu1 %342  ;;  %v341_v40 = vpop.permute.xlu0 %340 }
  0xad   :  { %v373_v57 = vmul.f32 %v7411_v50, %v343_v35  ;;  %v372_v9 = vmul.f32 %v7411_v50, %v341_v40  ;;  %v328_v35 = vadd.f32 %v312_v21, %v7204_v33 }
  0xaf   :  { %v389_v40 = vadd.f32 %v373_v57, %v325_v27  ;;  %v7446_v33 = vadd.f32 %v372_v9, %v324_v10 }
  0xb0   :  { %v347_v41 = vpop.permute.xlu1 %346  ;;  %v345_v44 = vpop.permute.xlu0 %344 }
  0xb1   :  { %v375_v5 = vmul.f32 %v7411_v50, %v347_v41  ;;  %v374_v22 = vmul.f32 %v7411_v50, %v345_v44  ;;  %v330_v41 = vadd.f32 %v314_v16, %v7219_v24  ;;  %v332_v44 = vadd.f32 %v316_v17, %v7246_v3 }
  0xb2   :  { %v320_v24 = vmul.f32 %v7401_v15, %v7375_v32  ;;  %v647_v26 = vrot.slane %v389_v40, 1  ;;  %v695_v55 = vrot.slane %v389_v40, 7  ;;  %v694_v43 = vrot.slane %v7446_v33, 7 }
  0xb3   :  { %v391_v57 = vadd.f32 %v375_v5, %v327_v23  ;;  %v390_v10 = vadd.f32 %v374_v22, %v326_v13  ;;  %v339_v17 = vadd.f32 %v323_v2, %v7323_v8 }
  0xb4   :  { %v351_v48 = vpop.permute.xlu1 %350  ;;  %v349_v49 = vpop.permute.xlu0 %348  ;;  %v7486_v9 = vadd.f32 %v320_v24, %v7301_v45  ;;  %v724_v22 = vsel %vm14884_vm0, %v694_v43, %v695_v55 }
  0xb5   :  { %v376_v30 = vmul.f32 %v7411_v50, %v349_v49  ;;  %v649_v13 = vrot.slane %v391_v57, 1  ;;  %v697_v23 = vrot.slane %v391_v57, 7  ;;  %v648_v54 = vrot.slane %v390_v10, 1 }
  0xb6   :  { %v696_v27 = vrot.slane %v390_v10, 7 }
  0xb8   :  { %v7381_v28 = vpop.permute.xlu1 %354  ;;  %v353_v59 = vpop.permute.xlu0 %352 }
  0xb9   :  { %v378_v31 = vmul.f32 %v7411_v50, %v353_v59  ;;  %v379_v32 = vmul.f32 %v7411_v50, %v7381_v28 }
  0xbb   :  { %v7472_v0 = vadd.f32 %v378_v31, %v330_v41  ;;  %v723_v31 = vsel %vm14884_vm0, %v695_v55, %v696_v27 }
  0xbc   :  { %v7383_v61 = vpop.permute.xlu1 %358  ;;  %v7385_v47 = vpop.permute.xlu0 %356 }
  0xbd   :  { %v381_v21 = vmul.f32 %v7411_v50, %v7383_v61  ;;  %v700_v24 = vrot.slane %v7472_v0, 7 }
  0xc0   :  { %v7387_v62 = vpop.permute.xlu1 %362  ;;  %v7389_v1 = vpop.permute.xlu0 %360 }
  0xc1   :  { %v383_v55 = vmul.f32 %v7411_v50, %v7387_v62 }
  0xc4   :  { %v7392_v6 = vpop.permute.xlu1 %366  ;;  %v7394_v46 = vpop.permute.xlu0 %364 }
  0xc8   :  { %v7396_v7 = vpop.permute.xlu1 %370  ;;  %v7398_v36 = vpop.permute.xlu0 %368 }
  0xc9   :  { %15187 = vst [vmem:[#allocation11_spill] sm:$0xff] %v7398_v36  ;;  %v319_v36 = vmul.f32 %v7401_v15, %v299_v12  ;;  %v377_v12 = vmul.f32 %v7411_v50, %v351_v48  ;;  %v7457_v48 = vadd.f32 %v321_v60, %v7294_v38  ;;  %v14747_v38 = vrot.slane %v7446_v33, 1 }
  0xca   :  { %v387_v16 = vmul.f32 %v7411_v50, %v7396_v7  ;;  %v7493_v60 = vadd.f32 %v381_v21, %v333_v19 }
  0xcb   :  { %v7451_v51 = vadd.f32 %v319_v36, %v7267_v14  ;;  %v322_v14 = vmul.f32 %v7401_v15, %v7379_v34  ;;  %v393_v59 = vadd.f32 %v377_v12, %v329_v11  ;;  %v392_v36 = vadd.f32 %v376_v30, %v328_v35 }
  0xcc   :  { %v7404_v18 = vpop.permute.xlu1 %536  ;;  %v7406_v20 = vpop.permute.xlu0 %534  ;;  %v380_v34 = vmul.f32 %v7411_v50, %v7385_v47  ;;  %v395_v11 = vadd.f32 %v379_v32, %v331_v42  ;;  %v652_v35 = vrot.slane %v7472_v0, 1  ;;  %v7501_v45 = vsel %vm14885_vm2, %v14747_v38, %v647_v26 }
  0xcd   :  { %v651_v63 = vrot.slane %v393_v59, 1  ;;  %v650_v61 = vrot.slane %v392_v36, 1  ;;  %v7490_v5 = vadd.f32 %v322_v14, %v7326_v37  ;;  %v698_v47 = vrot.slane %v392_v36, 7 }
  0xce   :  { %v396_v7 = vadd.f32 %v380_v34, %v332_v44  ;;  %v7503_v8 = vadd.f32 %v387_v16, %v339_v17  ;;  %v675_v42 = vsel %vm14885_vm2, %v647_v26, %v648_v54  ;;  %v722_v12 = vsel %vm14884_vm0, %v696_v27, %v697_v23 }
  0xcf   :  { %v674_v30 = vsel %vm14885_vm2, %v648_v54, %v649_v13  ;;  %v699_v41 = vrot.slane %v393_v59, 7  ;;  %v673_v19 = vsel %vm14885_vm2, %v649_v13, %v650_v61  ;;  %v672_v44 = vsel %vm14885_vm2, %v650_v61, %v651_v63 }
  0xd0   :  { %v7417_v29 = vpop.permute.xlu1 %540  ;;  %v7419_v4 = vpop.permute.xlu0 %538  ;;  %v653_v57 = vrot.slane %v395_v11, 1  ;;  %v671_v2 = vsel %vm14885_vm2, %v651_v63, %v652_v35  ;;  %v721_v10 = vsel %vm14884_vm0, %v697_v23, %v698_v47  ;;  %v655_v14 = vrot.slane %v7493_v60, 1 }
  0xd1   :  { %v654_v26 = vrot.slane %v396_v7, 1  ;;  %v702_v59 = vrot.slane %v396_v7, 7  ;;  %v382_v36 = vmul.f32 %v7411_v50, %v7389_v1  ;;  %v14746_v32 = vrot.slane %v7503_v8, 7 }
  0xd2   :  { %v743_v21 = vsub.f32 %v675_v42, %v724_v22  ;;  %v7536_v34 = vsub.f32 %v674_v30, %v723_v31  ;;  %v701_v23 = vrot.slane %v395_v11, 7  ;;  %v7538_v54 = vsub.f32 %v673_v19, %v722_v12 }
  0xd3   :  { %v720_v27 = vsel %vm14884_vm0, %v698_v47, %v699_v41  ;;  %v7542_v16 = vsub.f32 %v672_v44, %v721_v10  ;;  %v703_v1 = vrot.slane %v7493_v60, 7  ;;  %v670_v17 = vsel %vm14885_vm2, %v652_v35, %v653_v57 }
  0xd4   :  { %v7437_v52 = vpop.permute.xlu1 %544  ;;  %v7439_v25 = vpop.permute.xlu0 %542  ;;  %v7545_v62 = vsub.f32 %v671_v2, %v720_v27  ;;  %v719_v63 = vsel %vm14884_vm0, %v699_v41, %v700_v24  ;;  %v398_v61 = vadd.f32 %v382_v36, %v7454_v39  ;;  %v669_v11 = vsel %vm14885_vm2, %v653_v57, %v654_v26 }
  0xd5   :  { %v668_v47 = vsel %vm14885_vm2, %v654_v26, %v655_v14  ;;  %v717_v7 = vsel %vm14884_vm0, %v701_v23, %v702_v59  ;;  %v7559_v60 = vadd.f32 %v383_v55, %v7451_v51  ;;  %v385_v35 = vmul.f32 %v7411_v50, %v7392_v6 }
  0xd6   :  { %v725_v39 = vsel %vm14884_vm0, %v14746_v32, %v694_v43  ;;  %v7571_v12 = vand.u32 2147483647, %v743_v21  ;;  %v7574_v30 = vand.u32 2147483647, %v7538_v54  ;;  %v7577_v51 = vand.u32 2147483647, %v7536_v34 }
  0xd7   :  { %v7580_v41 = vand.u32 2147483647, %v7542_v16  ;;  %v718_v6 = vsel %vm14884_vm0, %v700_v24, %v701_v23  ;;  %v384_v43 = vmul.f32 %v7411_v50, %v7394_v46  ;;  %v7588_v31 = vsub.f32 %v670_v17, %v719_v63 }
  0xd8   :  { %v7463_v49 = vpop.permute.xlu1 %548  ;;  %v7465_v3 = vpop.permute.xlu0 %546  ;;  %15188 = vst [vmem:[#allocation12_spill] sm:$0xff] %v7574_v30  ;;  %v7586_v19 = vsub.f32 %v669_v11, %v718_v6  ;;  %v7590_v44 = vsub.f32 %v668_v47, %v717_v7  ;;  %v656_v57 = vrot.slane %v398_v61, 1  ;;  %v726_v2 = vmul.f32 %v7129_v58, %v725_v39 }
  0xd9   :  { %v7594_v10 = vand.u32 2147483647, %v7545_v62  ;;  %v716_v26 = vsel %vm14884_vm0, %v702_v59, %v703_v1  ;;  %v657_v24 = vrot.slane %v7559_v60, 1  ;;  %v14748_v36 = vrot.slane %v7559_v60, 7 }
  0xda   :  { %v704_v46 = vrot.slane %v398_v61, 7  ;;  %v7601_v55 = vadd.f32 %v385_v35, %v7457_v48  ;;  %v567_v17 = vmul.f32 %v7411_v50, %v7404_v18  ;;  %v566_v63 = vmul.f32 %v7411_v50, %v7406_v20 }
  0xdb   :  { %15189 = vst [vmem:[#allocation13_spill] sm:$0xff] %v7594_v10  ;;  %v7610_v47 = vadd.f32 %v384_v43, %v7486_v9  ;;  %v7613_v61 = vand.u32 2147483647, %v7586_v19  ;;  %v7616_v48 = vand.u32 2147483647, %v7588_v31  ;;  %v7624_v20 = vsub.f32 %v7501_v45, %v726_v2 }
  0xdc   :  { %v7481_v56 = vpop.permute.xlu1 %552  ;;  %v7483_v28 = vpop.permute.xlu0 %550  ;;  %v7619_v7 = vand.u32 2147483647, %v7590_v44  ;;  %v667_v39 = vsel %vm14885_vm2, %v655_v14, %v656_v57 }
  0xdd   :  { %15190 = vst [vmem:[#allocation14_spill] sm:$0xff] %v7613_v61  ;;  %15191 = vst [vmem:[#allocation15_spill] sm:$0xff] %v7616_v48  ;;  %v706_v32 = vrot.slane %v7610_v47, 7 }
  0xde   :  { %15192 = vst [vmem:[#allocation16_spill] sm:$0xff] %v7619_v7 }
  0xe0   :  { %v7505_v37 = vpop.permute.xlu1 %556  ;;  %v7507_v40 = vpop.permute.xlu0 %554 }
  0xe4   :  { %v7532_v13 = vpop.permute.xlu1 %560  ;;  %v7534_v0 = vpop.permute.xlu0 %558 }
  0xe8   :  { %v7567_v22 = vpop.permute.xlu1 %564  ;;  %v7569_v42 = vpop.permute.xlu0 %562 }
  0xec   :  { %v585_v23 = vpop.permute.xlu1 %584  ;;  %v583_v27 = vpop.permute.xlu0 %582 }
  0xed   :  { %v615_v11 = vmul.f32 %v7401_v15, %v585_v23  ;;  %v614_v59 = vmul.f32 %v7401_v15, %v583_v27  ;;  %v714_v23 = vsel %vm14884_vm0, %v704_v46, %v14748_v36  ;;  %v666_v27 = vsel %vm14885_vm2, %v656_v57, %v657_v24 }
  0xef   :  { %v631_v18 = vsub.f32 %v567_v17, %v615_v11  ;;  %v7621_v35 = vsub.f32 %v566_v63, %v614_v59  ;;  %v715_v17 = vsel %vm14884_vm0, %v703_v1, %v704_v46  ;;  %v569_v11 = vmul.f32 %v7411_v50, %v7417_v29 }
  0xf0   :  { %v589_v6 = vpop.permute.xlu1 %588  ;;  %v587_v43 = vpop.permute.xlu0 %586  ;;  %v568_v59 = vmul.f32 %v7411_v50, %v7419_v4  ;;  %v658_v46 = vrot.slane %v7610_v47, 1  ;;  %v7660_v4 = vsub.f32 %v667_v39, %v716_v26  ;;  %v570_v47 = vmul.f32 %v7411_v50, %v7439_v25 }
  0xf1   :  { %v7638_v2 = vand.u32 2147483647, %v631_v18  ;;  %v7640_v14 = vmul.f32 %v743_v21, %v631_v18  ;;  %v7644_v63 = vmul.f32 %v7624_v20, %v7621_v35  ;;  %v617_v57 = vmul.f32 %v7401_v15, %v589_v6  ;;  %v15195_v21 = vld [vmem:[#allocation11_spill] sm:$0xff] }
  0xf2   :  { %v616_v1 = vmul.f32 %v7401_v15, %v587_v43  ;;  %v386_v18 = vmul.f32 %v7411_v50, %v15195_v21  ;;  %v7662_v6 = vsub.f32 %v666_v27, %v715_v17  ;;  %v571_v43 = vmul.f32 %v7411_v50, %v7437_v52 }
  0xf3   :  { %15193 = vst [vmem:[#allocation17_spill] sm:$0xff] %v7638_v2  ;;  %15194 = vst [vmem:[#allocation18_spill] sm:$0xff] %v7644_v63  ;;  %v7658_v38 = vadd.f32 %v7571_v12, %v7638_v2  ;;  %v633_v36 = vsub.f32 %v569_v11, %v617_v57  ;;  %v665_v17 = vsel %vm14885_vm2, %v657_v24, %v658_v46  ;;  %v661_v57 = vrot.slane %v7503_v8, 1 }
  0xf4   :  { %v632_v29 = vsub.f32 %v568_v59, %v616_v1  ;;  %v593_v9 = vpop.permute.xlu1 %592  ;;  %v591_v45 = vpop.permute.xlu0 %590  ;;  %v7683_v52 = vadd.f32 %v386_v18, %v7490_v5  ;;  %v573_v1 = vmul.f32 %v7411_v50, %v7463_v49  ;;  %vm14887_vm10 = vcmp.ge.f32.partialorder %v7640_v14, 0.0 }
  0xf5   :  { %15196 = vst [vmem:[#allocation11_spill] sm:$0xff] %v7658_v38  ;;  %v619_v21 = vmul.f32 %v7401_v15, %v593_v9  ;;  %v618_v63 = vmul.f32 %v7401_v15, %v591_v45  ;;  %904 = vrot.lane.b32.xlu1 %v7658_v38, %s7003_s0  ;;  %v7672_v11 = vand.u32 2147483647, %v633_v36  ;;  %v7675_v26 = vmul.f32 %v7538_v54, %v633_v36 }
  0xf6   :  { %v7677_v39 = vand.u32 2147483647, %v632_v29  ;;  %v7680_v27 = vmul.f32 %v7536_v34, %v632_v29  ;;  %v15202_v34 = vrot.slane %v7601_v55, 7  ;;  %v660_v49 = vrot.slane %v7683_v52, 1 }
  0xf7   :  { %15197 = vst [vmem:[#allocation19_spill] sm:$0xff] %v7672_v11  ;;  %15198 = vst [vmem:[#allocation20_spill] sm:$0xff] %v7675_v26  ;;  %v635_v25 = vsub.f32 %v571_v43, %v619_v21  ;;  %v634_v9 = vsub.f32 %v570_v47, %v618_v63  ;;  %v7689_v45 = vadd.f32 %v7574_v30, %v7672_v11  ;;  %v15203_v63 = vrot.slane %v7601_v55, 1 }
  0xf8   :  { %15199 = vst [vmem:[#allocation21_spill] sm:$0xff] %v7680_v27  ;;  %v7693_v54 = vadd.f32 %v7577_v51, %v7677_v39  ;;  %v597_v36 = vpop.permute.xlu1 %596  ;;  %v595_v59 = vpop.permute.xlu0 %594  ;;  %v7699_v5 = vsel %vm14884_vm0, %v706_v32, %v15202_v34  ;;  %vm14891_vm12 = vcmp.ge.f32.partialorder %v7675_v26, 0.0 }
  0xf9   :  { %15200 = vst [vmem:[#allocation22_spill] sm:$0xff] %v7689_v45  ;;  %v7705_v24 = vsel %vm14885_vm2, %v658_v46, %v15203_v63  ;;  %v7710_v18 = vand.u32 2147483647, %v635_v25  ;;  %v7713_v29 = vmul.f32 %v7545_v62, %v635_v25  ;;  %v7715_v43 = vand.u32 2147483647, %v634_v9  ;;  %908 = vrot.lane.b32.xlu1 %v7689_v45, %s7003_s0 }
  0xfa   :  { %15201 = vst [vmem:[#allocation23_spill] sm:$0xff] %v7693_v54  ;;  %v7718_v47 = vmul.f32 %v7542_v16, %v634_v9  ;;  %v621_v21 = vmul.f32 %v7401_v15, %v597_v36  ;;  %v620_v46 = vmul.f32 %v7401_v15, %v595_v59  ;;  %906 = vrot.lane.b32.xlu0 %v7693_v54, %s7003_s0  ;;  %v708_v9 = vrot.slane %v7683_v52, 7 }
  0xfb   :  { %15204 = vst [vmem:[#allocation24_spill] sm:$0xff] %v7710_v18  ;;  %15205 = vst [vmem:[#allocation25_spill] sm:$0xff] %v7713_v29  ;;  %v572_v62 = vmul.f32 %v7411_v50, %v7465_v3  ;;  %v7731_v25 = vadd.f32 %v7594_v10, %v7710_v18  ;;  %v753_v16 = vsub.f32 %v665_v17, %v714_v23 }
  0xfc   :  { %15206 = vst [vmem:[#allocation26_spill] sm:$0xff] %v7718_v47  ;;  %v575_v36 = vmul.f32 %v7411_v50, %v7481_v56  ;;  %v7738_v59 = vadd.f32 %v7580_v41, %v7715_v43  ;;  %v637_v34 = vsub.f32 %v573_v1, %v621_v21  ;;  %v601_v63 = vpop.permute.xlu1 %600  ;;  %v599_v47 = vpop.permute.xlu0 %598  ;;  %v574_v3 = vmul.f32 %v7411_v50, %v7483_v28 }
  0xfd   :  { %15207 = vst [vmem:[#allocation27_spill] sm:$0xff] %v7731_v25  ;;  %v636_v29 = vsub.f32 %v572_v62, %v620_v46  ;;  %v623_v27 = vmul.f32 %v7401_v15, %v601_v63  ;;  %v622_v23 = vmul.f32 %v7401_v15, %v599_v47  ;;  %912 = vrot.lane.b32.xlu1 %v7731_v25, %s7003_s0  ;;  %v15211_v56 = vrot.slane %v7559_v60, 7 }
  0xfe   :  { %15208 = vst [vmem:[#allocation28_spill] sm:$0xff] %v7738_v59  ;;  %v7744_v17 = vand.u32 2147483647, %v637_v34  ;;  %v7747_v52 = vmul.f32 %v7586_v19, %v637_v34  ;;  %910 = vrot.lane.b32.xlu0 %v7738_v59, %s7003_s0  ;;  %v15212_v1 = vrot.slane %v7446_v33, 1  ;;  %v7771_v60 = vand.u32 2147483647, %v7660_v4 }
  0xff   :  { %v713_v28 = vsel %vm14884_vm0, %v15211_v56, %v706_v32  ;;  %v7761_v21 = vand.u32 2147483647, %v636_v29  ;;  %v7764_v19 = vmul.f32 %v7588_v31, %v636_v29  ;;  %v639_v46 = vsub.f32 %v575_v36, %v623_v27 }
 0x100   :  { %15209 = vst [vmem:[#allocation29_spill] sm:$0xff] %v7744_v17  ;;  %15210 = vst [vmem:[#allocation30_spill] sm:$0xff] %v7747_v52  ;;  %v677_v47 = vsel %vm14885_vm2, %v661_v57, %v15212_v1  ;;  %v638_v62 = vsub.f32 %v574_v3, %v622_v23  ;;  %v7768_v34 = vadd.f32 %v7613_v61, %v7744_v17  ;;  %v7773_v32 = vand.u32 2147483647, %v753_v16  ;;  %v605_v33 = vpop.permute.xlu1 %604  ;;  %v603_v63 = vpop.permute.xlu0 %602  ;;  %v15222_v3 = vld [vmem:[#allocation10_spill] sm:$0xff] }
 0x101   :  { %15213 = vst [vmem:[#allocation31_spill] sm:$0xff] %v7761_v21  ;;  %15214 = vst [vmem:[#allocation32_spill] sm:$0xff] %v7764_v19  ;;  %v15218_v56 = vrot.slane %v7601_v55, 1  ;;  %v7781_v31 = vadd.f32 %v7616_v48, %v7761_v21  ;;  %v7783_v27 = vand.u32 2147483647, %v639_v46  ;;  %v15221_v29 = vrot.slane %v7503_v8, 7 }
 0x102   :  { %15215 = vst [vmem:[#allocation33_spill] sm:$0xff] %v7768_v34  ;;  %15216 = vst [vmem:[#allocation34_spill] sm:$0xff] %v7771_v60  ;;  %v693_v23 = vmul.f32 %v15222_v3, %v677_v47  ;;  %v7791_v19 = vmul.f32 %v7660_v4, %v639_v46  ;;  %v7793_v52 = vand.u32 2147483647, %v638_v62  ;;  %v625_v21 = vmul.f32 %v7401_v15, %v605_v33 }
 0x103   :  { %15217 = vst [vmem:[#allocation35_spill] sm:$0xff] %v7773_v32  ;;  %v663_v1 = vsel %vm14885_vm2, %v15218_v56, %v660_v49  ;;  %15219 = vst [vmem:[#allocation36_spill] sm:$0xff] %v7781_v31  ;;  %v710_v36 = vsel %vm14884_vm0, %v708_v9, %v15221_v29  ;;  %v7796_v56 = vmul.f32 %v7590_v44, %v638_v62  ;;  %916 = vrot.lane.b32.xlu1 %v7768_v34, %s7003_s0 }
 0x104   :  { %15220 = vst [vmem:[#allocation37_spill] sm:$0xff] %v7783_v27  ;;  %15223 = vst [vmem:[#allocation38_spill] sm:$0xff] %v7791_v19  ;;  %v577_v8 = vmul.f32 %v7411_v50, %v7505_v37  ;;  %v576_v29 = vmul.f32 %v7411_v50, %v7507_v40  ;;  %v7807_v4 = vadd.f32 %v7771_v60, %v7783_v27  ;;  %914 = vrot.lane.b32.xlu0 %v7781_v31, %s7003_s0  ;;  %v609_v37 = vpop.permute.xlu1 %608  ;;  %v607_v62 = vpop.permute.xlu0 %606 }
 0x105   :  { %15224 = vst [vmem:[#allocation39_spill] sm:$0xff] %v7793_v52  ;;  %15225 = vst [vmem:[#allocation40_spill] sm:$0xff] %v7796_v56  ;;  %v624_v47 = vmul.f32 %v7401_v15, %v603_v63  ;;  %v7813_v44 = vand.u32 2147483647, %v7621_v35  ;;  %v7817_v46 = vadd.f32 %v7619_v7, %v7793_v52  ;;  %v662_v40 = vsel %vm14885_vm2, %v660_v49, %v661_v57 }
 0x106   :  { %15226 = vst [vmem:[#allocation41_spill] sm:$0xff] %v7807_v4  ;;  %v15228_v33 = vrot.slane %v7601_v55, 7  ;;  %v641_v56 = vsub.f32 %v577_v8, %v625_v21  ;;  %v627_v19 = vmul.f32 %v7401_v15, %v609_v37  ;;  %v626_v35 = vmul.f32 %v7401_v15, %v607_v62 }
 0x107   :  { %15227 = vst [vmem:[#allocation42_spill] sm:$0xff] %v7817_v46  ;;  %v640_v3 = vsub.f32 %v576_v29, %v624_v47  ;;  %v579_v52 = vmul.f32 %v7411_v50, %v7532_v13  ;;  %v578_v27 = vmul.f32 %v7411_v50, %v7534_v0  ;;  %v755_v17 = vsub.f32 %v663_v1, %v7699_v5 }
 0x108   :  { %v711_v63 = vsel %vm14884_vm0, %v15228_v33, %v708_v9  ;;  %920 = vrot.lane.b32.xlu1 %v7807_v4, %s7003_s0  ;;  %v757_v55 = vsub.f32 %v693_v23, %v710_v36  ;;  %v7835_v57 = vand.u32 2147483647, %v7624_v20  ;;  %v7837_v49 = vand.u32 2147483647, %v641_v56  ;;  %918 = vrot.lane.b32.xlu0 %v7817_v46, %s7003_s0  ;;  %v613_v1 = vpop.permute.xlu1 %612  ;;  %v611_v23 = vpop.permute.xlu0 %610 }
 0x109   :  { %v7839_v9 = vmul.f32 %v753_v16, %v641_v56  ;;  %v7842_v21 = vmul.f32 %v7662_v6, %v640_v3  ;;  %v7847_v13 = vand.u32 2147483647, %v7662_v6  ;;  %v643_v0 = vsub.f32 %v579_v52, %v627_v19 }
 0x10a   :  { %15229 = vst [vmem:[#allocation43_spill] sm:$0xff] %v7837_v49  ;;  %v642_v5 = vsub.f32 %v578_v27, %v626_v35  ;;  %v756_v36 = vsub.f32 %v662_v40, %v711_v63  ;;  %v7851_v20 = vadd.f32 %v7835_v57, %v7813_v44  ;;  %v7855_v16 = vadd.f32 %v7773_v32, %v7837_v49 }
 0x10b   :  { %15230 = vst [vmem:[#allocation44_spill] sm:$0xff] %v7839_v9  ;;  %15231 = vst [vmem:[#allocation45_spill] sm:$0xff] %v7842_v21  ;;  %v7857_v56 = vand.u32 2147483647, %v640_v3  ;;  %v754_v8 = vsub.f32 %v7705_v24, %v713_v28  ;;  %v581_v6 = vmul.f32 %v7411_v50, %v7567_v22  ;;  %v7862_v52 = vand.u32 2147483647, %v755_v17 }
 0x10c   :  { %15232 = vst [vmem:[#allocation46_spill] sm:$0xff] %v7847_v13  ;;  %15233 = vst [vmem:[#allocation47_spill] sm:$0xff] %v7851_v20  ;;  %v7864_v19 = vand.u32 2147483647, %v643_v0  ;;  %v7866_v27 = vmul.f32 %v755_v17, %v643_v0  ;;  %v629_v47 = vmul.f32 %v7401_v15, %v613_v1  ;;  %v7871_v37 = vand.u32 2147483647, %v757_v55  ;;  %924 = vrot.lane.b32.xlu1 %v7855_v16, %s7003_s0 }
 0x10d   :  { %15234 = vst [vmem:[#allocation48_spill] sm:$0xff] %v7855_v16  ;;  %15235 = vst [vmem:[#allocation49_spill] sm:$0xff] %v7857_v56  ;;  %v7868_v29 = vmul.f32 %v754_v8, %v642_v5  ;;  %v628_v3 = vmul.f32 %v7401_v15, %v611_v23  ;;  %902 = vrot.lane.b32.xlu0 %v7851_v20, %s7003_s0  ;;  %v580_v22 = vmul.f32 %v7411_v50, %v7569_v42 }
 0x10e   :  { %15236 = vst [vmem:[#allocation50_spill] sm:$0xff] %v7862_v52  ;;  %15237 = vst [vmem:[#allocation51_spill] sm:$0xff] %v7864_v19  ;;  %v7882_v24 = vadd.f32 %v7862_v52, %v7864_v19  ;;  %v7884_v17 = vand.u32 2147483647, %v756_v36  ;;  %v7888_v28 = vadd.f32 %v7847_v13, %v7857_v56  ;;  %v7890_v62 = vand.u32 2147483647, %v642_v5 }
 0x10f   :  { %15238 = vst [vmem:[#allocation52_spill] sm:$0xff] %v7866_v27  ;;  %15239 = vst [vmem:[#allocation53_spill] sm:$0xff] %v7868_v29  ;;  %v645_v40 = vsub.f32 %v581_v6, %v629_v47  ;;  %v644_v33 = vsub.f32 %v580_v22, %v628_v3  ;;  %v7892_v63 = vand.u32 2147483647, %v754_v8  ;;  %v7897_v42 = vmul.f32 0.41421357, %v7871_v37 }
 0x110   :  { %15240 = vst [vmem:[#allocation54_spill] sm:$0xff] %v7871_v37  ;;  %15241 = vst [vmem:[#allocation55_spill] sm:$0xff] %v7882_v24  ;;  %928 = vrot.lane.b32.xlu1 %v7882_v24, %s7003_s0  ;;  %v7906_v5 = vmul.f32 0.41421357, %v7884_v17  ;;  %v951_v3 = vrot.slane %v7658_v38, 7  ;;  %v958_v21 = vrot.slane %v7817_v46, 7 }
 0x111   :  { %15242 = vst [vmem:[#allocation56_spill] sm:$0xff] %v7884_v17  ;;  %15243 = vst [vmem:[#allocation57_spill] sm:$0xff] %v7888_v28  ;;  %v7894_v35 = vand.u32 2147483647, %v645_v40  ;;  %v7899_v0 = vmul.f32 %v757_v55, %v645_v40  ;;  %922 = vrot.lane.b32.xlu0 %v7888_v28, %s7003_s0  ;;  %v7908_v1 = vand.u32 2147483647, %v644_v33  ;;  %v7910_v23 = vmul.f32 %v756_v36, %v644_v33 }
 0x112   :  { %15244 = vst [vmem:[#allocation58_spill] sm:$0xff] %v7890_v62  ;;  %15245 = vst [vmem:[#allocation59_spill] sm:$0xff] %v7892_v63  ;;  %v7914_v8 = vadd.f32 %v7892_v63, %v7890_v62  ;;  %v950_v36 = vrot.slane %v7851_v20, 7  ;;  %v959_v9 = vrot.slane %v7807_v4, 7  ;;  %v963_v19 = vrot.slane %v7882_v24, 7 }
 0x113   :  { %15246 = vst [vmem:[#allocation60_spill] sm:$0xff] %v7894_v35  ;;  %15247 = vst [vmem:[#allocation61_spill] sm:$0xff] %v7897_v42  ;;  %v7918_v55 = vadd.f32 %v7871_v37, %v7894_v35  ;;  %v7921_v6 = vmul.f32 0.41421357, %v7894_v35  ;;  %vm14967_vm6 = vcmp.le.f32.partialorder %v7894_v35, %v7897_v42  ;;  %v7926_v47 = vmul.f32 0.41421357, %v7908_v1 }
 0x114   :  { %15248 = vst [vmem:[#allocation62_spill] sm:$0xff] %v7899_v0  ;;  %15249 = vst [vmem:[#allocation63_spill] sm:$0xff] %v7906_v5  ;;  %v7942_v22 = vadd.f32 %v7884_v17, %v7908_v1  ;;  %v7946_v40 = vsel %vm14884_vm0, %v950_v36, %v951_v3  ;;  %v952_v5 = vrot.slane %v7693_v54, 7  ;;  %v7971_v37 = vmul.f32 %v7401_v15, %v7129_v58 }
 0x115   :  { %15250 = vst [vmem:[#allocation64_spill] sm:$0xff] %v7908_v1  ;;  %15251 = vst [vmem:[#allocation65_spill] sm:$0xff] %v7910_v23  ;;  %932 = vrot.lane.b32.xlu1 %v7918_v55, %s7003_s0  ;;  %926 = vrot.lane.b32.xlu0 %v7914_v8, %s7003_s0  ;;  %v965_v33 = vrot.slane %v7918_v55, 7  ;;  %v953_v23 = vrot.slane %v7689_v45, 7  ;;  %v954_v1 = vrot.slane %v7738_v59, 7  ;;  %v956_v35 = vrot.slane %v7781_v31, 7 }
 0x116   :  { %15252 = vst [vmem:[#allocation66_spill] sm:$0xff] %v7914_v8  ;;  %15253 = vst [vmem:[#allocation67_spill] sm:$0xff] %v7918_v55  ;;  %v957_v0 = vrot.slane %v7768_v34, 7  ;;  %v7985_v29 = vmul.f32 %v7411_v50, %v7971_v37 }
 0x117   :  { %15254 = vst [vmem:[#allocation68_spill] sm:$0xff] %v7921_v6  ;;  %15255 = vst [vmem:[#allocation69_spill] sm:$0xff] %v7926_v47  ;;  %v7957_v47 = vsel %vm14884_vm0, %v965_v33, %v950_v36  ;;  %v7961_v17 = vsel %vm14884_vm0, %v952_v5, %v953_v23  ;;  %v955_v6 = vrot.slane %v7731_v25, 7  ;;  %v7975_v36 = vsel %vm14884_vm0, %v951_v3, %v952_v5 }
 0x118   :  { %15256 = vst [vmem:[#allocation70_spill] sm:$0xff] %v7942_v22  ;;  %15257 = vst [vmem:[#allocation71_spill] sm:$0xff] %v7971_v37  ;;  %v7994_v3 = vsel %vm14884_vm0, %v953_v23, %v954_v1  ;;  %v7998_v27 = vsel %vm14884_vm0, %v956_v35, %v957_v0  ;;  %v960_v23 = vrot.slane %v7888_v28, 7  ;;  %v8022_v62 = vsel %vm14884_vm0, %v957_v0, %v958_v21 }
 0x119   :  { %930 = vrot.lane.b32.xlu0 %v7942_v22, %s7003_s0  ;;  %1000 = vrot.lane.b32.xlu1 %v7946_v40, %s7003_s0  ;;  %15258 = vst [vmem:[#allocation72_spill] sm:$0xff] %v7975_v36  ;;  %v7979_v42 = vsel %vm14884_vm0, %v954_v1, %v955_v6  ;;  %15260 = vst [vmem:[#allocation74_spill] sm:$0xff] %v7985_v29  ;;  %v8008_v5 = vsel %vm14884_vm0, %v955_v6, %v956_v35  ;;  %v961_v29 = vrot.slane %v7855_v16, 7 }
 0x11a   :  { %15259 = vst [vmem:[#allocation73_spill] sm:$0xff] %v7979_v42  ;;  %15261 = vst [vmem:[#allocation75_spill] sm:$0xff] %v7994_v3  ;;  %v8012_v1 = vsel %vm14884_vm0, %v958_v21, %v959_v9  ;;  %v962_v6 = vrot.slane %v7914_v8, 7  ;;  %v8036_v37 = vsel %vm14884_vm0, %v959_v9, %v960_v23  ;;  %v964_v0 = vrot.slane %v7942_v22, 7 }
 0x11b   :  { %15262 = vst [vmem:[#allocation76_spill] sm:$0xff] %v7998_v27  ;;  %15263 = vst [vmem:[#allocation77_spill] sm:$0xff] %v8008_v5  ;;  %v8026_v35 = vsel %vm14884_vm0, %v960_v23, %v961_v29 }
 0x11c   :  { %15264 = vst [vmem:[#allocation78_spill] sm:$0xff] %v8012_v1  ;;  %15265 = vst [vmem:[#allocation79_spill] sm:$0xff] %v8022_v62  ;;  %v8040_v21 = vsel %vm14884_vm0, %v962_v6, %v963_v19  ;;  %v8049_v56 = vsel %vm14884_vm0, %v961_v29, %v962_v6  ;;  %v8053_v9 = vsel %vm14884_vm0, %v964_v0, %v965_v33  ;;  %v14804_v6 = vrot.slane %v7851_v20, 1 }
 0x11d   :  { %998 = vrot.lane.b32.xlu0 %v7957_v47, %s7003_s0  ;;  %1004 = vrot.lane.b32.xlu1 %v7961_v17, %s7003_s0  ;;  %15266 = vst [vmem:[#allocation80_spill] sm:$0xff] %v8026_v35  ;;  %15267 = vst [vmem:[#allocation81_spill] sm:$0xff] %v8036_v37  ;;  %v8061_v23 = vsel %vm14884_vm0, %v963_v19, %v964_v0  ;;  %v1223_v0 = vrot.slane %v7658_v38, 1 }
 0x11e   :  { %15268 = vst [vmem:[#allocation82_spill] sm:$0xff] %v8040_v21  ;;  %15269 = vst [vmem:[#allocation83_spill] sm:$0xff] %v8049_v56 }
 0x11f   :  { %15270 = vst [vmem:[#allocation84_spill] sm:$0xff] %v8053_v9  ;;  %15271 = vst [vmem:[#allocation85_spill] sm:$0xff] %v8061_v23 }
 0x121   :  { %1002 = vrot.lane.b32.xlu0 %v7975_v36, %s7003_s0  ;;  %1008 = vrot.lane.b32.xlu1 %v7979_v42, %s7003_s0 }
 0x125   :  { %1006 = vrot.lane.b32.xlu0 %v7994_v3, %s7003_s0  ;;  %1012 = vrot.lane.b32.xlu1 %v7998_v27, %s7003_s0 }
 0x129   :  { %1010 = vrot.lane.b32.xlu0 %v8008_v5, %s7003_s0  ;;  %1016 = vrot.lane.b32.xlu1 %v8012_v1, %s7003_s0 }
 0x12d   :  { %1014 = vrot.lane.b32.xlu0 %v8022_v62, %s7003_s0  ;;  %1020 = vrot.lane.b32.xlu1 %v8026_v35, %s7003_s0 }
 0x131   :  { %1018 = vrot.lane.b32.xlu0 %v8036_v37, %s7003_s0  ;;  %1024 = vrot.lane.b32.xlu1 %v8040_v21, %s7003_s0 }
 0x135   :  { %1022 = vrot.lane.b32.xlu0 %v8049_v56, %s7003_s0  ;;  %1028 = vrot.lane.b32.xlu1 %v8053_v9, %s7003_s0 }
 0x139   :  { %1026 = vrot.lane.b32.xlu0 %v8061_v23, %s7003_s0  ;;  %1064 = vrot.lane.b32.xlu1 %v7946_v40, %s7004_s20 }
 0x13d   :  { %1062 = vrot.lane.b32.xlu0 %v7957_v47, %s7004_s20  ;;  %1068 = vrot.lane.b32.xlu1 %v7961_v17, %s7004_s20 }
 0x141   :  { %1066 = vrot.lane.b32.xlu0 %v7975_v36, %s7004_s20  ;;  %1072 = vrot.lane.b32.xlu1 %v7979_v42, %s7004_s20  ;;  %v15301_v42 = vrot.slane %v7851_v20, 1 }
 0x145   :  { %1070 = vrot.lane.b32.xlu0 %v7994_v3, %s7004_s20  ;;  %1076 = vrot.lane.b32.xlu1 %v7998_v27, %s7004_s20 }
 0x149   :  { %1074 = vrot.lane.b32.xlu0 %v8008_v5, %s7004_s20  ;;  %1080 = vrot.lane.b32.xlu1 %v8012_v1, %s7004_s20 }
 0x14d   :  { %1078 = vrot.lane.b32.xlu0 %v8022_v62, %s7004_s20  ;;  %1084 = vrot.lane.b32.xlu1 %v8026_v35, %s7004_s20 }
 0x151   :  { %1082 = vrot.lane.b32.xlu0 %v8036_v37, %s7004_s20  ;;  %1088 = vrot.lane.b32.xlu1 %v8040_v21, %s7004_s20  ;;  %v1224_v21 = vrot.slane %v7693_v54, 1 }
 0x153   :  { %v8167_v5 = vsel %vm14885_vm2, %v1223_v0, %v1224_v21 }
 0x154   :  { %15280 = vst [vmem:[#allocation94_spill] sm:$0xff] %v8167_v5 }
 0x155   :  { %1086 = vrot.lane.b32.xlu0 %v8049_v56, %s7004_s20  ;;  %1092 = vrot.lane.b32.xlu1 %v8053_v9, %s7004_s20  ;;  %v8139_v56 = vsel %vm14885_vm2, %v14804_v6, %v1223_v0  ;;  %v1226_v6 = vrot.slane %v7738_v59, 1 }
 0x156   :  { %15274 = vst [vmem:[#allocation88_spill] sm:$0xff] %v8139_v56 }
 0x159   :  { %1090 = vrot.lane.b32.xlu0 %v8061_v23, %s7004_s20  ;;  %1176 = vrot.lane.b32.xlu1 %v7658_v38, %s7004_s20  ;;  %v1225_v38 = vrot.slane %v7689_v45, 1 }
 0x15b   :  { %v8153_v62 = vsel %vm14885_vm2, %v1224_v21, %v1225_v38  ;;  %v8185_v21 = vsel %vm14885_vm2, %v1225_v38, %v1226_v6 }
 0x15c   :  { %15277 = vst [vmem:[#allocation91_spill] sm:$0xff] %v8153_v62  ;;  %15283 = vst [vmem:[#allocation97_spill] sm:$0xff] %v8185_v21 }
 0x15d   :  { %1174 = vrot.lane.b32.xlu0 %v7851_v20, %s7004_s20  ;;  %1180 = vrot.lane.b32.xlu1 %v7689_v45, %s7004_s20  ;;  %v8323_v20 = vmul.f32 0.41421357, %v7594_v10 }
 0x15f   :  { %15311 = vst [vmem:[#allocation124_spill] sm:$0xff] %v8323_v20  ;;  %vm14904_vm7 = vcmp.le.f32.partialorder %v7710_v18, %v8323_v20 }
 0x161   :  { %1178 = vrot.lane.b32.xlu0 %v7693_v54, %s7004_s20  ;;  %1184 = vrot.lane.b32.xlu1 %v7731_v25, %s7004_s20  ;;  %v1227_v54 = vrot.slane %v7731_v25, 1  ;;  %v1228_v25 = vrot.slane %v7781_v31, 1 }
 0x163   :  { %v8203_v38 = vsel %vm14885_vm2, %v1227_v54, %v1228_v25 }
 0x164   :  { %15287 = vst [vmem:[#allocation101_spill] sm:$0xff] %v8203_v38 }
 0x165   :  { %1182 = vrot.lane.b32.xlu0 %v7738_v59, %s7004_s20  ;;  %1188 = vrot.lane.b32.xlu1 %v7768_v34, %s7004_s20  ;;  %v1229_v59 = vrot.slane %v7768_v34, 1  ;;  %v1230_v34 = vrot.slane %v7817_v46, 1 }
 0x167   :  { %v8115_v19 = vpop.permute.xlu1 %904  ;;  %v8189_v0 = vsel %vm14885_vm2, %v1228_v25, %v1229_v59 }
 0x168   :  { %15284 = vst [vmem:[#allocation98_spill] sm:$0xff] %v8189_v0 }
 0x169   :  { %1186 = vrot.lane.b32.xlu0 %v7781_v31, %s7004_s20  ;;  %1192 = vrot.lane.b32.xlu1 %v7807_v4, %s7004_s20  ;;  %v1231_v31 = vrot.slane %v7807_v4, 1  ;;  %v1232_v4 = vrot.slane %v7888_v28, 1 }
 0x16b   :  { %v8123_v33 = vpop.permute.xlu1 %908 }
 0x16c   :  { %v8121_v29 = vpop.permute.xlu0 %906 }
 0x16d   :  { %1190 = vrot.lane.b32.xlu0 %v7817_v46, %s7004_s20  ;;  %1196 = vrot.lane.b32.xlu1 %v7855_v16, %s7004_s20  ;;  %v1233_v46 = vrot.slane %v7855_v16, 1  ;;  %v1234_v16 = vrot.slane %v7914_v8, 1 }
 0x16f   :  { %v8133_v9 = vpop.permute.xlu1 %912  ;;  %v8225_v25 = vsel %vm14885_vm2, %v1232_v4, %v1233_v46 }
 0x170   :  { %v8131_v23 = vpop.permute.xlu0 %910  ;;  %15273 = vst [vmem:[#allocation87_spill] sm:$0xff] %v8133_v9  ;;  %15292 = vst [vmem:[#allocation106_spill] sm:$0xff] %v8225_v25 }
 0x171   :  { %1194 = vrot.lane.b32.xlu0 %v7888_v28, %s7004_s20  ;;  %1200 = vrot.lane.b32.xlu1 %v7882_v24, %s7004_s20  ;;  %15272 = vst [vmem:[#allocation86_spill] sm:$0xff] %v8131_v23  ;;  %v1235_v28 = vrot.slane %v7882_v24, 1  ;;  %v1236_v24 = vrot.slane %v7942_v22, 1 }
 0x173   :  { %v8273_v23 = vsel %vm14885_vm2, %v1235_v28, %v1236_v24 }
 0x174   :  { %15298 = vst [vmem:[#allocation112_spill] sm:$0xff] %v8273_v23 }
 0x175   :  { %1198 = vrot.lane.b32.xlu0 %v7914_v8, %s7004_s20  ;;  %1270 = vrot.lane.b32.xlu1 %v8139_v56, %s7004_s20  ;;  %v8147_v37 = vpop.permute.xlu1 %916  ;;  %v1237_v8 = vrot.slane %v7918_v55, 1 }
 0x176   :  { %15275 = vst [vmem:[#allocation89_spill] sm:$0xff] %v8147_v37  ;;  %v8149_v35 = vpop.permute.xlu0 %914 }
 0x177   :  { %15276 = vst [vmem:[#allocation90_spill] sm:$0xff] %v8149_v35  ;;  %v8171_v35 = vsel %vm14885_vm2, %v1226_v6, %v1227_v54  ;;  %v8207_v6 = vsel %vm14885_vm2, %v1230_v34, %v1231_v31  ;;  %v8221_v54 = vsel %vm14885_vm2, %v1229_v59, %v1230_v34  ;;  %v8239_v59 = vsel %vm14885_vm2, %v1231_v31, %v1232_v4 }
 0x178   :  { %15281 = vst [vmem:[#allocation95_spill] sm:$0xff] %v8171_v35  ;;  %15288 = vst [vmem:[#allocation102_spill] sm:$0xff] %v8207_v6  ;;  %v8243_v34 = vsel %vm14885_vm2, %v1234_v16, %v1235_v28  ;;  %v8257_v31 = vsel %vm14885_vm2, %v1233_v46, %v1234_v16  ;;  %v8261_v4 = vsel %vm14885_vm2, %v1236_v24, %v1237_v8 }
 0x179   :  { %1202 = vrot.lane.b32.xlu0 %v7942_v22, %s7004_s20  ;;  %1274 = vrot.lane.b32.xlu1 %v8153_v62, %s7004_s20  ;;  %15291 = vst [vmem:[#allocation105_spill] sm:$0xff] %v8221_v54  ;;  %15294 = vst [vmem:[#allocation108_spill] sm:$0xff] %v8239_v59  ;;  %v8287_v36 = vsel %vm14885_vm2, %v1237_v8, %v15301_v42 }
 0x17a   :  { %v8161_v45 = vpop.permute.xlu1 %920  ;;  %v8163_v1 = vpop.permute.xlu0 %918  ;;  %15295 = vst [vmem:[#allocation109_spill] sm:$0xff] %v8243_v34  ;;  %15296 = vst [vmem:[#allocation110_spill] sm:$0xff] %v8257_v31 }
 0x17b   :  { %15278 = vst [vmem:[#allocation92_spill] sm:$0xff] %v8161_v45  ;;  %15279 = vst [vmem:[#allocation93_spill] sm:$0xff] %v8163_v1 }
 0x17c   :  { %15297 = vst [vmem:[#allocation111_spill] sm:$0xff] %v8261_v4  ;;  %15302 = vst [vmem:[#allocation115_spill] sm:$0xff] %v8287_v36 }
 0x17d   :  { %1272 = vrot.lane.b32.xlu0 %v8167_v5, %s7004_s20  ;;  %1278 = vrot.lane.b32.xlu1 %v8171_v35, %s7004_s20  ;;  %v15359_v20 = vld [vmem:[#allocation89_spill] sm:$0xff] }
 0x17e   :  { %v8179_v45 = vpop.permute.xlu1 %924 }
 0x17f   :  { %15282 = vst [vmem:[#allocation96_spill] sm:$0xff] %v8179_v45  ;;  %v8181_v1 = vpop.permute.xlu0 %902 }
 0x181   :  { %1276 = vrot.lane.b32.xlu0 %v8185_v21, %s7004_s20  ;;  %1282 = vrot.lane.b32.xlu1 %v8189_v0, %s7004_s20 }
 0x182   :  { %v8197_v45 = vpop.permute.xlu1 %928 }
 0x183   :  { %15285 = vst [vmem:[#allocation99_spill] sm:$0xff] %v8197_v45  ;;  %v8199_v27 = vpop.permute.xlu0 %922 }
 0x184   :  { %15286 = vst [vmem:[#allocation100_spill] sm:$0xff] %v8199_v27 }
 0x185   :  { %1280 = vrot.lane.b32.xlu0 %v8203_v38, %s7004_s20  ;;  %1286 = vrot.lane.b32.xlu1 %v8207_v6, %s7004_s20 }
 0x187   :  { %v8215_v45 = vpop.permute.xlu1 %932  ;;  %v8217_v27 = vpop.permute.xlu0 %926 }
 0x188   :  { %15289 = vst [vmem:[#allocation103_spill] sm:$0xff] %v8215_v45  ;;  %15290 = vst [vmem:[#allocation104_spill] sm:$0xff] %v8217_v27 }
 0x189   :  { %1284 = vrot.lane.b32.xlu0 %v8221_v54, %s7004_s20  ;;  %1290 = vrot.lane.b32.xlu1 %v8225_v25, %s7004_s20 }
 0x18b   :  { %v8233_v45 = vpop.permute.xlu0 %930  ;;  %v8235_v27 = vpop.permute.xlu1 %1000 }
 0x18c   :  { %15293 = vst [vmem:[#allocation107_spill] sm:$0xff] %v8233_v45  ;;  %v1047_v9 = vmul.f32 %v7401_v15, %v8235_v27  ;;  %v935_v27 = vmul.f32 %v7401_v15, %v8115_v19 }
 0x18d   :  { %1288 = vrot.lane.b32.xlu0 %v8239_v59, %s7004_s20  ;;  %1294 = vrot.lane.b32.xlu1 %v8243_v34, %s7004_s20 }
 0x18f   :  { %v8251_v45 = vpop.permute.xlu0 %998  ;;  %v8253_v3 = vpop.permute.xlu1 %1004 }
 0x191   :  { %1292 = vrot.lane.b32.xlu0 %v8257_v31, %s7004_s20  ;;  %1298 = vrot.lane.b32.xlu1 %v8261_v4, %s7004_s20 }
 0x193   :  { %v8267_v22 = vpop.permute.xlu0 %1002  ;;  %v8269_v37 = vpop.permute.xlu1 %1008 }
 0x195   :  { %1296 = vrot.lane.b32.xlu0 %v8273_v23, %s7004_s20  ;;  %1334 = vrot.lane.b32.xlu1 %v8139_v56, %s7003_s0 }
 0x197   :  { %v8279_v46 = vpop.permute.xlu0 %1006  ;;  %v8281_v16 = vpop.permute.xlu1 %1012 }
 0x198   :  { %15299 = vst [vmem:[#allocation113_spill] sm:$0xff] %v8279_v46  ;;  %15300 = vst [vmem:[#allocation114_spill] sm:$0xff] %v8281_v16  ;;  %v982_v46 = vmul.f32 %v7129_v58, %v7957_v47 }
 0x199   :  { %1300 = vrot.lane.b32.xlu0 %v8287_v36, %s7004_s20  ;;  %1338 = vrot.lane.b32.xlu1 %v8153_v62, %s7003_s0  ;;  %v8314_v62 = vmul.f32 0.41421357, %v7571_v12 }
 0x19b   :  { %v8293_v24 = vpop.permute.xlu0 %1010  ;;  %v8295_v28 = vpop.permute.xlu1 %1016  ;;  %15309 = vst [vmem:[#allocation122_spill] sm:$0xff] %v8314_v62  ;;  %vm14886_vm1 = vcmp.le.f32.partialorder %v7638_v2, %v8314_v62  ;;  %v15342_v62 = vld [vmem:[#allocation51_spill] sm:$0xff] }
 0x19c   :  { %15303 = vst [vmem:[#allocation116_spill] sm:$0xff] %v8293_v24  ;;  %15304 = vst [vmem:[#allocation117_spill] sm:$0xff] %v8295_v28  ;;  %v8348_v28 = vmul.f32 0.41421357, %v7773_v32 }
 0x19d   :  { %1336 = vrot.lane.b32.xlu0 %v8167_v5, %s7003_s0  ;;  %1342 = vrot.lane.b32.xlu1 %v8171_v35, %s7003_s0  ;;  %v8317_v5 = vmul.f32 0.41421357, %v7574_v30  ;;  %v8320_v35 = vmul.f32 0.41421357, %v7577_v51 }
 0x19e   :  { %15316 = vst [vmem:[#allocation129_spill] sm:$0xff] %v8348_v28  ;;  %v8368_v28 = vmul.f32 0.41421357, %v7813_v44 }
 0x19f   :  { %v8301_v56 = vpop.permute.xlu0 %1014  ;;  %v8303_v42 = vpop.permute.xlu1 %1020  ;;  %15310 = vst [vmem:[#allocation123_spill] sm:$0xff] %v8317_v5  ;;  %vm14892_vm0 = vcmp.le.f32.partialorder %v7672_v11, %v8317_v5  ;;  %v15353_v5 = vld [vmem:[#allocation10_spill] sm:$0xff] }
 0x1a0   :  { %15305 = vst [vmem:[#allocation118_spill] sm:$0xff] %v8301_v56  ;;  %15306 = vst [vmem:[#allocation119_spill] sm:$0xff] %v8303_v42  ;;  %v8342_v42 = vmul.f32 0.41421357, %v7771_v60  ;;  %v8345_v56 = vmul.f32 0.41421357, %v7619_v7  ;;  %vm14895_vm3 = vcmp.le.f32.partialorder %v7835_v57, %v8368_v28 }
 0x1a1   :  { %1340 = vrot.lane.b32.xlu0 %v8185_v21, %s7003_s0  ;;  %1346 = vrot.lane.b32.xlu1 %v8189_v0, %s7003_s0  ;;  %v8326_v21 = vmul.f32 0.41421357, %v7580_v41  ;;  %v8329_v0 = vmul.f32 0.41421357, %v7613_v61  ;;  %v15332_v60 = vld [vmem:[#allocation39_spill] sm:$0xff] }
 0x1a2   :  { %15314 = vst [vmem:[#allocation127_spill] sm:$0xff] %v8342_v42  ;;  %15315 = vst [vmem:[#allocation128_spill] sm:$0xff] %v8345_v56  ;;  %v8364_v42 = vmul.f32 0.41421357, %v7892_v63  ;;  %v8386_v63 = vmul.f32 0.41421357, %v7715_v43 }
 0x1a3   :  { %v8309_v8 = vpop.permute.xlu0 %1018  ;;  %v8311_v53 = vpop.permute.xlu1 %1024  ;;  %15312 = vst [vmem:[#allocation125_spill] sm:$0xff] %v8329_v0  ;;  %v15330_v56 = vld [vmem:[#allocation37_spill] sm:$0xff]  ;;  %vm14917_vm8 = vcmp.le.f32.partialorder %v7715_v43, %v8326_v21 }
 0x1a4   :  { %15307 = vst [vmem:[#allocation120_spill] sm:$0xff] %v8309_v8  ;;  %15308 = vst [vmem:[#allocation121_spill] sm:$0xff] %v8311_v53  ;;  %v8336_v53 = vmul.f32 0.41421357, %v7835_v57  ;;  %v8339_v8 = vmul.f32 0.41421357, %v7616_v48 }
 0x1a5   :  { %1344 = vrot.lane.b32.xlu0 %v8203_v38, %s7003_s0  ;;  %1350 = vrot.lane.b32.xlu1 %v8207_v6, %s7003_s0  ;;  %v8351_v38 = vmul.f32 0.41421357, %v7847_v13  ;;  %v8354_v6 = vmul.f32 0.41421357, %v7638_v2  ;;  %15321 = vst [vmem:[#allocation134_spill] sm:$0xff] %v8364_v42  ;;  %v15323_v13 = vld [vmem:[#allocation18_spill] sm:$0xff] }
 0x1a6   :  { %15313 = vst [vmem:[#allocation126_spill] sm:$0xff] %v8339_v8  ;;  %v8361_v8 = vmul.f32 0.41421357, %v7862_v52  ;;  %vm886_vm11 = vcmp.ge.f32.partialorder %v15323_v13, 0.0  ;;  %15325 = vst [vmem:[#allocation136_spill] sm:$0xff] %v8386_v63  ;;  %v15326_v42 = vld [vmem:[#allocation29_spill] sm:$0xff]  ;;  %vm14893_vm4 = vcmp.le.f32.partialorder %v7813_v44, %v8336_v53 }
 0x1a7   :  { %15317 = vst [vmem:[#allocation130_spill] sm:$0xff] %v8351_v38  ;;  %v8356_v24 = vpop.permute.xlu0 %1022  ;;  %v8358_v36 = vpop.permute.xlu1 %1028  ;;  %v8371_v38 = vmul.f32 0.41421357, %v7672_v11  ;;  %v15328_v52 = vld [vmem:[#allocation31_spill] sm:$0xff]  ;;  %v8395_v7 = vmul.f32 0.41421357, %v15330_v56  ;;  %v1094_v56 = vmul.f32 %v7411_v50, %v7129_v58  ;;  %vm14890_vm15 = vcmp.le.f32.partialorder %v7571_v12, %v8354_v6 }
 0x1a8   :  { %15318 = vst [vmem:[#allocation131_spill] sm:$0xff] %v8356_v24  ;;  %15319 = vst [vmem:[#allocation132_spill] sm:$0xff] %v8358_v36  ;;  %v8376_v36 = vmul.f32 0.41421357, %v7677_v39  ;;  %v8379_v24 = vmul.f32 0.41421357, %v7710_v18 }
 0x1a9   :  { %15320 = vst [vmem:[#allocation133_spill] sm:$0xff] %v8361_v8  ;;  %15322 = vst [vmem:[#allocation135_spill] sm:$0xff] %v8371_v38  ;;  %1348 = vrot.lane.b32.xlu0 %v8221_v54, %s7003_s0  ;;  %1354 = vrot.lane.b32.xlu1 %v8225_v25, %s7003_s0  ;;  %v8389_v8 = vmul.f32 0.41421357, %v15326_v42  ;;  %v8392_v32 = vmul.f32 0.41421357, %v15328_v52  ;;  %vm14894_vm5 = vcmp.le.f32.partialorder %v7574_v30, %v8371_v38 }
 0x1aa   :  { %15324 = vst [vmem:[#allocation18_spill] sm:$0xff] %v8379_v24  ;;  %15331 = vst [vmem:[#allocation139_spill] sm:$0xff] %v8395_v7  ;;  %v8398_v48 = vmul.f32 0.41421357, %v15332_v60  ;;  %v8401_v54 = vmul.f32 0.41421357, %v7837_v49  ;;  %vm824_vm2 = vcmp.le.f32.partialorder %v7577_v51, %v8376_v36  ;;  %vm14907_vm9 = vcmp.le.f32.partialorder %v7594_v10, %v8379_v24 }
 0x1ab   :  { %15327 = vst [vmem:[#allocation137_spill] sm:$0xff] %v8389_v8  ;;  %15329 = vst [vmem:[#allocation138_spill] sm:$0xff] %v8392_v32  ;;  %v8403_v16 = vpop.permute.xlu0 %1026  ;;  %v1065_v25 = vpop.permute.xlu1 %1064  ;;  %v15335_v7 = vld [vmem:[#allocation21_spill] sm:$0xff]  ;;  %v8456_v2 = vmul.f32 0.41421357, %v15342_v62  ;;  %v15365_v18 = vld [vmem:[#allocation75_spill] sm:$0xff] }
 0x1ac   :  { %15333 = vst [vmem:[#allocation140_spill] sm:$0xff] %v8398_v48  ;;  %15334 = vst [vmem:[#allocation141_spill] sm:$0xff] %v8401_v54  ;;  %v1111_v52 = vmul.f32 %v7411_v50, %v1065_v25  ;;  %vm888_vm13 = vcmp.ge.f32.partialorder %v15335_v7, 0.0  ;;  %v15336_v60 = vld [vmem:[#allocation25_spill] sm:$0xff]  ;;  %v15339_v25 = vld [vmem:[#allocation71_spill] sm:$0xff] }
 0x1ad   :  { %vm14905_vm14 = vcmp.ge.f32.partialorder %v15336_v60, 0.0  ;;  %v15337_v49 = vld [vmem:[#allocation49_spill] sm:$0xff]  ;;  %1352 = vrot.lane.b32.xlu0 %v8239_v59, %s7003_s0  ;;  %1358 = vrot.lane.b32.xlu1 %v8243_v34, %s7003_s0  ;;  %v1046_v58 = vmul.f32 %v8251_v45, %v15339_v25  ;;  %15343 = vst [vmem:[#allocation71_spill] sm:$0xff] %v8456_v2  ;;  %v15366_v11 = vld [vmem:[#allocation76_spill] sm:$0xff]  ;;  %v15380_v26 = vld [vmem:[#allocation119_spill] sm:$0xff] }
 0x1ae   :  { %v8415_v54 = vmul.f32 0.41421357, %v15337_v49  ;;  %v1127_v47 = vsel %vm14887_vm10, %v1047_v9, %v1111_v52  ;;  %v1049_v52 = vmul.f32 %v7401_v15, %v8253_v3  ;;  %v934_v3 = vmul.f32 %v7401_v15, %v8181_v1  ;;  %v15352_v38 = vld [vmem:[#allocation73_spill] sm:$0xff] }
 0x1af   :  { %v1143_v34 = vsel %vm14886_vm1, %v7946_v40, %v1127_v47  ;;  %v1063_v59 = vpop.permute.xlu0 %1062  ;;  %v1069_v19 = vpop.permute.xlu1 %1068  ;;  %v15340_v40 = vld [vmem:[#allocation26_spill] sm:$0xff]  ;;  %v15364_v24 = vld [vmem:[#allocation117_spill] sm:$0xff] }
 0x1b0   :  { %15338 = vst [vmem:[#allocation21_spill] sm:$0xff] %v8415_v54  ;;  %v8450_v45 = vsel %vm14890_vm15, %v935_v27, %v1143_v34  ;;  %v1110_v9 = vmul.f32 %v1094_v56, %v1063_v59  ;;  %v1113_v25 = vmul.f32 %v7411_v50, %v1069_v19  ;;  %vm14921_vm1 = vcmp.ge.f32.partialorder %v15340_v40, 0.0  ;;  %v15341_v47 = vld [vmem:[#allocation30_spill] sm:$0xff] }
 0x1b1   :  { %vm14916_vm10 = vcmp.ge.f32.partialorder %v15341_v47, 0.0  ;;  %1356 = vrot.lane.b32.xlu0 %v8257_v31, %s7003_s0  ;;  %1362 = vrot.lane.b32.xlu1 %v8261_v4, %s7003_s0  ;;  %vm856_vm15 = vcmp.le.f32.partialorder %v7677_v39, %v8320_v35  ;;  %v937_v56 = vmul.f32 %v7401_v15, %v8123_v33  ;;  %v1048_v27 = vmul.f32 %v7401_v15, %v8267_v22  ;;  %v15351_v4 = vld [vmem:[#allocation72_spill] sm:$0xff]  ;;  %v15379_v47 = vld [vmem:[#allocation118_spill] sm:$0xff] }
 0x1b2   :  { %v1126_v59 = vsel %vm886_vm11, %v1046_v58, %v1110_v9  ;;  %v1129_v34 = vsel %vm14891_vm12, %v1049_v52, %v1113_v25  ;;  %v1051_v19 = vmul.f32 %v7401_v15, %v8269_v37  ;;  %vm14920_vm12 = vcmp.le.f32.partialorder %v7580_v41, %v8386_v63  ;;  %v15345_v25 = vld [vmem:[#allocation38_spill] sm:$0xff] }
 0x1b3   :  { %v1142_v33 = vsel %vm14893_vm4, %v982_v46, %v1126_v59  ;;  %v1145_v58 = vsel %vm14892_vm0, %v7961_v17, %v1129_v34  ;;  %v1067_v1 = vpop.permute.xlu0 %1066  ;;  %v1073_v52 = vpop.permute.xlu1 %1072  ;;  %v15344_v17 = vld [vmem:[#allocation32_spill] sm:$0xff]  ;;  %vm14930_vm4 = vcmp.ge.f32.partialorder %v15345_v25, 0.0  ;;  %v15346_v59 = vld [vmem:[#allocation58_spill] sm:$0xff]  ;;  %v1055_v10 = vmul.f32 %v7401_v15, %v15364_v24  ;;  %v15371_v24 = vld [vmem:[#allocation31_spill] sm:$0xff] }
 0x1b4   :  { %v8494_v22 = vsel %vm14895_vm3, %v934_v3, %v1142_v33  ;;  %v8499_v37 = vsel %vm14894_vm5, %v937_v56, %v1145_v58  ;;  %v1112_v46 = vmul.f32 %v7411_v50, %v1067_v1  ;;  %v1115_v9 = vmul.f32 %v7411_v50, %v1073_v52  ;;  %v15348_v56 = vld [vmem:[#allocation87_spill] sm:$0xff]  ;;  %v15349_v58 = vld [vmem:[#allocation113_spill] sm:$0xff] }
 0x1b5   :  { %vm892_vm0 = vcmp.ge.f32.partialorder %v15344_v17, 0.0  ;;  %v8506_v34 = vmul.f32 0.41421357, %v15346_v59  ;;  %v936_v3 = vmul.f32 %v7401_v15, %v8121_v29  ;;  %1360 = vrot.lane.b32.xlu0 %v8273_v23, %s7003_s0  ;;  %1204 = vrot.lane.b32.xlu1 %v7918_v55, %s7004_s20  ;;  %vm14933_vm5 = vcmp.le.f32.partialorder %v7613_v61, %v8389_v8  ;;  %v15350_v23 = vld [vmem:[#allocation114_spill] sm:$0xff] }
 0x1b6   :  { %vm14915_vm3 = vcmp.le.f32.partialorder %v15326_v42, %v8329_v0  ;;  %v939_v33 = vmul.f32 %v7401_v15, %v15348_v56  ;;  %v1050_v1 = vmul.f32 %v7401_v15, %v15349_v58  ;;  %v1128_v29 = vsel %vm888_vm13, %v1048_v27, %v1112_v46  ;;  %v15356_v46 = vld [vmem:[#allocation40_spill] sm:$0xff]  ;;  %v15373_v0 = vld [vmem:[#allocation34_spill] sm:$0xff] }
 0x1b7   :  { %15347 = vst [vmem:[#allocation26_spill] sm:$0xff] %v8506_v34  ;;  %v1131_v52 = vsel %vm14905_vm14, %v1051_v19, %v1115_v9  ;;  %v1053_v55 = vmul.f32 %v7401_v15, %v15350_v23  ;;  %v1144_v31 = vsel %vm856_vm15, %v15351_v4, %v1128_v29  ;;  %v1071_v58 = vpop.permute.xlu0 %1070  ;;  %v1077_v30 = vpop.permute.xlu1 %1076  ;;  %v8538_v27 = vmul.f32 %v7401_v15, %v15353_v5  ;;  %v15357_v9 = vld [vmem:[#allocation44_spill] sm:$0xff]  ;;  %v15358_v29 = vld [vmem:[#allocation86_spill] sm:$0xff] }
 0x1b8   :  { %v1147_v56 = vsel %vm14904_vm7, %v15352_v38, %v1131_v52  ;;  %v8543_v23 = vsel %vm824_vm2, %v936_v3, %v1144_v31  ;;  %v1114_v19 = vmul.f32 %v7411_v50, %v1071_v58  ;;  %v1117_v38 = vmul.f32 %v7411_v50, %v1077_v30  ;;  %v15360_v3 = vld [vmem:[#allocation115_spill] sm:$0xff]  ;;  %v15363_v30 = vld [vmem:[#allocation116_spill] sm:$0xff] }
 0x1b9   :  { %15354 = vst [vmem:[#allocation87_spill] sm:$0xff] %v8538_v27  ;;  %v8548_v4 = vsel %vm14907_vm9, %v939_v33, %v1147_v56  ;;  %vm894_vm7 = vcmp.ge.f32.partialorder %v15356_v46, 0.0  ;;  %vm14943_vm14 = vcmp.ge.f32.partialorder %v15357_v9, 0.0  ;;  %v938_v52 = vmul.f32 %v7401_v15, %v15358_v29  ;;  %1364 = vrot.lane.b32.xlu0 %v15360_v3, %s7003_s0  ;;  %v15361_v33 = vld [vmem:[#allocation15_spill] sm:$0xff]  ;;  %v15407_v9 = vld [vmem:[#allocation81_spill] sm:$0xff] }
 0x1ba   :  { %15355 = vst [vmem:[#allocation113_spill] sm:$0xff] %v8548_v4  ;;  %v941_v31 = vmul.f32 %v7401_v15, %v15359_v20  ;;  %vm14934_vm9 = vcmp.le.f32.partialorder %v15361_v33, %v8392_v32  ;;  %v8564_v56 = vmul.f32 %v7411_v50, %v8538_v27  ;;  %v1052_v58 = vmul.f32 %v7401_v15, %v15363_v30  ;;  %v15395_v33 = vld [vmem:[#allocation79_spill] sm:$0xff] }
 0x1bb   :  { %v1130_v29 = vsel %vm14921_vm1, %v1050_v1, %v1114_v19  ;;  %v1133_v20 = vsel %vm14916_vm10, %v1053_v55, %v1117_v38  ;;  %v1075_v30 = vpop.permute.xlu0 %1074  ;;  %v1081_v4 = vpop.permute.xlu1 %1080  ;;  %v229_v1 = vmul.f32 %v7411_v50, %v7401_v15  ;;  %v15368_v38 = vld [vmem:[#allocation45_spill] sm:$0xff]  ;;  %v1057_v63 = vmul.f32 %v7401_v15, %v15380_v26 }
 0x1bc   :  { %15362 = vst [vmem:[#allocation114_spill] sm:$0xff] %v8564_v56  ;;  %v1146_v60 = vsel %vm14917_vm8, %v15365_v18, %v1130_v29  ;;  %v1149_v27 = vsel %vm14915_vm3, %v15366_v11, %v1133_v20  ;;  %v1116_v19 = vmul.f32 %v7411_v50, %v1075_v30  ;;  %v1119_v11 = vmul.f32 %v7411_v50, %v1081_v4  ;;  %v15369_v29 = vld [vmem:[#allocation52_spill] sm:$0xff]  ;;  %v15370_v20 = vld [vmem:[#allocation126_spill] sm:$0xff]  ;;  %v15372_v56 = vld [vmem:[#allocation139_spill] sm:$0xff] }
 0x1bd   :  { %v8588_v55 = vsel %vm14920_vm12, %v938_v52, %v1146_v60  ;;  %v8593_v18 = vsel %vm14933_vm5, %v941_v31, %v1149_v27  ;;  %vm896_vm3 = vcmp.ge.f32.partialorder %v15368_v38, 0.0  ;;  %vm14953_vm10 = vcmp.ge.f32.partialorder %v15369_v29, 0.0  ;;  %v15374_v60 = vld [vmem:[#allocation127_spill] sm:$0xff]  ;;  %v15375_v52 = vld [vmem:[#allocation37_spill] sm:$0xff]  ;;  %v15377_v27 = vld [vmem:[#allocation90_spill] sm:$0xff] }
 0x1be   :  { %15367 = vst [vmem:[#allocation72_spill] sm:$0xff] %v8593_v18  ;;  %vm860_vm8 = vcmp.le.f32.partialorder %v15371_v24, %v15370_v20  ;;  %vm14945_vm12 = vcmp.le.f32.partialorder %v15373_v0, %v15372_v56  ;;  %vm14931_vm1 = vcmp.le.f32.partialorder %v15375_v52, %v15374_v60  ;;  %v8605_v8 = vsub.f32 1.0, %v229_v1  ;;  %v15378_v30 = vld [vmem:[#allocation92_spill] sm:$0xff]  ;;  %v15381_v1 = vld [vmem:[#allocation77_spill] sm:$0xff]  ;;  %v15388_v60 = vld [vmem:[#allocation35_spill] sm:$0xff] }
 0x1bf   :  { %v940_v31 = vmul.f32 %v7401_v15, %v15377_v27  ;;  %v943_v4 = vmul.f32 %v7401_v15, %v15378_v30  ;;  %v1132_v61 = vsel %vm892_vm0, %v1052_v58, %v1116_v19  ;;  %v1135_v42 = vsel %vm14930_vm4, %v1055_v10, %v1119_v11  ;;  %v1079_v58 = vpop.permute.xlu0 %1078  ;;  %v1085_v19 = vpop.permute.xlu1 %1084  ;;  %v15384_v11 = vld [vmem:[#allocation16_spill] sm:$0xff]  ;;  %v15391_v52 = vld [vmem:[#allocation93_spill] sm:$0xff] }
 0x1c0   :  { %15376 = vst [vmem:[#allocation73_spill] sm:$0xff] %v8605_v8  ;;  %v1054_v18 = vmul.f32 %v7401_v15, %v15379_v47  ;;  %v1148_v27 = vsel %vm860_vm8, %v15381_v1, %v1132_v61  ;;  %v15382_v8 = vld [vmem:[#allocation78_spill] sm:$0xff]  ;;  %v1118_v47 = vmul.f32 %v7411_v50, %v1079_v58  ;;  %v1121_v61 = vmul.f32 %v7411_v50, %v1085_v19  ;;  %v15387_v1 = vld [vmem:[#allocation141_spill] sm:$0xff]  ;;  %v15393_v0 = vld [vmem:[#allocation120_spill] sm:$0xff] }
 0x1c1   :  { %v1151_v30 = vsel %vm14931_vm1, %v15382_v8, %v1135_v42  ;;  %v8630_v10 = vsel %vm14934_vm9, %v940_v31, %v1148_v27  ;;  %vm14946_vm4 = vcmp.le.f32.partialorder %v15384_v11, %v8398_v48  ;;  %v15385_v42 = vld [vmem:[#allocation128_spill] sm:$0xff]  ;;  %v15386_v8 = vld [vmem:[#allocation39_spill] sm:$0xff]  ;;  %vm14955_vm5 = vcmp.le.f32.partialorder %v15388_v60, %v15387_v1  ;;  %v15389_v31 = vld [vmem:[#allocation129_spill] sm:$0xff] }
 0x1c2   :  { %v8635_v26 = vsel %vm14945_vm12, %v943_v4, %v1151_v30  ;;  %vm862_vm1 = vcmp.le.f32.partialorder %v15386_v8, %v15385_v42  ;;  %v15390_v27 = vld [vmem:[#allocation43_spill] sm:$0xff]  ;;  %v942_v4 = vmul.f32 %v7401_v15, %v15391_v52  ;;  %v15392_v30 = vld [vmem:[#allocation96_spill] sm:$0xff]  ;;  %v1134_v19 = vsel %vm894_vm7, %v1054_v18, %v1118_v47 }
 0x1c3   :  { %15383 = vst [vmem:[#allocation86_spill] sm:$0xff] %v8635_v26  ;;  %vm14944_vm9 = vcmp.le.f32.partialorder %v15390_v27, %v15389_v31  ;;  %v945_v58 = vmul.f32 %v7401_v15, %v15392_v30  ;;  %v1137_v56 = vsel %vm14943_vm14, %v1057_v63, %v1121_v61  ;;  %v1056_v25 = vmul.f32 %v7401_v15, %v15393_v0  ;;  %v15394_v26 = vld [vmem:[#allocation121_spill] sm:$0xff]  ;;  %v15396_v20 = vld [vmem:[#allocation80_spill] sm:$0xff]  ;;  %v1083_v18 = vpop.permute.xlu0 %1082  ;;  %v1089_v47 = vpop.permute.xlu1 %1088  ;;  %v15399_v61 = vld [vmem:[#allocation46_spill] sm:$0xff] }
 0x1c4   :  { %v1059_v32 = vmul.f32 %v7401_v15, %v15394_v26  ;;  %v1150_v52 = vsel %vm862_vm1, %v15395_v33, %v1134_v19  ;;  %v1153_v30 = vsel %vm14944_vm9, %v15396_v20, %v1137_v56  ;;  %v1120_v26 = vmul.f32 %v7411_v50, %v1083_v18  ;;  %v15400_v56 = vld [vmem:[#allocation130_spill] sm:$0xff]  ;;  %v15403_v19 = vld [vmem:[#allocation99_spill] sm:$0xff]  ;;  %v15406_v31 = vld [vmem:[#allocation132_spill] sm:$0xff] }
 0x1c5   :  { %v8670_v63 = vsel %vm14946_vm4, %v942_v4, %v1150_v52  ;;  %v8675_v0 = vsel %vm14955_vm5, %v945_v58, %v1153_v30  ;;  %v1123_v33 = vmul.f32 %v7411_v50, %v1089_v47  ;;  %vm14992_vm14 = vcmp.le.f32.partialorder %v15399_v61, %v8415_v54  ;;  %v15401_v20 = vld [vmem:[#allocation50_spill] sm:$0xff]  ;;  %v15402_v4 = vld [vmem:[#allocation133_spill] sm:$0xff]  ;;  %v15404_v52 = vld [vmem:[#allocation100_spill] sm:$0xff] }
 0x1c6   :  { %15397 = vst [vmem:[#allocation89_spill] sm:$0xff] %v8670_v63  ;;  %15398 = vst [vmem:[#allocation115_spill] sm:$0xff] %v8675_v0  ;;  %vm14993_vm9 = vcmp.le.f32.partialorder %v15337_v49, %v15400_v56  ;;  %vm14957_vm12 = vcmp.le.f32.partialorder %v15401_v20, %v8456_v2  ;;  %vm14954_vm4 = vcmp.le.f32.partialorder %v15342_v62, %v15402_v4  ;;  %v15405_v1 = vld [vmem:[#allocation131_spill] sm:$0xff]  ;;  %v15408_v0 = vld [vmem:[#allocation82_spill] sm:$0xff] }
 0x1c7   :  { %v947_v58 = vmul.f32 %v7401_v15, %v15403_v19  ;;  %v944_v30 = vmul.f32 %v7401_v15, %v15404_v52  ;;  %v1136_v18 = vsel %vm896_vm3, %v1056_v25, %v1120_v26  ;;  %v1139_v47 = vsel %vm14953_vm10, %v1059_v32, %v1123_v33  ;;  %v1087_v25 = vpop.permute.xlu0 %1086  ;;  %v1093_v26 = vpop.permute.xlu1 %1092  ;;  %v15411_v33 = vld [vmem:[#allocation53_spill] sm:$0xff]  ;;  %v15418_v20 = vld [vmem:[#allocation84_spill] sm:$0xff]  ;;  %v15439_v8 = vld [vmem:[#allocation47_spill] sm:$0xff] }
 0x1c8   :  { %v1058_v60 = vmul.f32 %v7401_v15, %v15405_v1  ;;  %v1061_v27 = vmul.f32 %v7401_v15, %v15406_v31  ;;  %v1152_v19 = vsel %vm14993_vm9, %v15407_v9, %v1136_v18  ;;  %v1155_v52 = vsel %vm14954_vm4, %v15408_v0, %v1139_v47  ;;  %v15412_v18 = vld [vmem:[#allocation62_spill] sm:$0xff]  ;;  %v15414_v47 = vld [vmem:[#allocation103_spill] sm:$0xff]  ;;  %v15429_v62 = vld [vmem:[#allocation64_spill] sm:$0xff] }
 0x1c9   :  { %v8710_v32 = vsel %vm14992_vm14, %v944_v30, %v1152_v19  ;;  %v8715_v1 = vsel %vm14957_vm12, %v947_v58, %v1155_v52  ;;  %v1122_v31 = vmul.f32 %v7411_v50, %v1087_v25  ;;  %v1125_v9 = vmul.f32 %v7411_v50, %v1093_v26  ;;  %v15413_v0 = vld [vmem:[#allocation134_spill] sm:$0xff]  ;;  %v15415_v19 = vld [vmem:[#allocation104_spill] sm:$0xff]  ;;  %v15416_v25 = vld [vmem:[#allocation59_spill] sm:$0xff] }
 0x1ca   :  { %15409 = vst [vmem:[#allocation116_spill] sm:$0xff] %v8710_v32  ;;  %15410 = vst [vmem:[#allocation117_spill] sm:$0xff] %v8715_v1  ;;  %vm14991_vm10 = vcmp.ge.f32.partialorder %v15411_v33, 0.0  ;;  %vm14963_vm4 = vcmp.ge.f32.partialorder %v15412_v18, 0.0  ;;  %vm14965_vm5 = vcmp.le.f32.partialorder %v15346_v59, %v15413_v0  ;;  %v949_v30 = vmul.f32 %v7401_v15, %v15414_v47  ;;  %v15417_v26 = vld [vmem:[#allocation83_spill] sm:$0xff]  ;;  %v15428_v47 = vld [vmem:[#allocation85_spill] sm:$0xff] }
 0x1cb   :  { %v946_v4 = vmul.f32 %v7401_v15, %v15415_v19  ;;  %v1138_v58 = vsel %vm14991_vm10, %v1058_v60, %v1122_v31  ;;  %v1141_v52 = vsel %vm14963_vm4, %v1061_v27, %v1125_v9  ;;  %vm14990_vm12 = vcmp.le.f32.partialorder %v15416_v25, %v8506_v34  ;;  %v1091_v19 = vpop.permute.xlu0 %1090  ;;  %v1177_v1 = vpop.permute.xlu1 %1176  ;;  %v15422_v31 = vld [vmem:[#allocation54_spill] sm:$0xff]  ;;  %v15423_v9 = vld [vmem:[#allocation68_spill] sm:$0xff]  ;;  %v15430_v34 = vld [vmem:[#allocation63_spill] sm:$0xff] }
 0x1cc   :  { %v1154_v2 = vsel %vm14965_vm5, %v15417_v26, %v1138_v58  ;;  %v1157_v29 = vsel %vm14967_vm6, %v15418_v20, %v1141_v52  ;;  %v1060_v60 = vmul.f32 %v7401_v15, %v8403_v16  ;;  %vm15424_vm4 = vcmp.le.f32.partialorder %v15422_v31, %v15423_v9  ;;  %v15426_v26 = vld [vmem:[#allocation65_spill] sm:$0xff]  ;;  %v15427_v20 = vld [vmem:[#allocation107_spill] sm:$0xff]  ;;  %v15432_v9 = vld [vmem:[#allocation56_spill] sm:$0xff] }
 0x1cd   :  { %v8746_v27 = vsel %vm14990_vm12, %v946_v4, %v1154_v2  ;;  %v8751_v18 = vsel %vm15424_vm4, %v949_v30, %v1157_v29  ;;  %v1124_v58 = vmul.f32 %v7411_v50, %v1091_v19  ;;  %vm14989_vm5 = vcmp.ge.f32.partialorder %v15426_v26, 0.0  ;;  %v15433_v29 = vld [vmem:[#allocation69_spill] sm:$0xff]  ;;  %v15441_v63 = vld [vmem:[#allocation23_spill] sm:$0xff] }
 0x1ce   :  { %15421 = vst [vmem:[#allocation75_spill] sm:$0xff] %v8746_v27  ;;  %15425 = vst [vmem:[#allocation76_spill] sm:$0xff] %v8751_v18  ;;  %v948_v52 = vmul.f32 %v7401_v15, %v15427_v20  ;;  %vm15431_vm6 = vcmp.le.f32.partialorder %v15429_v62, %v15430_v34  ;;  %vm15434_vm4 = vcmp.le.f32.partialorder %v15432_v9, %v15433_v29 }
 0x1cf   :  { %v1140_v16 = vsel %vm14989_vm5, %v1060_v60, %v1124_v58  ;;  %v1175_v4 = vpop.permute.xlu0 %1174  ;;  %v1181_v25 = vpop.permute.xlu1 %1180  ;;  %v8778_v11 = vmul.f32 %v15353_v5, %v15360_v3  ;;  %v8788_v17 = vmul.f32 %v7411_v50, %v15353_v5  ;;  %v1207_v3 = vmul.f32 %v7411_v50, %v1177_v1 }
 0x1d0   :  { %v1156_v2 = vsel %vm15431_vm6, %v15428_v47, %v1140_v16  ;;  %vm1446_vm6 = vcmp.ge.f32.partialorder %v15439_v8, %v8494_v22  ;;  %vm15443_vm5 = vcmp.le.f32.partialorder %v7813_v44, %v8336_v53 }
 0x1d1   :  { %v8766_v30 = vsel %vm15434_vm4, %v948_v52, %v1156_v2  ;;  %15437 = vst [vmem:[#allocation118_spill] sm:$0xff] %v8778_v11  ;;  %15440 = vst [vmem:[#allocation77_spill] sm:$0xff] %v8788_v17  ;;  %vm1448_vm4 = vcmp.ge.f32.partialorder %v15441_v63, %v8543_v23  ;;  %v1206_v11 = vmul.f32 %v7411_v50, %v1175_v4  ;;  %v15456_v23 = vld [vmem:[#allocation22_spill] sm:$0xff] }
 0x1d2   :  { %15435 = vst [vmem:[#allocation90_spill] sm:$0xff] %v8766_v30 }
 0x1d3   :  { %v1179_v19 = vpop.permute.xlu0 %1178  ;;  %v1185_v18 = vpop.permute.xlu1 %1184 }
 0x1d7   :  { %v1183_v31 = vpop.permute.xlu0 %1182  ;;  %v1189_v0 = vpop.permute.xlu1 %1188 }
 0x1d8   :  { %v8803_v5 = vmul.f32 %v7411_v50, %v1189_v0 }
 0x1db   :  { %v1187_v20 = vpop.permute.xlu0 %1186  ;;  %v1193_v59 = vpop.permute.xlu1 %1192 }
 0x1dc   :  { %v8808_v1 = vmul.f32 %v7411_v50, %v1187_v20  ;;  %v8811_v4 = vmul.f32 %v7411_v50, %v1193_v59  ;;  %v15446_v20 = vld [vmem:[#allocation28_spill] sm:$0xff] }
 0x1dd   :  { %vm1450_vm10 = vcmp.ge.f32.partialorder %v15446_v20, %v8588_v55  ;;  %v15470_v55 = vld [vmem:[#allocation89_spill] sm:$0xff] }
 0x1df   :  { %v1191_v26 = vpop.permute.xlu0 %1190  ;;  %v1197_v60 = vpop.permute.xlu1 %1196 }
 0x1e0   :  { %v8823_v13 = vmul.f32 %v7411_v50, %v1197_v60 }
 0x1e3   :  { %v1195_v58 = vpop.permute.xlu0 %1194  ;;  %v1201_v33 = vpop.permute.xlu1 %1200 }
 0x1e4   :  { %v8833_v53 = vmul.f32 %v7411_v50, %v1195_v58  ;;  %v8836_v44 = vmul.f32 %v7411_v50, %v1201_v33 }
 0x1e7   :  { %v1199_v54 = vpop.permute.xlu0 %1198  ;;  %v1271_v34 = vpop.permute.xlu1 %1270 }
 0x1e8   :  { %v1318_v46 = vmul.f32 %v7411_v50, %v1271_v34  ;;  %v8799_v34 = vmul.f32 %v7411_v50, %v1185_v18 }
 0x1eb   :  { %v1203_v47 = vpop.permute.xlu0 %1202  ;;  %v1275_v16 = vpop.permute.xlu1 %1274 }
 0x1ef   :  { %v1273_v62 = vpop.permute.xlu0 %1272  ;;  %v1279_v61 = vpop.permute.xlu1 %1278 }
 0x1f3   :  { %v1277_v56 = vpop.permute.xlu0 %1276  ;;  %v1283_v29 = vpop.permute.xlu1 %1282 }
 0x1f4   :  { %v1321_v33 = vmul.f32 %v7411_v50, %v1277_v56  ;;  %v1324_v60 = vmul.f32 %v7411_v50, %v1283_v29  ;;  %v15448_v56 = vmov 0.0  }
 0x1f7   :  { %v1281_v52 = vpop.permute.xlu0 %1280  ;;  %v1287_v2 = vpop.permute.xlu1 %1286 }
 0x1f8   :  { %v1323_v35 = vmul.f32 %v7411_v50, %v1281_v52  ;;  %v1326_v29 = vmul.f32 %v7411_v50, %v1287_v2  ;;  %v15453_v52 = vld [vmem:[#allocation122_spill] sm:$0xff] }
 0x1fb   :  { %v1285_v9 = vpop.permute.xlu0 %1284  ;;  %v1291_v30 = vpop.permute.xlu1 %1290 }
 0x1ff   :  { %v8768_v49 = vpop.permute.xlu0 %1288  ;;  %v8770_v27 = vpop.permute.xlu1 %1294 }
 0x203   :  { %v8772_v38 = vpop.permute.xlu0 %1292  ;;  %v8774_v48 = vpop.permute.xlu1 %1298 }
 0x204   :  { %15436 = vst [vmem:[#allocation92_spill] sm:$0xff] %v8774_v48  ;;  %v1208_v48 = vmul.f32 %v7411_v50, %v1179_v19  ;;  %v15442_v19 = vld [vmem:[#allocation88_spill] sm:$0xff] }
 0x207   :  { %v8780_v32 = vpop.permute.xlu0 %1296  ;;  %v1335_v42 = vpop.permute.xlu1 %1334 }
 0x208   :  { %15438 = vst [vmem:[#allocation119_spill] sm:$0xff] %v8780_v32  ;;  %v1382_v24 = vmul.f32 %v7401_v15, %v1335_v42  ;;  %v8795_v32 = vmul.f32 %v7411_v50, %v1181_v25  ;;  %v1210_v42 = vmul.f32 %v7411_v50, %v1183_v31  ;;  %v8814_v25 = vmul.f32 %v7411_v50, %v1191_v26  ;;  %v15445_v26 = vld [vmem:[#allocation11_spill] sm:$0xff] }
 0x209   :  { %vm1447_vm12 = vcmp.ge.f32.partialorder %v15445_v26, %v8450_v45 }
 0x20a   :  { %v1398_v17 = vsel %vm886_vm11, %v1318_v46, %v1382_v24  ;;  %v1320_v46 = vmul.f32 %v7411_v50, %v1275_v16  ;;  %vm15444_vm11 = vcmp.le.f32.partialorder %v7835_v57, %v8368_v28  ;;  %v8845_v57 = vmul.f32 %v7411_v50, %v1203_v47  ;;  %v15447_v16 = vld [vmem:[#allocation91_spill] sm:$0xff] }
 0x20b   :  { %v1414_v18 = vsel %vm15443_vm5, %v15442_v19, %v1398_v17  ;;  %v8820_v31 = vpop.permute.xlu0 %1300  ;;  %v1339_v0 = vpop.permute.xlu1 %1338  ;;  %v8839_v17 = vmul.f32 %v7411_v50, %v1199_v54  ;;  %v1319_v28 = vmul.f32 %v7411_v50, %v1273_v62 }
 0x20c   :  { %v1430_v59 = vsel %vm15444_vm11, %v1206_v11, %v1414_v18  ;;  %v1384_v24 = vmul.f32 %v7401_v15, %v1339_v0  ;;  %v1322_v11 = vmul.f32 %v7411_v50, %v1279_v61  ;;  %v8876_v18 = vmul.f32 %v7411_v50, %v1285_v9  ;;  %v15451_v0 = vld [vmem:[#allocation94_spill] sm:$0xff] }
 0x20d   :  { %vm1462_vm5 = vcmp.ge.f32.partialorder %v15439_v8, %v1430_v59 }
 0x20e   :  { %vm1478_vm11 = vmand %vm1446_vm6, %vm1462_vm5  ;;  %v1400_v54 = vsel %vm888_vm13, %v1320_v46, %v1384_v24  ;;  %v15452_v46 = vld [vmem:[#allocation17_spill] sm:$0xff]  ;;  %vm1449_vm6 = vcmp.ge.f32.partialorder %v15456_v23, %v8499_v37  ;;  %v15494_v37 = vld [vmem:[#allocation124_spill] sm:$0xff] }
 0x20f   :  { %v1494_v58 = vsel %vm1478_vm11, %v15439_v8, 0.0  ;;  %v1416_v62 = vsel %vm856_vm15, %v15447_v16, %v1400_v54  ;;  %v1337_v47 = vpop.permute.xlu0 %1336  ;;  %v1343_v61 = vpop.permute.xlu1 %1342  ;;  %vm15455_vm15 = vcmp.ge.f32.partialorder %v15340_v40, 0.0  ;;  %vm15457_vm11 = vcmp.le.f32.partialorder %v7571_v12, %v8354_v6  ;;  %v15462_v54 = vld [vmem:[#allocation136_spill] sm:$0xff] }
 0x210   :  { %vm1510_vm14 = vcmp.gt.f32.partialorder %v1494_v58, 150.0  ;;  %vm1558_vm9 = vcmp.gt.f32.partialorder %v1494_v58, 50.0  ;;  %v1432_v7 = vsel %vm824_vm2, %v1208_v48, %v1416_v62  ;;  %v1383_v22 = vmul.f32 %v7401_v15, %v1337_v47  ;;  %v15465_v62 = vld [vmem:[#allocation20_spill] sm:$0xff]  ;;  %v15467_v47 = vld [vmem:[#allocation113_spill] sm:$0xff] }
 0x211   :  { %v8866_v19 = vsel %vm1510_vm14, 1.0, %v15448_v56   ;;  %v8869_v8 = vsel %vm1558_vm9, 1.0, %v15448_v56  ;;  %vm1464_vm13 = vcmp.ge.f32.partialorder %v15441_v63, %v1432_v7  ;;  %v1386_v39 = vmul.f32 %v7401_v15, %v1343_v61  ;;  %v15468_v61 = vld [vmem:[#allocation27_spill] sm:$0xff] }
 0x212   :  { %15449 = vst [vmem:[#allocation78_spill] sm:$0xff] %v8869_v8  ;;  %vm1480_vm2 = vmand %vm1448_vm4, %vm1464_vm13  ;;  %vm15450_vm14 = vcmp.ge.f32.partialorder %v7640_v14, 0.0  ;;  %v8884_v48 = vmul.f32 %v7411_v50, %v1291_v30  ;;  %vm15454_vm9 = vcmp.le.f32.partialorder %v15452_v46, %v15453_v52  ;;  %vm15459_vm13 = vcmp.le.f32.partialorder %v7715_v43, %v8326_v21 }
 0x213   :  { %v1399_v51 = vsel %vm15450_vm14, %v1319_v28, %v1383_v22  ;;  %v1496_v36 = vsel %vm1480_vm2, %v15441_v63, 0.0  ;;  %v1402_v9 = vsel %vm15455_vm15, %v1322_v11, %v1386_v39  ;;  %v1341_v59 = vpop.permute.xlu0 %1340  ;;  %v1347_v24 = vpop.permute.xlu1 %1346  ;;  %v15458_v63 = vld [vmem:[#allocation95_spill] sm:$0xff]  ;;  %v15460_v28 = vld [vmem:[#allocation36_spill] sm:$0xff]  ;;  %v8916_v6 = vmul.f32 %v7411_v50, %v8768_v49  ;;  %v15471_v22 = vld [vmem:[#allocation42_spill] sm:$0xff] }
 0x214   :  { %v1415_v2 = vsel %vm15454_vm9, %v15451_v0, %v1399_v51  ;;  %vm1512_vm4 = vcmp.gt.f32.partialorder %v1496_v36, 150.0  ;;  %vm1560_vm5 = vcmp.gt.f32.partialorder %v1496_v36, 50.0  ;;  %v1418_v30 = vsel %vm15459_vm13, %v15458_v63, %v1402_v9  ;;  %v15464_v49 = vld [vmem:[#allocation92_spill] sm:$0xff]  ;;  %v15473_v51 = vld [vmem:[#allocation19_spill] sm:$0xff] }
 0x215   :  { %v1431_v14 = vsel %vm15457_vm11, %v1207_v3, %v1415_v2  ;;  %vm1452_vm2 = vcmp.ge.f32.partialorder %v15460_v28, %v8630_v10  ;;  %v8905_v40 = vsel %vm1512_vm4, 1.0, %v15448_v56   ;;  %v8908_v11 = vsel %vm1560_vm5, 1.0, %v15448_v56  ;;  %v15474_v36 = vld [vmem:[#allocation123_spill] sm:$0xff]  ;;  %v15477_v2 = vld [vmem:[#allocation12_spill] sm:$0xff] }
 0x216   :  { %15461 = vst [vmem:[#allocation93_spill] sm:$0xff] %v8908_v11  ;;  %vm1463_vm14 = vcmp.ge.f32.partialorder %v15445_v26, %v1431_v14  ;;  %vm15463_vm9 = vcmp.le.f32.partialorder %v7580_v41, %v15462_v54  ;;  %v1385_v43 = vmul.f32 %v7401_v15, %v1341_v59  ;;  %v1388_v21 = vmul.f32 %v7401_v15, %v1347_v24  ;;  %v15478_v9 = vld [vmem:[#allocation135_spill] sm:$0xff]  ;;  %v15480_v24 = vld [vmem:[#allocation98_spill] sm:$0xff]  ;;  %v15501_v63 = vld [vmem:[#allocation116_spill] sm:$0xff] }
 0x217   :  { %v1434_v12 = vsel %vm15463_vm9, %v1210_v42, %v1418_v30  ;;  %vm1479_vm15 = vmand %vm1447_vm12, %vm1463_vm14  ;;  %v8926_v3 = vmul.f32 %v7411_v50, %v8770_v27  ;;  %v8930_v41 = vmul.f32 %v7411_v50, %v8772_v38  ;;  %v8934_v42 = vmul.f32 %v7411_v50, %v15464_v49  ;;  %v1345_v58 = vpop.permute.xlu0 %1344  ;;  %v1351_v16 = vpop.permute.xlu1 %1350 }
 0x218   :  { %vm1466_vm4 = vcmp.ge.f32.partialorder %v15446_v20, %v1434_v12  ;;  %v1495_v45 = vsel %vm1479_vm15, %v15445_v26, 0.0  ;;  %vm15466_vm13 = vcmp.ge.f32.partialorder %v15465_v62, 0.0  ;;  %vm1451_vm14 = vcmp.ge.f32.partialorder %v15468_v61, %v15467_v47  ;;  %v15487_v62 = vld [vmem:[#allocation138_spill] sm:$0xff] }
 0x219   :  { %vm1482_vm12 = vmand %vm1450_vm10, %vm1466_vm4  ;;  %vm1511_vm5 = vcmp.gt.f32.partialorder %v1495_v45, 150.0  ;;  %vm1559_vm11 = vcmp.gt.f32.partialorder %v1495_v45, 50.0  ;;  %v1401_v38 = vsel %vm15466_vm13, %v1321_v33, %v1385_v43  ;;  %vm1454_vm15 = vcmp.ge.f32.partialorder %v15471_v22, %v15470_v55  ;;  %v15472_v33 = vld [vmem:[#allocation97_spill] sm:$0xff]  ;;  %v15483_v45 = vld [vmem:[#allocation72_spill] sm:$0xff] }
 0x21a   :  { %v1498_v27 = vsel %vm1482_vm12, %v15446_v20, 0.0  ;;  %v8946_v7 = vsel %vm1511_vm5, 1.0, %v15448_v56   ;;  %v8949_v26 = vsel %vm1559_vm11, 1.0, %v15448_v56  ;;  %vm15475_vm4 = vcmp.le.f32.partialorder %v15473_v51, %v15474_v36  ;;  %v15514_v51 = vld [vmem:[#allocation29_spill] sm:$0xff]  ;;  %v15520_v47 = vld [vmem:[#allocation14_spill] sm:$0xff] }
 0x21b   :  { %15469 = vst [vmem:[#allocation96_spill] sm:$0xff] %v8949_v26  ;;  %vm1514_vm9 = vcmp.gt.f32.partialorder %v1498_v27, 150.0  ;;  %vm1562_vm10 = vcmp.gt.f32.partialorder %v1498_v27, 50.0  ;;  %v1417_v0 = vsel %vm15475_vm4, %v15472_v33, %v1401_v38  ;;  %v1404_v52 = vsel %vm892_vm0, %v1324_v60, %v1388_v21  ;;  %v1349_v43 = vpop.permute.xlu0 %1348  ;;  %v1355_v49 = vpop.permute.xlu1 %1354  ;;  %v15484_v27 = vld [vmem:[#allocation33_spill] sm:$0xff]  ;;  %v15485_v60 = vld [vmem:[#allocation119_spill] sm:$0xff] }
 0x21c   :  { %v8954_v39 = vsel %vm1514_vm9, 1.0, %v15448_v56   ;;  %v8957_v20 = vsel %vm1562_vm10, 1.0, %v15448_v56  ;;  %vm15479_vm12 = vcmp.le.f32.partialorder %v15477_v2, %v15478_v9  ;;  %v1420_v30 = vsel %vm860_vm8, %v15480_v24, %v1404_v52  ;;  %v15493_v52 = vld [vmem:[#allocation24_spill] sm:$0xff]  ;;  %v15496_v9 = vld [vmem:[#allocation102_spill] sm:$0xff] }
 0x21d   :  { %v1433_v59 = vsel %vm15479_vm12, %v8795_v32, %v1417_v0  ;;  %v1387_v54 = vmul.f32 %v7401_v15, %v1345_v58  ;;  %v1390_v12 = vmul.f32 %v7401_v15, %v1351_v16  ;;  %vm1453_vm5 = vcmp.ge.f32.partialorder %v15484_v27, %v15483_v45  ;;  %v15486_v32 = vld [vmem:[#allocation15_spill] sm:$0xff]  ;;  %v15489_v16 = vld [vmem:[#allocation25_spill] sm:$0xff]  ;;  %v15534_v45 = vld [vmem:[#allocation38_spill] sm:$0xff] }
 0x21e   :  { %v8979_v21 = vmul.f32 %v7411_v50, %v15485_v60  ;;  %vm1465_vm0 = vcmp.ge.f32.partialorder %v15456_v23, %v1433_v59  ;;  %vm15488_vm11 = vcmp.le.f32.partialorder %v15486_v32, %v15487_v62  ;;  %v1389_v58 = vmul.f32 %v7401_v15, %v1349_v43  ;;  %v15509_v62 = vld [vmem:[#allocation140_spill] sm:$0xff]  ;;  %v15521_v59 = vld [vmem:[#allocation137_spill] sm:$0xff] }
 0x21f   :  { %v1436_v38 = vsel %vm15488_vm11, %v8808_v1, %v1420_v30  ;;  %vm1481_vm8 = vmand %vm1449_vm6, %vm1465_vm0  ;;  %vm15490_vm9 = vcmp.ge.f32.partialorder %v15489_v16, 0.0  ;;  %v1406_v36 = vsel %vm894_vm7, %v1326_v29, %v1390_v12  ;;  %v1392_v0 = vmul.f32 %v7401_v15, %v1355_v49  ;;  %v15492_v1 = vld [vmem:[#allocation101_spill] sm:$0xff]  ;;  %v15499_v29 = vld [vmem:[#allocation30_spill] sm:$0xff]  ;;  %v1353_v43 = vpop.permute.xlu0 %1352 }
 0x220   :  { %vm1468_vm13 = vcmp.ge.f32.partialorder %v15460_v28, %v1436_v38  ;;  %v1403_v33 = vsel %vm15490_vm9, %v1323_v35, %v1387_v54  ;;  %v1497_v46 = vsel %vm1481_vm8, %v15456_v23, 0.0  ;;  %vm15495_vm6 = vcmp.le.f32.partialorder %v15493_v52, %v15494_v37  ;;  %v15502_v23 = vld [vmem:[#allocation57_spill] sm:$0xff]  ;;  %v15504_v54 = vld [vmem:[#allocation18_spill] sm:$0xff]  ;;  %v15518_v37 = vld [vmem:[#allocation75_spill] sm:$0xff] }
 0x221   :  { %vm1484_vm10 = vmand %vm1452_vm2, %vm1468_vm13  ;;  %v1419_v2 = vsel %vm15495_vm6, %v15492_v1, %v1403_v33  ;;  %v1422_v35 = vsel %vm862_vm1, %v15496_v9, %v1406_v36  ;;  %vm15500_vm7 = vcmp.ge.f32.partialorder %v15499_v29, 0.0  ;;  %vm1456_vm4 = vcmp.ge.f32.partialorder %v15502_v23, %v15501_v63  ;;  %v15503_v30 = vld [vmem:[#allocation13_spill] sm:$0xff]  ;;  %v15547_v63 = vld [vmem:[#allocation58_spill] sm:$0xff] }
 0x222   :  { %v1405_v14 = vsel %vm15500_vm7, %v8876_v18, %v1389_v58  ;;  %vm1513_vm12 = vcmp.gt.f32.partialorder %v1497_v46, 150.0  ;;  %vm1561_vm0 = vcmp.gt.f32.partialorder %v1497_v46, 50.0  ;;  %v1500_v10 = vsel %vm1484_vm10, %v15460_v28, 0.0  ;;  %v1359_v18 = vpop.permute.xlu1 %1358  ;;  %v15511_v58 = vld [vmem:[#allocation86_spill] sm:$0xff]  ;;  %v15512_v16 = vld [vmem:[#allocation41_spill] sm:$0xff] }
 0x223   :  { %vm15505_vm2 = vcmp.le.f32.partialorder %v15503_v30, %v15504_v54  ;;  %v9019_v49 = vsel %vm1513_vm12, 1.0, %v15448_v56   ;;  %v9022_v60 = vsel %vm1561_vm0, 1.0, %v15448_v56  ;;  %vm1516_vm1 = vcmp.gt.f32.partialorder %v1500_v10, 150.0  ;;  %v15513_v33 = vld [vmem:[#allocation105_spill] sm:$0xff] }
 0x224   :  { %v1435_v12 = vsel %vm15505_vm2, %v8799_v34, %v1419_v2  ;;  %15506 = vst [vmem:[#allocation120_spill] sm:$0xff] %v9022_v60  ;;  %vm1564_vm11 = vcmp.gt.f32.partialorder %v1500_v10, 50.0  ;;  %v9025_v32 = vsel %vm1516_vm1, 1.0, %v15448_v56   ;;  %v15508_v34 = vld [vmem:[#allocation16_spill] sm:$0xff]  ;;  %vm1455_vm9 = vcmp.ge.f32.partialorder %v15512_v16, %v15511_v58  ;;  %v15515_v36 = vld [vmem:[#allocation125_spill] sm:$0xff]  ;;  %v15519_v2 = vld [vmem:[#allocation66_spill] sm:$0xff]  ;;  %v1357_v10 = vpop.permute.xlu0 %1356 }
 0x225   :  { %v9028_v28 = vsel %vm1564_vm11, 1.0, %v15448_v56  ;;  %vm1467_vm8 = vcmp.ge.f32.partialorder %v15468_v61, %v1435_v12  ;;  %vm15510_vm13 = vcmp.le.f32.partialorder %v15508_v34, %v15509_v62  ;;  %vm15516_vm7 = vcmp.le.f32.partialorder %v15514_v51, %v15515_v36  ;;  %v15524_v29 = vld [vmem:[#allocation49_spill] sm:$0xff]  ;;  %v15529_v12 = vld [vmem:[#allocation46_spill] sm:$0xff]  ;;  %v15532_v34 = vld [vmem:[#allocation115_spill] sm:$0xff] }
 0x226   :  { %15507 = vst [vmem:[#allocation121_spill] sm:$0xff] %v9028_v28  ;;  %v1438_v38 = vsel %vm15510_vm13, %v8814_v25, %v1422_v35  ;;  %vm1483_vm10 = vmand %vm1451_vm14, %vm1467_vm8  ;;  %v1421_v46 = vsel %vm15516_vm7, %v15513_v33, %v1405_v14  ;;  %v1408_v52 = vsel %vm896_vm3, %v8884_v48, %v1392_v0  ;;  %v1391_v25 = vmul.f32 %v7401_v15, %v1353_v43  ;;  %v15523_v35 = vld [vmem:[#allocation106_spill] sm:$0xff]  ;;  %v15530_v43 = vld [vmem:[#allocation21_spill] sm:$0xff] }
 0x227   :  { %vm1470_vm6 = vcmp.ge.f32.partialorder %v15471_v22, %v1438_v38  ;;  %vm1458_vm12 = vcmp.ge.f32.partialorder %v15519_v2, %v15518_v37  ;;  %v1499_v9 = vsel %vm1483_vm10, %v15468_v61, 0.0  ;;  %vm15522_vm0 = vcmp.le.f32.partialorder %v15520_v47, %v15521_v59  ;;  %v15525_v14 = vld [vmem:[#allocation130_spill] sm:$0xff]  ;;  %v15533_v62 = vld [vmem:[#allocation48_spill] sm:$0xff]  ;;  %v15538_v36 = vld [vmem:[#allocation37_spill] sm:$0xff] }
 0x228   :  { %vm1486_vm14 = vmand %vm1454_vm15, %vm1470_vm6  ;;  %v1437_v24 = vsel %vm15522_vm0, %v8803_v5, %v1421_v46  ;;  %vm15526_vm3 = vcmp.le.f32.partialorder %v15524_v29, %v15525_v14  ;;  %v1394_v0 = vmul.f32 %v7401_v15, %v1359_v18  ;;  %vm1515_vm2 = vcmp.gt.f32.partialorder %v1499_v9, 150.0  ;;  %v1361_v33 = vpop.permute.xlu0 %1360  ;;  %v15539_v46 = vld [vmem:[#allocation127_spill] sm:$0xff]  ;;  %v15543_v47 = vld [vmem:[#allocation34_spill] sm:$0xff] }
 0x229   :  { %v1424_v48 = vsel %vm15526_vm3, %v15523_v35, %v1408_v52  ;;  %vm1563_vm1 = vcmp.gt.f32.partialorder %v1499_v9, 50.0  ;;  %v1502_v61 = vsel %vm1486_vm14, %v15471_v22, 0.0  ;;  %vm1469_vm11 = vcmp.ge.f32.partialorder %v15484_v27, %v1437_v24  ;;  %v15541_v52 = vld [vmem:[#allocation53_spill] sm:$0xff]  ;;  %v15544_v59 = vld [vmem:[#allocation139_spill] sm:$0xff]  ;;  %v15548_v29 = vld [vmem:[#allocation134_spill] sm:$0xff] }
 0x22a   :  { %v9067_v55 = vsel %vm1515_vm2, 1.0, %v15448_v56   ;;  %v9070_v30 = vsel %vm1563_vm1, 1.0, %v15448_v56  ;;  %vm1518_vm15 = vcmp.gt.f32.partialorder %v1502_v61, 150.0  ;;  %vm1566_vm8 = vcmp.gt.f32.partialorder %v1502_v61, 50.0  ;;  %vm1485_vm13 = vmand %vm1453_vm5, %vm1469_vm11  ;;  %v15546_v35 = vld [vmem:[#allocation109_spill] sm:$0xff]  ;;  %v15550_v61 = vld [vmem:[#allocation90_spill] sm:$0xff] }
 0x22b   :  { %15527 = vst [vmem:[#allocation79_spill] sm:$0xff] %v9070_v30  ;;  %v9076_v5 = vsel %vm1518_vm15, 1.0, %v15448_v56   ;;  %v9079_v54 = vsel %vm1566_vm8, 1.0, %v15448_v56  ;;  %v1501_v22 = vsel %vm1485_vm13, %v15484_v27, 0.0  ;;  %vm15531_vm10 = vcmp.le.f32.partialorder %v15529_v12, %v15530_v43  ;;  %v15556_v12 = vld [vmem:[#allocation55_spill] sm:$0xff] }
 0x22c   :  { %15528 = vst [vmem:[#allocation80_spill] sm:$0xff] %v9079_v54  ;;  %v1440_v18 = vsel %vm15531_vm10, %v8833_v53, %v1424_v48  ;;  %vm1457_vm6 = vcmp.ge.f32.partialorder %v15533_v62, %v15532_v34  ;;  %vm1517_vm7 = vcmp.gt.f32.partialorder %v1501_v22, 150.0  ;;  %vm1565_vm14 = vcmp.gt.f32.partialorder %v1501_v22, 50.0  ;;  %v15537_v53 = vld [vmem:[#allocation108_spill] sm:$0xff]  ;;  %v15551_v22 = vld [vmem:[#allocation70_spill] sm:$0xff]  ;;  %v1365_v37 = vpop.permute.xlu0 %1364 }
 0x22d   :  { %vm1472_vm5 = vcmp.ge.f32.partialorder %v15502_v23, %v1440_v18  ;;  %vm15535_vm0 = vcmp.ge.f32.partialorder %v15534_v45, 0.0  ;;  %v9093_v51 = vsel %vm1517_vm7, 1.0, %v15448_v56   ;;  %v9096_v27 = vsel %vm1565_vm14, 1.0, %v15448_v56  ;;  %v15557_v18 = vld [vmem:[#allocation44_spill] sm:$0xff] }
 0x22e   :  { %v1407_v38 = vsel %vm15535_vm0, %v8916_v6, %v1391_v25  ;;  %15536 = vst [vmem:[#allocation99_spill] sm:$0xff] %v9096_v27  ;;  %vm1488_vm3 = vmand %vm1456_vm4, %vm1472_vm5  ;;  %vm15540_vm2 = vcmp.le.f32.partialorder %v15538_v36, %v15539_v46  ;;  %vm15542_vm1 = vcmp.ge.f32.partialorder %v15541_v52, 0.0  ;;  %v1363_v25 = vpop.permute.xlu1 %1362  ;;  %vm15545_vm11 = vcmp.le.f32.partialorder %v15543_v47, %v15544_v59  ;;  %v15561_v36 = vld [vmem:[#allocation129_spill] sm:$0xff]  ;;  %v15581_v34 = vld [vmem:[#allocation112_spill] sm:$0xff] }
 0x22f   :  { %v1423_v1 = vsel %vm15540_vm2, %v15537_v53, %v1407_v38  ;;  %v1410_v6 = vsel %vm15542_vm1, %v8926_v3, %v1394_v0  ;;  %v1504_v9 = vsel %vm1488_vm3, %v15502_v23, 0.0  ;;  %vm15549_vm4 = vcmp.le.f32.partialorder %v15547_v63, %v15548_v29  ;;  %v15552_v3 = vld [vmem:[#allocation59_spill] sm:$0xff]  ;;  %v15553_v23 = vld [vmem:[#allocation26_spill] sm:$0xff]  ;;  %v15572_v29 = vld [vmem:[#allocation64_spill] sm:$0xff] }
 0x230   :  { %v1439_v24 = vsel %vm15545_vm11, %v8811_v4, %v1423_v1  ;;  %v1426_v14 = vsel %vm15549_vm4, %v15546_v35, %v1410_v6  ;;  %v1393_v48 = vmul.f32 %v7401_v15, %v1357_v10  ;;  %vm1460_vm15 = vcmp.ge.f32.partialorder %v15551_v22, %v15550_v61  ;;  %v15555_v4 = vld [vmem:[#allocation117_spill] sm:$0xff]  ;;  %v15559_v38 = vld [vmem:[#allocation110_spill] sm:$0xff]  ;;  %v15560_v53 = vld [vmem:[#allocation43_spill] sm:$0xff] }
 0x231   :  { %vm1520_vm8 = vcmp.gt.f32.partialorder %v1504_v9, 150.0  ;;  %vm1568_vm13 = vcmp.gt.f32.partialorder %v1504_v9, 50.0  ;;  %vm1471_vm10 = vcmp.ge.f32.partialorder %v15512_v16, %v1439_v24  ;;  %vm15554_vm7 = vcmp.le.f32.partialorder %v15552_v3, %v15553_v23  ;;  %v15570_v24 = vld [vmem:[#allocation77_spill] sm:$0xff]  ;;  %v15571_v63 = vld [vmem:[#allocation111_spill] sm:$0xff]  ;;  %v15575_v3 = vld [vmem:[#allocation52_spill] sm:$0xff] }
 0x232   :  { %v1442_v0 = vsel %vm15554_vm7, %v8839_v17, %v1426_v14  ;;  %vm1459_vm14 = vcmp.ge.f32.partialorder %v15556_v12, %v15555_v4  ;;  %v9128_v43 = vsel %vm1520_vm8, 1.0, %v15448_v56   ;;  %v9131_v10 = vsel %vm1568_vm13, 1.0, %v15448_v56  ;;  %vm1487_vm5 = vmand %vm1455_vm9, %vm1471_vm10  ;;  %v15573_v14 = vld [vmem:[#allocation63_spill] sm:$0xff]  ;;  %v15599_v4 = vld [vmem:[#allocation76_spill] sm:$0xff] }
 0x233   :  { %vm1474_vm0 = vcmp.ge.f32.partialorder %v15519_v2, %v1442_v0  ;;  %vm15558_vm3 = vcmp.ge.f32.partialorder %v15557_v18, 0.0  ;;  %v1503_v17 = vsel %vm1487_vm5, %v15512_v16, 0.0  ;;  %vm15562_vm1 = vcmp.le.f32.partialorder %v15560_v53, %v15561_v36  ;;  %v15564_v16 = vld [vmem:[#allocation141_spill] sm:$0xff]  ;;  %v15577_v0 = vld [vmem:[#allocation87_spill] sm:$0xff] }
 0x234   :  { %v1409_v45 = vsel %vm15558_vm3, %v8930_v41, %v1393_v48  ;;  %vm1490_vm2 = vmand %vm1458_vm12, %vm1474_vm0  ;;  %v1396_v58 = vmul.f32 %v7401_v15, %v1363_v25  ;;  %v1395_v1 = vmul.f32 %v7401_v15, %v1361_v33  ;;  %vm1519_vm9 = vcmp.gt.f32.partialorder %v1503_v17, 150.0  ;;  %v15563_v41 = vld [vmem:[#allocation35_spill] sm:$0xff]  ;;  %v1205_v25 = vpop.permute.xlu1 %1204  ;;  %v15583_v53 = vld [vmem:[#allocation133_spill] sm:$0xff] }
 0x235   :  { %v1425_v46 = vsel %vm15562_vm1, %v15559_v38, %v1409_v45  ;;  %vm1567_vm11 = vcmp.gt.f32.partialorder %v1503_v17, 50.0  ;;  %v1506_v52 = vsel %vm1490_vm2, %v15519_v2, 0.0  ;;  %vm15565_vm4 = vcmp.le.f32.partialorder %v15563_v41, %v15564_v16  ;;  %v15568_v2 = vld [vmem:[#allocation65_spill] sm:$0xff]  ;;  %v15578_v45 = vld [vmem:[#allocation56_spill] sm:$0xff]  ;;  %v15582_v38 = vld [vmem:[#allocation51_spill] sm:$0xff] }
 0x236   :  { %v1441_v6 = vsel %vm15565_vm4, %v8823_v13, %v1425_v46  ;;  %v6370_v9 = vsel %vm1519_vm9, 1.0, %v15448_v56   ;;  %v9157_v47 = vsel %vm1567_vm11, 1.0, %v15448_v56  ;;  %vm1522_vm12 = vcmp.gt.f32.partialorder %v1506_v52, 150.0 }
 0x237   :  { %15566 = vst [vmem:[#allocation100_spill] sm:$0xff] %v9157_v47  ;;  %vm1570_vm8 = vcmp.gt.f32.partialorder %v1506_v52, 50.0  ;;  %v6373_v33 = vsel %vm1522_vm12, 1.0, %v15448_v56   ;;  %vm1473_vm13 = vcmp.ge.f32.partialorder %v15533_v62, %v1441_v6  ;;  %vm15569_vm10 = vcmp.ge.f32.partialorder %v15568_v2, 0.0  ;;  %v15589_v52 = vld [vmem:[#allocation62_spill] sm:$0xff]  ;;  %v15592_v6 = vld [vmem:[#allocation60_spill] sm:$0xff] }
 0x238   :  { %v9161_v59 = vsel %vm1570_vm8, 1.0, %v15448_v56  ;;  %v1412_v13 = vsel %vm15569_vm10, %v8934_v42, %v1396_v58  ;;  %v1333_v35 = vmul.f32 %v15570_v24, %v8820_v31  ;;  %vm1489_vm7 = vmand %vm1457_vm6, %vm1473_vm13  ;;  %vm15574_vm5 = vcmp.le.f32.partialorder %v15572_v29, %v15573_v14  ;;  %v15579_v31 = vld [vmem:[#allocation69_spill] sm:$0xff]  ;;  %v15586_v58 = vld [vmem:[#allocation71_spill] sm:$0xff] }
 0x239   :  { %15567 = vst [vmem:[#allocation131_spill] sm:$0xff] %v9161_v59  ;;  %v1428_v48 = vsel %vm15574_vm5, %v15571_v63, %v1412_v13  ;;  %vm15576_vm0 = vcmp.ge.f32.partialorder %v15575_v3, 0.0  ;;  %v1397_v18 = vmul.f32 %v1365_v37, %v15577_v0  ;;  %v1505_v42 = vsel %vm1489_vm7, %v15533_v62, 0.0  ;;  %v15593_v37 = vld [vmem:[#allocation61_spill] sm:$0xff]  ;;  %v15595_v2 = vld [vmem:[#allocation54_spill] sm:$0xff]  ;;  %v15596_v13 = vld [vmem:[#allocation68_spill] sm:$0xff] }
 0x23a   :  { %v1411_v23 = vsel %vm15576_vm0, %v8979_v21, %v1395_v1  ;;  %vm15580_vm3 = vcmp.le.f32.partialorder %v15578_v45, %v15579_v31  ;;  %vm15584_vm6 = vcmp.le.f32.partialorder %v15582_v38, %v15583_v53  ;;  %v1221_v46 = vmul.f32 %v7411_v50, %v1205_v25  ;;  %v15585_v21 = vld [vmem:[#allocation50_spill] sm:$0xff]  ;;  %v15600_v63 = vld [vmem:[#allocation67_spill] sm:$0xff] }
 0x23b   :  { %v1444_v17 = vsel %vm15580_vm3, %v8845_v57, %v1428_v48  ;;  %v1427_v36 = vsel %vm15584_vm6, %v15581_v34, %v1411_v23  ;;  %vm1521_vm2 = vcmp.gt.f32.partialorder %v1505_v42, 150.0  ;;  %vm1569_vm1 = vcmp.gt.f32.partialorder %v1505_v42, 50.0 }
 0x23c   :  { %vm1476_vm9 = vcmp.ge.f32.partialorder %v15551_v22, %v1444_v17  ;;  %vm15587_vm11 = vcmp.le.f32.partialorder %v15585_v21, %v15586_v58  ;;  %v6372_v1 = vsel %vm1521_vm2, 1.0, %v15448_v56   ;;  %v9197_v57 = vsel %vm1569_vm1, 1.0, %v15448_v56 }
 0x23d   :  { %v1443_v62 = vsel %vm15587_vm11, %v8836_v44, %v1427_v36  ;;  %15588 = vst [vmem:[#allocation132_spill] sm:$0xff] %v9197_v57  ;;  %vm1492_vm4 = vmand %vm1460_vm15, %vm1476_vm9  ;;  %vm15590_vm8 = vcmp.ge.f32.partialorder %v15589_v52, 0.0  ;;  %v15591_v44 = vld [vmem:[#allocation118_spill] sm:$0xff]  ;;  %vm15594_vm10 = vcmp.le.f32.partialorder %v15592_v6, %v15593_v37  ;;  %vm15597_vm15 = vcmp.le.f32.partialorder %v15595_v2, %v15596_v13 }
 0x23e   :  { %vm1475_vm12 = vcmp.ge.f32.partialorder %v15556_v12, %v1443_v62  ;;  %v1413_v41 = vsel %vm15590_vm8, %v1333_v35, %v1397_v18  ;;  %v1508_v16 = vsel %vm1492_vm4, %v15551_v22, 0.0  ;;  %vm1461_vm3 = vcmp.ge.f32.partialorder %v15600_v63, %v15599_v4 }
 0x23f   :  { %vm1491_vm13 = vmand %vm1459_vm14, %vm1475_vm12  ;;  %v1429_v25 = vsel %vm15594_vm10, %v15591_v44, %v1413_v41  ;;  %vm1524_vm7 = vcmp.gt.f32.partialorder %v1508_v16, 150.0  ;;  %vm1572_vm5 = vcmp.gt.f32.partialorder %v1508_v16, 50.0 }
 0x240   :  { %v1507_v61 = vsel %vm1491_vm13, %v15556_v12, 0.0  ;;  %v1445_v24 = vsel %vm15597_vm15, %v1221_v46, %v1429_v25  ;;  %v6375_v35 = vsel %vm1524_vm7, 1.0, %v15448_v56   ;;  %v9219_v22 = vsel %vm1572_vm5, 1.0, %v15448_v56 }
 0x241   :  { %15598 = vst [vmem:[#allocation81_spill] sm:$0xff] %v9219_v22  ;;  %vm1523_vm0 = vcmp.gt.f32.partialorder %v1507_v61, 150.0  ;;  %vm1571_vm14 = vcmp.gt.f32.partialorder %v1507_v61, 50.0  ;;  %vm1477_vm6 = vcmp.ge.f32.partialorder %v15600_v63, %v1445_v24 }
 0x242   :  { %v6374_v29 = vsel %vm1523_vm0, 1.0, %v15448_v56   ;;  %v9225_v14 = vsel %vm1571_vm14, 1.0, %v15448_v56  ;;  %vm1493_vm2 = vmand %vm1461_vm3, %vm1477_vm6 }
 0x243   :  { %15601 = vst [vmem:[#allocation82_spill] sm:$0xff] %v9225_v14  ;;  %v1509_v12 = vsel %vm1493_vm2, %v15600_v63, 0.0 }
 0x244   :  { %vm1525_vm1 = vcmp.gt.f32.partialorder %v1509_v12, 150.0  ;;  %vm1573_vm9 = vcmp.gt.f32.partialorder %v1509_v12, 50.0 }
 0x245   :  { %v6376_v48 = vsel %vm1525_vm1, 1.0, %v15448_v56   ;;  %v9231_v3 = vsel %vm1573_vm9, 1.0, %v15448_v56 }
 0x246   :  { %15602 = vst [vmem:[#allocation103_spill] sm:$0xff] %v9231_v3 }
 0x247 LB: > { %v15603_v27 = vld [vmem:[#allocation99_spill] sm:$0xff]  ;;  %v15604_v54 = vld [vmem:[#allocation80_spill] sm:$0xff]  ;;  %v15607_v28 = vld [vmem:[#allocation121_spill] sm:$0xff]  ;;  %15616 = vst [vmem:[#allocation142_spill] sm:$0xff] %v6866_v48  ;;  %s7006_s22 = smov 127   ;;  %s7007_s23 = smov 1   ;;  %v6914_v49 = vphi %v9019_v49, %v16013_v49   ;;  %v6910_v39 = vphi %v8954_v39, %v16012_v39   ;;  %v6906_v55 = vphi %v9067_v55, %v16011_v55   ;;  %v6902_v32 = vphi %v9025_v32, %v16010_v32   ;;  %v6898_v51 = vphi %v9093_v51, %v16009_v51   ;;  %v6894_v5 = vphi %v9076_v5, %v16008_v5   ;;  %v6890_v9 = vphi %v6370_v9, %v16007_v9   ;;  %v6886_v43 = vphi %v9128_v43, %v16006_v43   ;;  %v6882_v1 = vphi %v6372_v1, %v16005_v1   ;;  %v6878_v33 = vphi %v6373_v33, %v16004_v33   ;;  %v6874_v29 = vphi %v6374_v29, %v16003_v29   ;;  %v6870_v35 = vphi %v6375_v35, %v16002_v35   ;;  %v6866_v48 = vphi %v6376_v48, %v16001_v48   ;;  %s6930_s21 = sphi %s9275_s21, %s3847_s21   ;;  %v6926_v19 = vphi %v8866_v19, %v16016_v19   ;;  %v6922_v7 = vphi %v8946_v7, %v16015_v7   ;;  %v6918_v40 = vphi %v8905_v40, %v16014_v40  }
 0x248   : > { %v15605_v47 = vld [vmem:[#allocation100_spill] sm:$0xff]  ;;  %v15608_v30 = vld [vmem:[#allocation79_spill] sm:$0xff]  ;;  %v15611_v11 = vld [vmem:[#allocation93_spill] sm:$0xff]  ;;  %15617 = vst [vmem:[#allocation143_spill] sm:$0xff] %v6870_v35  ;;  %1678 = vrot.lane.b32.xlu1 %v6926_v19, %s7006_s22  ;;  %1630 = vrot.lane.b32.xlu0 %v6926_v19, %s7007_s23  ;;  %s3847_s21 = sadd.s32 8, %s6930_s21  }
 0x249   : > { %v15606_v57 = vld [vmem:[#allocation132_spill] sm:$0xff]  ;;  %v15609_v59 = vld [vmem:[#allocation131_spill] sm:$0xff]  ;;  %v15614_v8 = vld [vmem:[#allocation78_spill] sm:$0xff]  ;;  %15618 = vst [vmem:[#allocation144_spill] sm:$0xff] %v6874_v29  ;;  %p1625_p9 = scmp.lt.s32.totalorder %s3847_s21, 16384 }
 0x24a   : > { %v15610_v14 = vld [vmem:[#allocation82_spill] sm:$0xff]  ;;  %v15612_v26 = vld [vmem:[#allocation96_spill] sm:$0xff]  ;;  %15619 = vst [vmem:[#allocation145_spill] sm:$0xff] %v6878_v33  ;;  %15620 = vst [vmem:[#allocation146_spill] sm:$0xff] %v6882_v1 }
 0x24b   : > { %v15615_v60 = vld [vmem:[#allocation120_spill] sm:$0xff]  ;;  %15621 = vst [vmem:[#allocation147_spill] sm:$0xff] %v6886_v43  ;;  %15622 = vst [vmem:[#allocation148_spill] sm:$0xff] %v6890_v9  ;;  %v15637_v22 = vld [vmem:[#allocation81_spill] sm:$0xff] }
 0x24c   : > { %15623 = vst [vmem:[#allocation149_spill] sm:$0xff] %v6894_v5  ;;  %15624 = vst [vmem:[#allocation150_spill] sm:$0xff] %v6898_v51  ;;  %1708 = vrot.lane.b32.xlu1 %v6866_v48, %s7006_s22  ;;  %1660 = vrot.lane.b32.xlu0 %v6866_v48, %s7007_s23 }
 0x24d   : > { %v15613_v3 = vld [vmem:[#allocation103_spill] sm:$0xff]  ;;  %15625 = vst [vmem:[#allocation151_spill] sm:$0xff] %v6902_v32  ;;  %15626 = vst [vmem:[#allocation152_spill] sm:$0xff] %v6906_v55 }
 0x24e   : > { %15627 = vst [vmem:[#allocation153_spill] sm:$0xff] %v6910_v39  ;;  %15628 = vst [vmem:[#allocation154_spill] sm:$0xff] %v6914_v49 }
 0x24f   : > { %15629 = vst [vmem:[#allocation155_spill] sm:$0xff] %v6918_v40  ;;  %15630 = vst [vmem:[#allocation156_spill] sm:$0xff] %v6922_v7 }
 0x250   : > { %15631 = vst [vmem:[#allocation157_spill] sm:$0xff] %v6926_v19  ;;  %1658 = vrot.lane.b32.xlu1 %v6870_v35, %s7007_s23  ;;  %1632 = vrot.lane.b32.xlu0 %v6922_v7, %s7007_s23 }
 0x254   : > { %1706 = vrot.lane.b32.xlu1 %v6870_v35, %s7006_s22  ;;  %1680 = vrot.lane.b32.xlu0 %v6922_v7, %s7006_s22 }
 0x258   : > { %1656 = vrot.lane.b32.xlu1 %v6874_v29, %s7007_s23  ;;  %1634 = vrot.lane.b32.xlu0 %v6918_v40, %s7007_s23 }
 0x25c   : > { %1704 = vrot.lane.b32.xlu1 %v6874_v29, %s7006_s22  ;;  %1682 = vrot.lane.b32.xlu0 %v6918_v40, %s7006_s22 }
 0x260   : > { %1654 = vrot.lane.b32.xlu1 %v6878_v33, %s7007_s23  ;;  %1636 = vrot.lane.b32.xlu0 %v6914_v49, %s7007_s23 }
 0x264   : > { %1702 = vrot.lane.b32.xlu1 %v6878_v33, %s7006_s22  ;;  %1684 = vrot.lane.b32.xlu0 %v6914_v49, %s7006_s22 }
 0x268   : > { %1652 = vrot.lane.b32.xlu1 %v6882_v1, %s7007_s23  ;;  %1638 = vrot.lane.b32.xlu0 %v6910_v39, %s7007_s23 }
 0x26c   : > { %1700 = vrot.lane.b32.xlu1 %v6882_v1, %s7006_s22  ;;  %1686 = vrot.lane.b32.xlu0 %v6910_v39, %s7006_s22 }
 0x270   : > { %1650 = vrot.lane.b32.xlu1 %v6886_v43, %s7007_s23  ;;  %1640 = vrot.lane.b32.xlu0 %v6906_v55, %s7007_s23 }
 0x274   : > { %1698 = vrot.lane.b32.xlu1 %v6886_v43, %s7006_s22  ;;  %1688 = vrot.lane.b32.xlu0 %v6906_v55, %s7006_s22 }
 0x278   : > { %1648 = vrot.lane.b32.xlu1 %v6890_v9, %s7007_s23  ;;  %1642 = vrot.lane.b32.xlu0 %v6902_v32, %s7007_s23 }
 0x27c   : > { %1696 = vrot.lane.b32.xlu1 %v6890_v9, %s7006_s22  ;;  %1690 = vrot.lane.b32.xlu0 %v6902_v32, %s7006_s22 }
 0x280   : > { %1646 = vrot.lane.b32.xlu1 %v6894_v5, %s7007_s23  ;;  %1644 = vrot.lane.b32.xlu0 %v6898_v51, %s7007_s23 }
 0x284   : > { %1694 = vrot.lane.b32.xlu1 %v6894_v5, %s7006_s22  ;;  %1692 = vrot.lane.b32.xlu0 %v6898_v51, %s7006_s22 }
 0x2ba   : > { %v1679_v56 = vpop.permute.xlu1 %1678  ;;  %v1631_v23 = vpop.permute.xlu0 %1630 }
 0x2bb   : > { %v1710_v38 = vmul.f32 %v7411_v50, %v1679_v56  ;;  %v1662_v46 = vmul.f32 %v7401_v15, %v1631_v23 }
 0x2bd   : > { %v1726_v6 = vmax.f32 %v1662_v46, %v1710_v38 }
 0x2be   : > { %v1709_v0 = vpop.permute.xlu1 %1708  ;;  %v1661_v18 = vpop.permute.xlu0 %1660 }
 0x2bf   : > { %v1725_v21 = vmul.f32 %v7411_v50, %v1709_v0  ;;  %v1677_v58 = vmul.f32 %v7401_v15, %v1661_v18  ;;  %v9411_v56 = vmax.f32 %v6926_v19, %v1726_v6  ;;  %v15632_v6 = vld [vmem:[#allocation8_spill] sm:$0xff] }
 0x2c0   : > { %vm15633_vm11 = vcmp.lt.s32.totalorder %v15632_v6, 7  ;;  %vm15634_vm4 = vcmp.lt.s32.totalorder %v15632_v6, 1  ;;  %v15986_v6 = vld [vmem:[#allocation148_spill] sm:$0xff] }
 0x2c1   : > { %v1741_v37 = vmax.f32 %v1677_v58, %v1725_v21  ;;  %v14994_v46 = vrot.slane %v9411_v56, 7  ;;  %vm15635_vm12 = vmmov %vm15634_vm4 }
 0x2c2   : > { %v1659_v42 = vpop.permute.xlu1 %1658  ;;  %v1633_v45 = vpop.permute.xlu0 %1632  ;;  %vm15636_vm8 = vmmov %vm15633_vm11 }
 0x2c3   : > { %v1676_v31 = vmul.f32 %v7401_v15, %v1659_v42  ;;  %v1663_v62 = vmul.f32 %v7401_v15, %v1633_v45  ;;  %v9414_v23 = vmax.f32 %v6866_v48, %v1741_v37  ;;  %vm15638_vm13 = vmmov %vm15636_vm8 }
 0x2c4   : > { %vm15639_vm10 = vmmov %vm15634_vm4 }
 0x2c5   : > { %vm15640_vm7 = vmmov %vm15634_vm4 }
 0x2c6   : > { %v1707_v17 = vpop.permute.xlu1 %1706  ;;  %v1681_v34 = vpop.permute.xlu0 %1680  ;;  %vm15641_vm5 = vmmov %vm15636_vm8 }
 0x2c7   : > { %v1724_v53 = vmul.f32 %v7411_v50, %v1707_v17  ;;  %v1711_v36 = vmul.f32 %v7411_v50, %v1681_v34  ;;  %vm15642_vm15 = vmmov %vm15641_vm5 }
 0x2c8   : > { %vm15643_vm0 = vmmov %vm15634_vm4 }
 0x2c9   : > { %v1740_v52 = vmax.f32 %v1676_v31, %v1724_v53  ;;  %v1727_v41 = vmax.f32 %v1663_v62, %v1711_v36  ;;  %v14995_v36 = vrot.slane %v9414_v23, 1  ;;  %vm15644_vm14 = vmmov %vm15643_vm0 }
 0x2ca   : > { %v1657_v16 = vpop.permute.xlu1 %1656  ;;  %v1635_v44 = vpop.permute.xlu0 %1634  ;;  %vm15645_vm3 = vmmov %vm15641_vm5 }
 0x2cb   : > { %v1675_v25 = vmul.f32 %v7401_v15, %v1657_v16  ;;  %v9402_v61 = vmax.f32 %v6870_v35, %v1740_v52  ;;  %v9405_v2 = vmax.f32 %v6922_v7, %v1727_v41  ;;  %v1664_v4 = vmul.f32 %v7401_v15, %v1635_v44  ;;  %vm15646_vm6 = vmmov %vm15645_vm3 }
 0x2cc   : > { %vm15647_vm2 = vmmov %vm15643_vm0 }
 0x2cd   : > { %v1820_v31 = vrot.slane %v9402_v61, 1  ;;  %v1759_v17 = vrot.slane %v9405_v2, 7  ;;  %v14997_v53 = vrot.slane %v9402_v61, 7  ;;  %v14999_v62 = vrot.slane %v9405_v2, 1  ;;  %vm15648_vm1 = vmmov %vm15643_vm0 }
 0x2ce   : > { %v1705_v13 = vpop.permute.xlu1 %1704  ;;  %v1683_v24 = vpop.permute.xlu0 %1682  ;;  %vm15649_vm9 = vmmov %vm15645_vm3 }
 0x2cf   : > { %v1723_v63 = vmul.f32 %v7411_v50, %v1705_v13  ;;  %v1712_v12 = vmul.f32 %v7411_v50, %v1683_v24  ;;  %v1822_v37 = vsel %vm15633_vm11, %v1820_v31, %v14995_v36  ;;  %vm15651_vm11 = vmmov %vm15645_vm3 }
 0x2d1   : > { %v1739_v0 = vmax.f32 %v1675_v25, %v1723_v63  ;;  %v1728_v18 = vmax.f32 %v1664_v4, %v1712_v12  ;;  %v1788_v25 = vsel %vm15634_vm4, %v14994_v46, %v1759_v17  ;;  %vm15652_vm4 = vmmov %vm15645_vm3 }
 0x2d2   : > { %v1655_v42 = vpop.permute.xlu1 %1654  ;;  %v1637_v45 = vpop.permute.xlu0 %1636 }
 0x2d3   : > { %v9419_v34 = vmax.f32 %v6874_v29, %v1739_v0  ;;  %v9422_v38 = vmax.f32 %v6918_v40, %v1728_v18  ;;  %v1674_v21 = vmul.f32 %v7401_v15, %v1655_v42  ;;  %v1665_v41 = vmul.f32 %v7401_v15, %v1637_v45 }
 0x2d5   : > { %v1771_v58 = vrot.slane %v9419_v34, 7  ;;  %v1808_v52 = vrot.slane %v9422_v38, 1  ;;  %v1819_v36 = vrot.slane %v9419_v34, 1  ;;  %v1760_v35 = vrot.slane %v9422_v38, 7 }
 0x2d6   : > { %v1703_v16 = vpop.permute.xlu1 %1702  ;;  %v1685_v44 = vpop.permute.xlu0 %1684 }
 0x2d7   : > { %v1722_v13 = vmul.f32 %v7411_v50, %v1703_v16  ;;  %v1713_v24 = vmul.f32 %v7411_v50, %v1685_v44  ;;  %v1775_v4 = vsel %vm15635_vm12, %v1771_v58, %v14997_v53  ;;  %v1835_v63 = vsel %vm15636_vm8, %v14999_v62, %v1808_v52  ;;  %vm15653_vm12 = vmmov %vm15643_vm0 }
 0x2d8   : > { %v1868_v12 = vmax.f32 %v1775_v4, %v1822_v37  ;;  %v1855_v0 = vmax.f32 %v1788_v25, %v1835_v63  ;;  %vm15655_vm8 = vmmov %vm15643_vm0 }
 0x2d9   : > { %v1738_v18 = vmax.f32 %v1674_v21, %v1722_v13  ;;  %v1729_v42 = vmax.f32 %v1665_v41, %v1713_v24 }
 0x2da   : > { %v1653_v45 = vpop.permute.xlu1 %1652  ;;  %v1639_v46 = vpop.permute.xlu0 %1638  ;;  %v1884_v16 = vmax.f32 %v9402_v61, %v1868_v12  ;;  %v1871_v44 = vmax.f32 %v9405_v2, %v1855_v0  ;;  %v1823_v12 = vsel %vm15638_vm13, %v1819_v36, %v1820_v31  ;;  %v1787_v0 = vsel %vm15639_vm10, %v1759_v17, %v1760_v35  ;;  %vm15656_vm13 = vmmov %vm15643_vm0 }
 0x2db   : > { %v9455_v53 = vmax.f32 %v6878_v33, %v1738_v18  ;;  %v9458_v29 = vmax.f32 %v6914_v49, %v1729_v42  ;;  %v1673_v41 = vmul.f32 %v7401_v15, %v1653_v45  ;;  %v1666_v24 = vmul.f32 %v7401_v15, %v1639_v46  ;;  %vm15657_vm10 = vmmov %vm15645_vm3  ;;  %v15658_v49 = vld [vmem:[#allocation10_spill] sm:$0xff] }
 0x2dc   : > { %v9461_v37 = vmul.f32 %v15637_v22, %v1884_v16  ;;  %v9464_v21 = vmul.f32 %v15612_v26, %v1871_v44  ;;  %v15659_v22 = vrot.slane %v9402_v61, 7 }
 0x2dd   : > { %v1770_v25 = vrot.slane %v9455_v53, 7  ;;  %v1809_v13 = vrot.slane %v9458_v29, 1 }
 0x2de   : > { %v1701_v4 = vpop.permute.xlu1 %1700  ;;  %1930 = vrot.lane.b32.xlu1 %v9461_v37, %s7007_s23  ;;  %1904 = vrot.lane.b32.xlu0 %v9464_v21, %s7007_s23  ;;  %v1687_v63 = vpop.permute.xlu0 %1686 }
 0x2df   : > { %v1721_v18 = vmul.f32 %v7411_v50, %v1701_v4  ;;  %v1714_v42 = vmul.f32 %v7411_v50, %v1687_v63  ;;  %v1776_v46 = vsel %vm15640_vm7, %v1770_v25, %v1771_v58  ;;  %v1834_v45 = vsel %vm15641_vm5, %v1808_v52, %v1809_v13  ;;  %vm15660_vm7 = vmmov %vm15643_vm0 }
 0x2e0   : > { %v1867_v16 = vmax.f32 %v1776_v46, %v1823_v12  ;;  %v1856_v44 = vmax.f32 %v1787_v0, %v1834_v45  ;;  %v1818_v58 = vrot.slane %v9455_v53, 1  ;;  %v1761_v52 = vrot.slane %v9458_v29, 7  ;;  %vm15662_vm5 = vmmov %vm15645_vm3 }
 0x2e1   : > { %v1737_v62 = vmax.f32 %v1673_v41, %v1721_v18  ;;  %v1730_v33 = vmax.f32 %v1666_v24, %v1714_v42 }
 0x2e2   : > { %v1651_v48 = vpop.permute.xlu1 %1650  ;;  %1978 = vrot.lane.b32.xlu1 %v9461_v37, %s7006_s22  ;;  %1952 = vrot.lane.b32.xlu0 %v9464_v21, %s7006_s22  ;;  %v1641_v31 = vpop.permute.xlu0 %1640  ;;  %v1883_v17 = vmax.f32 %v9419_v34, %v1867_v16  ;;  %v1872_v4 = vmax.f32 %v9422_v38, %v1856_v44 }
 0x2e3   : > { %v9493_v63 = vmax.f32 %v6882_v1, %v1737_v62  ;;  %v9496_v41 = vmax.f32 %v6910_v39, %v1730_v33  ;;  %v1672_v34 = vmul.f32 %v7401_v15, %v1651_v48  ;;  %v1667_v18 = vmul.f32 %v7401_v15, %v1641_v31 }
 0x2e4   : > { %v9499_v24 = vmul.f32 %v15610_v14, %v1883_v17  ;;  %v9502_v12 = vmul.f32 %v15611_v11, %v1872_v4  ;;  %v1824_v62 = vsel %vm15642_vm15, %v1818_v58, %v1819_v36  ;;  %v1786_v48 = vsel %vm15643_vm0, %v1760_v35, %v1761_v52  ;;  %vm15664_vm15 = vmmov %vm15643_vm0 }
 0x2e5   : > { %v1769_v38 = vrot.slane %v9493_v63, 7  ;;  %v1810_v0 = vrot.slane %v9496_v41, 1  ;;  %vm15665_vm0 = vmmov %vm15645_vm3 }
 0x2e6   : > { %v1699_v42 = vpop.permute.xlu1 %1698  ;;  %1928 = vrot.lane.b32.xlu1 %v9499_v24, %s7007_s23  ;;  %1906 = vrot.lane.b32.xlu0 %v9502_v12, %s7007_s23  ;;  %v1689_v33 = vpop.permute.xlu0 %1688 }
 0x2e7   : > { %v1720_v46 = vmul.f32 %v7411_v50, %v1699_v42  ;;  %v1715_v45 = vmul.f32 %v7411_v50, %v1689_v33  ;;  %v1777_v16 = vsel %vm15644_vm14, %v1769_v38, %v1770_v25  ;;  %v1833_v44 = vsel %vm15645_vm3, %v1809_v13, %v1810_v0  ;;  %vm15666_vm14 = vmmov %vm15665_vm0 }
 0x2e8   : > { %v1866_v31 = vmax.f32 %v1777_v16, %v1824_v62  ;;  %v1857_v17 = vmax.f32 %v1786_v48, %v1833_v44  ;;  %v1817_v25 = vrot.slane %v9493_v63, 1  ;;  %v1762_v13 = vrot.slane %v9496_v41, 7  ;;  %vm15667_vm3 = vmmov %vm15648_vm1 }
 0x2e9   : > { %v1736_v4 = vmax.f32 %v1672_v34, %v1720_v46  ;;  %v1731_v1 = vmax.f32 %v1667_v18, %v1715_v45 }
 0x2ea   : > { %v1649_v39 = vpop.permute.xlu1 %1648  ;;  %1976 = vrot.lane.b32.xlu1 %v9499_v24, %s7006_s22  ;;  %1954 = vrot.lane.b32.xlu0 %v9502_v12, %s7006_s22  ;;  %v1643_v35 = vpop.permute.xlu0 %1642  ;;  %v1882_v36 = vmax.f32 %v9455_v53, %v1866_v31  ;;  %v1873_v42 = vmax.f32 %v9458_v29, %v1857_v17  ;;  %v1825_v16 = vsel %vm15646_vm6, %v1817_v25, %v1818_v58  ;;  %v1773_v58 = vrot.slane %v9414_v23, 7  ;;  %vm15668_vm6 = vmmov %vm15648_vm1 }
 0x2eb   : > { %v9531_v33 = vmax.f32 %v6886_v43, %v1736_v4  ;;  %v9534_v34 = vmax.f32 %v6906_v55, %v1731_v1  ;;  %v1671_v53 = vmul.f32 %v7401_v15, %v1649_v39  ;;  %v1668_v46 = vmul.f32 %v7401_v15, %v1643_v35 }
 0x2ec   : > { %v9537_v18 = vmul.f32 %v15609_v59, %v1882_v36  ;;  %v9540_v62 = vmul.f32 %v15615_v60, %v1873_v42  ;;  %v1785_v39 = vsel %vm15647_vm2, %v1761_v52, %v1762_v13  ;;  %v1806_v42 = vrot.slane %v9411_v56, 1  ;;  %vm15669_vm2 = vmmov %vm15665_vm0 }
 0x2ed   : > { %v1768_v29 = vrot.slane %v9531_v33, 7  ;;  %v1811_v48 = vrot.slane %v9534_v34, 1 }
 0x2ee   : > { %v1697_v45 = vpop.permute.xlu1 %1696  ;;  %1926 = vrot.lane.b32.xlu1 %v9537_v18, %s7007_s23  ;;  %1908 = vrot.lane.b32.xlu0 %v9540_v62, %s7007_s23  ;;  %v1691_v1 = vpop.permute.xlu0 %1690 }
 0x2ef   : > { %v1719_v44 = vmul.f32 %v7411_v50, %v1697_v45  ;;  %v1716_v31 = vmul.f32 %v7411_v50, %v1691_v1  ;;  %v1778_v17 = vsel %vm15648_vm1, %v1768_v29, %v1769_v38  ;;  %v1832_v4 = vsel %vm15649_vm9, %v1810_v0, %v1811_v48  ;;  %vm15670_vm9 = vmmov %vm15665_vm0 }
 0x2f0   : > { %v1865_v35 = vmax.f32 %v1778_v17, %v1825_v16  ;;  %v1858_v36 = vmax.f32 %v1785_v39, %v1832_v4  ;;  %v1816_v45 = vrot.slane %v9531_v33, 1  ;;  %v1763_v1 = vrot.slane %v9534_v34, 7 }
 0x2f1   : > { %v1735_v43 = vmax.f32 %v1671_v53, %v1719_v44  ;;  %v1732_v19 = vmax.f32 %v1668_v46, %v1716_v31 }
 0x2f2   : > { %v1647_v40 = vpop.permute.xlu1 %1646  ;;  %1974 = vrot.lane.b32.xlu1 %v9537_v18, %s7006_s22  ;;  %1956 = vrot.lane.b32.xlu0 %v9540_v62, %s7006_s22  ;;  %v1645_v52 = vpop.permute.xlu0 %1644  ;;  %v1881_v38 = vmax.f32 %v9493_v63, %v1865_v35  ;;  %v1874_v0 = vmax.f32 %v9496_v41, %v1858_v36  ;;  %v15650_v63 = vrot.slane %v9414_v23, 1  ;;  %v1826_v35 = vsel %vm15652_vm4, %v1816_v45, %v1817_v25  ;;  %vm15672_vm4 = vmmov %vm15648_vm1 }
 0x2f3   : > { %v9571_v53 = vmax.f32 %v6890_v9, %v1735_v43  ;;  %v9574_v46 = vmax.f32 %v6902_v32, %v1732_v19  ;;  %v1670_v44 = vmul.f32 %v7401_v15, %v1647_v40  ;;  %v1669_v31 = vmul.f32 %v7401_v15, %v1645_v52 }
 0x2f4   : > { %v9577_v16 = vmul.f32 %v15606_v57, %v1881_v38  ;;  %v9580_v39 = vmul.f32 %v8957_v20, %v1874_v0  ;;  %v1837_v41 = vsel %vm15651_vm11, %v15650_v63, %v1806_v42  ;;  %v1784_v40 = vsel %vm15653_vm12, %v1762_v13, %v1763_v1  ;;  %vm15671_vm11 = vmmov %vm15665_vm0 }
 0x2f5   : > { %v1767_v43 = vrot.slane %v9571_v53, 7  ;;  %v1812_v19 = vrot.slane %v9574_v46, 1  ;;  %v15654_v36 = vrot.slane %v9411_v56, 7  ;;  %v1853_v32 = vmul.f32 %v15658_v49, %v1837_v41  ;;  %vm15673_vm12 = vmmov %vm15648_vm1 }
 0x2f6   : > { %v1695_v17 = vpop.permute.xlu1 %1694  ;;  %1924 = vrot.lane.b32.xlu1 %v9577_v16, %s7007_s23  ;;  %1910 = vrot.lane.b32.xlu0 %v9580_v39, %s7007_s23  ;;  %v1693_v4 = vpop.permute.xlu0 %1692 }
 0x2f7   : > { %v1789_v52 = vsel %vm15655_vm8, %v1773_v58, %v15654_v36  ;;  %v1718_v38 = vmul.f32 %v7411_v50, %v1695_v17  ;;  %v1717_v0 = vmul.f32 %v7411_v50, %v1693_v4  ;;  %v1779_v63 = vsel %vm15656_vm13, %v1767_v43, %v1768_v29  ;;  %vm15674_vm8 = vmmov %vm15665_vm0 }
 0x2f8   : > { %v1831_v9 = vsel %vm15657_vm10, %v1811_v48, %v1812_v19  ;;  %v1864_v7 = vmax.f32 %v1779_v63, %v1826_v35  ;;  %v1774_v36 = vsel %vm15660_vm7, %v15659_v22, %v1773_v58  ;;  %v15661_v17 = vrot.slane %v9405_v2, 1  ;;  %v15663_v48 = vld [vmem:[#allocation9_spill] sm:$0xff]  ;;  %vm15675_vm13 = vmmov %vm15665_vm0 }
 0x2f9   : > { %v1859_v25 = vmax.f32 %v1784_v40, %v1831_v9  ;;  %v1734_v13 = vmax.f32 %v1670_v44, %v1718_v38  ;;  %v1733_v55 = vmax.f32 %v1669_v31, %v1717_v0  ;;  %v1790_v61 = vmul.f32 %v15663_v48, %v1789_v52  ;;  %vm15676_vm10 = vmmov %vm15648_vm1 }
 0x2fa   : > { %v1836_v4 = vsel %vm15662_vm5, %v1806_v42, %v15661_v17  ;;  %1972 = vrot.lane.b32.xlu1 %v9577_v16, %s7006_s22  ;;  %1958 = vrot.lane.b32.xlu0 %v9580_v39, %s7006_s22  ;;  %v1880_v9 = vmax.f32 %v9531_v33, %v1864_v7  ;;  %v1869_v58 = vmax.f32 %v1774_v36, %v1853_v32  ;;  %v1815_v7 = vrot.slane %v9571_v53, 1  ;;  %vm15677_vm7 = vmmov %vm15648_vm1 }
 0x2fb   : > { %v1875_v29 = vmax.f32 %v9534_v34, %v1859_v25  ;;  %v1750_v41 = vmax.f32 %v6894_v5, %v1734_v13  ;;  %v1749_v22 = vmax.f32 %v6898_v51, %v1733_v55  ;;  %v1854_v44 = vmax.f32 %v1790_v61, %v1836_v4  ;;  %vm15678_vm5 = vmmov %vm15665_vm0 }
 0x2fc   : > { %v9627_v2 = vmul.f32 %v9131_v10, %v1880_v9  ;;  %v1764_v55 = vrot.slane %v9574_v46, 7  ;;  %v1885_v33 = vmax.f32 %v9414_v23, %v1869_v58  ;;  %v1827_v52 = vsel %vm15666_vm14, %v1815_v7, %v1816_v45  ;;  %vm15680_vm14 = vmmov %vm15648_vm1 }
 0x2fd   : > { %v9630_v42 = vmul.f32 %v15608_v30, %v1875_v29  ;;  %v1766_v31 = vrot.slane %v1750_v41, 7  ;;  %v1813_v35 = vrot.slane %v1749_v22, 1  ;;  %v1870_v34 = vmax.f32 %v9411_v56, %v1854_v44 }
 0x2fe   : > { %1922 = vrot.lane.b32.xlu1 %v9627_v2, %s7007_s23  ;;  %v1783_v23 = vsel %vm15667_vm3, %v1763_v1, %v1764_v55  ;;  %v9653_v56 = vmul.f32 %v15613_v3, %v1885_v33  ;;  %v1765_v0 = vrot.slane %v1749_v22, 7  ;;  %v1814_v63 = vrot.slane %v1750_v41, 1  ;;  %vm15681_vm3 = vmmov %vm15665_vm0 }
 0x2ff   : > { %1912 = vrot.lane.b32.xlu0 %v9630_v42, %s7007_s23  ;;  %v1780_v32 = vsel %vm15664_vm15, %v1766_v31, %v1767_v43  ;;  %v1830_v40 = vsel %vm15665_vm0, %v1812_v19, %v1813_v35  ;;  %v9656_v43 = vmul.f32 %v15614_v8, %v1870_v34  ;;  %vm15679_vm15 = vmmov %vm15648_vm1 }
 0x300   : > { %v1863_v38 = vmax.f32 %v1780_v32, %v1827_v52  ;;  %v1860_v19 = vmax.f32 %v1783_v23, %v1830_v40  ;;  %v1782_v25 = vsel %vm15668_vm6, %v1764_v55, %v1765_v0  ;;  %v1829_v13 = vsel %vm15669_vm2, %v1813_v35, %v1814_v63  ;;  %vm15682_vm6 = vmmov %vm15665_vm0 }
 0x301   : > { %v1781_v36 = vsel %vm15648_vm1, %v1765_v0, %v1766_v31  ;;  %v1828_v17 = vsel %vm15670_vm9, %v1814_v63, %v1815_v7  ;;  %v1861_v4 = vmax.f32 %v1782_v25, %v1829_v13  ;;  %vm15683_vm2 = vmmov %vm15648_vm1 }
 0x302   : > { %1970 = vrot.lane.b32.xlu1 %v9627_v2, %s7006_s22  ;;  %v1879_v45 = vmax.f32 %v9571_v53, %v1863_v38  ;;  %v1876_v1 = vmax.f32 %v9574_v46, %v1860_v19  ;;  %v1862_v9 = vmax.f32 %v1781_v36, %v1828_v17  ;;  %vm15684_vm9 = vmmov %vm15665_vm0 }
 0x303   : > { %1960 = vrot.lane.b32.xlu0 %v9630_v42, %s7006_s22  ;;  %v1877_v29 = vmax.f32 %v1749_v22, %v1861_v4 }
 0x304   : > { %v9677_v53 = vmul.f32 %v15605_v47, %v1879_v45  ;;  %v9680_v46 = vmul.f32 %v15607_v28, %v1876_v1  ;;  %v1878_v61 = vmax.f32 %v1750_v41, %v1862_v9 }
 0x305   : > { %v9691_v58 = vmul.f32 %v15603_v27, %v1877_v29 }
 0x306   : > { %1932 = vrot.lane.b32.xlu1 %v9653_v56, %s7007_s23  ;;  %v9694_v44 = vmul.f32 %v15604_v54, %v1878_v61 }
 0x307   : > { %1902 = vrot.lane.b32.xlu0 %v9656_v43, %s7007_s23 }
 0x30a   : > { %1980 = vrot.lane.b32.xlu1 %v9653_v56, %s7006_s22 }
 0x30b   : > { %1950 = vrot.lane.b32.xlu0 %v9656_v43, %s7006_s22 }
 0x30e   : > { %1920 = vrot.lane.b32.xlu1 %v9677_v53, %s7007_s23 }
 0x30f   : > { %1914 = vrot.lane.b32.xlu0 %v9680_v46, %s7007_s23 }
 0x312   : > { %1968 = vrot.lane.b32.xlu1 %v9677_v53, %s7006_s22 }
 0x313   : > { %1962 = vrot.lane.b32.xlu0 %v9680_v46, %s7006_s22 }
 0x316   : > { %1918 = vrot.lane.b32.xlu1 %v9694_v44, %s7007_s23 }
 0x317   : > { %1916 = vrot.lane.b32.xlu0 %v9691_v58, %s7007_s23 }
 0x31a   : > { %1966 = vrot.lane.b32.xlu1 %v9694_v44, %s7006_s22 }
 0x31b   : > { %1964 = vrot.lane.b32.xlu0 %v9691_v58, %s7006_s22 }
 0x350   : > { %v1931_v41 = vpop.permute.xlu1 %1930  ;;  %v1905_v22 = vpop.permute.xlu0 %1904 }
 0x351   : > { %v1948_v0 = vmul.f32 %v7401_v15, %v1931_v41  ;;  %v1935_v63 = vmul.f32 %v7401_v15, %v1905_v22 }
 0x354   : > { %v1979_v31 = vpop.permute.xlu1 %1978  ;;  %v1953_v35 = vpop.permute.xlu0 %1952 }
 0x355   : > { %v1996_v52 = vmul.f32 %v7411_v50, %v1979_v31  ;;  %v1983_v23 = vmul.f32 %v7411_v50, %v1953_v35 }
 0x357   : > { %v2012_v36 = vmax.f32 %v1948_v0, %v1996_v52  ;;  %v1999_v17 = vmax.f32 %v1935_v63, %v1983_v23 }
 0x358   : > { %v1929_v7 = vpop.permute.xlu1 %1928  ;;  %v1907_v55 = vpop.permute.xlu0 %1906 }
 0x359   : > { %v1947_v38 = vmul.f32 %v7401_v15, %v1929_v7  ;;  %v1936_v19 = vmul.f32 %v7401_v15, %v1907_v55  ;;  %v9723_v7 = vmax.f32 %v9461_v37, %v2012_v36  ;;  %v9726_v55 = vmax.f32 %v9464_v21, %v1999_v17 }
 0x35b   : > { %v15014_v37 = vrot.slane %v9723_v7, 1 }
 0x35c   : > { %v1977_v33 = vpop.permute.xlu1 %1976  ;;  %v1955_v34 = vpop.permute.xlu0 %1954 }
 0x35d   : > { %v1995_v32 = vmul.f32 %v7411_v50, %v1977_v33  ;;  %v1984_v40 = vmul.f32 %v7411_v50, %v1955_v34 }
 0x35f   : > { %v2011_v45 = vmax.f32 %v1947_v38, %v1995_v32  ;;  %v2000_v1 = vmax.f32 %v1936_v19, %v1984_v40  ;;  %v2031_v38 = vrot.slane %v9726_v55, 7 }
 0x360   : > { %v1927_v25 = vpop.permute.xlu1 %1926  ;;  %v1909_v13 = vpop.permute.xlu0 %1908 }
 0x361   : > { %v9713_v4 = vmax.f32 %v9499_v24, %v2011_v45  ;;  %v9716_v9 = vmax.f32 %v9502_v12, %v2000_v1  ;;  %v1946_v31 = vmul.f32 %v7401_v15, %v1927_v25  ;;  %v1937_v41 = vmul.f32 %v7401_v15, %v1909_v13 }
 0x363   : > { %v2091_v32 = vrot.slane %v9713_v4, 1  ;;  %v2032_v40 = vrot.slane %v9716_v9, 7  ;;  %v15013_v19 = vrot.slane %v9713_v4, 7  ;;  %v2080_v0 = vrot.slane %v9716_v9, 1 }
 0x364   : > { %v1975_v29 = vpop.permute.xlu1 %1974  ;;  %v1957_v61 = vpop.permute.xlu0 %1956 }
 0x365   : > { %v1994_v22 = vmul.f32 %v7411_v50, %v1975_v29  ;;  %v1985_v35 = vmul.f32 %v7411_v50, %v1957_v61  ;;  %v2059_v13 = vsel %vm15672_vm4, %v2031_v38, %v2032_v40  ;;  %vm15686_vm4 = vmmov %vm15648_vm1 }
 0x367   : > { %v2010_v24 = vmax.f32 %v1946_v31, %v1994_v22  ;;  %v2001_v33 = vmax.f32 %v1937_v41, %v1985_v35 }
 0x368   : > { %v1925_v12 = vpop.permute.xlu1 %1924  ;;  %v1911_v34 = vpop.permute.xlu0 %1910 }
 0x369   : > { %v9731_v52 = vmax.f32 %v9537_v18, %v2010_v24  ;;  %v9734_v23 = vmax.f32 %v9540_v62, %v2001_v33  ;;  %v1945_v45 = vmul.f32 %v7401_v15, %v1925_v12  ;;  %v1938_v18 = vmul.f32 %v7401_v15, %v1911_v34 }
 0x36a   : > { %v2095_v62 = vsel %vm15671_vm11, %v2091_v32, %v15014_v37  ;;  %vm15685_vm11 = vmmov %vm15665_vm0 }
 0x36b   : > { %v2042_v21 = vrot.slane %v9731_v52, 7  ;;  %v2081_v63 = vrot.slane %v9734_v23, 1  ;;  %v2090_v24 = vrot.slane %v9731_v52, 1 }
 0x36c   : > { %v1973_v1 = vpop.permute.xlu1 %1972  ;;  %v1959_v25 = vpop.permute.xlu0 %1958 }
 0x36d   : > { %v1993_v36 = vmul.f32 %v7411_v50, %v1973_v1  ;;  %v1986_v17 = vmul.f32 %v7411_v50, %v1959_v25  ;;  %v2048_v29 = vsel %vm15673_vm12, %v2042_v21, %v15013_v19  ;;  %v2106_v61 = vsel %vm15674_vm8, %v2080_v0, %v2081_v63  ;;  %vm15688_vm12 = vmmov %vm15665_vm0 }
 0x36e   : > { %v2139_v31 = vmax.f32 %v2048_v29, %v2095_v62  ;;  %v2128_v41 = vmax.f32 %v2059_v13, %v2106_v61  ;;  %v2033_v25 = vrot.slane %v9734_v23, 7  ;;  %v2096_v13 = vsel %vm15675_vm13, %v2090_v24, %v2091_v32  ;;  %vm15690_vm8 = vmmov %vm15648_vm1 }
 0x36f   : > { %v2009_v22 = vmax.f32 %v1945_v45, %v1993_v36  ;;  %v2002_v35 = vmax.f32 %v1938_v18, %v1986_v17  ;;  %vm15691_vm13 = vmmov %vm15648_vm1 }
 0x370   : > { %v1923_v33 = vpop.permute.xlu1 %1922  ;;  %v2155_v34 = vmax.f32 %v9713_v4, %v2139_v31  ;;  %v2144_v1 = vmax.f32 %v9716_v9, %v2128_v41  ;;  %v2058_v61 = vsel %vm15676_vm10, %v2032_v40, %v2033_v25  ;;  %vm15692_vm10 = vmmov %vm15665_vm0 }
 0x371   : > { %v1913_v12 = vpop.permute.xlu0 %1912  ;;  %v9767_v19 = vmax.f32 %v9577_v16, %v2009_v22  ;;  %v9770_v37 = vmax.f32 %v9580_v39, %v2002_v35  ;;  %v1944_v17 = vmul.f32 %v7401_v15, %v1923_v33 }
 0x372   : > { %v9773_v62 = vmul.f32 %v15610_v14, %v2155_v34  ;;  %v9776_v45 = vmul.f32 %v15611_v11, %v2144_v1  ;;  %v1939_v16 = vmul.f32 %v7401_v15, %v1913_v12 }
 0x373   : > { %v2041_v18 = vrot.slane %v9767_v19, 7  ;;  %v2082_v36 = vrot.slane %v9770_v37, 1 }
 0x374   : > { %v1971_v29 = vpop.permute.xlu1 %1970  ;;  %2200 = vrot.lane.b32.xlu1 %v9773_v62, %s7007_s23  ;;  %2178 = vrot.lane.b32.xlu0 %v9776_v45, %s7007_s23 }
 0x375   : > { %v1961_v39 = vpop.permute.xlu0 %1960  ;;  %v1992_v31 = vmul.f32 %v7411_v50, %v1971_v29  ;;  %v2049_v41 = vsel %vm15677_vm7, %v2041_v18, %v2042_v21  ;;  %v2105_v22 = vsel %vm15678_vm5, %v2081_v63, %v2082_v36  ;;  %vm15693_vm7 = vmmov %vm15648_vm1 }
 0x376   : > { %v1987_v32 = vmul.f32 %v7411_v50, %v1961_v39  ;;  %v2138_v35 = vmax.f32 %v2049_v41, %v2096_v13  ;;  %v2129_v33 = vmax.f32 %v2058_v61, %v2105_v22  ;;  %v2089_v13 = vrot.slane %v9767_v19, 1  ;;  %vm15694_vm5 = vmmov %vm15665_vm0 }
 0x377   : > { %v2008_v12 = vmax.f32 %v1944_v17, %v1992_v31  ;;  %v2034_v17 = vrot.slane %v9770_v37, 7 }
 0x378   : > { %v2003_v34 = vmax.f32 %v1939_v16, %v1987_v32  ;;  %v1933_v1 = vpop.permute.xlu1 %1932  ;;  %2248 = vrot.lane.b32.xlu1 %v9773_v62, %s7006_s22  ;;  %2226 = vrot.lane.b32.xlu0 %v9776_v45, %s7006_s22  ;;  %v2154_v29 = vmax.f32 %v9731_v52, %v2138_v35  ;;  %v2145_v39 = vmax.f32 %v9734_v23, %v2129_v33 }
 0x379   : > { %v1903_v40 = vpop.permute.xlu0 %1902  ;;  %v9803_v21 = vmax.f32 %v9627_v2, %v2008_v12  ;;  %v2097_v32 = vsel %vm15665_vm0, %v2089_v13, %v2090_v24  ;;  %v2057_v41 = vsel %vm15680_vm14, %v2033_v25, %v2034_v17  ;;  %vm15696_vm14 = vmmov %vm15665_vm0 }
 0x37a   : > { %v9806_v63 = vmax.f32 %v9630_v42, %v2003_v34  ;;  %v9811_v16 = vmul.f32 %v15609_v59, %v2154_v29  ;;  %v9814_v61 = vmul.f32 %v15615_v60, %v2145_v39  ;;  %v1934_v25 = vmul.f32 %v7401_v15, %v1903_v40 }
 0x37b   : > { %v2040_v52 = vrot.slane %v9803_v21, 7 }
 0x37c   : > { %v2083_v23 = vrot.slane %v9806_v63, 1  ;;  %v1981_v31 = vpop.permute.xlu1 %1980  ;;  %2198 = vrot.lane.b32.xlu1 %v9811_v16, %s7007_s23  ;;  %2180 = vrot.lane.b32.xlu0 %v9814_v61, %s7007_s23 }
 0x37d   : > { %v1951_v2 = vpop.permute.xlu0 %1950  ;;  %v2050_v42 = vsel %vm15679_vm15, %v2040_v52, %v2041_v18  ;;  %vm15695_vm15 = vmmov %vm15648_vm1 }
 0x37e   : > { %v2104_v22 = vsel %vm15681_vm3, %v2082_v36, %v2083_v23  ;;  %v2137_v35 = vmax.f32 %v2050_v42, %v2097_v32  ;;  %v1982_v12 = vmul.f32 %v7411_v50, %v1951_v2  ;;  %v1997_v2 = vmul.f32 %v7411_v50, %v1981_v31  ;;  %vm15697_vm3 = vmmov %vm15648_vm1 }
 0x37f   : > { %v2130_v33 = vmax.f32 %v2057_v41, %v2104_v22  ;;  %v1949_v42 = vmul.f32 %v7401_v15, %v1933_v1 }
 0x380   : > { %v1921_v34 = vpop.permute.xlu1 %1920  ;;  %2246 = vrot.lane.b32.xlu1 %v9811_v16, %s7006_s22  ;;  %2228 = vrot.lane.b32.xlu0 %v9814_v61, %s7006_s22  ;;  %v2153_v24 = vmax.f32 %v9767_v19, %v2137_v35  ;;  %v1998_v32 = vmax.f32 %v1934_v25, %v1982_v12  ;;  %v15015_v12 = vrot.slane %v9803_v21, 1 }
 0x381   : > { %v1915_v18 = vpop.permute.xlu0 %1914  ;;  %v2146_v29 = vmax.f32 %v9770_v37, %v2130_v33  ;;  %v1943_v19 = vmul.f32 %v7401_v15, %v1921_v34  ;;  %v2013_v31 = vmax.f32 %v1949_v42, %v1997_v2 }
 0x382   : > { %v9839_v36 = vmul.f32 %v15606_v57, %v2153_v24  ;;  %v1940_v40 = vmul.f32 %v7401_v15, %v1915_v18  ;;  %v9856_v24 = vmax.f32 %v9656_v43, %v1998_v32  ;;  %v2035_v18 = vrot.slane %v9806_v63, 7 }
 0x383   : > { %v9842_v39 = vmul.f32 %v8957_v20, %v2146_v29  ;;  %v9868_v42 = vmax.f32 %v9653_v56, %v2013_v31  ;;  %v2098_v32 = vsel %vm15682_vm6, %v15015_v12, %v2089_v13  ;;  %vm15700_vm6 = vmmov %vm15648_vm1 }
 0x384   : > { %v1969_v41 = vpop.permute.xlu1 %1968  ;;  %2196 = vrot.lane.b32.xlu1 %v9839_v36, %s7007_s23  ;;  %v2030_v56 = vrot.slane %v9856_v24, 7 }
 0x385   : > { %2182 = vrot.lane.b32.xlu0 %v9842_v39, %s7007_s23  ;;  %v1963_v37 = vpop.permute.xlu0 %1962  ;;  %v1991_v22 = vmul.f32 %v7411_v50, %v1969_v41  ;;  %v2093_v12 = vrot.slane %v9868_v42, 1 }
 0x386   : > { %v1988_v35 = vmul.f32 %v7411_v50, %v1963_v37 }
 0x387   : > { %v2007_v33 = vmax.f32 %v1943_v19, %v1991_v22 }
 0x388   : > { %v2004_v1 = vmax.f32 %v1940_v40, %v1988_v35  ;;  %2244 = vrot.lane.b32.xlu1 %v9839_v36, %s7006_s22  ;;  %v1919_v29 = vpop.permute.xlu1 %1918 }
 0x389   : > { %2230 = vrot.lane.b32.xlu0 %v9842_v39, %s7006_s22  ;;  %v1917_v34 = vpop.permute.xlu0 %1916  ;;  %v9864_v25 = vmax.f32 %v9677_v53, %v2007_v33  ;;  %v1942_v37 = vmul.f32 %v7401_v15, %v1919_v29  ;;  %v2079_v29 = vrot.slane %v9726_v55, 1 }
 0x38a   : > { %v2020_v2 = vmax.f32 %v9680_v46, %v2004_v1  ;;  %v1941_v19 = vmul.f32 %v7401_v15, %v1917_v34  ;;  %v2056_v46 = vsel %vm15683_vm2, %v2034_v17, %v2035_v18  ;;  %vm15701_vm2 = vmmov %vm15648_vm1 }
 0x38b   : > { %v15016_v43 = vrot.slane %v9864_v25, 7 }
 0x38c   : > { %v2084_v41 = vrot.slane %v2020_v2, 1  ;;  %v1967_v40 = vpop.permute.xlu1 %1966 }
 0x38d   : > { %v1965_v53 = vpop.permute.xlu0 %1964  ;;  %v1990_v22 = vmul.f32 %v7411_v50, %v1967_v40  ;;  %v2051_v13 = vsel %vm15648_vm1, %v15016_v43, %v2040_v52  ;;  %v2107_v52 = vsel %vm15685_vm11, %v2079_v29, %v2080_v0  ;;  %v2044_v43 = vrot.slane %v9723_v7, 7  ;;  %vm15702_vm1 = vmmov %vm15665_vm0 }
 0x38e   : > { %v1989_v35 = vmul.f32 %v7411_v50, %v1965_v53  ;;  %v2103_v31 = vsel %vm15684_vm9, %v2083_v23, %v2084_v41  ;;  %v2136_v33 = vmax.f32 %v2051_v13, %v2098_v32  ;;  %v2078_v0 = vrot.slane %v9856_v24, 1  ;;  %vm15704_vm9 = vmmov %vm15665_vm0 }
 0x38f   : > { %v2131_v1 = vmax.f32 %v2056_v46, %v2103_v31  ;;  %v2006_v34 = vmax.f32 %v1942_v37, %v1990_v22  ;;  %v2036_v46 = vrot.slane %v2020_v2, 7  ;;  %v2060_v37 = vsel %vm15686_vm4, %v2030_v56, %v2031_v38  ;;  %vm15705_vm11 = vmmov %vm15701_vm2 }
 0x390   : > { %v2005_v17 = vmax.f32 %v1941_v19, %v1989_v35  ;;  %v2152_v40 = vmax.f32 %v9803_v21, %v2136_v33  ;;  %v2045_v19 = vrot.slane %v9868_v42, 7  ;;  %v2127_v38 = vmax.f32 %v2060_v37, %v2107_v52  ;;  %vm15706_vm4 = vmmov %vm15665_vm0 }
 0x391   : > { %v2147_v53 = vmax.f32 %v9806_v63, %v2131_v1  ;;  %v2022_v23 = vmax.f32 %v9694_v44, %v2006_v34  ;;  %v15689_v31 = vrot.slane %v9713_v4, 7  ;;  %v2055_v1 = vsel %vm15691_vm13, %v2035_v18, %v2036_v46  ;;  %vm15709_vm13 = vmmov %vm15701_vm2 }
 0x392   : > { %v2021_v32 = vmax.f32 %v9691_v58, %v2005_v17  ;;  %v9905_v63 = vmul.f32 %v9131_v10, %v2152_v40  ;;  %v15687_v58 = vrot.slane %v9723_v7, 1  ;;  %v2061_v4 = vsel %vm15695_vm15, %v2045_v19, %v2030_v56  ;;  %vm15714_vm15 = vmmov %vm15701_vm2 }
 0x393   : > { %v9908_v9 = vmul.f32 %v15608_v30, %v2147_v53  ;;  %v2086_v35 = vrot.slane %v2022_v23, 1  ;;  %v2047_v33 = vsel %vm15690_vm8, %v15689_v31, %v2044_v43  ;;  %v2109_v37 = vsel %vm15665_vm0, %v2093_v12, %v2078_v0  ;;  %vm15708_vm8 = vmmov %vm15665_vm0 }
 0x394   : > { %v2085_v22 = vrot.slane %v2021_v32, 1  ;;  %v2037_v44 = vrot.slane %v2021_v32, 7  ;;  %v2094_v13 = vsel %vm15688_vm12, %v15687_v58, %v2093_v12  ;;  %2194 = vrot.lane.b32.xlu1 %v9905_v63, %s7007_s23  ;;  %v2125_v31 = vmul.f32 %v15658_v49, %v2109_v37  ;;  %vm15707_vm12 = vmmov %vm15701_vm2 }
 0x395   : > { %2184 = vrot.lane.b32.xlu0 %v9908_v9, %s7007_s23  ;;  %v2140_v52 = vmax.f32 %v2047_v33, %v2094_v13 }
 0x396   : > { %v2102_v34 = vsel %vm15692_vm10, %v2084_v41, %v2085_v22  ;;  %v2054_v17 = vsel %vm15693_vm7, %v2036_v46, %v2037_v44  ;;  %v2101_v40 = vsel %vm15694_vm5, %v2085_v22, %v2086_v35  ;;  %v2143_v46 = vmax.f32 %v9726_v55, %v2127_v38  ;;  %v15698_v38 = vld [vmem:[#allocation81_spill] sm:$0xff]  ;;  %vm15710_vm10 = vmmov %vm15665_vm0 }
 0x397   : > { %v2132_v53 = vmax.f32 %v2055_v1, %v2102_v34  ;;  %v2133_v58 = vmax.f32 %v2054_v17, %v2101_v40  ;;  %v2062_v22 = vmul.f32 %v15663_v48, %v2061_v4  ;;  %v2156_v12 = vmax.f32 %v9723_v7, %v2140_v52  ;;  %vm15711_vm7 = vmmov %vm15701_vm2 }
 0x398   : > { %2242 = vrot.lane.b32.xlu1 %v9905_v63, %s7006_s22  ;;  %v2108_v55 = vsel %vm15696_vm14, %v2078_v0, %v2079_v29  ;;  %v2038_v34 = vrot.slane %v2022_v23, 7  ;;  %v2087_v29 = vrot.slane %v9864_v25, 1  ;;  %vm15712_vm5 = vmmov %vm15665_vm0 }
 0x399   : > { %2232 = vrot.lane.b32.xlu0 %v9908_v9, %s7006_s22  ;;  %v2148_v18 = vmax.f32 %v2020_v2, %v2132_v53  ;;  %v2149_v41 = vmax.f32 %v2021_v32, %v2133_v58  ;;  %v2046_v2 = vsel %vm15697_vm3, %v2044_v43, %v2045_v19  ;;  %v9958_v32 = vmul.f32 %v15612_v26, %v2143_v46  ;;  %vm15716_vm14 = vmmov %vm15701_vm2 }
 0x39a   : > { %v9961_v33 = vmul.f32 %v15698_v38, %v2156_v12  ;;  %v2126_v7 = vmax.f32 %v2062_v22, %v2108_v55  ;;  %v2141_v1 = vmax.f32 %v2046_v2, %v2125_v31  ;;  %v15699_v19 = vrot.slane %v9864_v25, 7  ;;  %vm15718_vm3 = vmmov %vm15665_vm0 }
 0x39b   : > { %v9942_v13 = vmul.f32 %v15607_v28, %v2148_v18  ;;  %v9945_v56 = vmul.f32 %v15603_v27, %v2149_v41  ;;  %v2053_v40 = vsel %vm15701_vm2, %v2037_v44, %v2038_v34  ;;  %v2100_v53 = vsel %vm15702_vm1, %v2086_v35, %v2087_v29  ;;  %vm15722_vm1 = vmmov %vm15665_vm0 }
 0x39c   : > { %v2142_v0 = vmax.f32 %v9856_v24, %v2126_v7  ;;  %v2157_v43 = vmax.f32 %v9868_v42, %v2141_v1  ;;  %v2052_v17 = vsel %vm15700_vm6, %v2038_v34, %v15699_v19  ;;  %v15703_v24 = vrot.slane %v9803_v21, 1  ;;  %vm15719_vm6 = vmmov %vm15701_vm2 }
 0x39d   : > { %2186 = vrot.lane.b32.xlu0 %v9942_v13, %s7007_s23  ;;  %2188 = vrot.lane.b32.xlu1 %v9945_v56, %s7007_s23  ;;  %v2134_v4 = vmax.f32 %v2053_v40, %v2100_v53  ;;  %vm15720_vm2 = vmmov %vm15665_vm0 }
 0x39e   : > { %v2099_v42 = vsel %vm15704_vm9, %v2087_v29, %v15703_v24  ;;  %v9987_v58 = vmul.f32 %v15614_v8, %v2142_v0  ;;  %v9990_v52 = vmul.f32 %v15613_v3, %v2157_v43  ;;  %vm15725_vm9 = vmmov %vm15665_vm0 }
 0x39f   : > { %v2135_v44 = vmax.f32 %v2052_v17, %v2099_v42  ;;  %v2150_v21 = vmax.f32 %v2022_v23, %v2134_v4 }
 0x3a1   : > { %2176 = vrot.lane.b32.xlu0 %v9958_v32, %s7007_s23  ;;  %2202 = vrot.lane.b32.xlu1 %v9961_v33, %s7007_s23  ;;  %v2151_v35 = vmax.f32 %v9864_v25, %v2135_v44  ;;  %v10005_v18 = vmul.f32 %v15604_v54, %v2150_v21 }
 0x3a3   : > { %v10002_v37 = vmul.f32 %v15605_v47, %v2151_v35 }
 0x3a5   : > { %2224 = vrot.lane.b32.xlu0 %v9958_v32, %s7006_s22  ;;  %2250 = vrot.lane.b32.xlu1 %v9961_v33, %s7006_s22 }
 0x3a9   : > { %2174 = vrot.lane.b32.xlu0 %v9987_v58, %s7007_s23  ;;  %2204 = vrot.lane.b32.xlu1 %v9990_v52, %s7007_s23 }
 0x3ad   : > { %2222 = vrot.lane.b32.xlu0 %v9987_v58, %s7006_s22  ;;  %2252 = vrot.lane.b32.xlu1 %v9990_v52, %s7006_s22 }
 0x3b1   : > { %2192 = vrot.lane.b32.xlu1 %v10002_v37, %s7007_s23  ;;  %2190 = vrot.lane.b32.xlu0 %v10005_v18, %s7007_s23 }
 0x3b5   : > { %2236 = vrot.lane.b32.xlu1 %v9945_v56, %s7006_s22  ;;  %2234 = vrot.lane.b32.xlu0 %v9942_v13, %s7006_s22 }
 0x3b9   : > { %2240 = vrot.lane.b32.xlu1 %v10002_v37, %s7006_s22  ;;  %2238 = vrot.lane.b32.xlu0 %v10005_v18, %s7006_s22 }
 0x3e6   : > { %v2201_v25 = vpop.permute.xlu1 %2200  ;;  %v2179_v23 = vpop.permute.xlu0 %2178 }
 0x3e7   : > { %v2219_v43 = vmul.f32 %v7401_v15, %v2201_v25  ;;  %v2208_v19 = vmul.f32 %v7401_v15, %v2179_v23 }
 0x3ea   : > { %v2249_v41 = vpop.permute.xlu1 %2248  ;;  %v2227_v46 = vpop.permute.xlu0 %2226 }
 0x3eb   : > { %v2267_v1 = vmul.f32 %v7411_v50, %v2249_v41  ;;  %v2256_v34 = vmul.f32 %v7411_v50, %v2227_v46 }
 0x3ed   : > { %v2283_v42 = vmax.f32 %v2219_v43, %v2267_v1  ;;  %v2272_v44 = vmax.f32 %v2208_v19, %v2256_v34 }
 0x3ee   : > { %v2199_v22 = vpop.permute.xlu1 %2198  ;;  %v2181_v12 = vpop.permute.xlu0 %2180 }
 0x3ef   : > { %v2218_v29 = vmul.f32 %v7401_v15, %v2199_v22  ;;  %v2209_v0 = vmul.f32 %v7401_v15, %v2181_v12  ;;  %v10038_v12 = vmax.f32 %v9773_v62, %v2283_v42 }
 0x3f1   : > { %v15018_v34 = vrot.slane %v10038_v12, 1 }
 0x3f2   : > { %v2247_v31 = vpop.permute.xlu1 %2246  ;;  %v2229_v55 = vpop.permute.xlu0 %2228 }
 0x3f3   : > { %v2266_v2 = vmul.f32 %v7411_v50, %v2247_v31  ;;  %v2257_v7 = vmul.f32 %v7411_v50, %v2229_v55  ;;  %v10041_v31 = vmax.f32 %v9776_v45, %v2272_v44 }
 0x3f5   : > { %v2282_v17 = vmax.f32 %v2218_v29, %v2266_v2  ;;  %v2273_v40 = vmax.f32 %v2209_v0, %v2257_v7  ;;  %v15017_v62 = vrot.slane %v10041_v31, 7 }
 0x3f6   : > { %v2197_v53 = vpop.permute.xlu1 %2196 }
 0x3f7   : > { %v2183_v24 = vpop.permute.xlu0 %2182  ;;  %v10028_v4 = vmax.f32 %v9811_v16, %v2282_v17  ;;  %v10031_v35 = vmax.f32 %v9814_v61, %v2273_v40  ;;  %v2217_v46 = vmul.f32 %v7401_v15, %v2197_v53 }
 0x3f8   : > { %v2210_v25 = vmul.f32 %v7401_v15, %v2183_v24 }
 0x3f9   : > { %v2362_v7 = vrot.slane %v10028_v4, 1  ;;  %v2305_v1 = vrot.slane %v10031_v35, 7  ;;  %v15023_v45 = vrot.slane %v10028_v4, 7  ;;  %v15022_v0 = vrot.slane %v10031_v35, 1 }
 0x3fa   : > { %v2245_v21 = vpop.permute.xlu1 %2244 }
 0x3fb   : > { %v2231_v41 = vpop.permute.xlu0 %2230  ;;  %v2265_v23 = vmul.f32 %v7411_v50, %v2245_v21  ;;  %v2368_v43 = vsel %vm15706_vm4, %v2362_v7, %v15018_v34  ;;  %v2330_v19 = vsel %vm15707_vm12, %v15017_v62, %v2305_v1  ;;  %vm15729_vm4 = vmmov %vm15719_vm6 }
 0x3fc   : > { %v2258_v22 = vmul.f32 %v7411_v50, %v2231_v41  ;;  %vm15730_vm12 = vmmov %vm15665_vm0 }
 0x3fd   : > { %v2281_v16 = vmax.f32 %v2217_v46, %v2265_v23 }
 0x3fe   : > { %v2274_v55 = vmax.f32 %v2210_v25, %v2258_v22 }
 0x3ff   : > { %v10044_v61 = vmax.f32 %v9839_v36, %v2281_v16 }
 0x400   : > { %v10047_v2 = vmax.f32 %v9842_v39, %v2274_v55 }
 0x401   : > { %v2313_v29 = vrot.slane %v10044_v61, 7 }
 0x402   : > { %v2354_v36 = vrot.slane %v10047_v2, 1 }
 0x403   : > { %v2321_v39 = vsel %vm15705_vm11, %v2313_v29, %v15023_v45  ;;  %vm15728_vm11 = vmmov %vm15719_vm6 }
 0x404   : > { %v2377_v17 = vsel %vm15708_vm8, %v15022_v0, %v2354_v36  ;;  %v2410_v40 = vmax.f32 %v2321_v39, %v2368_v43  ;;  %v15029_v0 = vrot.slane %v10041_v31, 1  ;;  %vm15731_vm8 = vmmov %vm15729_vm4 }
 0x405   : > { %v2401_v53 = vmax.f32 %v2330_v19, %v2377_v17 }
 0x406   : > { %v2195_v24 = vpop.permute.xlu1 %2194  ;;  %v2426_v44 = vmax.f32 %v10028_v4, %v2410_v40 }
 0x407   : > { %v2185_v42 = vpop.permute.xlu0 %2184  ;;  %v2417_v21 = vmax.f32 %v10031_v35, %v2401_v53  ;;  %v2216_v22 = vmul.f32 %v7401_v15, %v2195_v24  ;;  %v15020_v53 = vrot.slane %v10044_v61, 1  ;;  %v2306_v24 = vrot.slane %v10047_v2, 7 }
 0x408   : > { %v10076_v41 = vmul.f32 %v15609_v59, %v2426_v44  ;;  %v2211_v16 = vmul.f32 %v7401_v15, %v2185_v42 }
 0x409   : > { %v10079_v46 = vmul.f32 %v15615_v60, %v2417_v21 }
 0x40a   : > { %v2243_v25 = vpop.permute.xlu1 %2242  ;;  %2470 = vrot.lane.b32.xlu1 %v10076_v41, %s7007_s23 }
 0x40b   : > { %2452 = vrot.lane.b32.xlu0 %v10079_v46, %s7007_s23  ;;  %v2233_v23 = vpop.permute.xlu0 %2232  ;;  %v2264_v55 = vmul.f32 %v7411_v50, %v2243_v25 }
 0x40c   : > { %v2259_v39 = vmul.f32 %v7411_v50, %v2233_v23 }
 0x40d   : > { %v2280_v43 = vmax.f32 %v2216_v22, %v2264_v55 }
 0x40e   : > { %v2275_v19 = vmax.f32 %v2211_v16, %v2259_v39  ;;  %2518 = vrot.lane.b32.xlu1 %v10076_v41, %s7006_s22 }
 0x40f   : > { %v2189_v17 = vpop.permute.xlu1 %2188  ;;  %2500 = vrot.lane.b32.xlu0 %v10079_v46, %s7006_s22  ;;  %v2187_v40 = vpop.permute.xlu0 %2186  ;;  %v10096_v42 = vmax.f32 %v9905_v63, %v2280_v43  ;;  %v2369_v63 = vsel %vm15710_vm10, %v15020_v53, %v2362_v7  ;;  %vm15734_vm10 = vmmov %vm15729_vm4 }
 0x410   : > { %v10099_v44 = vmax.f32 %v9908_v9, %v2275_v19  ;;  %v2329_v9 = vsel %vm15711_vm7, %v2305_v1, %v2306_v24  ;;  %vm15735_vm7 = vmmov %vm15729_vm4 }
 0x411   : > { %v15019_v21 = vrot.slane %v10096_v42, 7 }
 0x412   : > { %v15021_v25 = vrot.slane %v10099_v44, 1  ;;  %v2307_v45 = vrot.slane %v10099_v44, 7 }
 0x413   : > { %v2203_v23 = vpop.permute.xlu1 %2202  ;;  %v2177_v22 = vpop.permute.xlu0 %2176  ;;  %v2322_v16 = vsel %vm15709_vm13, %v15019_v21, %v2313_v29  ;;  %vm15732_vm13 = vmmov %vm15665_vm0 }
 0x414   : > { %v2376_v55 = vsel %vm15712_vm5, %v2354_v36, %v15021_v25  ;;  %v2409_v39 = vmax.f32 %v2322_v16, %v2369_v63  ;;  %v15030_v25 = vrot.slane %v10038_v12, 7  ;;  %vm15736_vm5 = vmmov %vm15665_vm0 }
 0x415   : > { %v2402_v43 = vmax.f32 %v2329_v9, %v2376_v55  ;;  %v2220_v9 = vmul.f32 %v7401_v15, %v2203_v23  ;;  %v2207_v55 = vmul.f32 %v7401_v15, %v2177_v22 }
 0x416   : > { %v2425_v34 = vmax.f32 %v10044_v61, %v2409_v39 }
 0x417   : > { %v2251_v19 = vpop.permute.xlu1 %2250  ;;  %v2225_v62 = vpop.permute.xlu0 %2224  ;;  %v2418_v29 = vmax.f32 %v10047_v2, %v2402_v43 }
 0x418   : > { %v10120_v21 = vmul.f32 %v15606_v57, %v2425_v34  ;;  %v2268_v34 = vmul.f32 %v7411_v50, %v2251_v19  ;;  %v2255_v63 = vmul.f32 %v7411_v50, %v2225_v62  ;;  %v2213_v19 = vmul.f32 %v7401_v15, %v2189_v17 }
 0x419   : > { %v10123_v7 = vmul.f32 %v8957_v20, %v2418_v29  ;;  %v2212_v62 = vmul.f32 %v7401_v15, %v2187_v40 }
 0x41a   : > { %2468 = vrot.lane.b32.xlu1 %v10120_v21, %s7007_s23  ;;  %v2284_v29 = vmax.f32 %v2220_v9, %v2268_v34  ;;  %v2271_v53 = vmax.f32 %v2207_v55, %v2255_v63  ;;  %v15713_v55 = vrot.slane %v10028_v4, 7 }
 0x41b   : > { %v2205_v1 = vpop.permute.xlu1 %2204  ;;  %2454 = vrot.lane.b32.xlu0 %v10123_v7, %s7007_s23  ;;  %v2175_v36 = vpop.permute.xlu0 %2174 }
 0x41c   : > { %v10145_v60 = vmax.f32 %v9961_v33, %v2284_v29  ;;  %v10148_v34 = vmax.f32 %v9958_v32, %v2271_v53  ;;  %v10156_v17 = vsel %vm15714_vm15, %v15713_v55, %v15030_v25  ;;  %v2360_v32 = vrot.slane %v10096_v42, 1  ;;  %vm15738_vm15 = vmmov %vm15665_vm0 }
 0x41d   : > { %v2221_v33 = vmul.f32 %v7401_v15, %v2205_v1  ;;  %v2328_v29 = vsel %vm15716_vm14, %v2306_v24, %v2307_v45 }
 0x41e   : > { %2516 = vrot.lane.b32.xlu1 %v10120_v21, %s7006_s22 }
 0x41f   : > { %v2253_v16 = vpop.permute.xlu1 %2252  ;;  %2502 = vrot.lane.b32.xlu0 %v10123_v7, %s7006_s22  ;;  %v2223_v2 = vpop.permute.xlu0 %2222 }
 0x420   : > { %v2269_v40 = vmul.f32 %v7411_v50, %v2253_v16 }
 0x423   : > { %v2193_v39 = vpop.permute.xlu1 %2192  ;;  %v2191_v43 = vpop.permute.xlu0 %2190 }
 0x424   : > { %v2215_v1 = vmul.f32 %v7401_v15, %v2193_v39  ;;  %v2214_v16 = vmul.f32 %v7401_v15, %v2191_v43 }
 0x427   : > { %v2237_v5 = vpop.permute.xlu1 %2236  ;;  %v2235_v51 = vpop.permute.xlu0 %2234 }
 0x428   : > { %v2261_v23 = vmul.f32 %v7411_v50, %v2237_v5  ;;  %v2260_v22 = vmul.f32 %v7411_v50, %v2235_v51  ;;  %v15715_v5 = vrot.slane %v10031_v35, 1 }
 0x42a   : > { %v2277_v63 = vmax.f32 %v2213_v19, %v2261_v23  ;;  %v2276_v9 = vmax.f32 %v2212_v62, %v2260_v22  ;;  %v10164_v51 = vsel %vm15665_vm0, %v15029_v0, %v15715_v5  ;;  %v2254_v5 = vmul.f32 %v7411_v50, %v2223_v2  ;;  %vm15740_vm0 = vmmov %vm15729_vm4 }
 0x42b   : > { %v2241_v53 = vpop.permute.xlu1 %2240  ;;  %v2239_v4 = vpop.permute.xlu0 %2238  ;;  %vm15742_vm14 = vmmov %vm15740_vm0 }
 0x42c   : > { %v2293_v19 = vmax.f32 %v9945_v56, %v2277_v63  ;;  %v2292_v35 = vmax.f32 %v9942_v13, %v2276_v9  ;;  %v2263_v62 = vmul.f32 %v7411_v50, %v2241_v53  ;;  %v2262_v23 = vmul.f32 %v7411_v50, %v2239_v4 }
 0x42d   : > { %v2206_v56 = vmul.f32 %v7401_v15, %v2175_v36  ;;  %v2285_v13 = vmax.f32 %v2221_v33, %v2269_v40  ;;  %v15717_v4 = vrot.slane %v10099_v44, 1 }
 0x42e   : > { %v2357_v0 = vrot.slane %v2293_v19, 1  ;;  %v2308_v24 = vrot.slane %v2292_v35, 7  ;;  %v2356_v25 = vrot.slane %v2292_v35, 1  ;;  %v2279_v63 = vmax.f32 %v2215_v1, %v2263_v62 }
 0x42f   : > { %v2278_v9 = vmax.f32 %v2214_v16, %v2262_v23  ;;  %v2309_v53 = vrot.slane %v2293_v19, 7  ;;  %v2270_v40 = vmax.f32 %v2206_v56, %v2254_v5  ;;  %v15721_v62 = vrot.slane %v10044_v61, 1 }
 0x430   : > { %v2375_v55 = vsel %vm15718_vm3, %v15717_v4, %v2356_v25  ;;  %v2327_v39 = vsel %vm15719_vm6, %v2307_v45, %v2308_v24  ;;  %v2374_v2 = vsel %vm15720_vm2, %v2356_v25, %v2357_v0  ;;  %v2295_v43 = vmax.f32 %v10002_v37, %v2279_v63  ;;  %vm15744_vm3 = vmmov %vm15722_vm1 }
 0x431   : > { %v2294_v22 = vmax.f32 %v10005_v18, %v2278_v9  ;;  %v2403_v36 = vmax.f32 %v2328_v29, %v2375_v55  ;;  %v2404_v33 = vmax.f32 %v2327_v39, %v2374_v2  ;;  %v2370_v23 = vsel %vm15722_vm1, %v2360_v32, %v15721_v62  ;;  %vm15745_vm6 = vmmov %vm15722_vm1 }
 0x432   : > { %v15723_v1 = vrot.slane %v10145_v60, 1  ;;  %v15724_v16 = vrot.slane %v10038_v12, 1  ;;  %v15726_v25 = vrot.slane %v10041_v31, 7  ;;  %v15727_v37 = vrot.slane %v10148_v34, 7  ;;  %vm15746_vm2 = vmmov %vm15740_vm0 }
 0x433   : > { %v2311_v29 = vrot.slane %v2295_v43, 7  ;;  %v2359_v55 = vrot.slane %v2295_v43, 1  ;;  %v2310_v61 = vrot.slane %v2294_v22, 7  ;;  %v2358_v5 = vrot.slane %v2294_v22, 1  ;;  %vm15747_vm1 = vmmov %vm15740_vm0 }
 0x434   : > { %v2367_v45 = vsel %vm15725_vm9, %v15724_v16, %v15723_v1  ;;  %v2331_v18 = vsel %vm15728_vm11, %v15727_v37, %v15726_v25  ;;  %v10208_v56 = vmax.f32 %v9990_v52, %v2285_v13  ;;  %v2419_v63 = vmax.f32 %v10099_v44, %v2403_v36  ;;  %vm15748_vm9 = vmmov %vm15744_vm3 }
 0x435   : > { %v2420_v9 = vmax.f32 %v2292_v35, %v2404_v33  ;;  %v2326_v4 = vsel %vm15729_vm4, %v2308_v24, %v2309_v53  ;;  %v2373_v39 = vsel %vm15730_vm12, %v2357_v0, %v2358_v5  ;;  %v2325_v2 = vsel %vm15731_vm8, %v2309_v53, %v2310_v61  ;;  %vm15749_vm11 = vmmov %vm15740_vm0 }
 0x436   : > { %v2372_v62 = vsel %vm15732_vm13, %v2358_v5, %v2359_v55  ;;  %v15733_v1 = vrot.slane %v10096_v42, 7  ;;  %v10224_v44 = vmul.f32 %v15608_v30, %v2419_v63  ;;  %v2405_v24 = vmax.f32 %v2326_v4, %v2373_v39  ;;  %vm15750_vm4 = vmmov %vm15744_vm3 }
 0x437   : > { %v10227_v35 = vmul.f32 %v15607_v28, %v2420_v9  ;;  %v2406_v13 = vmax.f32 %v2325_v2, %v2372_v62  ;;  %v2286_v0 = vmax.f32 %v9987_v58, %v2270_v40  ;;  %v2324_v53 = vsel %vm15735_vm7, %v2310_v61, %v2311_v29  ;;  %vm15752_vm12 = vmmov %vm15744_vm3 }
 0x438   : > { %v2323_v52 = vsel %vm15734_vm10, %v2311_v29, %v15733_v1  ;;  %v2371_v33 = vsel %vm15736_vm5, %v2359_v55, %v2360_v32  ;;  %2456 = vrot.lane.b32.xlu0 %v10224_v44, %s7007_s23  ;;  %v2421_v16 = vmax.f32 %v2293_v19, %v2405_v24  ;;  %v2411_v5 = vmax.f32 %v10156_v17, %v2367_v45  ;;  %vm15753_vm8 = vmmov %vm15740_vm0 }
 0x439   : > { %v2408_v36 = vmax.f32 %v2323_v52, %v2370_v23  ;;  %2458 = vrot.lane.b32.xlu1 %v10227_v35, %s7007_s23  ;;  %v2422_v25 = vmax.f32 %v2294_v22, %v2406_v13  ;;  %v2407_v37 = vmax.f32 %v2324_v53, %v2371_v33  ;;  %v2400_v58 = vmax.f32 %v2331_v18, %v10164_v51  ;;  %vm15754_vm13 = vmmov %vm15744_vm3 }
 0x43a   : > { %v10241_v40 = vmul.f32 %v15603_v27, %v2421_v16  ;;  %v2365_v55 = vrot.slane %v10208_v56, 1  ;;  %v2302_v61 = vrot.slane %v2286_v0, 7  ;;  %v2316_v17 = vrot.slane %v10145_v60, 7  ;;  %vm15755_vm10 = vmmov %vm15740_vm0 }
 0x43b   : > { %v10244_v23 = vmul.f32 %v15604_v54, %v2422_v25  ;;  %v2424_v32 = vmax.f32 %v10096_v42, %v2408_v36  ;;  %v2423_v29 = vmax.f32 %v2295_v43, %v2407_v37  ;;  %v2351_v51 = vrot.slane %v10148_v34, 1  ;;  %vm15756_vm7 = vmmov %vm15744_vm3 }
 0x43c   : > { %2460 = vrot.lane.b32.xlu0 %v10241_v40, %s7007_s23  ;;  %v2427_v42 = vmax.f32 %v10038_v12, %v2411_v5  ;;  %v2416_v43 = vmax.f32 %v10041_v31, %v2400_v58  ;;  %v2317_v45 = vrot.slane %v10208_v56, 7  ;;  %v2350_v18 = vrot.slane %v2286_v0, 1  ;;  %vm15757_vm5 = vmmov %vm15740_vm0 }
 0x43d   : > { %2462 = vrot.lane.b32.xlu1 %v10244_v23, %s7007_s23  ;;  %v10255_v19 = vmul.f32 %v9131_v10, %v2424_v32  ;;  %v10258_v22 = vmul.f32 %v15605_v47, %v2423_v29  ;;  %v15737_v63 = vrot.slane %v10145_v60, 1  ;;  %v15739_v4 = vrot.slane %v10148_v34, 7 }
 0x43e   : > { %v15741_v2 = vrot.slane %v10038_v12, 7  ;;  %v15743_v1 = vrot.slane %v10041_v31, 1  ;;  %v10284_v24 = vmul.f32 %v15610_v14, %v2427_v42  ;;  %v10287_v13 = vmul.f32 %v15611_v11, %v2416_v43 }
 0x43f   : > { %v2366_v9 = vsel %vm15738_vm15, %v15737_v63, %v2365_v55  ;;  %v2332_v39 = vsel %vm15740_vm0, %v2302_v61, %v15739_v4  ;;  %v2381_v33 = vsel %vm15745_vm6, %v2365_v55, %v2350_v18  ;;  %v2333_v12 = vsel %vm15746_vm2, %v2317_v45, %v2302_v61  ;;  %vm15758_vm15 = vmmov %vm15744_vm3 }
 0x440   : > { %2464 = vrot.lane.b32.xlu0 %v10258_v22, %s7007_s23  ;;  %v2319_v62 = vsel %vm15742_vm14, %v15741_v2, %v2316_v17  ;;  %v2379_v52 = vsel %vm15744_vm3, %v2351_v51, %v15743_v1  ;;  %v2397_v25 = vmul.f32 %v15658_v49, %v2381_v33  ;;  %v2334_v37 = vmul.f32 %v15663_v48, %v2333_v12  ;;  %vm15759_vm14 = vmmov %vm15744_vm3 }
 0x441   : > { %2466 = vrot.lane.b32.xlu1 %v10255_v19, %s7007_s23  ;;  %v2412_v36 = vmax.f32 %v2319_v62, %v2366_v9  ;;  %v2399_v53 = vmax.f32 %v2332_v39, %v2379_v52  ;;  %v2318_v5 = vsel %vm15747_vm1, %v2316_v17, %v2317_v45  ;;  %v2380_v58 = vsel %vm15748_vm9, %v2350_v18, %v2351_v51  ;;  %vm15760_vm3 = vmmov %vm15740_vm0 }
 0x442   : > { %v2413_v32 = vmax.f32 %v2318_v5, %v2397_v25  ;;  %v2398_v29 = vmax.f32 %v2334_v37, %v2380_v58  ;;  %vm15761_vm6 = vmmov %vm15750_vm4 }
 0x443   : > { %v2428_v31 = vmax.f32 %v10145_v60, %v2412_v36  ;;  %v2415_v16 = vmax.f32 %v10148_v34, %v2399_v53  ;;  %vm15763_vm2 = vmmov %vm15740_vm0 }
 0x444   : > { %2450 = vrot.lane.b32.xlu0 %v10287_v13, %s7007_s23  ;;  %v2429_v55 = vmax.f32 %v10208_v56, %v2413_v32  ;;  %v2414_v61 = vmax.f32 %v2286_v0, %v2398_v29  ;;  %vm15764_vm1 = vmmov %vm15740_vm0 }
 0x445   : > { %2472 = vrot.lane.b32.xlu1 %v10284_v24, %s7007_s23  ;;  %v10310_v60 = vmul.f32 %v15698_v38, %v2428_v31  ;;  %v10313_v34 = vmul.f32 %v15612_v26, %v2415_v16  ;;  %vm15766_vm9 = vmmov %vm15750_vm4 }
 0x446   : > { %v10325_v17 = vmul.f32 %v15613_v3, %v2429_v55  ;;  %v10328_v51 = vmul.f32 %v15614_v8, %v2414_v61 }
 0x448   : > { %2498 = vrot.lane.b32.xlu0 %v10287_v13, %s7006_s22 }
 0x449   : > { %2520 = vrot.lane.b32.xlu1 %v10284_v24, %s7006_s22 }
 0x44c   : > { %2448 = vrot.lane.b32.xlu0 %v10313_v34, %s7007_s23 }
 0x44d   : > { %2474 = vrot.lane.b32.xlu1 %v10310_v60, %s7007_s23 }
 0x450   : > { %2496 = vrot.lane.b32.xlu0 %v10313_v34, %s7006_s22 }
 0x451   : > { %2522 = vrot.lane.b32.xlu1 %v10310_v60, %s7006_s22 }
 0x454   : > { %2446 = vrot.lane.b32.xlu0 %v10328_v51, %s7007_s23 }
 0x455   : > { %2476 = vrot.lane.b32.xlu1 %v10325_v17, %s7007_s23 }
 0x458   : > { %2494 = vrot.lane.b32.xlu0 %v10328_v51, %s7006_s22 }
 0x459   : > { %2524 = vrot.lane.b32.xlu1 %v10325_v17, %s7006_s22 }
 0x45c   : > { %2504 = vrot.lane.b32.xlu0 %v10224_v44, %s7006_s22 }
 0x45d   : > { %2506 = vrot.lane.b32.xlu1 %v10227_v35, %s7006_s22 }
 0x460   : > { %2508 = vrot.lane.b32.xlu0 %v10241_v40, %s7006_s22 }
 0x461   : > { %2510 = vrot.lane.b32.xlu1 %v10244_v23, %s7006_s22 }
 0x464   : > { %2512 = vrot.lane.b32.xlu0 %v10258_v22, %s7006_s22 }
 0x465   : > { %2514 = vrot.lane.b32.xlu1 %v10255_v19, %s7006_s22 }
 0x47c   : > { %v2471_v56 = vpop.permute.xlu1 %2470 }
 0x47d   : > { %v2453_v0 = vpop.permute.xlu0 %2452  ;;  %v2490_v8 = vmul.f32 %v7401_v15, %v2471_v56 }
 0x47e   : > { %v2481_v3 = vmul.f32 %v7401_v15, %v2453_v0 }
 0x480   : > { %v2519_v42 = vpop.permute.xlu1 %2518 }
 0x481   : > { %v2501_v43 = vpop.permute.xlu0 %2500  ;;  %v2538_v32 = vmul.f32 %v7411_v50, %v2519_v42 }
 0x482   : > { %v2529_v29 = vmul.f32 %v7411_v50, %v2501_v43 }
 0x483   : > { %v2554_v48 = vmax.f32 %v2490_v8, %v2538_v32 }
 0x484   : > { %v2545_v49 = vmax.f32 %v2481_v3, %v2529_v29 }
 0x485   : > { %v10381_v56 = vmax.f32 %v10076_v41, %v2554_v48 }
 0x486   : > { %v10384_v0 = vmax.f32 %v10079_v46, %v2545_v49 }
 0x48c   : > { %v2469_v45 = vpop.permute.xlu1 %2468 }
 0x48d   : > { %v2455_v18 = vpop.permute.xlu0 %2454  ;;  %v2489_v55 = vmul.f32 %v7401_v15, %v2469_v45 }
 0x48e   : > { %v2482_v61 = vmul.f32 %v7401_v15, %v2455_v18 }
 0x490   : > { %v2517_v63 = vpop.permute.xlu1 %2516 }
 0x491   : > { %v2503_v9 = vpop.permute.xlu0 %2502  ;;  %v2537_v25 = vmul.f32 %v7411_v50, %v2517_v63 }
 0x492   : > { %v2530_v37 = vmul.f32 %v7411_v50, %v2503_v9 }
 0x493   : > { %v2553_v26 = vmax.f32 %v2489_v55, %v2537_v25 }
 0x494   : > { %v2546_v63 = vmax.f32 %v2482_v61, %v2530_v37 }
 0x495   : > { %v10371_v42 = vmax.f32 %v10120_v21, %v2553_v26  ;;  %v15045_v21 = vrot.slane %v10381_v56, 1 }
 0x496   : > { %v10374_v43 = vmax.f32 %v10123_v7, %v2546_v63  ;;  %v15040_v7 = vrot.slane %v10384_v0, 7 }
 0x497   : > { %v15046_v25 = vrot.slane %v10371_v42, 1 }
 0x498   : > { %v2578_v8 = vrot.slane %v10374_v43, 7 }
 0x499   : > { %v10406_v55 = vsel %vm15750_vm4, %v15046_v25, %v15045_v21 }
 0x49a   : > { %v2601_v29 = vsel %vm15749_vm11, %v15040_v7, %v2578_v8  ;;  %vm15768_vm11 = vmmov %vm15750_vm4 }
 0x49b   : > { %vm15770_vm4 = vmmov %vm15740_vm0 }
 0x4aa   : > { %v2457_v39 = vpop.permute.xlu0 %2456 }
 0x4ab   : > { %v2459_v4 = vpop.permute.xlu1 %2458  ;;  %v2483_v41 = vmul.f32 %v7401_v15, %v2457_v39 }
 0x4ac   : > { %v2484_v48 = vmul.f32 %v7401_v15, %v2459_v4 }
 0x4ae   : > { %v2461_v62 = vpop.permute.xlu0 %2460 }
 0x4af   : > { %v2463_v2 = vpop.permute.xlu1 %2462  ;;  %v2485_v39 = vmul.f32 %v7401_v15, %v2461_v62 }
 0x4b0   : > { %v2486_v4 = vmul.f32 %v7401_v15, %v2463_v2 }
 0x4b2   : > { %v2465_v52 = vpop.permute.xlu0 %2464 }
 0x4b3   : > { %v2467_v1 = vpop.permute.xlu1 %2466  ;;  %v2487_v7 = vmul.f32 %v7401_v15, %v2465_v52 }
 0x4b4   : > { %v2488_v49 = vmul.f32 %v7401_v15, %v2467_v1 }
 0x4b6   : > { %v2451_v53 = vpop.permute.xlu0 %2450 }
 0x4b7   : > { %v2473_v36 = vpop.permute.xlu1 %2472 }
 0x4b8   : > { %v2491_v14 = vmul.f32 %v7401_v15, %v2473_v36 }
 0x4ba   : > { %v2499_v12 = vpop.permute.xlu0 %2498 }
 0x4bb   : > { %v2521_v33 = vpop.permute.xlu1 %2520 }
 0x4bc   : > { %v2539_v21 = vmul.f32 %v7411_v50, %v2521_v33 }
 0x4be   : > { %v10352_v16 = vpop.permute.xlu0 %2448 }
 0x4bf   : > { %v10350_v31 = vpop.permute.xlu1 %2474 }
 0x4c2   : > { %v10358_v58 = vpop.permute.xlu0 %2496 }
 0x4c3   : > { %v10356_v5 = vpop.permute.xlu1 %2522 }
 0x4c6   : > { %v10368_v9 = vpop.permute.xlu0 %2446 }
 0x4c7   : > { %v10366_v38 = vpop.permute.xlu1 %2476 }
 0x4ca   : > { %v10378_v18 = vpop.permute.xlu0 %2494 }
 0x4cb   : > { %v10376_v45 = vpop.permute.xlu1 %2524 }
 0x4ce   : > { %v2505_v26 = vpop.permute.xlu0 %2504 }
 0x4cf   : > { %v2507_v3 = vpop.permute.xlu1 %2506  ;;  %v2531_v32 = vmul.f32 %v7411_v50, %v2505_v26 }
 0x4d0   : > { %v2532_v37 = vmul.f32 %v7411_v50, %v2507_v3 }
 0x4d1   : > { %v2547_v63 = vmax.f32 %v2483_v41, %v2531_v32  ;;  %v2528_v32 = vmul.f32 %v7411_v50, %v2499_v12 }
 0x4d2   : > { %v2548_v61 = vmax.f32 %v2484_v48, %v2532_v37  ;;  %v2509_v26 = vpop.permute.xlu0 %2508  ;;  %v2480_v37 = vmul.f32 %v7401_v15, %v2451_v53  ;;  %v15751_v53 = vrot.slane %v10374_v43, 1 }
 0x4d3   : > { %v2511_v3 = vpop.permute.xlu1 %2510  ;;  %v2533_v11 = vmul.f32 %v7411_v50, %v2509_v26  ;;  %v2563_v62 = vmax.f32 %v10224_v44, %v2547_v63 }
 0x4d4   : > { %v2534_v46 = vmul.f32 %v7411_v50, %v2511_v3  ;;  %v2564_v2 = vmax.f32 %v10227_v35, %v2548_v61  ;;  %v2555_v61 = vmax.f32 %v2491_v14, %v2539_v21 }
 0x4d5   : > { %v2549_v1 = vmax.f32 %v2485_v39, %v2533_v11  ;;  %v2579_v25 = vrot.slane %v2563_v62, 7  ;;  %v2627_v3 = vrot.slane %v2563_v62, 1 }
 0x4d6   : > { %v2550_v48 = vmax.f32 %v2486_v4, %v2534_v46  ;;  %v2580_v41 = vrot.slane %v2564_v2, 7  ;;  %v2628_v52 = vrot.slane %v2564_v2, 1  ;;  %v2513_v26 = vpop.permute.xlu0 %2512 }
 0x4d7   : > { %v2515_v59 = vpop.permute.xlu1 %2514  ;;  %v2565_v33 = vmax.f32 %v10241_v40, %v2549_v1  ;;  %v2535_v44 = vmul.f32 %v7411_v50, %v2513_v26  ;;  %v2648_v11 = vsel %vm15752_vm12, %v15751_v53, %v2627_v3  ;;  %v2600_v12 = vsel %vm15753_vm8, %v2578_v8, %v2579_v25  ;;  %vm15772_vm12 = vmmov %vm15740_vm0 }
 0x4d8   : > { %v2566_v36 = vmax.f32 %v10244_v23, %v2550_v48  ;;  %v2536_v35 = vmul.f32 %v7411_v50, %v2515_v59  ;;  %v2647_v46 = vsel %vm15754_vm13, %v2627_v3, %v2628_v52  ;;  %v2674_v48 = vmax.f32 %v2601_v29, %v2648_v11  ;;  %vm15774_vm8 = vmmov %vm15761_vm6 }
 0x4d9   : > { %v2581_v39 = vrot.slane %v2565_v33, 7  ;;  %v2629_v40 = vrot.slane %v2565_v33, 1  ;;  %v2551_v59 = vmax.f32 %v2487_v7, %v2535_v44  ;;  %v2675_v1 = vmax.f32 %v2600_v12, %v2647_v46  ;;  %vm15775_vm13 = vmmov %vm15761_vm6 }
 0x4da   : > { %v2582_v4 = vrot.slane %v2566_v36, 7  ;;  %v2630_v23 = vrot.slane %v2566_v36, 1  ;;  %v2552_v63 = vmax.f32 %v2488_v49, %v2536_v35  ;;  %v2599_v14 = vsel %vm15755_vm10, %v2579_v25, %v2580_v41  ;;  %vm15776_vm10 = vmmov %vm15740_vm0 }
 0x4db   : > { %v2646_v21 = vsel %vm15756_vm7, %v2628_v52, %v2629_v40  ;;  %v2598_v8 = vsel %vm15757_vm5, %v2580_v41, %v2581_v39  ;;  %v2567_v53 = vmax.f32 %v10258_v22, %v2551_v59  ;;  %v2690_v7 = vmax.f32 %v10374_v43, %v2674_v48  ;;  %vm15777_vm7 = vmmov %vm15740_vm0 }
 0x4dc   : > { %v2645_v3 = vsel %vm15758_vm15, %v2629_v40, %v2630_v23  ;;  %v2568_v26 = vmax.f32 %v10255_v19, %v2552_v63  ;;  %v2691_v49 = vmax.f32 %v2563_v62, %v2675_v1  ;;  %v2544_v29 = vmax.f32 %v2480_v37, %v2528_v32  ;;  %vm15778_vm5 = vmmov %vm15761_vm6 }
 0x4dd   : > { %v2676_v35 = vmax.f32 %v2599_v14, %v2646_v21  ;;  %v2677_v44 = vmax.f32 %v2598_v8, %v2645_v3  ;;  %v2597_v25 = vsel %vm15740_vm0, %v2581_v39, %v2582_v4  ;;  %v2583_v12 = vrot.slane %v2567_v53, 7  ;;  %vm15781_vm15 = vmmov %vm15778_vm5 }
 0x4de   : > { %v2584_v52 = vrot.slane %v2568_v26, 7  ;;  %v2632_v11 = vrot.slane %v2568_v26, 1  ;;  %v2631_v41 = vrot.slane %v2567_v53, 1  ;;  %v10446_v46 = vmul.f32 %v8957_v20, %v2690_v7 }
 0x4df   : > { %v10449_v19 = vmul.f32 %v15608_v30, %v2691_v49  ;;  %v2692_v22 = vmax.f32 %v2564_v2, %v2676_v35  ;;  %v2693_v40 = vmax.f32 %v2565_v33, %v2677_v44  ;;  %v2596_v37 = vsel %vm15760_vm3, %v2582_v4, %v2583_v12  ;;  %vm15783_vm3 = vmmov %vm15778_vm5 }
 0x4e0   : > { %v2644_v62 = vsel %vm15759_vm14, %v2630_v23, %v2631_v41  ;;  %v2643_v32 = vsel %vm15761_vm6, %v2631_v41, %v2632_v11  ;;  %v15762_v39 = vrot.slane %v10371_v42, 7  ;;  %2726 = vrot.lane.b32.xlu0 %v10446_v46, %s7007_s23  ;;  %v10472_v23 = vmax.f32 %v10284_v24, %v2555_v61  ;;  %vm15782_vm14 = vmmov %vm15740_vm0 }
 0x4e1   : > { %2728 = vrot.lane.b32.xlu1 %v10449_v19, %s7007_s23  ;;  %v10466_v2 = vmul.f32 %v15607_v28, %v2692_v22  ;;  %v10469_v33 = vmul.f32 %v15603_v27, %v2693_v40  ;;  %v2678_v4 = vmax.f32 %v2597_v25, %v2644_v62  ;;  %v2679_v59 = vmax.f32 %v2596_v37, %v2643_v32  ;;  %vm15786_vm6 = vmmov %vm15783_vm3 }
 0x4e2   : > { %v2594_v63 = vsel %vm15763_vm2, %v2584_v52, %v15762_v39  ;;  %v2595_v48 = vsel %vm15764_vm1, %v2583_v12, %v2584_v52  ;;  %v15765_v1 = vrot.slane %v10371_v42, 1  ;;  %v10481_v21 = vmax.f32 %v10287_v13, %v2544_v29  ;;  %vm15787_vm2 = vmmov %vm15740_vm0 }
 0x4e3   : > { %v2694_v8 = vmax.f32 %v2566_v36, %v2678_v4  ;;  %v2681_v3 = vmax.f32 %v2594_v63, %v10406_v55  ;;  %v2540_v24 = vmul.f32 %v7411_v50, %v10356_v5  ;;  %v2527_v61 = vmul.f32 %v7411_v50, %v10358_v58  ;;  %vm15790_vm1 = vmmov %vm15740_vm0 }
 0x4e4   : > { %v2642_v14 = vsel %vm15766_vm9, %v2632_v11, %v15765_v1  ;;  %v2695_v49 = vmax.f32 %v2567_v53, %v2679_v59  ;;  %2730 = vrot.lane.b32.xlu0 %v10466_v2, %s7007_s23  ;;  %v2492_v55 = vmul.f32 %v7401_v15, %v10350_v31  ;;  %v2479_v36 = vmul.f32 %v7401_v15, %v10352_v16  ;;  %vm15791_vm9 = vmmov %vm15783_vm3 }
 0x4e5   : > { %v2680_v7 = vmax.f32 %v2595_v48, %v2642_v14  ;;  %2732 = vrot.lane.b32.xlu1 %v10469_v33, %s7007_s23  ;;  %v10493_v13 = vmul.f32 %v15604_v54, %v2694_v8  ;;  %v2635_v58 = vrot.slane %v10472_v23, 1  ;;  %v2576_v53 = vrot.slane %v10481_v21, 7 }
 0x4e6   : > { %v10500_v5 = vmul.f32 %v15605_v47, %v2695_v49  ;;  %v2697_v29 = vmax.f32 %v10371_v42, %v2681_v3  ;;  %v2556_v44 = vmax.f32 %v2492_v55, %v2540_v24  ;;  %v2543_v25 = vmax.f32 %v2479_v36, %v2527_v61  ;;  %v15780_v49 = vld [vmem:[#allocation120_spill] sm:$0xff] }
 0x4e7   : > { %v2696_v35 = vmax.f32 %v2568_v26, %v2680_v7  ;;  %v2586_v31 = vrot.slane %v10381_v56, 7  ;;  %v2625_v16 = vrot.slane %v10384_v0, 1  ;;  %v15767_v26 = vrot.slane %v10381_v56, 1 }
 0x4e8   : > { %2734 = vrot.lane.b32.xlu0 %v10493_v13, %s7007_s23  ;;  %v10512_v52 = vmul.f32 %v15606_v57, %v2697_v29  ;;  %v15769_v41 = vrot.slane %v10384_v0, 7  ;;  %v10526_v40 = vmax.f32 %v10310_v60, %v2556_v44  ;;  %v10529_v62 = vmax.f32 %v10313_v34, %v2543_v25 }
 0x4e9   : > { %2736 = vrot.lane.b32.xlu1 %v10500_v5, %s7007_s23  ;;  %v10515_v11 = vmul.f32 %v9131_v10, %v2696_v35  ;;  %v2640_v12 = vsel %vm15768_vm11, %v15767_v26, %v2635_v58  ;;  %v2541_v37 = vmul.f32 %v7411_v50, %v10376_v45  ;;  %v2526_v32 = vmul.f32 %v7411_v50, %v10378_v18  ;;  %vm15796_vm11 = vmmov %vm15740_vm0 }
 0x4ea   : > { %v2602_v22 = vsel %vm15770_vm4, %v2576_v53, %v15769_v41  ;;  %v2493_v39 = vmul.f32 %v7401_v15, %v10366_v38  ;;  %v2478_v60 = vmul.f32 %v7401_v15, %v10368_v9  ;;  %v15771_v34 = vrot.slane %v10371_v42, 7  ;;  %vm15797_vm4 = vmmov %vm15783_vm3 }
 0x4eb   : > { %v15773_v63 = vrot.slane %v10374_v43, 1  ;;  %v2636_v48 = vrot.slane %v10526_v40, 1  ;;  %v2575_v1 = vrot.slane %v10529_v62, 7  ;;  %v2587_v9 = vrot.slane %v10472_v23, 7 }
 0x4ec   : > { %2738 = vrot.lane.b32.xlu0 %v10515_v11, %s7007_s23  ;;  %v2593_v45 = vsel %vm15772_vm12, %v15771_v34, %v2586_v31  ;;  %v2557_v38 = vmax.f32 %v2493_v39, %v2541_v37  ;;  %v2542_v14 = vmax.f32 %v2478_v60, %v2526_v32  ;;  %v2624_v42 = vrot.slane %v10481_v21, 1  ;;  %v15785_v32 = vld [vmem:[#allocation93_spill] sm:$0xff]  ;;  %vm15798_vm12 = vmmov %vm15740_vm0 }
 0x4ed   : > { %2740 = vrot.lane.b32.xlu1 %v10512_v52, %s7007_s23  ;;  %v2649_v18 = vsel %vm15774_vm8, %v2625_v16, %v15773_v63  ;;  %v2682_v4 = vmax.f32 %v2593_v45, %v2640_v12  ;;  %v2639_v24 = vsel %vm15775_vm13, %v2635_v58, %v2636_v48  ;;  %v2603_v61 = vsel %vm15776_vm10, %v2575_v1, %v2576_v53  ;;  %vm15799_vm8 = vmmov %vm15783_vm3 }
 0x4ee   : > { %v2673_v59 = vmax.f32 %v2602_v22, %v2649_v18  ;;  %v2573_v3 = vmax.f32 %v10325_v17, %v2557_v38  ;;  %v2558_v7 = vmax.f32 %v10328_v51, %v2542_v14  ;;  %v2650_v17 = vsel %vm15778_vm5, %v2624_v42, %v2625_v16  ;;  %vm15800_vm13 = vmmov %vm15740_vm0 }
 0x4ef   : > { %v2698_v43 = vmax.f32 %v10381_v56, %v2682_v4  ;;  %v2592_v56 = vsel %vm15777_vm7, %v2586_v31, %v2587_v9  ;;  %v2672_v58 = vmax.f32 %v2603_v61, %v2650_v17  ;;  %v2588_v35 = vrot.slane %v10526_v40, 7  ;;  %v15794_v17 = vld [vmem:[#allocation103_spill] sm:$0xff]  ;;  %vm15801_vm10 = vmmov %vm15783_vm3 }
 0x4f0   : > { %2774 = vrot.lane.b32.xlu0 %v10446_v46, %s7006_s22  ;;  %v2689_v8 = vmax.f32 %v10384_v0, %v2673_v59  ;;  %v15779_v0 = vld [vmem:[#allocation131_spill] sm:$0xff]  ;;  %v2683_v36 = vmax.f32 %v2592_v56, %v2639_v24  ;;  %v2637_v53 = vrot.slane %v2573_v3, 1  ;;  %v2574_v29 = vrot.slane %v2558_v7, 7  ;;  %v15788_v59 = vld [vmem:[#allocation10_spill] sm:$0xff]  ;;  %vm15802_vm7 = vmmov %vm15740_vm0 }
 0x4f1   : > { %2776 = vrot.lane.b32.xlu1 %v10449_v19, %s7006_s22  ;;  %v10576_v51 = vmul.f32 %v15779_v0, %v2698_v43  ;;  %v2623_v44 = vrot.slane %v10529_v62, 1  ;;  %v2688_v31 = vmax.f32 %v10481_v21, %v2672_v58  ;;  %v2589_v16 = vrot.slane %v2573_v3, 7  ;;  %v15784_v21 = vld [vmem:[#allocation82_spill] sm:$0xff]  ;;  %vm15803_vm5 = vmmov %vm15783_vm3 }
 0x4f2   : > { %v10579_v55 = vmul.f32 %v15780_v49, %v2689_v8  ;;  %v2699_v25 = vmax.f32 %v10472_v23, %v2683_v36  ;;  %v2622_v26 = vrot.slane %v2558_v7, 1  ;;  %v2638_v12 = vsel %vm15781_vm15, %v2636_v48, %v2637_v53  ;;  %v15795_v58 = vld [vmem:[#allocation78_spill] sm:$0xff]  ;;  %vm15804_vm15 = vmmov %vm15740_vm0 }
 0x4f3   : > { %v2604_v41 = vsel %vm15740_vm0, %v2574_v29, %v2575_v1  ;;  %v2591_v22 = vsel %vm15782_vm14, %v2587_v9, %v2588_v35  ;;  %v2651_v23 = vsel %vm15783_vm3, %v2623_v44, %v2624_v42  ;;  %v10605_v39 = vmul.f32 %v15785_v32, %v2688_v31  ;;  %v15789_v1 = vld [vmem:[#allocation9_spill] sm:$0xff]  ;;  %vm15805_vm0 = vmmov %vm15783_vm3 }
 0x4f4   : > { %2778 = vrot.lane.b32.xlu0 %v10466_v2, %s7006_s22  ;;  %v10602_v37 = vmul.f32 %v15784_v21, %v2699_v25  ;;  %v2684_v60 = vmax.f32 %v2591_v22, %v2638_v12  ;;  %v2671_v34 = vmax.f32 %v2604_v41, %v2651_v23  ;;  %v2653_v45 = vsel %vm15786_vm6, %v2637_v53, %v2622_v26  ;;  %v15792_v42 = vld [vmem:[#allocation81_spill] sm:$0xff]  ;;  %vm15806_vm14 = vmmov %vm15790_vm1 }
 0x4f5   : > { %2780 = vrot.lane.b32.xlu1 %v10469_v33, %s7006_s22  ;;  %v2605_v63 = vsel %vm15787_vm2, %v2589_v16, %v2574_v29  ;;  %v2669_v48 = vmul.f32 %v15788_v59, %v2653_v45  ;;  %v2590_v14 = vsel %vm15790_vm1, %v2588_v35, %v2589_v16  ;;  %v2652_v9 = vsel %vm15791_vm9, %v2622_v26, %v2623_v44  ;;  %vm15807_vm3 = vmmov %vm15805_vm0 }
 0x4f6   : > { %v2700_v18 = vmax.f32 %v10526_v40, %v2684_v60  ;;  %v2687_v4 = vmax.f32 %v10529_v62, %v2671_v34  ;;  %v2606_v38 = vmul.f32 %v15789_v1, %v2605_v63  ;;  %v15793_v62 = vld [vmem:[#allocation96_spill] sm:$0xff]  ;;  %vm15808_vm6 = vmmov %vm15790_vm1 }
 0x4f7   : > { %v2685_v8 = vmax.f32 %v2590_v14, %v2669_v48  ;;  %vm15810_vm2 = vmmov %vm15790_vm1 }
 0x4f8   : > { %2724 = vrot.lane.b32.xlu0 %v10579_v55, %s7007_s23  ;;  %v10628_v40 = vmul.f32 %v15792_v42, %v2700_v18  ;;  %v10631_v43 = vmul.f32 %v15793_v62, %v2687_v4  ;;  %v2670_v24 = vmax.f32 %v2606_v38, %v2652_v9  ;;  %vm15812_vm1 = vmmov %vm15805_vm0 }
 0x4f9   : > { %2742 = vrot.lane.b32.xlu1 %v10576_v51, %s7007_s23  ;;  %v2701_v61 = vmax.f32 %v2573_v3, %v2685_v8  ;;  %vm15813_vm9 = vmmov %vm15805_vm0 }
 0x4fa   : > { %v2686_v56 = vmax.f32 %v2558_v7, %v2670_v24 }
 0x4fb   : > { %v10642_v36 = vmul.f32 %v15794_v17, %v2701_v61 }
 0x4fc   : > { %2772 = vrot.lane.b32.xlu0 %v10579_v55, %s7006_s22  ;;  %v10645_v53 = vmul.f32 %v15795_v58, %v2686_v56 }
 0x4fd   : > { %2790 = vrot.lane.b32.xlu1 %v10576_v51, %s7006_s22 }
 0x500   : > { %2722 = vrot.lane.b32.xlu0 %v10605_v39, %s7007_s23 }
 0x501   : > { %2744 = vrot.lane.b32.xlu1 %v10602_v37, %s7007_s23 }
 0x504   : > { %2770 = vrot.lane.b32.xlu0 %v10605_v39, %s7006_s22 }
 0x505   : > { %2792 = vrot.lane.b32.xlu1 %v10602_v37, %s7006_s22 }
 0x508   : > { %2720 = vrot.lane.b32.xlu0 %v10631_v43, %s7007_s23 }
 0x509   : > { %2746 = vrot.lane.b32.xlu1 %v10628_v40, %s7007_s23 }
 0x50c   : > { %2768 = vrot.lane.b32.xlu0 %v10631_v43, %s7006_s22 }
 0x50d   : > { %2794 = vrot.lane.b32.xlu1 %v10628_v40, %s7006_s22 }
 0x510   : > { %2718 = vrot.lane.b32.xlu0 %v10645_v53, %s7007_s23 }
 0x511   : > { %2748 = vrot.lane.b32.xlu1 %v10642_v36, %s7007_s23 }
 0x514   : > { %2766 = vrot.lane.b32.xlu0 %v10645_v53, %s7006_s22 }
 0x515   : > { %2796 = vrot.lane.b32.xlu1 %v10642_v36, %s7006_s22 }
 0x518   : > { %2782 = vrot.lane.b32.xlu0 %v10493_v13, %s7006_s22 }
 0x519   : > { %2784 = vrot.lane.b32.xlu1 %v10500_v5, %s7006_s22 }
 0x51c   : > { %2786 = vrot.lane.b32.xlu0 %v10515_v11, %s7006_s22 }
 0x51d   : > { %2788 = vrot.lane.b32.xlu1 %v10512_v52, %s7006_s22 }
 0x552   : > { %v2727_v7 = vpop.permute.xlu0 %2726 }
 0x553   : > { %v2729_v3 = vpop.permute.xlu1 %2728  ;;  %v2754_v22 = vmul.f32 %v7401_v15, %v2727_v7 }
 0x554   : > { %v2755_v41 = vmul.f32 %v7401_v15, %v2729_v3 }
 0x556   : > { %v2731_v35 = vpop.permute.xlu0 %2730 }
 0x557   : > { %v2733_v29 = vpop.permute.xlu1 %2732  ;;  %v2756_v14 = vmul.f32 %v7401_v15, %v2731_v35 }
 0x558   : > { %v2757_v38 = vmul.f32 %v7401_v15, %v2733_v29 }
 0x55a   : > { %v2735_v25 = vpop.permute.xlu0 %2734 }
 0x55b   : > { %v2737_v44 = vpop.permute.xlu1 %2736 }
 0x55e   : > { %v10665_v16 = vpop.permute.xlu0 %2738 }
 0x55f   : > { %v10663_v31 = vpop.permute.xlu1 %2740  ;;  %v2760_v59 = vmul.f32 %v7401_v15, %v10665_v16 }
 0x560   : > { %v2761_v62 = vmul.f32 %v7401_v15, %v10663_v31 }
 0x562   : > { %v2775_v12 = vpop.permute.xlu0 %2774 }
 0x563   : > { %v2777_v26 = vpop.permute.xlu1 %2776  ;;  %v2802_v60 = vmul.f32 %v7411_v50, %v2775_v12 }
 0x564   : > { %v2803_v23 = vmul.f32 %v7411_v50, %v2777_v26 }
 0x565   : > { %v2818_v45 = vmax.f32 %v2754_v22, %v2802_v60 }
 0x566   : > { %v2819_v34 = vmax.f32 %v2755_v41, %v2803_v23  ;;  %v2779_v18 = vpop.permute.xlu0 %2778 }
 0x567   : > { %v2781_v63 = vpop.permute.xlu1 %2780  ;;  %v2804_v48 = vmul.f32 %v7411_v50, %v2779_v18  ;;  %v10679_v8 = vmax.f32 %v10446_v46, %v2818_v45 }
 0x568   : > { %v2805_v4 = vmul.f32 %v7411_v50, %v2781_v63  ;;  %v10676_v9 = vmax.f32 %v10449_v19, %v2819_v34 }
 0x569   : > { %v2820_v61 = vmax.f32 %v2756_v14, %v2804_v48  ;;  %v15050_v26 = vrot.slane %v10679_v8, 7 }
 0x56a   : > { %v2821_v24 = vmax.f32 %v2757_v38, %v2805_v4  ;;  %v2725_v3 = vpop.permute.xlu0 %2724  ;;  %v2851_v7 = vrot.slane %v10676_v9, 7  ;;  %v15049_v19 = vrot.slane %v10676_v9, 1 }
 0x56b   : > { %v10681_v56 = vpop.permute.xlu1 %2742  ;;  %v2836_v29 = vmax.f32 %v10466_v2, %v2820_v61 }
 0x56c   : > { %v10686_v12 = vmax.f32 %v10469_v33, %v2821_v24  ;;  %v2872_v60 = vsel %vm15796_vm11, %v15050_v26, %v2851_v7  ;;  %vm15814_vm11 = vmmov %vm15810_vm2 }
 0x56d   : > { %v2852_v46 = vrot.slane %v2836_v29, 7  ;;  %v2900_v41 = vrot.slane %v2836_v29, 1 }
 0x56e   : > { %v2901_v35 = vrot.slane %v10686_v12, 1  ;;  %v2773_v23 = vpop.permute.xlu0 %2772  ;;  %v2853_v57 = vrot.slane %v10686_v12, 7 }
 0x56f   : > { %v10691_v22 = vpop.permute.xlu1 %2790  ;;  %v2919_v33 = vsel %vm15797_vm4, %v15049_v19, %v2900_v41  ;;  %v2871_v2 = vsel %vm15798_vm12, %v2851_v7, %v2852_v46  ;;  %vm15815_vm4 = vmmov %vm15805_vm0 }
 0x570   : > { %v2918_v34 = vsel %vm15799_vm8, %v2900_v41, %v2901_v35  ;;  %v2947_v45 = vmax.f32 %v2872_v60, %v2919_v33  ;;  %vm15816_vm12 = vmmov %vm15805_vm0 }
 0x571   : > { %v2948_v63 = vmax.f32 %v2871_v2, %v2918_v34  ;;  %vm15817_vm8 = vmmov %vm15810_vm2 }
 0x572   : > { %v2723_v4 = vpop.permute.xlu0 %2722  ;;  %v2963_v48 = vmax.f32 %v10676_v9, %v2947_v45 }
 0x573   : > { %v10705_v18 = vpop.permute.xlu1 %2744  ;;  %v2964_v38 = vmax.f32 %v2836_v29, %v2948_v63 }
 0x574   : > { %v10711_v24 = vmul.f32 %v15608_v30, %v2963_v48  ;;  %v2759_v30 = vmul.f32 %v7401_v15, %v2737_v44  ;;  %v2801_v44 = vmul.f32 %v7411_v50, %v2773_v23 }
 0x575   : > { %v10714_v61 = vmul.f32 %v15607_v28, %v2964_v38  ;;  %v2758_v28 = vmul.f32 %v7401_v15, %v2735_v25 }
 0x576   : > { %v2771_v7 = vpop.permute.xlu0 %2770  ;;  %3000 = vrot.lane.b32.xlu0 %v10711_v24, %s7007_s23 }
 0x577   : > { %v10708_v14 = vpop.permute.xlu1 %2792  ;;  %3002 = vrot.lane.b32.xlu1 %v10714_v61, %s7007_s23 }
 0x57a   : > { %v10722_v60 = vpop.permute.xlu0 %2720 }
 0x57b   : > { %v10720_v41 = vpop.permute.xlu1 %2746 }
 0x57e   : > { %v2769_v33 = vpop.permute.xlu0 %2768 }
 0x57f   : > { %v2795_v29 = vpop.permute.xlu1 %2794 }
 0x582   : > { %v10726_v34 = vpop.permute.xlu0 %2718 }
 0x583   : > { %v10724_v2 = vpop.permute.xlu1 %2748 }
 0x586   : > { %v10730_v63 = vpop.permute.xlu0 %2766 }
 0x587   : > { %v10728_v45 = vpop.permute.xlu1 %2796 }
 0x58a   : > { %v2783_v38 = vpop.permute.xlu0 %2782 }
 0x58b   : > { %v2785_v48 = vpop.permute.xlu1 %2784  ;;  %v2806_v26 = vmul.f32 %v7411_v50, %v2783_v38 }
 0x58c   : > { %v2807_v19 = vmul.f32 %v7411_v50, %v2785_v48 }
 0x58d   : > { %v2822_v17 = vmax.f32 %v2758_v28, %v2806_v26  ;;  %v2753_v28 = vmul.f32 %v7401_v15, %v2725_v3 }
 0x58e   : > { %v2823_v0 = vmax.f32 %v2759_v30, %v2807_v19  ;;  %v2787_v42 = vpop.permute.xlu0 %2786  ;;  %v2800_v30 = vmul.f32 %v7411_v50, %v2771_v7 }
 0x58f   : > { %v2789_v58 = vpop.permute.xlu1 %2788  ;;  %v2808_v38 = vmul.f32 %v7411_v50, %v2787_v42  ;;  %v2838_v1 = vmax.f32 %v10493_v13, %v2822_v17  ;;  %v2752_v42 = vmul.f32 %v7401_v15, %v2723_v4 }
 0x590   : > { %v2809_v48 = vmul.f32 %v7411_v50, %v2789_v58  ;;  %v2839_v25 = vmax.f32 %v10500_v5, %v2823_v0  ;;  %v2870_v58 = vsel %vm15800_vm13, %v2852_v46, %v2853_v57  ;;  %v2817_v5 = vmax.f32 %v2753_v28, %v2801_v44  ;;  %vm15818_vm13 = vmmov %vm15810_vm2 }
 0x591   : > { %v2824_v19 = vmax.f32 %v2760_v59, %v2808_v38  ;;  %v2854_v21 = vrot.slane %v2838_v1, 7  ;;  %v2902_v32 = vrot.slane %v2838_v1, 1  ;;  %v2816_v17 = vmax.f32 %v2752_v42, %v2800_v30 }
 0x592   : > { %v2825_v26 = vmax.f32 %v2761_v62, %v2809_v48  ;;  %v2903_v31 = vrot.slane %v2839_v25, 1  ;;  %v2855_v16 = vrot.slane %v2839_v25, 7  ;;  %v2810_v42 = vmul.f32 %v7411_v50, %v10691_v22 }
 0x593   : > { %v10755_v13 = vmax.f32 %v10515_v11, %v2824_v19  ;;  %v2917_v0 = vsel %vm15801_vm10, %v2901_v35, %v2902_v32  ;;  %v2869_v59 = vsel %vm15802_vm7, %v2853_v57, %v2854_v21  ;;  %v10783_v30 = vmax.f32 %v10605_v39, %v2816_v17  ;;  %vm15819_vm10 = vmmov %vm15805_vm0 }
 0x594   : > { %v10752_v23 = vmax.f32 %v10512_v52, %v2825_v26  ;;  %v2916_v62 = vsel %vm15803_vm5, %v2902_v32, %v2903_v31  ;;  %v2949_v4 = vmax.f32 %v2870_v58, %v2917_v0  ;;  %v2868_v7 = vsel %vm15804_vm15, %v2854_v21, %v2855_v16  ;;  %vm15820_vm7 = vmmov %vm15805_vm0 }
 0x595   : > { %v2856_v46 = vrot.slane %v10755_v13, 7  ;;  %v2904_v52 = vrot.slane %v10755_v13, 1  ;;  %v2950_v11 = vmax.f32 %v2869_v59, %v2916_v62  ;;  %v10780_v21 = vmax.f32 %v10579_v55, %v2817_v5  ;;  %vm15821_vm5 = vmmov %vm15810_vm2 }
 0x596   : > { %v2905_v3 = vrot.slane %v10752_v23, 1  ;;  %v2965_v48 = vmax.f32 %v10686_v12, %v2949_v4  ;;  %v2812_v12 = vmul.f32 %v7411_v50, %v2795_v29  ;;  %v2764_v29 = vmul.f32 %v7401_v15, %v10720_v41  ;;  %vm15824_vm15 = vmmov %vm15810_vm2 }
 0x597   : > { %v2915_v35 = vsel %vm15805_vm0, %v2903_v31, %v2904_v52  ;;  %v2867_v57 = vsel %vm15806_vm14, %v2855_v16, %v2856_v46  ;;  %v2966_v38 = vmax.f32 %v2838_v1, %v2950_v11  ;;  %v2799_v1 = vmul.f32 %v7411_v50, %v2769_v33  ;;  %vm15827_vm14 = vmmov %vm15805_vm0 }
 0x598   : > { %v2914_v32 = vsel %vm15807_vm3, %v2904_v52, %v2905_v3  ;;  %v2951_v44 = vmax.f32 %v2868_v7, %v2915_v35  ;;  %v10786_v26 = vmul.f32 %v15603_v27, %v2965_v48  ;;  %v2751_v33 = vmul.f32 %v7401_v15, %v10722_v60  ;;  %vm15828_vm3 = vmmov %vm15810_vm2 }
 0x599   : > { %v2952_v28 = vmax.f32 %v2867_v57, %v2914_v32  ;;  %v10789_v19 = vmul.f32 %v15604_v54, %v2966_v38  ;;  %v2849_v16 = vrot.slane %v10780_v21, 7  ;;  %v2848_v5 = vrot.slane %v10783_v30, 7 }
 0x59a   : > { %v2967_v31 = vmax.f32 %v2839_v25, %v2951_v44  ;;  %3004 = vrot.lane.b32.xlu0 %v10786_v26, %s7007_s23  ;;  %v2811_v25 = vmul.f32 %v7411_v50, %v10708_v14  ;;  %v2763_v0 = vmul.f32 %v7401_v15, %v10705_v18  ;;  %v2828_v59 = vmax.f32 %v2764_v29, %v2812_v12 }
 0x59b   : > { %v2968_v58 = vmax.f32 %v10755_v13, %v2952_v28  ;;  %3006 = vrot.lane.b32.xlu1 %v10789_v19, %s7007_s23  ;;  %v2815_v62 = vmax.f32 %v2751_v33, %v2799_v1  ;;  %v2898_v14 = vrot.slane %v10679_v8, 1  ;;  %v2762_v41 = vmul.f32 %v7401_v15, %v10681_v56  ;;  %v15834_v13 = vld [vmem:[#allocation78_spill] sm:$0xff] }
 0x59c   : > { %v10799_v55 = vmul.f32 %v15605_v47, %v2967_v31  ;;  %v2897_v22 = vrot.slane %v10780_v21, 1  ;;  %v2827_v60 = vmax.f32 %v2763_v0, %v2811_v25  ;;  %v2874_v18 = vsel %vm15808_vm6, %v2848_v5, %v2849_v16  ;;  %vm15831_vm6 = vmmov %vm15810_vm2 }
 0x59d   : > { %v10802_v39 = vmul.f32 %v9131_v10, %v2968_v58  ;;  %v2826_v17 = vmax.f32 %v2762_v41, %v2810_v42  ;;  %v15809_v52 = vrot.slane %v10679_v8, 7  ;;  %v10831_v56 = vmax.f32 %v10628_v40, %v2828_v59 }
 0x59e   : > { %3008 = vrot.lane.b32.xlu0 %v10799_v55, %s7007_s23  ;;  %v10834_v11 = vmax.f32 %v10631_v43, %v2815_v62  ;;  %v2813_v7 = vmul.f32 %v7411_v50, %v10728_v45  ;;  %v2798_v35 = vmul.f32 %v7411_v50, %v10730_v63  ;;  %v15811_v57 = vrot.slane %v10676_v9, 1 }
 0x59f   : > { %3010 = vrot.lane.b32.xlu1 %v10802_v39, %s7007_s23  ;;  %v2873_v4 = vsel %vm15810_vm2, %v2849_v16, %v15809_v52  ;;  %v10849_v43 = vmax.f32 %v10602_v37, %v2827_v60  ;;  %v2765_v45 = vmul.f32 %v7401_v15, %v10724_v2  ;;  %v2750_v63 = vmul.f32 %v7401_v15, %v10726_v34 }
 0x5a0   : > { %v2920_v40 = vsel %vm15812_vm1, %v2898_v14, %v15811_v57  ;;  %v2921_v32 = vsel %vm15813_vm9, %v2897_v22, %v2898_v14  ;;  %v10858_v48 = vmax.f32 %v10576_v51, %v2826_v17  ;;  %v2908_v44 = vrot.slane %v10831_v56, 1  ;;  %v15823_v57 = vld [vmem:[#allocation82_spill] sm:$0xff]  ;;  %vm15832_vm1 = vmmov %vm15805_vm0 }
 0x5a1   : > { %v2945_v38 = vmax.f32 %v2874_v18, %v2921_v32  ;;  %v2946_v9 = vmax.f32 %v2873_v4, %v2920_v40  ;;  %v2847_v28 = vrot.slane %v10834_v11, 7  ;;  %v2829_v37 = vmax.f32 %v2765_v45, %v2813_v7  ;;  %v15822_v7 = vld [vmem:[#allocation93_spill] sm:$0xff]  ;;  %vm15833_vm9 = vmmov %vm15805_vm0 }
 0x5a2   : > { %3048 = vrot.lane.b32.xlu0 %v10711_v24, %s7006_s22  ;;  %v2814_v31 = vmax.f32 %v2750_v63, %v2798_v35  ;;  %v2859_v2 = vrot.slane %v10849_v43, 7  ;;  %v2907_v34 = vrot.slane %v10849_v43, 1  ;;  %v2896_v51 = vrot.slane %v10783_v30, 1 }
 0x5a3   : > { %3050 = vrot.lane.b32.xlu1 %v10714_v61, %s7006_s22  ;;  %v2858_v58 = vrot.slane %v10858_v48, 7  ;;  %v2961_v12 = vmax.f32 %v10780_v21, %v2945_v38  ;;  %v2962_v1 = vmax.f32 %v10679_v8, %v2946_v9  ;;  %v2845_v25 = vmax.f32 %v10642_v36, %v2829_v37 }
 0x5a4   : > { %v2830_v29 = vmax.f32 %v10645_v53, %v2814_v31  ;;  %v2875_v33 = vsel %vm15814_vm11, %v2847_v28, %v2848_v5  ;;  %v2911_v42 = vsel %vm15815_vm4, %v2907_v34, %v2908_v44  ;;  %v2922_v8 = vsel %vm15816_vm12, %v2896_v51, %v2897_v22  ;;  %v15826_v31 = vld [vmem:[#allocation10_spill] sm:$0xff]  ;;  %vm15838_vm11 = vmmov %vm15805_vm0 }
 0x5a5   : > { %v2864_v36 = vsel %vm15817_vm8, %v2858_v58, %v2859_v2  ;;  %v10889_v53 = vmul.f32 %v15780_v49, %v2961_v12  ;;  %v10892_v21 = vmul.f32 %v8957_v20, %v2962_v1  ;;  %v2944_v16 = vmax.f32 %v2875_v33, %v2922_v8  ;;  %v15829_v1 = vld [vmem:[#allocation96_spill] sm:$0xff]  ;;  %vm15839_vm4 = vmmov %vm15810_vm2 }
 0x5a6   : > { %3052 = vrot.lane.b32.xlu0 %v10786_v26, %s7006_s22  ;;  %v2955_v5 = vmax.f32 %v2864_v36, %v2911_v42  ;;  %v2909_v0 = vrot.slane %v2845_v25, 1  ;;  %v2846_v59 = vrot.slane %v2830_v29, 7  ;;  %v2860_v62 = vrot.slane %v10831_v56, 7  ;;  %vm15840_vm12 = vmmov %vm15805_vm0 }
 0x5a7   : > { %3054 = vrot.lane.b32.xlu1 %v10789_v19, %s7006_s22  ;;  %v2895_v14 = vrot.slane %v10834_v11, 1  ;;  %v2960_v41 = vmax.f32 %v10783_v30, %v2944_v16  ;;  %v2861_v60 = vrot.slane %v2845_v25, 7  ;;  %v2894_v17 = vrot.slane %v2830_v29, 1  ;;  %vm15841_vm8 = vmmov %vm15810_vm2 }
 0x5a8   : > { %v2971_v22 = vmax.f32 %v10849_v43, %v2955_v5  ;;  %v2876_v18 = vsel %vm15818_vm13, %v2846_v59, %v2847_v28  ;;  %v2910_v52 = vsel %vm15819_vm10, %v2908_v44, %v2909_v0  ;;  %v2863_v30 = vsel %vm15821_vm5, %v2859_v2, %v2860_v62  ;;  %v15825_v28 = vld [vmem:[#allocation9_spill] sm:$0xff]  ;;  %vm15842_vm13 = vmmov %vm15810_vm2 }
 0x5a9   : > { %v2923_v4 = vsel %vm15820_vm7, %v2895_v14, %v2896_v51  ;;  %v10915_v35 = vmul.f32 %v15822_v7, %v2960_v41  ;;  %v2956_v63 = vmax.f32 %v2863_v30, %v2910_v52  ;;  %v2877_v32 = vsel %vm15824_vm15, %v2861_v60, %v2846_v59  ;;  %vm15843_vm10 = vmmov %vm15805_vm0 }
 0x5aa   : > { %3056 = vrot.lane.b32.xlu0 %v10799_v55, %s7006_s22  ;;  %v10918_v40 = vmul.f32 %v15823_v57, %v2971_v22  ;;  %v2943_v45 = vmax.f32 %v2876_v18, %v2923_v4  ;;  %v2925_v38 = vsel %vm15805_vm0, %v2909_v0, %v2894_v17  ;;  %v2878_v37 = vmul.f32 %v15825_v28, %v2877_v32  ;;  %vm15844_vm7 = vmmov %vm15810_vm2 }
 0x5ab   : > { %3058 = vrot.lane.b32.xlu1 %v10802_v39, %s7006_s22  ;;  %v2972_v44 = vmax.f32 %v10831_v56, %v2956_v63  ;;  %v2941_v2 = vmul.f32 %v15826_v31, %v2925_v38  ;;  %v2924_v51 = vsel %vm15827_vm14, %v2894_v17, %v2895_v14  ;;  %v2862_v12 = vsel %vm15828_vm3, %v2860_v62, %v2861_v60  ;;  %v15830_v56 = vld [vmem:[#allocation81_spill] sm:$0xff]  ;;  %v15837_v17 = vld [vmem:[#allocation132_spill] sm:$0xff]  ;;  %vm15845_vm5 = vmmov %vm15805_vm0 }
 0x5ac   : > { %v2959_v9 = vmax.f32 %v10834_v11, %v2943_v45  ;;  %v2942_v42 = vmax.f32 %v2878_v37, %v2924_v51  ;;  %v2857_v36 = vrot.slane %v10752_v23, 7  ;;  %v2906_v16 = vrot.slane %v10858_v48, 1  ;;  %vm15847_vm15 = vmmov %vm15810_vm2 }
 0x5ad   : > { %v10944_v33 = vmul.f32 %v15830_v56, %v2972_v44  ;;  %v2957_v8 = vmax.f32 %v2862_v12, %v2941_v2  ;;  %vm15849_vm14 = vmmov %vm15810_vm2 }
 0x5ae   : > { %2996 = vrot.lane.b32.xlu0 %v10889_v53, %s7007_s23  ;;  %v10941_v11 = vmul.f32 %v15829_v1, %v2959_v9  ;;  %v2958_v5 = vmax.f32 %v2830_v29, %v2942_v42  ;;  %v2865_v59 = vsel %vm15831_vm6, %v2857_v36, %v2858_v58  ;;  %v2866_v62 = vsel %vm15810_vm2, %v2856_v46, %v2857_v36  ;;  %v15835_v46 = vld [vmem:[#allocation103_spill] sm:$0xff]  ;;  %vm15850_vm3 = vmmov %vm15805_vm0 }
 0x5af   : > { %2998 = vrot.lane.b32.xlu1 %v10892_v21, %s7007_s23  ;;  %v2973_v0 = vmax.f32 %v2845_v25, %v2957_v8  ;;  %v2913_v14 = vsel %vm15832_vm1, %v2905_v3, %v2906_v16  ;;  %v2912_v58 = vsel %vm15833_vm9, %v2906_v16, %v2907_v34  ;;  %v15836_v34 = vld [vmem:[#allocation131_spill] sm:$0xff]  ;;  %vm15852_vm6 = vmmov %vm15810_vm2 }
 0x5b0   : > { %v10971_v25 = vmul.f32 %v15834_v13, %v2958_v5  ;;  %v2954_v41 = vmax.f32 %v2865_v59, %v2912_v58  ;;  %v2953_v22 = vmax.f32 %v2866_v62, %v2913_v14  ;;  %vm15855_vm1 = vmmov %vm15805_vm0 }
 0x5b1   : > { %v10974_v29 = vmul.f32 %v15835_v46, %v2973_v0  ;;  %vm15857_vm9 = vmmov %vm15805_vm0 }
 0x5b2   : > { %3044 = vrot.lane.b32.xlu0 %v10889_v53, %s7006_s22  ;;  %v2970_v3 = vmax.f32 %v10858_v48, %v2954_v41  ;;  %v2969_v43 = vmax.f32 %v10752_v23, %v2953_v22 }
 0x5b3   : > { %3046 = vrot.lane.b32.xlu1 %v10892_v21, %s7006_s22 }
 0x5b4   : > { %v10987_v60 = vmul.f32 %v15836_v34, %v2970_v3  ;;  %v10990_v18 = vmul.f32 %v15837_v17, %v2969_v43 }
 0x5b6   : > { %2994 = vrot.lane.b32.xlu0 %v10915_v35, %s7007_s23 }
 0x5b7   : > { %3016 = vrot.lane.b32.xlu1 %v10918_v40, %s7007_s23 }
 0x5ba   : > { %3042 = vrot.lane.b32.xlu0 %v10915_v35, %s7006_s22 }
 0x5bb   : > { %3064 = vrot.lane.b32.xlu1 %v10918_v40, %s7006_s22 }
 0x5be   : > { %2992 = vrot.lane.b32.xlu0 %v10941_v11, %s7007_s23 }
 0x5bf   : > { %3018 = vrot.lane.b32.xlu1 %v10944_v33, %s7007_s23 }
 0x5c2   : > { %3040 = vrot.lane.b32.xlu0 %v10941_v11, %s7006_s22 }
 0x5c3   : > { %3066 = vrot.lane.b32.xlu1 %v10944_v33, %s7006_s22 }
 0x5c6   : > { %2990 = vrot.lane.b32.xlu0 %v10971_v25, %s7007_s23 }
 0x5c7   : > { %3020 = vrot.lane.b32.xlu1 %v10974_v29, %s7007_s23 }
 0x5ca   : > { %3038 = vrot.lane.b32.xlu0 %v10971_v25, %s7006_s22 }
 0x5cb   : > { %3068 = vrot.lane.b32.xlu1 %v10974_v29, %s7006_s22 }
 0x5ce   : > { %3012 = vrot.lane.b32.xlu0 %v10990_v18, %s7007_s23 }
 0x5cf   : > { %3014 = vrot.lane.b32.xlu1 %v10987_v60, %s7007_s23 }
 0x5d2   : > { %3060 = vrot.lane.b32.xlu0 %v10990_v18, %s7006_s22 }
 0x5d3   : > { %3062 = vrot.lane.b32.xlu1 %v10987_v60, %s7006_s22 }
 0x5e8   : > { %v3001_v48 = vpop.permute.xlu0 %3000 }
 0x5e9   : > { %v3003_v23 = vpop.permute.xlu1 %3002  ;;  %v3027_v9 = vmul.f32 %v7401_v15, %v3001_v48 }
 0x5ea   : > { %v3028_v38 = vmul.f32 %v7401_v15, %v3003_v23 }
 0x60c   : > { %v3005_v4 = vpop.permute.xlu0 %3004 }
 0x60d   : > { %v3007_v52 = vpop.permute.xlu1 %3006  ;;  %v3029_v5 = vmul.f32 %v7401_v15, %v3005_v4 }
 0x60e   : > { %v3030_v16 = vmul.f32 %v7401_v15, %v3007_v52 }
 0x610   : > { %v3009_v45 = vpop.permute.xlu0 %3008 }
 0x611   : > { %v3011_v30 = vpop.permute.xlu1 %3010  ;;  %v3031_v3 = vmul.f32 %v7401_v15, %v3009_v45 }
 0x612   : > { %v3032_v22 = vmul.f32 %v7401_v15, %v3011_v30 }
 0x614   : > { %v3049_v32 = vpop.permute.xlu0 %3048 }
 0x615   : > { %v3051_v63 = vpop.permute.xlu1 %3050  ;;  %v3075_v37 = vmul.f32 %v7411_v50, %v3049_v32 }
 0x616   : > { %v3076_v44 = vmul.f32 %v7411_v50, %v3051_v63 }
 0x617   : > { %v3091_v51 = vmax.f32 %v3027_v9, %v3075_v37 }
 0x618   : > { %v3092_v2 = vmax.f32 %v3028_v38, %v3076_v44  ;;  %v3053_v42 = vpop.permute.xlu0 %3052 }
 0x619   : > { %v3055_v12 = vpop.permute.xlu1 %3054  ;;  %v3077_v36 = vmul.f32 %v7411_v50, %v3053_v42  ;;  %v11012_v59 = vmax.f32 %v10711_v24, %v3091_v51 }
 0x61a   : > { %v3078_v8 = vmul.f32 %v7411_v50, %v3055_v12  ;;  %v11009_v0 = vmax.f32 %v10714_v61, %v3092_v2 }
 0x61b   : > { %v3093_v14 = vmax.f32 %v3029_v5, %v3077_v36  ;;  %v3123_v24 = vrot.slane %v11012_v59, 7 }
 0x61c   : > { %v3094_v62 = vmax.f32 %v3030_v16, %v3078_v8  ;;  %v3057_v41 = vpop.permute.xlu0 %3056  ;;  %v3124_v52 = vrot.slane %v11009_v0, 7  ;;  %v3172_v32 = vrot.slane %v11009_v0, 1 }
 0x61d   : > { %v3059_v58 = vpop.permute.xlu1 %3058  ;;  %v3079_v23 = vmul.f32 %v7411_v50, %v3057_v41  ;;  %v3109_v61 = vmax.f32 %v10786_v26, %v3093_v14 }
 0x61e   : > { %v3080_v43 = vmul.f32 %v7411_v50, %v3059_v58  ;;  %v3110_v48 = vmax.f32 %v10789_v19, %v3094_v62 }
 0x61f   : > { %v3095_v63 = vmax.f32 %v3031_v3, %v3079_v23  ;;  %v3125_v30 = vrot.slane %v3109_v61, 7  ;;  %v3173_v9 = vrot.slane %v3109_v61, 1 }
 0x620   : > { %v3096_v4 = vmax.f32 %v3032_v22, %v3080_v43  ;;  %v3174_v38 = vrot.slane %v3110_v48, 1  ;;  %v2997_v44 = vpop.permute.xlu0 %2996  ;;  %v3126_v37 = vrot.slane %v3110_v48, 7 }
 0x621   : > { %v2999_v45 = vpop.permute.xlu1 %2998  ;;  %v11027_v19 = vmax.f32 %v10799_v55, %v3095_v63  ;;  %v3190_v26 = vsel %vm15838_vm11, %v3172_v32, %v3173_v9  ;;  %v3142_v51 = vsel %vm15839_vm4, %v3124_v52, %v3125_v30  ;;  %vm15858_vm11 = vmmov %vm15810_vm2 }
 0x622   : > { %v11024_v2 = vmax.f32 %v10802_v39, %v3096_v4  ;;  %v3189_v12 = vsel %vm15840_vm12, %v3173_v9, %v3174_v38  ;;  %v3143_v39 = vsel %vm15841_vm8, %v3123_v24, %v3124_v52  ;;  %v3026_v55 = vmul.f32 %v7401_v15, %v2999_v45  ;;  %v15846_v45 = vld [vmem:[#allocation121_spill] sm:$0xff]  ;;  %vm15859_vm4 = vmmov %vm15805_vm0 }
 0x623   : > { %v15058_v8 = vrot.slane %v11027_v19, 7  ;;  %v3175_v36 = vrot.slane %v11027_v19, 1  ;;  %v3220_v62 = vmax.f32 %v3143_v39, %v3190_v26  ;;  %v3221_v14 = vmax.f32 %v3142_v51, %v3189_v12  ;;  %vm15860_vm12 = vmmov %vm15810_vm2 }
 0x624   : > { %v15057_v42 = vrot.slane %v11024_v2, 1  ;;  %v3045_v5 = vpop.permute.xlu0 %3044  ;;  %v3141_v41 = vsel %vm15842_vm13, %v3125_v30, %v3126_v37  ;;  %vm15861_vm8 = vmmov %vm15810_vm2 }
 0x625   : > { %v3047_v16 = vpop.permute.xlu1 %3046  ;;  %v3188_v22 = vsel %vm15843_vm10, %v3174_v38, %v3175_v36  ;;  %v3140_v3 = vsel %vm15844_vm7, %v3126_v37, %v15058_v8  ;;  %v3236_v43 = vmax.f32 %v11009_v0, %v3220_v62  ;;  %v3237_v23 = vmax.f32 %v3109_v61, %v3221_v14  ;;  %vm15862_vm13 = vmmov %vm15805_vm0 }
 0x626   : > { %v3074_v58 = vmul.f32 %v7411_v50, %v3047_v16  ;;  %v3222_v52 = vmax.f32 %v3141_v41, %v3188_v22  ;;  %v3187_v4 = vsel %vm15845_vm5, %v3175_v36, %v15057_v42  ;;  %v3171_v36 = vrot.slane %v11012_v59, 1  ;;  %vm15863_vm10 = vmmov %vm15805_vm0 }
 0x627   : > { %v3223_v9 = vmax.f32 %v3140_v3, %v3187_v4  ;;  %v11056_v26 = vmul.f32 %v15846_v45, %v3236_v43  ;;  %v11059_v38 = vmul.f32 %v15603_v27, %v3237_v23  ;;  %v3073_v43 = vmul.f32 %v7411_v50, %v3045_v5  ;;  %v15848_v4 = vld [vmem:[#allocation79_spill] sm:$0xff]  ;;  %vm15865_vm7 = vmmov %vm15810_vm2 }
 0x628   : > { %v3090_v63 = vmax.f32 %v3026_v55, %v3074_v58  ;;  %v2995_v51 = vpop.permute.xlu0 %2994  ;;  %v3238_v37 = vmax.f32 %v3110_v48, %v3222_v52  ;;  %v3191_v62 = vsel %vm15805_vm0, %v3171_v36, %v3172_v32  ;;  %v3025_v32 = vmul.f32 %v7401_v15, %v2997_v44  ;;  %vm15866_vm5 = vmmov %vm15805_vm0 }
 0x629   : > { %v3017_v30 = vpop.permute.xlu1 %3016  ;;  %3274 = vrot.lane.b32.xlu0 %v11056_v26, %s7007_s23  ;;  %3276 = vrot.lane.b32.xlu1 %v11059_v38, %s7007_s23  ;;  %v3239_v12 = vmax.f32 %v11027_v19, %v3223_v9 }
 0x62a   : > { %v11062_v0 = vmax.f32 %v10892_v21, %v3090_v63  ;;  %v11069_v61 = vmul.f32 %v15604_v54, %v3238_v37  ;;  %v3089_v37 = vmax.f32 %v3025_v32, %v3073_v43 }
 0x62b   : > { %v11075_v48 = vmul.f32 %v15605_v47, %v3239_v12  ;;  %v3035_v47 = vmul.f32 %v7401_v15, %v3017_v30 }
 0x62c   : > { %v3122_v39 = vrot.slane %v11062_v0, 7  ;;  %v3043_v21 = vpop.permute.xlu0 %3042  ;;  %v3170_v43 = vrot.slane %v11062_v0, 1 }
 0x62d   : > { %v3065_v55 = vpop.permute.xlu1 %3064  ;;  %3278 = vrot.lane.b32.xlu0 %v11069_v61, %s7007_s23  ;;  %3280 = vrot.lane.b32.xlu1 %v11075_v48, %s7007_s23  ;;  %v3072_v23 = vmul.f32 %v7411_v50, %v3043_v21 }
 0x62e   : > { %v3144_v16 = vsel %vm15847_vm15, %v3122_v39, %v3123_v24  ;;  %v3083_v32 = vmul.f32 %v7411_v50, %v3065_v55  ;;  %vm15868_vm15 = vmmov %vm15805_vm0 }
 0x62f   : > { %v3219_v41 = vmax.f32 %v3144_v16, %v3191_v62  ;;  %v11104_v62 = vmax.f32 %v10889_v53, %v3089_v37  ;;  %vm15869_vm0 = vmmov %vm15810_vm2 }
 0x630   : > { %v2993_v58 = vpop.permute.xlu0 %2992 }
 0x631   : > { %v3019_v14 = vpop.permute.xlu1 %3018  ;;  %3322 = vrot.lane.b32.xlu0 %v11056_v26, %s7006_s22  ;;  %3324 = vrot.lane.b32.xlu1 %v11059_v38, %s7006_s22  ;;  %v3235_v3 = vmax.f32 %v11012_v59, %v3219_v41  ;;  %v3024_v59 = vmul.f32 %v7401_v15, %v2995_v51  ;;  %v3128_v51 = vrot.slane %v11024_v2, 7 }
 0x633   : > { %v11098_v63 = vmul.f32 %v15848_v4, %v3235_v3  ;;  %v3088_v5 = vmax.f32 %v3024_v59, %v3072_v23  ;;  %v3121_v3 = vrot.slane %v11104_v62, 7 }
 0x634   : > { %v3041_v24 = vpop.permute.xlu0 %3040 }
 0x635   : > { %v3067_v22 = vpop.permute.xlu1 %3066  ;;  %3326 = vrot.lane.b32.xlu0 %v11069_v61, %s7006_s22  ;;  %3328 = vrot.lane.b32.xlu1 %v11075_v48, %s7006_s22  ;;  %v11109_v44 = vmax.f32 %v10915_v35, %v3088_v5  ;;  %v3071_v55 = vmul.f32 %v7411_v50, %v3041_v24  ;;  %v3145_v23 = vsel %vm15849_vm14, %v3121_v3, %v3122_v39  ;;  %vm15870_vm14 = vmmov %vm15855_vm1 }
 0x636   : > { %v3084_v53 = vmul.f32 %v7411_v50, %v3067_v22  ;;  %v3036_v22 = vmul.f32 %v7401_v15, %v3019_v14 }
 0x637   : > { %v15851_v4 = vrot.slane %v11109_v44, 7 }
 0x638   : > { %v2991_v9 = vpop.permute.xlu0 %2990  ;;  %v3100_v24 = vmax.f32 %v3036_v22, %v3084_v53 }
 0x639   : > { %v3021_v52 = vpop.permute.xlu1 %3020  ;;  %3272 = vrot.lane.b32.xlu1 %v11098_v63, %s7007_s23  ;;  %v3146_v30 = vsel %vm15852_vm6, %v15851_v4, %v3121_v3  ;;  %vm15872_vm6 = vmmov %vm15869_vm0 }
 0x63a   : > { %v3037_v39 = vmul.f32 %v7401_v15, %v3021_v52 }
 0x63c   : > { %v3039_v16 = vpop.permute.xlu0 %3038 }
 0x63d   : > { %v3069_v12 = vpop.permute.xlu1 %3068  ;;  %3320 = vrot.lane.b32.xlu1 %v11098_v63, %s7006_s22 }
 0x63e   : > { %v3085_v45 = vmul.f32 %v7411_v50, %v3069_v12 }
 0x640   : > { %v3013_v41 = vpop.permute.xlu0 %3012  ;;  %v3101_v3 = vmax.f32 %v3037_v39, %v3085_v45 }
 0x641   : > { %v3015_v21 = vpop.permute.xlu1 %3014  ;;  %v3033_v35 = vmul.f32 %v7401_v15, %v3013_v41  ;;  %v3099_v41 = vmax.f32 %v3035_v47, %v3083_v32  ;;  %v3070_v47 = vmul.f32 %v7411_v50, %v3039_v16 }
 0x642   : > { %v3034_v42 = vmul.f32 %v7401_v15, %v3015_v21  ;;  %v3117_v22 = vmax.f32 %v10974_v29, %v3101_v3 }
 0x644   : > { %v3061_v59 = vpop.permute.xlu0 %3060 }
 0x645   : > { %v3063_v37 = vpop.permute.xlu1 %3062  ;;  %v3081_v8 = vmul.f32 %v7411_v50, %v3061_v59  ;;  %v3192_v59 = vsel %vm15850_vm3, %v3170_v43, %v3171_v36  ;;  %vm15871_vm3 = vmmov %vm15869_vm0 }
 0x646   : > { %v3082_v5 = vmul.f32 %v7411_v50, %v3063_v37  ;;  %v3023_v37 = vmul.f32 %v7401_v15, %v2993_v58  ;;  %v15854_v58 = vrot.slane %v11104_v62, 1 }
 0x647   : > { %v3097_v54 = vmax.f32 %v3033_v35, %v3081_v8  ;;  %v15853_v8 = vrot.slane %v11027_v19, 7  ;;  %v3116_v19 = vmax.f32 %v10944_v33, %v3100_v24  ;;  %v15856_v35 = vrot.slane %v11024_v2, 1 }
 0x648   : > { %v3098_v21 = vmax.f32 %v3034_v42, %v3082_v5  ;;  %v3087_v42 = vmax.f32 %v3023_v37, %v3071_v55  ;;  %v3193_v4 = vsel %vm15855_vm1, %v15854_v58, %v3170_v43 }
 0x649   : > { %v3113_v12 = vmax.f32 %v10990_v18, %v3097_v54  ;;  %v3139_v36 = vsel %vm15810_vm2, %v15853_v8, %v3128_v51  ;;  %v3022_v54 = vmul.f32 %v7401_v15, %v2991_v9  ;;  %v3218_v18 = vmax.f32 %v3145_v23, %v3192_v59  ;;  %vm15873_vm2 = vmmov %vm15855_vm1 }
 0x64a   : > { %v3114_v14 = vmax.f32 %v10987_v60, %v3098_v21  ;;  %v3115_v60 = vmax.f32 %v10918_v40, %v3099_v41  ;;  %v3217_v16 = vmax.f32 %v3146_v30, %v3193_v4  ;;  %v11159_v55 = vmax.f32 %v10941_v11, %v3087_v42  ;;  %vm15874_vm1 = vmmov %vm15869_vm0 }
 0x64b   : > { %v3129_v52 = vrot.slane %v3113_v12, 7  ;;  %v3177_v53 = vrot.slane %v3113_v12, 1  ;;  %v3086_v40 = vmax.f32 %v3022_v54, %v3070_v47  ;;  %v3234_v37 = vmax.f32 %v11062_v0, %v3218_v18 }
 0x64c   : > { %v3178_v32 = vrot.slane %v3114_v14, 1  ;;  %v3130_v33 = vrot.slane %v3114_v14, 7  ;;  %v3131_v59 = vrot.slane %v3115_v60, 7  ;;  %v3179_v30 = vrot.slane %v3115_v60, 1 }
 0x64d   : > { %v3186_v5 = vsel %vm15857_vm9, %v15856_v35, %v3177_v53  ;;  %v3138_v43 = vsel %vm15858_vm11, %v3128_v51, %v3129_v52  ;;  %v3180_v51 = vrot.slane %v3116_v19, 1  ;;  %v3233_v24 = vmax.f32 %v11104_v62, %v3217_v16  ;;  %vm15875_vm9 = vmmov %vm15873_vm2 }
 0x64e   : > { %v3185_v45 = vsel %vm15859_vm4, %v3177_v53, %v3178_v32  ;;  %v3224_v9 = vmax.f32 %v3139_v36, %v3186_v5  ;;  %v3119_v39 = vrot.slane %v11159_v55, 7  ;;  %v3102_v11 = vmax.f32 %v10971_v25, %v3086_v40  ;;  %vm15876_vm11 = vmmov %vm15869_vm0 }
 0x64f   : > { %v3225_v23 = vmax.f32 %v3138_v43, %v3185_v45  ;;  %v3181_v47 = vrot.slane %v3117_v22, 1  ;;  %v3137_v0 = vsel %vm15861_vm8, %v3129_v52, %v3130_v33  ;;  %v3168_v8 = vrot.slane %v11109_v44, 1  ;;  %vm15877_vm4 = vmmov %vm15873_vm2 }
 0x650   : > { %v3240_v21 = vmax.f32 %v11024_v2, %v3224_v9  ;;  %v3136_v2 = vsel %vm15860_vm12, %v3130_v33, %v3131_v59  ;;  %v3132_v25 = vrot.slane %v3116_v19, 7  ;;  %v11185_v36 = vmul.f32 %v8957_v20, %v3234_v37  ;;  %vm15878_vm12 = vmmov %vm15869_vm0 }
 0x651   : > { %v3241_v41 = vmax.f32 %v3113_v12, %v3225_v23  ;;  %v3184_v12 = vsel %vm15862_vm13, %v3178_v32, %v3179_v30  ;;  %v3183_v58 = vsel %vm15863_vm10, %v3179_v30, %v3180_v51  ;;  %v11190_v4 = vmul.f32 %v15780_v49, %v3233_v24  ;;  %vm15879_vm8 = vmmov %vm15873_vm2 }
 0x652   : > { %v11168_v42 = vmul.f32 %v9131_v10, %v3240_v21  ;;  %v3227_v3 = vmax.f32 %v3136_v2, %v3183_v58  ;;  %v3226_v32 = vmax.f32 %v3137_v0, %v3184_v12  ;;  %v15864_v52 = vrot.slane %v11109_v44, 7  ;;  %vm15882_vm13 = vmmov %vm15869_vm0 }
 0x653   : > { %v11171_v29 = vmul.f32 %v15837_v17, %v3241_v41  ;;  %v3166_v54 = vrot.slane %v3102_v11, 1  ;;  %v3182_v18 = vsel %vm15866_vm5, %v3180_v51, %v3181_v47  ;;  %v15867_v16 = vrot.slane %v11104_v62, 1  ;;  %vm15883_vm10 = vmmov %vm15873_vm2 }
 0x654   : > { %3282 = vrot.lane.b32.xlu0 %v11168_v42, %s7007_s23  ;;  %v3147_v53 = vsel %vm15865_vm7, %v3119_v39, %v15864_v52  ;;  %v3135_v5 = vsel %vm15869_vm0, %v3131_v59, %v3132_v25  ;;  %v3243_v45 = vmax.f32 %v3115_v60, %v3227_v3  ;;  %v3242_v40 = vmax.f32 %v3114_v14, %v3226_v32  ;;  %vm15884_vm7 = vmmov %vm15873_vm2 }
 0x655   : > { %3284 = vrot.lane.b32.xlu1 %v11171_v29, %s7007_s23  ;;  %v3194_v35 = vsel %vm15868_vm15, %v3168_v8, %v15867_v16  ;;  %v3228_v9 = vmax.f32 %v3135_v5, %v3182_v18  ;;  %v3118_v23 = vrot.slane %v3102_v11, 7  ;;  %v3197_v33 = vsel %vm15870_vm14, %v3181_v47, %v3166_v54  ;;  %vm15886_vm5 = vmmov %vm15869_vm0 }
 0x656   : > { %v3216_v43 = vmax.f32 %v3147_v53, %v3194_v35  ;;  %v3167_v62 = vrot.slane %v11159_v55, 1  ;;  %v3133_v21 = vrot.slane %v3117_v22, 7  ;;  %v3213_v37 = vmul.f32 %v15826_v31, %v3197_v33  ;;  %vm15888_vm15 = vmmov %vm15869_vm0 }
 0x657   : > { %v11218_v14 = vmul.f32 %v15823_v57, %v3243_v45  ;;  %v11221_v60 = vmul.f32 %v15836_v34, %v3242_v40  ;;  %v3244_v59 = vmax.f32 %v3116_v19, %v3228_v9  ;;  %v3148_v30 = vsel %vm15871_vm3, %v3118_v23, %v3119_v39  ;;  %vm15890_vm14 = vmmov %vm15873_vm2 }
 0x658   : > { %3270 = vrot.lane.b32.xlu0 %v11185_v36, %s7007_s23  ;;  %v3232_v41 = vmax.f32 %v11109_v44, %v3216_v43  ;;  %v3134_v44 = vsel %vm15872_vm6, %v3132_v25, %v3133_v21  ;;  %v3195_v51 = vsel %vm15873_vm2, %v3167_v62, %v3168_v8  ;;  %v3149_v2 = vsel %vm15874_vm1, %v3133_v21, %v3118_v23  ;;  %vm15892_vm3 = vmmov %vm15873_vm2 }
 0x659   : > { %3268 = vrot.lane.b32.xlu1 %v11190_v4, %s7007_s23  ;;  %v11234_v24 = vmul.f32 %v15830_v56, %v3244_v59  ;;  %v3229_v47 = vmax.f32 %v3134_v44, %v3213_v37  ;;  %v3215_v39 = vmax.f32 %v3148_v30, %v3195_v51  ;;  %v3150_v0 = vmul.f32 %v15825_v28, %v3149_v2  ;;  %vm15893_vm6 = vmmov %vm15869_vm0 }
 0x65a   : > { %v11237_v19 = vmul.f32 %v15822_v7, %v3232_v41  ;;  %v3196_v25 = vsel %vm15875_vm9, %v3166_v54, %v3167_v62  ;;  %vm15895_vm1 = vmmov %vm15873_vm2 }
 0x65b   : > { %v3245_v12 = vmax.f32 %v3117_v22, %v3229_v47  ;;  %v3231_v8 = vmax.f32 %v11159_v55, %v3215_v39  ;;  %v3214_v32 = vmax.f32 %v3150_v0, %v3196_v25  ;;  %vm15896_vm9 = vmmov %vm15869_vm0 }
 0x65c   : > { %3318 = vrot.lane.b32.xlu0 %v11185_v36, %s7006_s22 }
 0x65d   : > { %3316 = vrot.lane.b32.xlu1 %v11190_v4, %s7006_s22  ;;  %v11254_v58 = vmul.f32 %v15835_v46, %v3245_v12  ;;  %v11257_v3 = vmul.f32 %v15829_v1, %v3231_v8  ;;  %v3230_v55 = vmax.f32 %v3102_v11, %v3214_v32 }
 0x65f   : > { %v11268_v22 = vmul.f32 %v15834_v13, %v3230_v55 }
 0x660   : > { %3286 = vrot.lane.b32.xlu0 %v11221_v60, %s7007_s23 }
 0x661   : > { %3288 = vrot.lane.b32.xlu1 %v11218_v14, %s7007_s23 }
 0x664   : > { %3266 = vrot.lane.b32.xlu0 %v11237_v19, %s7007_s23 }
 0x665   : > { %3290 = vrot.lane.b32.xlu1 %v11234_v24, %s7007_s23 }
 0x668   : > { %3314 = vrot.lane.b32.xlu0 %v11237_v19, %s7006_s22 }
 0x669   : > { %3338 = vrot.lane.b32.xlu1 %v11234_v24, %s7006_s22 }
 0x66c   : > { %3264 = vrot.lane.b32.xlu0 %v11257_v3, %s7007_s23 }
 0x66d   : > { %3292 = vrot.lane.b32.xlu1 %v11254_v58, %s7007_s23 }
 0x670   : > { %3312 = vrot.lane.b32.xlu0 %v11257_v3, %s7006_s22 }
 0x671   : > { %3340 = vrot.lane.b32.xlu1 %v11254_v58, %s7006_s22 }
 0x674   : > { %3262 = vrot.lane.b32.xlu0 %v11268_v22, %s7007_s23 }
 0x675   : > { %3332 = vrot.lane.b32.xlu1 %v11171_v29, %s7006_s22 }
 0x678   : > { %3310 = vrot.lane.b32.xlu0 %v11268_v22, %s7006_s22 }
 0x679   : > { %3336 = vrot.lane.b32.xlu1 %v11218_v14, %s7006_s22 }
 0x67c   : > { %3330 = vrot.lane.b32.xlu0 %v11168_v42, %s7006_s22 }
 0x680   : > { %3334 = vrot.lane.b32.xlu0 %v11221_v60, %s7006_s22 }
 0x69b   : > { %v3277_v11 = vpop.permute.xlu1 %3276  ;;  %v3275_v52 = vpop.permute.xlu0 %3274 }
 0x69c   : > { %v3301_v35 = vmul.f32 %v7401_v15, %v3277_v11  ;;  %v3300_v5 = vmul.f32 %v7401_v15, %v3275_v52 }
 0x69f   : > { %v3281_v53 = vpop.permute.xlu1 %3280  ;;  %v3279_v54 = vpop.permute.xlu0 %3278 }
 0x6a0   : > { %v3303_v41 = vmul.f32 %v7401_v15, %v3281_v53  ;;  %v3302_v37 = vmul.f32 %v7401_v15, %v3279_v54 }
 0x6a3   : > { %v3325_v18 = vpop.permute.xlu1 %3324  ;;  %v3323_v16 = vpop.permute.xlu0 %3322 }
 0x6a4   : > { %v3349_v43 = vmul.f32 %v7411_v50, %v3325_v18  ;;  %v3348_v45 = vmul.f32 %v7411_v50, %v3323_v16 }
 0x6a6   : > { %v3365_v40 = vmax.f32 %v3301_v35, %v3349_v43  ;;  %v3364_v9 = vmax.f32 %v3300_v5, %v3348_v45 }
 0x6a7   : > { %v3329_v23 = vpop.permute.xlu1 %3328  ;;  %v3327_v33 = vpop.permute.xlu0 %3326 }
 0x6a8   : > { %v3351_v62 = vmul.f32 %v7411_v50, %v3329_v23  ;;  %v3350_v21 = vmul.f32 %v7411_v50, %v3327_v33  ;;  %v3381_v59 = vmax.f32 %v11059_v38, %v3365_v40  ;;  %v3380_v30 = vmax.f32 %v11056_v26, %v3364_v9  ;;  %v15881_v33 = vld [vmem:[#allocation80_spill] sm:$0xff] }
 0x6aa   : > { %v3367_v44 = vmax.f32 %v3303_v41, %v3351_v62  ;;  %v3366_v51 = vmax.f32 %v3302_v37, %v3350_v21  ;;  %v3397_v39 = vrot.slane %v3381_v59, 7  ;;  %v3396_v2 = vrot.slane %v3380_v30, 7 }
 0x6ab   : > { %v3273_v47 = vpop.permute.xlu1 %3272  ;;  %v3445_v8 = vrot.slane %v3381_v59, 1  ;;  %v3444_v35 = vrot.slane %v3380_v30, 1 }
 0x6ac   : > { %v11293_v0 = vmax.f32 %v11075_v48, %v3367_v44  ;;  %v11296_v12 = vmax.f32 %v11069_v61, %v3366_v51  ;;  %v3299_v26 = vmul.f32 %v7401_v15, %v3273_v47  ;;  %v3414_v52 = vsel %vm15876_vm11, %v3396_v2, %v3397_v39  ;;  %v15885_v44 = vld [vmem:[#allocation121_spill] sm:$0xff]  ;;  %vm15897_vm11 = vmmov %vm15895_vm1 }
 0x6ad   : > { %v3462_v21 = vsel %vm15883_vm10, %v3444_v35, %v3445_v8  ;;  %vm15905_vm10 = vmmov %vm15895_vm1 }
 0x6ae   : > { %v15063_v25 = vrot.slane %v11293_v0, 1  ;;  %v15065_v32 = vrot.slane %v11296_v12, 7  ;;  %v3446_v38 = vrot.slane %v11296_v12, 1 }
 0x6af   : > { %v3321_v55 = vpop.permute.xlu1 %3320 }
 0x6b0   : > { %v3347_v11 = vmul.f32 %v7411_v50, %v3321_v55  ;;  %v3461_v48 = vsel %vm15877_vm4, %v3445_v8, %v3446_v38  ;;  %v3413_v61 = vsel %vm15878_vm12, %v3397_v39, %v15065_v32  ;;  %v3460_v53 = vsel %vm15879_vm8, %v3446_v38, %v15063_v25  ;;  %vm15898_vm4 = vmmov %vm15869_vm0 }
 0x6b1   : > { %v3493_v18 = vmax.f32 %v3414_v52, %v3461_v48  ;;  %v3494_v16 = vmax.f32 %v3413_v61, %v3460_v53  ;;  %vm15901_vm12 = vmmov %vm15869_vm0 }
 0x6b2   : > { %v3363_v54 = vmax.f32 %v3299_v26, %v3347_v11  ;;  %vm15902_vm8 = vmmov %vm15869_vm0 }
 0x6b3   : > { %v3509_v43 = vmax.f32 %v3381_v59, %v3493_v18  ;;  %v3510_v45 = vmax.f32 %v11296_v12, %v3494_v16 }
 0x6b4   : > { %v11316_v5 = vmax.f32 %v11098_v63, %v3363_v54 }
 0x6b5   : > { %v11322_v23 = vmul.f32 %v15603_v27, %v3509_v43  ;;  %v11325_v62 = vmul.f32 %v15881_v33, %v3510_v45 }
 0x6b6   : > { %v3395_v40 = vrot.slane %v11316_v5, 7  ;;  %v15064_v9 = vrot.slane %v11316_v5, 1 }
 0x6b7   : > { %15880 = vst [vmem:[#allocation158_spill] sm:$0xff] %v11322_v23  ;;  %3548 = vrot.lane.b32.xlu0 %v11322_v23, %s7007_s23  ;;  %3550 = vrot.lane.b32.xlu1 %v11325_v62, %s7007_s23 }
 0x6b8   : > { %v3415_v63 = vsel %vm15882_vm13, %v3395_v40, %v3396_v2  ;;  %v3463_v41 = vsel %vm15884_vm7, %v15064_v9, %v3444_v35  ;;  %vm15904_vm13 = vmmov %vm15895_vm1 }
 0x6b9   : > { %v3492_v37 = vmax.f32 %v3415_v63, %v3462_v21  ;;  %vm15906_vm7 = vmmov %vm15895_vm1 }
 0x6bb   : > { %v3508_v59 = vmax.f32 %v3380_v30, %v3492_v37  ;;  %3596 = vrot.lane.b32.xlu0 %v11322_v23, %s7006_s22  ;;  %3598 = vrot.lane.b32.xlu1 %v11325_v62, %s7006_s22  ;;  %v15894_v23 = vld [vmem:[#allocation100_spill] sm:$0xff] }
 0x6bd   : > { %v11344_v51 = vmul.f32 %v15885_v44, %v3508_v59 }
 0x6bf   : > { %3546 = vrot.lane.b32.xlu1 %v11344_v51, %s7007_s23 }
 0x6c3   : > { %3594 = vrot.lane.b32.xlu1 %v11344_v51, %s7006_s22 }
 0x6c6   : > { %v3283_v39 = vpop.permute.xlu0 %3282 }
 0x6c7   : > { %v3285_v47 = vpop.permute.xlu1 %3284  ;;  %v3304_v44 = vmul.f32 %v7401_v15, %v3283_v39 }
 0x6ca   : > { %v3271_v8 = vpop.permute.xlu0 %3270 }
 0x6cb   : > { %v3269_v2 = vpop.permute.xlu1 %3268  ;;  %v3298_v55 = vmul.f32 %v7401_v15, %v3271_v8 }
 0x6ce   : > { %v3319_v38 = vpop.permute.xlu0 %3318 }
 0x6cf   : > { %v3317_v30 = vpop.permute.xlu1 %3316  ;;  %v3346_v26 = vmul.f32 %v7411_v50, %v3319_v38 }
 0x6d0   : > { %v3345_v38 = vmul.f32 %v7411_v50, %v3317_v30 }
 0x6d1   : > { %v3362_v11 = vmax.f32 %v3298_v55, %v3346_v26  ;;  %v3297_v26 = vmul.f32 %v7401_v15, %v3269_v2 }
 0x6d2   : > { %v3287_v48 = vpop.permute.xlu0 %3286 }
 0x6d3   : > { %v3289_v52 = vpop.permute.xlu1 %3288  ;;  %v11353_v61 = vmax.f32 %v11185_v36, %v3362_v11  ;;  %v3361_v11 = vmax.f32 %v3297_v26, %v3345_v38 }
 0x6d5   : > { %v3394_v53 = vrot.slane %v11353_v61, 7  ;;  %v11372_v9 = vmax.f32 %v11190_v4, %v3361_v11  ;;  %v3306_v4 = vmul.f32 %v7401_v15, %v3287_v48  ;;  %v3307_v11 = vmul.f32 %v7401_v15, %v3289_v52 }
 0x6d6   : > { %v3267_v18 = vpop.permute.xlu0 %3266  ;;  %v15891_v48 = vrot.slane %v11293_v0, 1 }
 0x6d7   : > { %v11356_v54 = vpop.permute.xlu1 %3290  ;;  %v3416_v16 = vsel %vm15886_vm5, %v3394_v53, %v3395_v40  ;;  %v15068_v38 = vrot.slane %v11372_v9, 7  ;;  %vm15907_vm5 = vmmov %vm15869_vm0 }
 0x6d8   : > { %v3491_v35 = vmax.f32 %v3416_v16, %v3463_v41  ;;  %v3305_v16 = vmul.f32 %v7401_v15, %v3285_v47  ;;  %v15067_v47 = vrot.slane %v11353_v61, 1 }
 0x6da   : > { %v3315_v45 = vpop.permute.xlu0 %3314  ;;  %v11363_v63 = vmax.f32 %v11316_v5, %v3491_v35 }
 0x6db   : > { %v11360_v43 = vpop.permute.xlu1 %3338 }
 0x6de   : > { %v3265_v37 = vpop.permute.xlu0 %3264 }
 0x6df   : > { %v11365_v21 = vpop.permute.xlu1 %3292 }
 0x6e2   : > { %v3313_v59 = vpop.permute.xlu0 %3312 }
 0x6e3   : > { %v3341_v36 = vpop.permute.xlu1 %3340 }
 0x6e6   : > { %v3263_v8 = vpop.permute.xlu0 %3262 }
 0x6e7   : > { %v3333_v55 = vpop.permute.xlu1 %3332 }
 0x6e8   : > { %v3353_v40 = vmul.f32 %v7411_v50, %v3333_v55  ;;  %v3399_v55 = vrot.slane %v11293_v0, 7 }
 0x6ea   : > { %v3311_v41 = vpop.permute.xlu0 %3310  ;;  %v3369_v25 = vmax.f32 %v3305_v16, %v3353_v40  ;;  %v15887_v16 = vrot.slane %v11296_v12, 7 }
 0x6eb   : > { %v3337_v33 = vpop.permute.xlu1 %3336 }
 0x6ec   : > { %v11377_v30 = vmax.f32 %v11171_v29, %v3369_v25  ;;  %v3355_v40 = vmul.f32 %v7411_v50, %v3337_v33  ;;  %v15889_v33 = vrot.slane %v11316_v5, 1  ;;  %v3343_v5 = vmul.f32 %v7411_v50, %v3313_v59 }
 0x6ee   : > { %v3331_v35 = vpop.permute.xlu0 %3330  ;;  %v3449_v29 = vrot.slane %v11377_v30, 1  ;;  %v3371_v52 = vmax.f32 %v3307_v11, %v3355_v40  ;;  %v3296_v40 = vmul.f32 %v7401_v15, %v3267_v18  ;;  %v3295_v11 = vmul.f32 %v7401_v15, %v3265_v37 }
 0x6ef   : > { %v3352_v32 = vmul.f32 %v7411_v50, %v3331_v35  ;;  %v3412_v35 = vsel %vm15888_vm15, %v15887_v16, %v3399_v55  ;;  %vm15908_vm15 = vmmov %vm15895_vm1 }
 0x6f1   : > { %v3368_v2 = vmax.f32 %v3304_v44, %v3352_v32 }
 0x6f2   : > { %v3335_v27 = vpop.permute.xlu0 %3334 }
 0x6f3   : > { %v3354_v26 = vmul.f32 %v7411_v50, %v3335_v27  ;;  %v3384_v39 = vmax.f32 %v11168_v42, %v3368_v2  ;;  %v3417_v27 = vsel %vm15869_vm0, %v15068_v38, %v3394_v53  ;;  %v3464_v42 = vsel %vm15890_vm14, %v15067_v47, %v15889_v33  ;;  %vm15909_vm14 = vmmov %vm15869_vm0 }
 0x6f4   : > { %v3344_v53 = vmul.f32 %v7411_v50, %v3315_v45  ;;  %v3359_v45 = vmax.f32 %v3295_v11, %v3343_v5 }
 0x6f5   : > { %v3400_v25 = vrot.slane %v3384_v39, 7  ;;  %v3448_v32 = vrot.slane %v3384_v39, 1  ;;  %v3370_v44 = vmax.f32 %v3306_v4, %v3354_v26 }
 0x6f6   : > { %v3360_v38 = vmax.f32 %v3296_v40, %v3344_v53  ;;  %v3356_v53 = vmul.f32 %v7411_v50, %v11360_v43 }
 0x6f7   : > { %v3459_v12 = vsel %vm15892_vm3, %v15891_v48, %v3448_v32  ;;  %v3411_v2 = vsel %vm15893_vm6, %v3399_v55, %v3400_v25  ;;  %v3458_v26 = vsel %vm15873_vm2, %v3448_v32, %v3449_v29  ;;  %v11413_v33 = vmax.f32 %v11221_v60, %v3370_v44  ;;  %vm15910_vm3 = vmmov %vm15869_vm0 }
 0x6f8   : > { %v3495_v4 = vmax.f32 %v3412_v35, %v3459_v12  ;;  %v3496_v16 = vmax.f32 %v3411_v2, %v3458_v26  ;;  %v11419_v55 = vmax.f32 %v11218_v14, %v3371_v52  ;;  %v3490_v32 = vmax.f32 %v3417_v27, %v3464_v42  ;;  %vm15911_vm6 = vmmov %vm15895_vm1 }
 0x6f9   : > { %v3342_v60 = vmul.f32 %v7411_v50, %v3311_v41  ;;  %v3402_v18 = vrot.slane %v11413_v33, 7  ;;  %v3450_v37 = vrot.slane %v11413_v33, 1  ;;  %v3357_v14 = vmul.f32 %v7411_v50, %v3341_v36  ;;  %vm15912_vm2 = vmmov %vm15895_vm1 }
 0x6fa   : > { %v3511_v48 = vmax.f32 %v11293_v0, %v3495_v4  ;;  %v3512_v47 = vmax.f32 %v3384_v39, %v3496_v16  ;;  %v3401_v0 = vrot.slane %v11377_v30, 7  ;;  %v3294_v39 = vmul.f32 %v7401_v15, %v3263_v8 }
 0x6fb   : > { %v3376_v41 = vmax.f32 %v11237_v19, %v3360_v38  ;;  %v3309_v44 = vmul.f32 %v7401_v15, %v11365_v21  ;;  %v11442_v27 = vmax.f32 %v11257_v3, %v3359_v45  ;;  %v3506_v42 = vmax.f32 %v11353_v61, %v3490_v32  ;;  %v15899_v38 = vld [vmem:[#allocation79_spill] sm:$0xff] }
 0x6fc   : > { %v11422_v59 = vmul.f32 %v15894_v23, %v3511_v48  ;;  %v11425_v35 = vmul.f32 %v9131_v10, %v3512_v47  ;;  %v3451_v47 = vrot.slane %v11419_v55, 1  ;;  %v3358_v52 = vmax.f32 %v3294_v39, %v3342_v60 }
 0x6fd   : > { %v3457_v36 = vsel %vm15895_vm1, %v3449_v29, %v3450_v37  ;;  %v3409_v8 = vsel %vm15896_vm9, %v3401_v0, %v3402_v18  ;;  %v3373_v3 = vmax.f32 %v3309_v44, %v3357_v14  ;;  %v3410_v21 = vsel %vm15898_vm4, %v3400_v25, %v3401_v0  ;;  %vm15913_vm1 = vmmov %vm15869_vm0 }
 0x6fe   : > { %3552 = vrot.lane.b32.xlu0 %v11422_v59, %s7007_s23  ;;  %3554 = vrot.lane.b32.xlu1 %v11425_v35, %s7007_s23  ;;  %v3456_v19 = vsel %vm15897_vm11, %v3450_v37, %v3451_v47  ;;  %v11463_v29 = vmul.f32 %v15899_v38, %v11363_v63  ;;  %v11466_v12 = vmul.f32 %v8957_v20, %v3506_v42  ;;  %v3392_v5 = vrot.slane %v3376_v41, 7  ;;  %vm15914_vm9 = vmmov %vm15912_vm2 }
 0x6ff   : > { %v3497_v2 = vmax.f32 %v3410_v21, %v3457_v36  ;;  %v3498_v26 = vmax.f32 %v3409_v8, %v3456_v19  ;;  %v3391_v4 = vrot.slane %v11442_v27, 7  ;;  %v3374_v16 = vmax.f32 %v11268_v22, %v3358_v52  ;;  %vm15916_vm11 = vmmov %vm15869_vm0 }
 0x700   : > { %v3441_v63 = vrot.slane %v11372_v9, 1  ;;  %v3308_v25 = vmul.f32 %v7401_v15, %v11356_v54  ;;  %v3440_v40 = vrot.slane %v3376_v41, 1  ;;  %v3389_v11 = vmax.f32 %v11254_v58, %v3373_v3  ;;  %vm15917_vm4 = vmmov %vm15912_vm2 }
 0x701   : > { %v3513_v43 = vmax.f32 %v11377_v30, %v3497_v2  ;;  %v3514_v48 = vmax.f32 %v11413_v33, %v3498_v26  ;;  %v3438_v22 = vrot.slane %v3374_v16, 1  ;;  %v15900_v45 = vrot.slane %v11372_v9, 7 }
 0x702   : > { %3600 = vrot.lane.b32.xlu0 %v11422_v59, %s7006_s22  ;;  %3602 = vrot.lane.b32.xlu1 %v11425_v35, %s7006_s22  ;;  %v3372_v32 = vmax.f32 %v3308_v25, %v3356_v53  ;;  %v3419_v37 = vsel %vm15902_vm8, %v3391_v4, %v3392_v5  ;;  %v3453_v58 = vrot.slane %v3389_v11, 1  ;;  %v15903_v54 = vrot.slane %v11353_v61, 1  ;;  %vm15919_vm8 = vmmov %vm15912_vm2 }
 0x703   : > { %v3418_v60 = vsel %vm15901_vm12, %v3392_v5, %v15900_v45  ;;  %v3466_v14 = vsel %vm15905_vm10, %v3440_v40, %v3441_v63  ;;  %v11499_v0 = vmul.f32 %v15837_v17, %v3513_v43  ;;  %v11502_v39 = vmul.f32 %v15836_v34, %v3514_v48  ;;  %vm15918_vm12 = vmmov %vm15869_vm0 }
 0x704   : > { %v3465_v30 = vsel %vm15904_vm13, %v3441_v63, %v15903_v54  ;;  %v3488_v42 = vmax.f32 %v3419_v37, %v3466_v14  ;;  %v3388_v52 = vmax.f32 %v11234_v24, %v3372_v32  ;;  %v3390_v36 = vrot.slane %v3374_v16, 7  ;;  %vm15920_vm13 = vmmov %vm15912_vm2 }
 0x705   : > { %v3489_v44 = vmax.f32 %v3418_v60, %v3465_v30  ;;  %v3469_v61 = vsel %vm15906_vm7, %v3453_v58, %v3438_v22  ;;  %v3405_v8 = vrot.slane %v3389_v11, 7  ;;  %v3439_v19 = vrot.slane %v11442_v27, 1  ;;  %vm15921_vm10 = vmmov %vm15869_vm0 }
 0x706   : > { %3544 = vrot.lane.b32.xlu0 %v11463_v29, %s7007_s23  ;;  %3542 = vrot.lane.b32.xlu1 %v11466_v12, %s7007_s23  ;;  %v3485_v3 = vmul.f32 %v15826_v31, %v3469_v61  ;;  %v3504_v2 = vmax.f32 %v3376_v41, %v3488_v42  ;;  %v3404_v26 = vrot.slane %v3388_v52, 7  ;;  %v3420_v24 = vsel %vm15907_vm5, %v3390_v36, %v3391_v4  ;;  %vm15922_vm7 = vmmov %vm15912_vm2 }
 0x707   : > { %v3505_v21 = vmax.f32 %v11372_v9, %v3489_v44  ;;  %v3467_v53 = vsel %vm15908_vm15, %v3439_v19, %v3440_v40  ;;  %v3403_v25 = vrot.slane %v11419_v55, 7  ;;  %v3421_v43 = vsel %vm15909_vm14, %v3405_v8, %v3390_v36  ;;  %vm15926_vm5 = vmmov %vm15869_vm0 }
 0x708   : > { %v3406_v5 = vsel %vm15869_vm0, %v3404_v26, %v3405_v8  ;;  %v11528_v9 = vmul.f32 %v15822_v7, %v3504_v2  ;;  %v3487_v41 = vmax.f32 %v3420_v24, %v3467_v53  ;;  %v3422_v40 = vmul.f32 %v15825_v28, %v3421_v43  ;;  %vm15927_vm15 = vmmov %vm15869_vm0 }
 0x709   : > { %v11525_v63 = vmul.f32 %v15780_v49, %v3505_v21  ;;  %v3501_v4 = vmax.f32 %v3406_v5, %v3485_v3  ;;  %v3452_v45 = vrot.slane %v3388_v52, 1  ;;  %v3407_v60 = vsel %vm15910_vm3, %v3403_v25, %v3404_v26  ;;  %vm15928_vm0 = vmmov %vm15912_vm2 }
 0x70a   : > { %3592 = vrot.lane.b32.xlu0 %v11463_v29, %s7006_s22  ;;  %3590 = vrot.lane.b32.xlu1 %v11466_v12, %s7006_s22  ;;  %v3503_v48 = vmax.f32 %v11442_v27, %v3487_v41  ;;  %v3468_v37 = vsel %vm15911_vm6, %v3438_v22, %v3439_v19  ;;  %v3408_v22 = vsel %vm15913_vm1, %v3402_v18, %v3403_v25  ;;  %vm15930_vm14 = vmmov %vm15913_vm1 }
 0x70b   : > { %v3517_v32 = vmax.f32 %v3389_v11, %v3501_v4  ;;  %v3454_v54 = vsel %vm15912_vm2, %v3452_v45, %v3453_v58  ;;  %v3486_v11 = vmax.f32 %v3422_v40, %v3468_v37  ;;  %v3455_v58 = vsel %vm15914_vm9, %v3451_v47, %v3452_v45  ;;  %vm15933_vm3 = vmmov %vm15913_vm1 }
 0x70c   : > { %v11550_v30 = vmul.f32 %v15829_v1, %v3503_v48  ;;  %v3500_v14 = vmax.f32 %v3407_v60, %v3454_v54  ;;  %v3499_v33 = vmax.f32 %v3408_v22, %v3455_v58  ;;  %vm15934_vm6 = vmmov %vm15928_vm0 }
 0x70d   : > { %v11553_v27 = vmul.f32 %v15835_v46, %v3517_v32  ;;  %v3502_v44 = vmax.f32 %v3374_v16, %v3486_v11  ;;  %vm15937_vm2 = vmmov %vm15913_vm1 }
 0x70e   : > { %3556 = vrot.lane.b32.xlu0 %v11499_v0, %s7007_s23  ;;  %3558 = vrot.lane.b32.xlu1 %v11502_v39, %s7007_s23  ;;  %v3516_v42 = vmax.f32 %v3388_v52, %v3500_v14  ;;  %v3515_v18 = vmax.f32 %v11419_v55, %v3499_v33  ;;  %vm15938_vm1 = vmmov %vm15928_vm0 }
 0x70f   : > { %v11572_v36 = vmul.f32 %v15834_v13, %v3502_v44  ;;  %vm15939_vm9 = vmmov %vm15937_vm2 }
 0x710   : > { %v11575_v16 = vmul.f32 %v15830_v56, %v3516_v42  ;;  %v11587_v47 = vmul.f32 %v15823_v57, %v3515_v18 }
 0x712   : > { %3604 = vrot.lane.b32.xlu0 %v11499_v0, %s7006_s22  ;;  %3606 = vrot.lane.b32.xlu1 %v11502_v39, %s7006_s22 }
 0x716   : > { %3540 = vrot.lane.b32.xlu0 %v11525_v63, %s7007_s23  ;;  %3538 = vrot.lane.b32.xlu1 %v11528_v9, %s7007_s23 }
 0x71a   : > { %3588 = vrot.lane.b32.xlu0 %v11525_v63, %s7006_s22  ;;  %3586 = vrot.lane.b32.xlu1 %v11528_v9, %s7006_s22 }
 0x71e   : > { %3536 = vrot.lane.b32.xlu0 %v11550_v30, %s7007_s23  ;;  %3564 = vrot.lane.b32.xlu1 %v11553_v27, %s7007_s23 }
 0x722   : > { %3584 = vrot.lane.b32.xlu0 %v11550_v30, %s7006_s22  ;;  %3612 = vrot.lane.b32.xlu1 %v11553_v27, %s7006_s22 }
 0x726   : > { %3534 = vrot.lane.b32.xlu0 %v11572_v36, %s7007_s23  ;;  %3562 = vrot.lane.b32.xlu1 %v11575_v16, %s7007_s23 }
 0x729   : > { %v3551_v52 = vpop.permute.xlu1 %3550  ;;  %v3549_v8 = vpop.permute.xlu0 %3548 }
 0x72a   : > { %3582 = vrot.lane.b32.xlu0 %v11572_v36, %s7006_s22  ;;  %3610 = vrot.lane.b32.xlu1 %v11575_v16, %s7006_s22  ;;  %v3574_v60 = vmul.f32 %v7401_v15, %v3551_v52  ;;  %v3573_v37 = vmul.f32 %v7401_v15, %v3549_v8  ;;  %v15915_v52 = vld [vmem:[#allocation158_spill] sm:$0xff] }
 0x72d   : > { %v3599_v61 = vpop.permute.xlu1 %3598  ;;  %v3597_v55 = vpop.permute.xlu0 %3596 }
 0x72e   : > { %3560 = vrot.lane.b32.xlu0 %v11587_v47, %s7007_s23  ;;  %v3622_v4 = vmul.f32 %v7411_v50, %v3599_v61  ;;  %v3621_v25 = vmul.f32 %v7411_v50, %v3597_v55 }
 0x730   : > { %v3638_v44 = vmax.f32 %v3574_v60, %v3622_v4  ;;  %v3637_v42 = vmax.f32 %v3573_v37, %v3621_v25 }
 0x731   : > { %v3547_v19 = vpop.permute.xlu1 %3546 }
 0x732   : > { %3608 = vrot.lane.b32.xlu0 %v11587_v47, %s7006_s22  ;;  %v3572_v43 = vmul.f32 %v7401_v15, %v3547_v19  ;;  %v11607_v19 = vmax.f32 %v11325_v62, %v3638_v44  ;;  %v3653_v55 = vmax.f32 %v15915_v52, %v3637_v42 }
 0x734   : > { %v3669_v62 = vrot.slane %v3653_v55, 7  ;;  %v3717_v4 = vrot.slane %v3653_v55, 1  ;;  %v3670_v37 = vrot.slane %v11607_v19, 7 }
 0x735   : > { %v3595_v3 = vpop.permute.xlu1 %3594 }
 0x736   : > { %v3620_v41 = vmul.f32 %v7411_v50, %v3595_v3 }
 0x738   : > { %v3636_v54 = vmax.f32 %v3572_v43, %v3620_v41  ;;  %v3718_v41 = vrot.slane %v11607_v19, 1 }
 0x73a   : > { %v11604_v61 = vmax.f32 %v11344_v51, %v3636_v54 }
 0x770   : > { %v3555_v21 = vpop.permute.xlu1 %3554  ;;  %v3553_v2 = vpop.permute.xlu0 %3552 }
 0x771   : > { %v3576_v11 = vmul.f32 %v7401_v15, %v3555_v21  ;;  %v3575_v14 = vmul.f32 %v7401_v15, %v3553_v2 }
 0x774   : > { %v3603_v26 = vpop.permute.xlu1 %3602  ;;  %v3601_v24 = vpop.permute.xlu0 %3600 }
 0x775   : > { %v3624_v40 = vmul.f32 %v7411_v50, %v3603_v26  ;;  %v3623_v48 = vmul.f32 %v7411_v50, %v3601_v24  ;;  %v3668_v26 = vrot.slane %v11604_v61, 7 }
 0x777   : > { %v3640_v22 = vmax.f32 %v3576_v11, %v3624_v40  ;;  %v3639_v58 = vmax.f32 %v3575_v14, %v3623_v48 }
 0x778   : > { %v3543_v53 = vpop.permute.xlu1 %3542  ;;  %v3545_v5 = vpop.permute.xlu0 %3544 }
 0x779   : > { %v11611_v8 = vmax.f32 %v11425_v35, %v3640_v22  ;;  %v11614_v3 = vmax.f32 %v11422_v59, %v3639_v58  ;;  %v3571_v25 = vmul.f32 %v7401_v15, %v3545_v5  ;;  %v3570_v40 = vmul.f32 %v7401_v15, %v3543_v53 }
 0x77a   : > { %v3733_v5 = vsel %vm15917_vm4, %v3717_v4, %v3718_v41  ;;  %vm15941_vm4 = vmmov %vm15928_vm0 }
 0x77b   : > { %v15070_v35 = vrot.slane %v11611_v8, 1  ;;  %v15071_v43 = vrot.slane %v11614_v3, 7  ;;  %v3719_v59 = vrot.slane %v11614_v3, 1 }
 0x77c   : > { %v3591_v32 = vpop.permute.xlu1 %3590  ;;  %v3593_v45 = vpop.permute.xlu0 %3592 }
 0x77d   : > { %v3619_v24 = vmul.f32 %v7411_v50, %v3593_v45  ;;  %v3618_v51 = vmul.f32 %v7411_v50, %v3591_v32  ;;  %v3686_v45 = vsel %vm15916_vm11, %v3668_v26, %v3669_v62  ;;  %v3684_v53 = vsel %vm15918_vm12, %v3670_v37, %v15071_v43  ;;  %vm15940_vm11 = vmmov %vm15937_vm2 }
 0x77e   : > { %v3765_v44 = vmax.f32 %v3686_v45, %v3733_v5  ;;  %v3731_v42 = vsel %vm15919_vm8, %v3719_v59, %v15070_v35  ;;  %vm15943_vm12 = vmmov %vm15928_vm0 }
 0x77f   : > { %v3635_v32 = vmax.f32 %v3571_v25, %v3619_v24  ;;  %v3634_v54 = vmax.f32 %v3570_v40, %v3618_v51  ;;  %v3732_v25 = vsel %vm15920_vm13, %v3718_v41, %v3719_v59  ;;  %v3767_v59 = vmax.f32 %v3684_v53, %v3731_v42  ;;  %vm15944_vm8 = vmmov %vm15928_vm0 }
 0x780   : > { %v3559_v33 = vpop.permute.xlu1 %3558  ;;  %v3557_v18 = vpop.permute.xlu0 %3556  ;;  %vm15950_vm13 = vmmov %vm15928_vm0 }
 0x781   : > { %v3578_v22 = vmul.f32 %v7401_v15, %v3559_v33  ;;  %v11642_v24 = vmax.f32 %v11463_v29, %v3635_v32  ;;  %v11650_v40 = vmax.f32 %v11466_v12, %v3634_v54  ;;  %v3685_v29 = vsel %vm15921_vm10, %v3669_v62, %v3670_v37  ;;  %v15923_v37 = vld [vmem:[#allocation99_spill] sm:$0xff]  ;;  %vm15951_vm10 = vmmov %vm15937_vm2 }
 0x782   : > { %v3766_v41 = vmax.f32 %v3685_v29, %v3732_v25 }
 0x783   : > { %v3667_v12 = vrot.slane %v11642_v24, 7 }
 0x784   : > { %v3607_v21 = vpop.permute.xlu1 %3606  ;;  %v3605_v2 = vpop.permute.xlu0 %3604 }
 0x785   : > { %v3626_v11 = vmul.f32 %v7411_v50, %v3607_v21  ;;  %v3625_v14 = vmul.f32 %v7411_v50, %v3605_v2  ;;  %v3577_v21 = vmul.f32 %v7401_v15, %v3557_v18  ;;  %v3716_v18 = vrot.slane %v11604_v61, 1 }
 0x787   : > { %v3642_v32 = vmax.f32 %v3578_v22, %v3626_v11  ;;  %v3641_v5 = vmax.f32 %v3577_v21, %v3625_v14  ;;  %v3782_v22 = vmax.f32 %v11607_v19, %v3766_v41  ;;  %v15932_v41 = vld [vmem:[#allocation150_spill] sm:$0xff] }
 0x788   : > { %v3539_v48 = vpop.permute.xlu1 %3538  ;;  %v3541_v60 = vpop.permute.xlu0 %3540 }
 0x789   : > { %v3568_v45 = vmul.f32 %v7401_v15, %v3539_v48  ;;  %v3569_v33 = vmul.f32 %v7401_v15, %v3541_v60  ;;  %v3666_v48 = vrot.slane %v11650_v40, 7  ;;  %v3715_v60 = vrot.slane %v11642_v24, 1 }
 0x78a   : > { %v11661_v54 = vmax.f32 %v11502_v39, %v3642_v32  ;;  %v11664_v62 = vmax.f32 %v11499_v0, %v3641_v5  ;;  %v3672_v39 = vrot.slane %v11611_v8, 7  ;;  %v3783_v0 = vmax.f32 %v11614_v3, %v3767_v59 }
 0x78b   : > { %v3688_v21 = vsel %vm15927_vm15, %v3666_v48, %v3667_v12  ;;  %vm15954_vm15 = vmmov %vm15928_vm0 }
 0x78c   : > { %v3587_v58 = vpop.permute.xlu1 %3586  ;;  %v3589_v52 = vpop.permute.xlu0 %3588  ;;  %v3721_v19 = vrot.slane %v11664_v62, 1 }
 0x78d   : > { %v3616_v2 = vmul.f32 %v7411_v50, %v3587_v58  ;;  %v3617_v51 = vmul.f32 %v7411_v50, %v3589_v52  ;;  %v3781_v58 = vmax.f32 %v3653_v55, %v3765_v44  ;;  %v3734_v55 = vsel %vm15922_vm7, %v3716_v18, %v3717_v4  ;;  %vm15952_vm7 = vmmov %vm15937_vm2 }
 0x78e   : > { %v3687_v4 = vsel %vm15926_vm5, %v3667_v12, %v3668_v26  ;;  %v3714_v12 = vrot.slane %v11650_v40, 1  ;;  %vm15953_vm5 = vmmov %vm15928_vm0 }
 0x78f   : > { %v3632_v35 = vmax.f32 %v3568_v45, %v3616_v2  ;;  %v3633_v52 = vmax.f32 %v3569_v33, %v3617_v51  ;;  %v11669_v51 = vmul.f32 %v15923_v37, %v3781_v58   ;;  %v15073_v2 = vrot.slane %v11661_v54, 1 }
 0x790   : > { %v3565_v43 = vpop.permute.xlu1 %3564  ;;  %v3537_v56 = vpop.permute.xlu0 %3536  ;;  %v11702_v58 = vmul.f32 %v15894_v23, %v3783_v0   ;;  %v15935_v0 = vld [vmem:[#allocation80_spill] sm:$0xff] }
 0x791   : > { %15924 = vst [vmem:[#allocation104_spill] sm:$0xff] %v11669_v51  ;;  %v15925_v11 = vmov %v11669_v51  ;;  %v11672_v14 = vmax.f32 %v11528_v9, %v3632_v35  ;;  %v11675_v44 = vmax.f32 %v11525_v63, %v3633_v52  ;;  %v3735_v9 = vsel %vm15928_vm0, %v3715_v60, %v3716_v18  ;;  %vm15957_vm0 = vmmov %vm15937_vm2 }
 0x792   : > { %v3567_v63 = vmul.f32 %v7401_v15, %v3537_v56  ;;  %v15074_v51 = vrot.slane %v11664_v62, 7  ;;  %v15929_v56 = vrot.slane %v11614_v3, 7  ;;  %15931 = vst [vmem:[#allocation83_spill] sm:$0xff] %v11702_v58  ;;  %v3581_v52 = vmul.f32 %v7401_v15, %v3565_v43 }
 0x793   : > { %v3664_v26 = vrot.slane %v11672_v14, 7  ;;  %v3665_v45 = vrot.slane %v11675_v44, 7  ;;  %v3713_v33 = vrot.slane %v11675_v44, 1  ;;  %v3763_v37 = vmax.f32 %v3688_v21, %v3735_v9 }
 0x794   : > { %v3613_v53 = vpop.permute.xlu1 %3612  ;;  %v3585_v42 = vpop.permute.xlu0 %3584  ;;  %v11699_v18 = vsel %vm15930_vm14, %v15929_v56, %v3672_v39  ;;  %v3682_v3 = vsel %vm15933_vm3, %v3672_v39, %v15074_v51  ;;  %v3729_v23 = vsel %vm15934_vm6, %v3721_v19, %v15073_v2  ;;  %vm15966_vm14 = vmmov %vm15957_vm0 }
 0x795   : > { %v3615_v35 = vmul.f32 %v7411_v50, %v3585_v42  ;;  %v3629_v25 = vmul.f32 %v7411_v50, %v3613_v53  ;;  %v3764_v53 = vmax.f32 %v3687_v4, %v3734_v55  ;;  %v3690_v55 = vsel %vm15937_vm2, %v3664_v26, %v3665_v45  ;;  %vm15975_vm3 = vmmov %vm15938_vm1 }
 0x796   : > { %v3779_v56 = vmax.f32 %v11642_v24, %v3763_v37  ;;  %v3689_v2 = vsel %vm15940_vm11, %v3665_v45, %v3666_v48  ;;  %vm15979_vm6 = vmmov %vm15957_vm0 }
 0x797   : > { %v3631_v29 = vmax.f32 %v3567_v63, %v3615_v35  ;;  %v3645_v43 = vmax.f32 %v3581_v52, %v3629_v25  ;;  %v11718_v63 = vmul.f32 %v15935_v0, %v3782_v22   ;;  %v3712_v35 = vrot.slane %v11672_v14, 1  ;;  %vm15980_vm2 = vmmov %vm15957_vm0 }
 0x798   : > { %v3563_v32 = vpop.permute.xlu1 %3562  ;;  %v3535_v5 = vpop.permute.xlu0 %3534  ;;  %v3780_v52 = vmax.f32 %v11604_v61, %v3764_v53  ;;  %v3769_v0 = vmax.f32 %v3682_v3, %v3729_v23 }
 0x799   : > { %v3647_v42 = vmax.f32 %v11550_v30, %v3631_v29  ;;  %15936 = vst [vmem:[#allocation84_spill] sm:$0xff] %v11718_v63  ;;  %v3737_v30 = vsel %vm15938_vm1, %v3713_v33, %v3714_v12  ;;  %v3580_v9 = vmul.f32 %v7401_v15, %v3563_v32  ;;  %v3566_v29 = vmul.f32 %v7401_v15, %v3535_v5 }
 0x79a   : > { %v11736_v51 = vmax.f32 %v11553_v27, %v3645_v43  ;;  %v3738_v24 = vsel %vm15944_vm8, %v3712_v35, %v3713_v33  ;;  %v3785_v43 = vmax.f32 %v11664_v62, %v3769_v0 }
 0x79b   : > { %v3663_v4 = vrot.slane %v3647_v42, 7  ;;  %v3711_v53 = vrot.slane %v3647_v42, 1 }
 0x79c   : > { %v3611_v21 = vpop.permute.xlu1 %3610  ;;  %v3583_v39 = vpop.permute.xlu0 %3582 }
 0x79d   : > { %v3628_v25 = vmul.f32 %v7411_v50, %v3611_v21  ;;  %v3614_v22 = vmul.f32 %v7411_v50, %v3583_v39  ;;  %v3691_v59 = vsel %vm15939_vm9, %v3663_v4, %v3664_v26  ;;  %v3736_v21 = vsel %vm15941_vm4, %v3714_v12, %v3715_v60  ;;  %v15947_v12 = vld [vmem:[#allocation121_spill] sm:$0xff]  ;;  %vm15982_vm9 = vmmov %vm15938_vm1 }
 0x79e   : > { %v15942_v39 = vrot.slane %v11611_v8, 1  ;;  %v3761_v26 = vmax.f32 %v3690_v55, %v3737_v30  ;;  %v3760_v48 = vmax.f32 %v3691_v59, %v3738_v24  ;;  %v11751_v55 = vmul.f32 %v15899_v38, %v3779_v56  }
 0x79f   : > { %v3644_v32 = vmax.f32 %v3580_v9, %v3628_v25  ;;  %v3630_v5 = vmax.f32 %v3566_v29, %v3614_v22  ;;  %v3762_v23 = vmax.f32 %v3689_v2, %v3736_v21  ;;  %v3677_v59 = vrot.slane %v11736_v51, 7 }
 0x7a0   : > { %v3730_v61 = vsel %vm15943_vm12, %v15942_v39, %v3721_v19  ;;  %v3561_v37 = vpop.permute.xlu0 %3560  ;;  %15945 = vst [vmem:[#allocation107_spill] sm:$0xff] %v11751_v55  ;;  %v15946_v60 = vmov %v11751_v55  ;;  %v3674_v19 = vrot.slane %v11661_v54, 7  ;;  %v3739_v29 = vsel %vm15950_vm13, %v3711_v53, %v3712_v35 }
 0x7a1   : > { %v11747_v27 = vmax.f32 %v11575_v16, %v3644_v32  ;;  %v3646_v45 = vmax.f32 %v11572_v36, %v3630_v5  ;;  %v11754_v32 = vmul.f32 %v15947_v12, %v3780_v52   ;;  %v3768_v33 = vmax.f32 %v11699_v18, %v3730_v61 }
 0x7a2   : > { %v3777_v16 = vmax.f32 %v11675_v44, %v3761_v26  ;;  %v3725_v36 = vrot.slane %v11736_v51, 1  ;;  %v3776_v2 = vmax.f32 %v11672_v14, %v3760_v48  ;;  %v3778_v22 = vmax.f32 %v11650_v40, %v3762_v23 }
 0x7a3   : > { %15948 = vst [vmem:[#allocation85_spill] sm:$0xff] %v11754_v32  ;;  %v15949_v3 = vmov %v11754_v32  ;;  %v3662_v30 = vrot.slane %v3646_v45, 7  ;;  %v3676_v38 = vrot.slane %v11747_v27, 7  ;;  %v3710_v55 = vrot.slane %v3646_v45, 1 }
 0x7a4   : > { %v3609_v9 = vpop.permute.xlu0 %3608  ;;  %v3579_v14 = vmul.f32 %v7401_v15, %v3561_v37  ;;  %v11780_v49 = vmul.f32 %v15780_v49, %v3777_v16   ;;  %v3784_v5 = vmax.f32 %v11611_v8, %v3768_v33  ;;  %v11786_v39 = vmul.f32 %v15822_v7, %v3776_v2   ;;  %v15967_v33 = vld [vmem:[#allocation151_spill] sm:$0xff] }
 0x7a5   : > { %v3692_v18 = vsel %vm15951_vm10, %v3662_v30, %v3663_v4  ;;  %v3693_v25 = vsel %vm15952_vm7, %v3677_v59, %v3662_v30  ;;  %v3741_v56 = vsel %vm15953_vm5, %v3725_v36, %v3710_v55  ;;  %v3740_v0 = vsel %vm15954_vm15, %v3710_v55, %v3711_v53 }
 0x7a6   : > { %v3694_v44 = vmul.f32 %v15825_v28, %v3693_v25  ;;  %v3759_v52 = vmax.f32 %v3692_v18, %v3739_v29  ;;  %v3757_v35 = vmul.f32 %v15826_v31, %v3741_v56  ;;  %v3627_v4 = vmul.f32 %v7411_v50, %v3609_v9  ;;  %15955 = vst [vmem:[#allocation47_spill] sm:$0xff] %v11780_v49  ;;  %v15973_v29 = vld [vmem:[#allocation156_spill] sm:$0xff] }
 0x7a7   : > { %v15956_v21 = vmov %v11780_v49  ;;  %v3678_v40 = vsel %vm15957_vm0, %v3676_v38, %v3677_v59  ;;  %15958 = vst [vmem:[#allocation23_spill] sm:$0xff] %v11786_v39  ;;  %v15959_v61 = vmov %v11786_v39  ;;  %v11789_v39 = vmul.f32 %v8957_v20, %v3778_v22   ;;  %v15964_v49 = vld [vmem:[#allocation152_spill] sm:$0xff] }
 0x7a8   : > { %v3758_v28 = vmax.f32 %v3694_v44, %v3740_v0  ;;  %v3775_v32 = vmax.f32 %v3647_v42, %v3759_v52  ;;  %v3773_v24 = vmax.f32 %v3678_v40, %v3757_v35  ;;  %v3643_v26 = vmax.f32 %v3579_v14, %v3627_v4 }
 0x7a9   : > { %15960 = vst [vmem:[#allocation88_spill] sm:$0xff] %v11789_v39  ;;  %v15961_v31 = vmov %v11789_v39  ;;  %v3724_v37 = vrot.slane %v11747_v27, 1  ;;  %v3811_v48 = vsub.f32 %v15946_v60, %v15964_v49  ;;  %v15965_v42 = vrot.slane %v11664_v62, 7  ;;  %v15987_v49 = vld [vmem:[#allocation146_spill] sm:$0xff] }
 0x7aa   : > { %v3774_v53 = vmax.f32 %v3646_v45, %v3758_v28  ;;  %v11793_v7 = vmul.f32 %v15829_v1, %v3775_v32   ;;  %v3659_v23 = vmax.f32 %v11587_v47, %v3643_v26  ;;  %v3812_v59 = vsub.f32 %v15949_v3, %v15967_v33  ;;  %v15970_v45 = vld [vmem:[#allocation154_spill] sm:$0xff]  ;;  %v15974_v47 = vld [vmem:[#allocation155_spill] sm:$0xff] }
 0x7ab   : > { %v3681_v8 = vsel %vm15966_vm14, %v15965_v42, %v3674_v19  ;;  %v11805_v1 = vmul.f32 %v15837_v17, %v3785_v43   ;;  %v3809_v16 = vsub.f32 %v15956_v21, %v15970_v45  ;;  %v3789_v55 = vmax.f32 %v11736_v51, %v3773_v24 }
 0x7ac   : > { %15962 = vst [vmem:[#allocation11_spill] sm:$0xff] %v11793_v7  ;;  %v15963_v12 = vmov %v11793_v7  ;;  %v11810_v7 = vmul.f32 %v15834_v13, %v3774_v53   ;;  %v3675_v62 = vrot.slane %v3659_v23, 7  ;;  %v3723_v9 = vrot.slane %v3659_v23, 1  ;;  %v15978_v13 = vld [vmem:[#allocation153_spill] sm:$0xff] }
 0x7ad   : > { %15968 = vst [vmem:[#allocation28_spill] sm:$0xff] %v11805_v1  ;;  %v15969_v30 = vmov %v11805_v1  ;;  %v3807_v18 = vsub.f32 %v15963_v12, %v15973_v29  ;;  %v3808_v25 = vsub.f32 %v15959_v61, %v15974_v47  ;;  %v3726_v17 = vsel %vm15975_vm3, %v3724_v37, %v3725_v36  ;;  %v15976_v1 = vld [vmem:[#allocation157_spill] sm:$0xff] }
 0x7ae   : > { %15971 = vst [vmem:[#allocation91_spill] sm:$0xff] %v11810_v7  ;;  %v15972_v2 = vmov %v11810_v7  ;;  %v11822_v22 = vmul.f32 %v9131_v10, %v3784_v5   ;;  %v3810_v51 = vsub.f32 %v15961_v31, %v15978_v13  ;;  %v3679_v44 = vsel %vm15979_vm6, %v3675_v62, %v3676_v38 }
 0x7af   : > { %v3806_v43 = vsub.f32 %v15972_v2, %v15976_v1  ;;  %v3680_v56 = vsel %vm15980_vm2, %v3674_v19, %v3675_v62  ;;  %v3727_v52 = vsel %vm15938_vm1, %v3723_v9, %v3724_v37  ;;  %v15981_v36 = vrot.slane %v11661_v54, 1  ;;  %v15997_v62 = vld [vmem:[#allocation145_spill] sm:$0xff] }
 0x7b0   : > { %15977 = vst [vmem:[#allocation94_spill] sm:$0xff] %v11822_v22  ;;  %v3771_v14 = vmax.f32 %v3680_v56, %v3727_v52  ;;  %v3772_v4 = vmax.f32 %v3679_v44, %v3726_v17  ;;  %v11837_v40 = vmul.f32 %v15835_v46, %v3789_v55   ;;  %v3823_v32 = vmax.f32 %v3807_v18, %v3811_v48  ;;  %v15988_v46 = vld [vmem:[#allocation149_spill] sm:$0xff]  ;;  %v15998_v18 = vld [vmem:[#allocation144_spill] sm:$0xff] }
 0x7b1   : > { %v3728_v0 = vsel %vm15982_vm9, %v15981_v36, %v3723_v9  ;;  %v3824_v5 = vmax.f32 %v3808_v25, %v3812_v59  ;;  %v15985_v38 = vsub.f32 %v15925_v11, %v15932_v41  ;;  %v3822_v37 = vmax.f32 %v3806_v43, %v3810_v51  ;;  %v15996_v59 = vld [vmem:[#allocation142_spill] sm:$0xff] }
 0x7b2   : > { %v3770_v35 = vmax.f32 %v3681_v8, %v3728_v0  ;;  %15983 = vst [vmem:[#allocation17_spill] sm:$0xff] %v11837_v40  ;;  %v15984_v28 = vmov %v11837_v40  ;;  %v3787_v39 = vmax.f32 %v3659_v23, %v3771_v14  ;;  %v3788_v26 = vmax.f32 %v11747_v27, %v3772_v4  ;;  %v15989_v8 = vld [vmem:[#allocation147_spill] sm:$0xff]  ;;  %v15993_v27 = vld [vmem:[#allocation81_spill] sm:$0xff] }
 0x7b3   : > { %v3825_v19 = vmax.f32 %v3809_v16, %v15985_v38  ;;  %v3815_v53 = vsub.f32 %v11702_v58, %v15986_v6  ;;  %v3817_v42 = vsub.f32 %v15969_v30, %v15987_v49  ;;  %v3814_v48 = vsub.f32 %v11718_v63, %v15988_v46 }
 0x7b4   : > { %v3786_v24 = vmax.f32 %v11661_v54, %v3770_v35  ;;  %v3816_v33 = vsub.f32 %v11822_v22, %v15989_v8  ;;  %v11853_v29 = vmul.f32 %v15823_v57, %v3787_v39   ;;  %v11859_v35 = vmul.f32 %v15993_v27, %v3788_v26  }
 0x7b5   : > { %v3821_v45 = vsub.f32 %v15984_v28, %v15996_v59  ;;  %v3827_v16 = vmax.f32 %v3823_v32, %v3815_v53  ;;  %v3829_v55 = vmax.f32 %v3825_v19, %v3817_v42  ;;  %v3826_v47 = vmax.f32 %v3822_v37, %v3814_v48 }
 0x7b6   : > { %15990 = vst [vmem:[#allocation122_spill] sm:$0xff] %v11853_v29  ;;  %v15991_v41 = vmov %v11853_v29  ;;  %v11856_v54 = vmul.f32 %v15836_v34, %v3786_v24   ;;  %15994 = vst [vmem:[#allocation95_spill] sm:$0xff] %v11859_v35  ;;  %v15995_v23 = vmov %v11859_v35  ;;  %v3828_v7 = vmax.f32 %v3824_v5, %v3816_v33  ;;  %v15999_v29 = vld [vmem:[#allocation143_spill] sm:$0xff] }
 0x7b7   : > { %v3819_v57 = vsub.f32 %v15991_v41, %v15998_v18  ;;  %v3820_v34 = vsub.f32 %v15995_v23, %v15999_v29  ;;  %v3833_v43 = vmax.f32 %v3829_v55, %v3821_v45  ;;  %v16001_v48 = vmov %v15984_v28 }
 0x7b8   : > { %15992 = vst [vmem:[#allocation22_spill] sm:$0xff] %v11856_v54  ;;  %v3818_v9 = vsub.f32 %v11856_v54, %v15997_v62  ;;  %v16003_v29 = vmov %v15991_v41  ;;  %v16004_v33 = vmov %v11856_v54  ;;  %v16008_v5 = vmov %v11718_v63 }
 0x7b9   : > { %v3831_v17 = vmax.f32 %v3827_v16, %v3819_v57  ;;  %v3832_v1 = vmax.f32 %v3828_v7, %v3820_v34  ;;  %v16010_v32 = vmov %v15949_v3  ;;  %v16011_v55 = vmov %v15946_v60 }
 0x7ba   : > { %v3830_v25 = vmax.f32 %v3826_v47, %v3818_v9  ;;  %v16007_v9 = vmov %v11702_v58  ;;  %v16012_v39 = vmov %v15961_v31  ;;  %v16013_v49 = vmov %v15956_v21 }
 0x7bb   : > { %v3835_v51 = vmax.f32 %v3832_v1, %v3833_v43  ;;  %v16005_v1 = vmov %v15969_v30  ;;  %v16006_v43 = vmov %v11822_v22  ;;  %v16014_v40 = vmov %v15959_v61 }
 0x7bc   : > { %v3834_v13 = vmax.f32 %v3830_v25, %v3831_v17  ;;  %v16015_v7 = vmov %v15963_v12  ;;  %v16016_v19 = vmov %v15972_v2 }
 0x7be   : > { %v3836_v44 = vmax.f32 %v3834_v13, %v3835_v51  ;;  %v16009_v51 = vmov %v15925_v11 }
 0x7c0   : > { %3837 = vmax.xlane.f32.xlu0 %v3836_v44 }
 0x84d   : > { %v3838_v56 = vpop.xlane.xlu0 %3837 }
 0x84e   : > { %v3839_v52 = vrot.slane %v3838_v56, 4 }
 0x850   : > { %v3840_v36 = vmax.f32 %v3838_v56, %v3839_v52 }
 0x852   : > { %v3841_v0 = vrot.slane %v3840_v36, 2 }
 0x854   : > { %v3842_v35 = vmax.f32 %v3840_v36, %v3841_v0 }
 0x856   : > { %v3843_v14 = vrot.slane %v3842_v35, 1 }
 0x858   : > { %v3844_v4 = vmax.f32 %v3842_v35, %v3843_v14  ;;  %v16002_v35 = vmov %v15995_v23 }
 0x85a   : > { %6393 = vpush %v3844_v4 }
 0x88b   : > { %s6394_s24 = spop %6393 }
 0x88c   : > { %p3846_p8 = scmp.gt.f32.partialorder %s6394_s24, 0.5 }
 0x88e   : > { %p11870_p10 = pnand %p3846_p8, %p1625_p9 }
 0x88f   :  { %v11927_v38 = vsub.f32 (%p11870_p10), 1.0, %v15972_v2  ;;  %v11930_v19 = vsub.f32 (%p11870_p10), 1.0, %v15963_v12  ;;  %v11933_v24 = vsub.f32 (%p11870_p10), 1.0, %v15959_v61  ;;  %v11936_v26 = vsub.f32 (%p11870_p10), 1.0, %v15956_v21  ;;  %v16031_v48 = vld [vmem:[#allocation74_spill] sm:$0xff] (%p11870_p10)  ;;  %v16033_v27 = vld [vmem:[#allocation73_spill] sm:$0xff] (%p11870_p10) }
 0x890   :  { %1629 = sbr.rel (!%p11870_p10) target bundleno = 583 (0x247), region = 42  ;;  %v11939_v37 = vsub.f32 (%p11870_p10), 1.0, %v15961_v31  ;;  %v11942_v6 = vsub.f32 (%p11870_p10), 1.0, %v15946_v60  ;;  %v11945_v53 = vsub.f32 (%p11870_p10), 1.0, %v15949_v3  ;;  %v11948_v20 = vsub.f32 (%p11870_p10), 1.0, %v15925_v11  ;;  %v16034_v1 = vld [vmem:[#allocation114_spill] sm:$0xff] (%p11870_p10) }
 0x891   :  { %16017 = vst [vmem:[#allocation36_spill] sm:$0xff] (%p11870_p10), %v11927_v38  ;;  %16018 = vst [vmem:[#allocation136_spill] sm:$0xff] (%p11870_p10), %v11930_v19  ;;  %v11951_v10 = vsub.f32 (%p11870_p10), 1.0, %v11718_v63  ;;  %v11954_v40 = vsub.f32 (%p11870_p10), 1.0, %v11702_v58  ;;  %v11957_v32 = vsub.f32 (%p11870_p10), 1.0, %v11822_v22  ;;  %v11960_v5 = vsub.f32 (%p11870_p10), 1.0, %v15969_v30 }
 0x892   :  { %16019 = vst [vmem:[#allocation92_spill] sm:$0xff] (%p11870_p10), %v11933_v24  ;;  %16020 = vst [vmem:[#allocation20_spill] sm:$0xff] (%p11870_p10), %v11936_v26  ;;  %v11963_v39 = vsub.f32 (%p11870_p10), 1.0, %v11856_v54  ;;  %v11966_v49 = vsub.f32 (%p11870_p10), 1.0, %v15991_v41  ;;  %v11969_v42 = vsub.f32 (%p11870_p10), 1.0, %v15995_v23  ;;  %v11972_v46 = vsub.f32 (%p11870_p10), 1.0, %v15984_v28 }
 0x893   :  { %16021 = vst [vmem:[#allocation113_spill] sm:$0xff] (%p11870_p10), %v11942_v6  ;;  %16022 = vst [vmem:[#allocation27_spill] sm:$0xff] (%p11870_p10), %v11945_v53  ;;  %v16032_v8 = vsub.f32 (%p11870_p10), 1.0, %v16031_v48  ;;  %v3865_v59 = vmul.f32 (%p11870_p10), %v11930_v19, %v16033_v27   ;;  %v3866_v45 = vmul.f32 (%p11870_p10), %v11933_v24, %v16033_v27   ;;  %v3867_v16 = vmul.f32 (%p11870_p10), %v11936_v26, %v16033_v27   ;;  %s12040_s26 = smov (%p11870_p10), 0  }
 0x894   :  { %16023 = vst [vmem:[#allocation89_spill] sm:$0xff] (%p11870_p10), %v11948_v20  ;;  %16024 = vst [vmem:[#allocation42_spill] sm:$0xff] (%p11870_p10), %v11951_v10  ;;  %v3868_v7 = vmul.f32 (%p11870_p10), %v11939_v37, %v16033_v27   ;;  %v3869_v55 = vmul.f32 (%p11870_p10), %v11942_v6, %v16033_v27   ;;  %v3870_v62 = vmul.f32 (%p11870_p10), %v11945_v53, %v16033_v27   ;;  %v16035_v43 = vsub.f32 (%p11870_p10), 1.0, %v16034_v1 }
 0x895   :  { %16025 = vst [vmem:[#allocation97_spill] sm:$0xff] (%p11870_p10), %v11954_v40  ;;  %16026 = vst [vmem:[#allocation19_spill] sm:$0xff] (%p11870_p10), %v11960_v5  ;;  %v3864_v33 = vmul.f32 (%p11870_p10), %v11927_v38, %v16032_v8   ;;  %v3871_v9 = vmul.f32 (%p11870_p10), %v11948_v20, %v16033_v27   ;;  %v3872_v18 = vmul.f32 (%p11870_p10), %v11951_v10, %v16033_v27  }
 0x896   :  { %16027 = vst [vmem:[#allocation123_spill] sm:$0xff] (%p11870_p10), %v11963_v39  ;;  %16028 = vst [vmem:[#allocation32_spill] sm:$0xff] (%p11870_p10), %v11966_v49  ;;  %v3873_v57 = vmul.f32 (%p11870_p10), %v11954_v40, %v16033_v27   ;;  %v3874_v29 = vmul.f32 (%p11870_p10), %v11957_v32, %v16033_v27   ;;  %v3875_v34 = vmul.f32 (%p11870_p10), %v11960_v5, %v16033_v27  }
 0x897   :  { %16029 = vst [vmem:[#allocation12_spill] sm:$0xff] %v11969_v42  ;;  %16030 = vst [vmem:[#allocation135_spill] sm:$0xff] %v11972_v46  ;;  %v3876_v47 = vmul.f32 %v11963_v39, %v16033_v27   ;;  %v3877_v25 = vmul.f32 %v11966_v49, %v16033_v27   ;;  %v3878_v17 = vmul.f32 %v11969_v42, %v16033_v27  }
 0x898   :  { %v3879_v13 = vmul.f32 %v11972_v46, %v16035_v43  }
 0x899 LB: > { %v16044_v24 = vld [vmem:[#allocation92_spill] sm:$0xff]  ;;  %16049 = vst [vmem:[#allocation159_spill] sm:$0xff] %v6934_v13  ;;  %16050 = vst [vmem:[#allocation160_spill] sm:$0xff] %v6938_v17  ;;  %s7008_s27 = smov 127   ;;  %s7009_s28 = smov 1   ;;  %v6982_v16 = vphi %v3867_v16, %v16432_v16   ;;  %v6978_v7 = vphi %v3868_v7, %v16431_v7   ;;  %v6974_v55 = vphi %v3869_v55, %v16430_v55   ;;  %v6970_v62 = vphi %v3870_v62, %v16429_v62   ;;  %v6966_v9 = vphi %v3871_v9, %v16428_v9   ;;  %v6962_v18 = vphi %v3872_v18, %v16427_v18   ;;  %v6958_v57 = vphi %v3873_v57, %v16426_v57   ;;  %v6954_v29 = vphi %v3874_v29, %v16425_v29   ;;  %v6950_v34 = vphi %v3875_v34, %v16424_v34   ;;  %v6946_v47 = vphi %v3876_v47, %v16423_v47   ;;  %v6942_v25 = vphi %v3877_v25, %v16422_v25   ;;  %v6938_v17 = vphi %v3878_v17, %v16421_v17   ;;  %v6934_v13 = vphi %v3879_v13, %v16420_v13   ;;  %s6998_s26 = sphi %s12040_s26, %s6121_s26   ;;  %v6994_v33 = vphi %v3864_v33, %v16435_v33   ;;  %v6990_v59 = vphi %v3865_v59, %v16434_v59   ;;  %v6986_v45 = vphi %v3866_v45, %v16433_v45  }
 0x89a   : > { %v16040_v53 = vld [vmem:[#allocation27_spill] sm:$0xff]  ;;  %v16041_v6 = vld [vmem:[#allocation113_spill] sm:$0xff]  ;;  %v16045_v19 = vld [vmem:[#allocation136_spill] sm:$0xff]  ;;  %16051 = vst [vmem:[#allocation161_spill] sm:$0xff] %v6942_v25  ;;  %3952 = vrot.lane.b32.xlu1 %v6994_v33, %s7008_s27  ;;  %3904 = vrot.lane.b32.xlu0 %v6994_v33, %s7009_s28  ;;  %s6121_s26 = sadd.s32 8, %s6998_s26  }
 0x89b   : > { %v16036_v20 = vld [vmem:[#allocation89_spill] sm:$0xff]  ;;  %v16037_v10 = vld [vmem:[#allocation42_spill] sm:$0xff]  ;;  %v16047_v38 = vld [vmem:[#allocation36_spill] sm:$0xff]  ;;  %16052 = vst [vmem:[#allocation162_spill] sm:$0xff] %v6946_v47  ;;  %p3899_p12 = scmp.lt.s32.totalorder %s6121_s26, 16384 }
 0x89c   : > { %v16038_v40 = vld [vmem:[#allocation97_spill] sm:$0xff]  ;;  %v16039_v5 = vld [vmem:[#allocation19_spill] sm:$0xff]  ;;  %v16048_v26 = vld [vmem:[#allocation20_spill] sm:$0xff]  ;;  %16053 = vst [vmem:[#allocation163_spill] sm:$0xff] %v6950_v34 }
 0x89d   : > { %v16042_v39 = vld [vmem:[#allocation123_spill] sm:$0xff]  ;;  %v16043_v49 = vld [vmem:[#allocation32_spill] sm:$0xff]  ;;  %16054 = vst [vmem:[#allocation164_spill] sm:$0xff] %v6954_v29  ;;  %16055 = vst [vmem:[#allocation165_spill] sm:$0xff] %v6958_v57 }
 0x89e   : > { %v16046_v46 = vld [vmem:[#allocation135_spill] sm:$0xff]  ;;  %16056 = vst [vmem:[#allocation166_spill] sm:$0xff] %v6962_v18  ;;  %16057 = vst [vmem:[#allocation167_spill] sm:$0xff] %v6966_v9  ;;  %3982 = vrot.lane.b32.xlu1 %v6934_v13, %s7008_s27  ;;  %3934 = vrot.lane.b32.xlu0 %v6934_v13, %s7009_s28  ;;  %v16072_v42 = vld [vmem:[#allocation12_spill] sm:$0xff] }
 0x89f   : > { %16058 = vst [vmem:[#allocation168_spill] sm:$0xff] %v6970_v62  ;;  %16059 = vst [vmem:[#allocation169_spill] sm:$0xff] %v6974_v55 }
 0x8a0   : > { %16060 = vst [vmem:[#allocation170_spill] sm:$0xff] %v6978_v7  ;;  %16061 = vst [vmem:[#allocation171_spill] sm:$0xff] %v6982_v16 }
 0x8a1   : > { %16062 = vst [vmem:[#allocation172_spill] sm:$0xff] %v6986_v45  ;;  %16063 = vst [vmem:[#allocation173_spill] sm:$0xff] %v6990_v59 }
 0x8a2   : > { %16064 = vst [vmem:[#allocation174_spill] sm:$0xff] %v6994_v33  ;;  %3932 = vrot.lane.b32.xlu1 %v6938_v17, %s7009_s28  ;;  %3906 = vrot.lane.b32.xlu0 %v6990_v59, %s7009_s28 }
 0x8a6   : > { %3980 = vrot.lane.b32.xlu1 %v6938_v17, %s7008_s27  ;;  %3954 = vrot.lane.b32.xlu0 %v6990_v59, %s7008_s27 }
 0x8aa   : > { %3930 = vrot.lane.b32.xlu1 %v6942_v25, %s7009_s28  ;;  %3908 = vrot.lane.b32.xlu0 %v6986_v45, %s7009_s28 }
 0x8ae   : > { %3978 = vrot.lane.b32.xlu1 %v6942_v25, %s7008_s27  ;;  %3956 = vrot.lane.b32.xlu0 %v6986_v45, %s7008_s27 }
 0x8b2   : > { %3928 = vrot.lane.b32.xlu1 %v6946_v47, %s7009_s28  ;;  %3910 = vrot.lane.b32.xlu0 %v6982_v16, %s7009_s28 }
 0x8b6   : > { %3976 = vrot.lane.b32.xlu1 %v6946_v47, %s7008_s27  ;;  %3958 = vrot.lane.b32.xlu0 %v6982_v16, %s7008_s27 }
 0x8ba   : > { %3926 = vrot.lane.b32.xlu1 %v6950_v34, %s7009_s28  ;;  %3912 = vrot.lane.b32.xlu0 %v6978_v7, %s7009_s28 }
 0x8be   : > { %3974 = vrot.lane.b32.xlu1 %v6950_v34, %s7008_s27  ;;  %3960 = vrot.lane.b32.xlu0 %v6978_v7, %s7008_s27 }
 0x8c2   : > { %3924 = vrot.lane.b32.xlu1 %v6954_v29, %s7009_s28  ;;  %3914 = vrot.lane.b32.xlu0 %v6974_v55, %s7009_s28 }
 0x8c6   : > { %3972 = vrot.lane.b32.xlu1 %v6954_v29, %s7008_s27  ;;  %3962 = vrot.lane.b32.xlu0 %v6974_v55, %s7008_s27 }
 0x8ca   : > { %3922 = vrot.lane.b32.xlu1 %v6958_v57, %s7009_s28  ;;  %3916 = vrot.lane.b32.xlu0 %v6970_v62, %s7009_s28 }
 0x8ce   : > { %3970 = vrot.lane.b32.xlu1 %v6958_v57, %s7008_s27  ;;  %3964 = vrot.lane.b32.xlu0 %v6970_v62, %s7008_s27 }
 0x8d2   : > { %3920 = vrot.lane.b32.xlu1 %v6962_v18, %s7009_s28  ;;  %3918 = vrot.lane.b32.xlu0 %v6966_v9, %s7009_s28 }
 0x8d6   : > { %3968 = vrot.lane.b32.xlu1 %v6962_v18, %s7008_s27  ;;  %3966 = vrot.lane.b32.xlu0 %v6966_v9, %s7008_s27 }
 0x90c   : > { %v3953_v51 = vpop.permute.xlu1 %3952  ;;  %v3905_v44 = vpop.permute.xlu0 %3904 }
 0x90d   : > { %v3984_v48 = vmul.f32 %v7411_v50, %v3953_v51  ;;  %v3936_v1 = vmul.f32 %v7401_v15, %v3905_v44 }
 0x90f   : > { %v4000_v22 = vmax.f32 %v3936_v1, %v3984_v48 }
 0x910   : > { %v3983_v56 = vpop.permute.xlu1 %3982  ;;  %v3935_v52 = vpop.permute.xlu0 %3934 }
 0x911   : > { %v3999_v43 = vmul.f32 %v7411_v50, %v3983_v56  ;;  %v3951_v28 = vmul.f32 %v7401_v15, %v3935_v52 }
 0x913   : > { %v4015_v58 = vmax.f32 %v3951_v28, %v3999_v43 }
 0x914   : > { %v3933_v36 = vpop.permute.xlu1 %3932  ;;  %v3907_v0 = vpop.permute.xlu0 %3906 }
 0x915   : > { %v3950_v35 = vmul.f32 %v7401_v15, %v3933_v36  ;;  %v3937_v23 = vmul.f32 %v7401_v15, %v3907_v0  ;;  %v12179_v28 = vmax.f32 %v6934_v13, %v4015_v58 }
 0x918   : > { %v3981_v14 = vpop.permute.xlu1 %3980  ;;  %v3955_v4 = vpop.permute.xlu0 %3954 }
 0x919   : > { %v3998_v8 = vmul.f32 %v7411_v50, %v3981_v14  ;;  %v3985_v27 = vmul.f32 %v7411_v50, %v3955_v4 }
 0x91b   : > { %v4014_v41 = vmax.f32 %v3950_v35, %v3998_v8  ;;  %v4001_v54 = vmax.f32 %v3937_v23, %v3985_v27  ;;  %v12176_v35 = vmax.f32 %v6994_v33, %v4000_v22 }
 0x91c   : > { %v3931_v30 = vpop.permute.xlu1 %3930  ;;  %v3909_v36 = vpop.permute.xlu0 %3908 }
 0x91d   : > { %v3949_v51 = vmul.f32 %v7401_v15, %v3931_v30  ;;  %v12167_v14 = vmax.f32 %v6938_v17, %v4014_v41  ;;  %v12170_v4 = vmax.f32 %v6990_v59, %v4001_v54  ;;  %v3938_v52 = vmul.f32 %v7401_v15, %v3909_v36 }
 0x91e   : > { %v15086_v36 = vrot.slane %v12179_v28, 1  ;;  %v15091_v58 = vrot.slane %v12176_v35, 7 }
 0x91f   : > { %v4094_v54 = vrot.slane %v12167_v14, 1  ;;  %v4033_v27 = vrot.slane %v12170_v4, 7  ;;  %v16068_v11 = vrot.slane %v12167_v14, 7  ;;  %v16070_v3 = vrot.slane %v12170_v4, 1 }
 0x920   : > { %v3979_v44 = vpop.permute.xlu1 %3978  ;;  %v3957_v56 = vpop.permute.xlu0 %3956 }
 0x921   : > { %v3997_v0 = vmul.f32 %v7411_v50, %v3979_v44  ;;  %v3986_v23 = vmul.f32 %v7411_v50, %v3957_v56 }
 0x923   : > { %v4013_v30 = vmax.f32 %v3949_v51, %v3997_v0  ;;  %v4002_v41 = vmax.f32 %v3938_v52, %v3986_v23 }
 0x924   : > { %v3929_v48 = vpop.permute.xlu1 %3928  ;;  %v3911_v8 = vpop.permute.xlu0 %3910 }
 0x925   : > { %v12184_v1 = vmax.f32 %v6942_v25, %v4013_v30  ;;  %v12187_v43 = vmax.f32 %v6986_v45, %v4002_v41  ;;  %v3948_v51 = vmul.f32 %v7401_v15, %v3929_v48  ;;  %v3939_v0 = vmul.f32 %v7401_v15, %v3911_v8  ;;  %v16065_v41 = vld [vmem:[#allocation8_spill] sm:$0xff] }
 0x926   : > { %vm16066_vm11 = vcmp.lt.s32.totalorder %v16065_v41, 7  ;;  %vm16067_vm4 = vcmp.lt.s32.totalorder %v16065_v41, 1  ;;  %v16408_v41 = vld [vmem:[#allocation165_spill] sm:$0xff] }
 0x927   : > { %v4045_v44 = vrot.slane %v12184_v1, 7  ;;  %v4082_v52 = vrot.slane %v12187_v43, 1  ;;  %v4096_v22 = vsel %vm16066_vm11, %v4094_v54, %v15086_v36  ;;  %v4062_v48 = vsel %vm16067_vm4, %v15091_v58, %v4033_v27  ;;  %vm16069_vm12 = vmmov %vm16067_vm4 }
 0x928   : > { %v3977_v23 = vpop.permute.xlu1 %3976  ;;  %v3959_v30 = vpop.permute.xlu0 %3958  ;;  %vm16071_vm8 = vmmov %vm16066_vm11  ;;  %v4093_v2 = vrot.slane %v12184_v1, 1  ;;  %v4034_v17 = vrot.slane %v12187_v43, 7 }
 0x929   : > { %v3996_v63 = vmul.f32 %v7411_v50, %v3977_v23  ;;  %v3987_v56 = vmul.f32 %v7411_v50, %v3959_v30  ;;  %v4049_v8 = vsel %vm16069_vm12, %v4045_v44, %v16068_v11  ;;  %v4109_v60 = vsel %vm16071_vm8, %v16070_v3, %v4082_v52  ;;  %vm16073_vm13 = vmmov %vm16071_vm8 }
 0x92a   : > { %v4142_v36 = vmax.f32 %v4049_v8, %v4096_v22  ;;  %v4129_v31 = vmax.f32 %v4062_v48, %v4109_v60  ;;  %vm16074_vm10 = vmmov %vm16067_vm4 }
 0x92b   : > { %v4012_v21 = vmax.f32 %v3948_v51, %v3996_v63  ;;  %v4003_v61 = vmax.f32 %v3939_v0, %v3987_v56  ;;  %vm16075_vm7 = vmmov %vm16067_vm4 }
 0x92c   : > { %v3927_v12 = vpop.permute.xlu1 %3926  ;;  %v3913_v58 = vpop.permute.xlu0 %3912  ;;  %v4158_v23 = vmax.f32 %v12167_v14, %v4142_v36  ;;  %v4145_v30 = vmax.f32 %v12170_v4, %v4129_v31  ;;  %vm16076_vm5 = vmmov %vm16071_vm8 }
 0x92d   : > { %v12220_v11 = vmax.f32 %v6946_v47, %v4012_v21  ;;  %v12223_v25 = vmax.f32 %v6982_v16, %v4003_v61  ;;  %v3947_v3 = vmul.f32 %v7401_v15, %v3927_v12  ;;  %v3940_v36 = vmul.f32 %v7401_v15, %v3913_v58  ;;  %vm16077_vm15 = vmmov %vm16076_vm5  ;;  %v16093_v16 = vld [vmem:[#allocation10_spill] sm:$0xff] }
 0x92e   : > { %v12226_v60 = vmul.f32 %v4158_v23, %v16072_v42  ;;  %v12229_v63 = vmul.f32 %v4145_v30, %v16045_v19  ;;  %v4097_v61 = vsel %vm16073_vm13, %v4093_v2, %v4094_v54  ;;  %v4061_v12 = vsel %vm16074_vm10, %v4033_v27, %v4034_v17  ;;  %vm16078_vm0 = vmmov %vm16067_vm4 }
 0x92f   : > { %v4044_v31 = vrot.slane %v12220_v11, 7  ;;  %v4083_v22 = vrot.slane %v12223_v25, 1  ;;  %vm16079_vm14 = vmmov %vm16078_vm0  ;;  %v16094_v42 = vrot.slane %v12167_v14, 7 }
 0x930   : > { %v3975_v51 = vpop.permute.xlu1 %3974  ;;  %4204 = vrot.lane.b32.xlu1 %v12226_v60, %s7009_s28  ;;  %4178 = vrot.lane.b32.xlu0 %v12229_v63, %s7009_s28  ;;  %v3961_v21 = vpop.permute.xlu0 %3960  ;;  %vm16080_vm3 = vmmov %vm16076_vm5 }
 0x931   : > { %v3995_v56 = vmul.f32 %v7411_v50, %v3975_v51  ;;  %v3988_v0 = vmul.f32 %v7411_v50, %v3961_v21  ;;  %v4050_v58 = vsel %vm16075_vm7, %v4044_v31, %v4045_v44  ;;  %v4108_v48 = vsel %vm16076_vm5, %v4082_v52, %v4083_v22  ;;  %vm16081_vm6 = vmmov %vm16080_vm3 }
 0x932   : > { %v4141_v8 = vmax.f32 %v4050_v58, %v4097_v61  ;;  %v4130_v23 = vmax.f32 %v4061_v12, %v4108_v48  ;;  %v4092_v44 = vrot.slane %v12220_v11, 1  ;;  %v4035_v52 = vrot.slane %v12223_v25, 7  ;;  %vm16082_vm2 = vmmov %vm16078_vm0 }
 0x933   : > { %v4011_v30 = vmax.f32 %v3947_v3, %v3995_v56  ;;  %v4004_v47 = vmax.f32 %v3940_v36, %v3988_v0  ;;  %vm16083_vm1 = vmmov %vm16078_vm0 }
 0x934   : > { %v3925_v13 = vpop.permute.xlu1 %3924  ;;  %4252 = vrot.lane.b32.xlu1 %v12226_v60, %s7008_s27  ;;  %4226 = vrot.lane.b32.xlu0 %v12229_v63, %s7008_s27  ;;  %v3915_v54 = vpop.permute.xlu0 %3914  ;;  %v4157_v27 = vmax.f32 %v12184_v1, %v4141_v8  ;;  %v4146_v51 = vmax.f32 %v12187_v43, %v4130_v23  ;;  %v4098_v58 = vsel %vm16077_vm15, %v4092_v44, %v4093_v2  ;;  %vm16084_vm9 = vmmov %vm16080_vm3 }
 0x935   : > { %v12258_v21 = vmax.f32 %v6950_v34, %v4011_v30  ;;  %v12261_v3 = vmax.f32 %v6978_v7, %v4004_v47  ;;  %v3946_v1 = vmul.f32 %v7401_v15, %v3925_v13  ;;  %v3941_v56 = vmul.f32 %v7401_v15, %v3915_v54  ;;  %vm16086_vm11 = vmmov %vm16080_vm3 }
 0x936   : > { %v12264_v36 = vmul.f32 %v4157_v27, %v16043_v49  ;;  %v12267_v61 = vmul.f32 %v4146_v51, %v16044_v24  ;;  %v4060_v13 = vsel %vm16078_vm0, %v4034_v17, %v4035_v52  ;;  %vm16087_vm4 = vmmov %vm16080_vm3 }
 0x937   : > { %v4043_v43 = vrot.slane %v12258_v21, 7  ;;  %v4084_v12 = vrot.slane %v12261_v3, 1  ;;  %vm16088_vm12 = vmmov %vm16078_vm0 }
 0x938   : > { %v3973_v0 = vpop.permute.xlu1 %3972  ;;  %4202 = vrot.lane.b32.xlu1 %v12264_v36, %s7009_s28  ;;  %4180 = vrot.lane.b32.xlu0 %v12267_v61, %s7009_s28  ;;  %v3963_v47 = vpop.permute.xlu0 %3962  ;;  %vm16090_vm8 = vmmov %vm16078_vm0 }
 0x939   : > { %v3994_v48 = vmul.f32 %v7411_v50, %v3973_v0  ;;  %v3989_v8 = vmul.f32 %v7411_v50, %v3963_v47  ;;  %v4051_v23 = vsel %vm16079_vm14, %v4043_v43, %v4044_v31  ;;  %v4107_v30 = vsel %vm16080_vm3, %v4083_v22, %v4084_v12  ;;  %vm16091_vm13 = vmmov %vm16078_vm0 }
 0x93a   : > { %v4140_v54 = vmax.f32 %v4051_v23, %v4098_v58  ;;  %v4131_v27 = vmax.f32 %v4060_v13, %v4107_v30  ;;  %v4091_v31 = vrot.slane %v12258_v21, 1  ;;  %v4036_v22 = vrot.slane %v12261_v3, 7  ;;  %vm16092_vm10 = vmmov %vm16080_vm3 }
 0x93b   : > { %v4010_v51 = vmax.f32 %v3946_v1, %v3994_v48  ;;  %v4005_v34 = vmax.f32 %v3941_v56, %v3989_v8  ;;  %vm16095_vm7 = vmmov %vm16078_vm0 }
 0x93c   : > { %v3923_v7 = vpop.permute.xlu1 %3922  ;;  %4250 = vrot.lane.b32.xlu1 %v12264_v36, %s7008_s27  ;;  %4228 = vrot.lane.b32.xlu0 %v12267_v61, %s7008_s27  ;;  %v3917_v2 = vpop.permute.xlu0 %3916  ;;  %v4156_v17 = vmax.f32 %v12220_v11, %v4140_v54  ;;  %v4147_v0 = vmax.f32 %v12223_v25, %v4131_v27  ;;  %v4099_v23 = vsel %vm16081_vm6, %v4091_v31, %v4092_v44  ;;  %v4047_v44 = vrot.slane %v12179_v28, 7  ;;  %vm16097_vm5 = vmmov %vm16080_vm3 }
 0x93d   : > { %v12296_v47 = vmax.f32 %v6954_v29, %v4010_v51  ;;  %v12299_v1 = vmax.f32 %v6974_v55, %v4005_v34  ;;  %v3945_v11 = vmul.f32 %v7401_v15, %v3923_v7  ;;  %v3942_v48 = vmul.f32 %v7401_v15, %v3917_v2  ;;  %vm16099_vm15 = vmmov %vm16078_vm0 }
 0x93e   : > { %v12302_v56 = vmul.f32 %v4156_v17, %v16042_v39  ;;  %v12305_v58 = vmul.f32 %v4147_v0, %v16048_v26  ;;  %v4059_v7 = vsel %vm16082_vm2, %v4035_v52, %v4036_v22  ;;  %v4080_v0 = vrot.slane %v12176_v35, 1  ;;  %vm16100_vm0 = vmmov %vm16080_vm3 }
 0x93f   : > { %v4042_v25 = vrot.slane %v12296_v47, 7  ;;  %v4085_v13 = vrot.slane %v12299_v1, 1  ;;  %vm16101_vm14 = vmmov %vm16100_vm0 }
 0x940   : > { %v3971_v8 = vpop.permute.xlu1 %3970  ;;  %4200 = vrot.lane.b32.xlu1 %v12302_v56, %s7009_s28  ;;  %4182 = vrot.lane.b32.xlu0 %v12305_v58, %s7009_s28  ;;  %v3965_v34 = vpop.permute.xlu0 %3964  ;;  %vm16102_vm3 = vmmov %vm16083_vm1 }
 0x941   : > { %v3993_v30 = vmul.f32 %v7411_v50, %v3971_v8  ;;  %v3990_v54 = vmul.f32 %v7411_v50, %v3965_v34  ;;  %v4052_v27 = vsel %vm16083_vm1, %v4042_v25, %v4043_v43  ;;  %v4106_v51 = vsel %vm16084_vm9, %v4084_v12, %v4085_v13  ;;  %vm16103_vm6 = vmmov %vm16083_vm1 }
 0x942   : > { %v4139_v2 = vmax.f32 %v4052_v27, %v4099_v23  ;;  %v4132_v17 = vmax.f32 %v4059_v7, %v4106_v51  ;;  %v4090_v8 = vrot.slane %v12296_v47, 1  ;;  %v4037_v34 = vrot.slane %v12299_v1, 7  ;;  %vm16104_vm2 = vmmov %vm16100_vm0 }
 0x943   : > { %v4009_v29 = vmax.f32 %v3945_v11, %v3993_v30  ;;  %v4006_v33 = vmax.f32 %v3942_v48, %v3990_v54  ;;  %vm16105_vm9 = vmmov %vm16100_vm0 }
 0x944   : > { %v3921_v45 = vpop.permute.xlu1 %3920  ;;  %4248 = vrot.lane.b32.xlu1 %v12302_v56, %s7008_s27  ;;  %4230 = vrot.lane.b32.xlu0 %v12305_v58, %s7008_s27  ;;  %v3919_v52 = vpop.permute.xlu0 %3918  ;;  %v4155_v43 = vmax.f32 %v12258_v21, %v4139_v2  ;;  %v4148_v12 = vmax.f32 %v12261_v3, %v4132_v17  ;;  %v16085_v21 = vrot.slane %v12179_v28, 1  ;;  %v4100_v2 = vsel %vm16087_vm4, %v4090_v8, %v4091_v31  ;;  %vm16107_vm4 = vmmov %vm16083_vm1 }
 0x945   : > { %v12336_v11 = vmax.f32 %v6958_v57, %v4009_v29  ;;  %v12339_v48 = vmax.f32 %v6970_v62, %v4006_v33  ;;  %v3944_v30 = vmul.f32 %v7401_v15, %v3921_v45  ;;  %v3943_v54 = vmul.f32 %v7401_v15, %v3919_v52 }
 0x946   : > { %v12342_v23 = vmul.f32 %v4155_v43, %v16039_v5  ;;  %v12345_v7 = vmul.f32 %v4148_v12, %v11939_v37  ;;  %v4111_v3 = vsel %vm16086_vm11, %v16085_v21, %v4080_v0  ;;  %v4058_v45 = vsel %vm16088_vm12, %v4036_v22, %v4037_v34  ;;  %vm16106_vm11 = vmmov %vm16100_vm0 }
 0x947   : > { %v4041_v29 = vrot.slane %v12336_v11, 7  ;;  %v4086_v33 = vrot.slane %v12339_v48, 1  ;;  %v16089_v17 = vrot.slane %v12176_v35, 7  ;;  %v4127_v62 = vmul.f32 %v16093_v16, %v4111_v3  ;;  %vm16108_vm12 = vmmov %vm16083_vm1 }
 0x948   : > { %v3969_v27 = vpop.permute.xlu1 %3968  ;;  %4198 = vrot.lane.b32.xlu1 %v12342_v23, %s7009_s28  ;;  %4184 = vrot.lane.b32.xlu0 %v12345_v7, %s7009_s28  ;;  %v3967_v51 = vpop.permute.xlu0 %3966 }
 0x949   : > { %v4063_v52 = vsel %vm16090_vm8, %v4047_v44, %v16089_v17  ;;  %v3992_v43 = vmul.f32 %v7411_v50, %v3969_v27  ;;  %v3991_v12 = vmul.f32 %v7411_v50, %v3967_v51  ;;  %v4053_v21 = vsel %vm16091_vm13, %v4041_v29, %v4042_v25  ;;  %vm16109_vm8 = vmmov %vm16100_vm0 }
 0x94a   : > { %v4105_v57 = vsel %vm16092_vm10, %v4085_v13, %v4086_v33  ;;  %v4138_v59 = vmax.f32 %v4053_v21, %v4100_v2  ;;  %v4048_v17 = vsel %vm16095_vm7, %v16094_v42, %v4047_v44  ;;  %v16096_v27 = vrot.slane %v12170_v4, 1  ;;  %v16098_v13 = vld [vmem:[#allocation9_spill] sm:$0xff]  ;;  %vm16110_vm13 = vmmov %vm16100_vm0 }
 0x94b   : > { %v4133_v31 = vmax.f32 %v4058_v45, %v4105_v57  ;;  %v4008_v22 = vmax.f32 %v3944_v30, %v3992_v43  ;;  %v4007_v55 = vmax.f32 %v3943_v54, %v3991_v12  ;;  %v4064_v14 = vmul.f32 %v16098_v13, %v4063_v52  ;;  %vm16111_vm10 = vmmov %vm16083_vm1 }
 0x94c   : > { %v4110_v51 = vsel %vm16097_vm5, %v4080_v0, %v16096_v27  ;;  %4246 = vrot.lane.b32.xlu1 %v12342_v23, %s7008_s27  ;;  %4232 = vrot.lane.b32.xlu0 %v12345_v7, %s7008_s27  ;;  %v4154_v57 = vmax.f32 %v12296_v47, %v4138_v59  ;;  %v4143_v44 = vmax.f32 %v4048_v17, %v4127_v62  ;;  %v4089_v59 = vrot.slane %v12336_v11, 1  ;;  %vm16112_vm7 = vmmov %vm16083_vm1 }
 0x94d   : > { %v4149_v25 = vmax.f32 %v12299_v1, %v4133_v31  ;;  %v4024_v3 = vmax.f32 %v6962_v18, %v4008_v22  ;;  %v4023_v42 = vmax.f32 %v6966_v9, %v4007_v55  ;;  %v4128_v30 = vmax.f32 %v4064_v14, %v4110_v51  ;;  %vm16113_vm5 = vmmov %vm16100_vm0 }
 0x94e   : > { %v12392_v4 = vmul.f32 %v4154_v57, %v11957_v32  ;;  %v4038_v55 = vrot.slane %v12339_v48, 7  ;;  %v4159_v47 = vmax.f32 %v12179_v28, %v4143_v44  ;;  %v4101_v52 = vsel %vm16101_vm14, %v4089_v59, %v4090_v8  ;;  %vm16115_vm14 = vmmov %vm16083_vm1 }
 0x94f   : > { %v12395_v0 = vmul.f32 %v4149_v25, %v16041_v6  ;;  %v4040_v54 = vrot.slane %v4024_v3, 7  ;;  %v4087_v2 = vrot.slane %v4023_v42, 1  ;;  %v4144_v1 = vmax.f32 %v12176_v35, %v4128_v30 }
 0x950   : > { %4196 = vrot.lane.b32.xlu1 %v12392_v4, %s7009_s28  ;;  %v4057_v28 = vsel %vm16102_vm3, %v4037_v34, %v4038_v55  ;;  %v12418_v35 = vmul.f32 %v4159_v47, %v16046_v46  ;;  %v4039_v12 = vrot.slane %v4023_v42, 7  ;;  %v4088_v21 = vrot.slane %v4024_v3, 1  ;;  %vm16116_vm3 = vmmov %vm16100_vm0 }
 0x951   : > { %4186 = vrot.lane.b32.xlu0 %v12395_v0, %s7009_s28  ;;  %v4054_v62 = vsel %vm16099_vm15, %v4040_v54, %v4041_v29  ;;  %v4104_v45 = vsel %vm16100_vm0, %v4086_v33, %v4087_v2  ;;  %v12421_v29 = vmul.f32 %v4144_v1, %v16047_v38  ;;  %vm16114_vm15 = vmmov %vm16083_vm1 }
 0x952   : > { %v4137_v43 = vmax.f32 %v4054_v62, %v4101_v52  ;;  %v4134_v33 = vmax.f32 %v4057_v28, %v4104_v45  ;;  %v4056_v31 = vsel %vm16103_vm6, %v4038_v55, %v4039_v12  ;;  %v4103_v22 = vsel %vm16104_vm2, %v4087_v2, %v4088_v21  ;;  %vm16117_vm6 = vmmov %vm16100_vm0 }
 0x953   : > { %v4055_v17 = vsel %vm16083_vm1, %v4039_v12, %v4040_v54  ;;  %v4102_v27 = vsel %vm16105_vm9, %v4088_v21, %v4089_v59  ;;  %v4135_v51 = vmax.f32 %v4056_v31, %v4103_v22  ;;  %vm16118_vm2 = vmmov %vm16083_vm1 }
 0x954   : > { %4244 = vrot.lane.b32.xlu1 %v12392_v4, %s7008_s27  ;;  %v4153_v8 = vmax.f32 %v12336_v11, %v4137_v43  ;;  %v4150_v34 = vmax.f32 %v12339_v48, %v4134_v33  ;;  %v4136_v57 = vmax.f32 %v4055_v17, %v4102_v27  ;;  %vm16119_vm9 = vmmov %vm16100_vm0 }
 0x955   : > { %4234 = vrot.lane.b32.xlu0 %v12395_v0, %s7008_s27  ;;  %v4151_v25 = vmax.f32 %v4023_v42, %v4135_v51 }
 0x956   : > { %v12442_v11 = vmul.f32 %v4153_v8, %v16038_v40  ;;  %v12445_v48 = vmul.f32 %v4150_v34, %v16040_v53  ;;  %v4152_v14 = vmax.f32 %v4024_v3, %v4136_v57 }
 0x957   : > { %v12456_v44 = vmul.f32 %v4151_v25, %v16036_v20 }
 0x958   : > { %4206 = vrot.lane.b32.xlu1 %v12418_v35, %s7009_s28  ;;  %v12459_v30 = vmul.f32 %v4152_v14, %v16037_v10 }
 0x959   : > { %4176 = vrot.lane.b32.xlu0 %v12421_v29, %s7009_s28 }
 0x95c   : > { %4254 = vrot.lane.b32.xlu1 %v12418_v35, %s7008_s27 }
 0x95d   : > { %4224 = vrot.lane.b32.xlu0 %v12421_v29, %s7008_s27 }
 0x960   : > { %4194 = vrot.lane.b32.xlu1 %v12442_v11, %s7009_s28 }
 0x961   : > { %4188 = vrot.lane.b32.xlu0 %v12445_v48, %s7009_s28 }
 0x964   : > { %4242 = vrot.lane.b32.xlu1 %v12442_v11, %s7008_s27 }
 0x965   : > { %4236 = vrot.lane.b32.xlu0 %v12445_v48, %s7008_s27 }
 0x968   : > { %4192 = vrot.lane.b32.xlu1 %v12459_v30, %s7009_s28 }
 0x969   : > { %4190 = vrot.lane.b32.xlu0 %v12456_v44, %s7009_s28 }
 0x96c   : > { %4240 = vrot.lane.b32.xlu1 %v12459_v30, %s7008_s27 }
 0x96d   : > { %4238 = vrot.lane.b32.xlu0 %v12456_v44, %s7008_s27 }
 0x9a2   : > { %v4205_v3 = vpop.permute.xlu1 %4204  ;;  %v4179_v42 = vpop.permute.xlu0 %4178 }
 0x9a3   : > { %v4222_v12 = vmul.f32 %v7401_v15, %v4205_v3  ;;  %v4209_v21 = vmul.f32 %v7401_v15, %v4179_v42 }
 0x9a6   : > { %v4253_v54 = vpop.permute.xlu1 %4252  ;;  %v4227_v2 = vpop.permute.xlu0 %4226 }
 0x9a7   : > { %v4270_v52 = vmul.f32 %v7411_v50, %v4253_v54  ;;  %v4257_v28 = vmul.f32 %v7411_v50, %v4227_v2 }
 0x9a9   : > { %v4286_v17 = vmax.f32 %v4222_v12, %v4270_v52  ;;  %v4273_v27 = vmax.f32 %v4209_v21, %v4257_v28 }
 0x9aa   : > { %v4203_v59 = vpop.permute.xlu1 %4202  ;;  %v4181_v55 = vpop.permute.xlu0 %4180 }
 0x9ab   : > { %v4221_v43 = vmul.f32 %v7401_v15, %v4203_v59  ;;  %v4210_v33 = vmul.f32 %v7401_v15, %v4181_v55  ;;  %v12488_v59 = vmax.f32 %v12226_v60, %v4286_v17  ;;  %v12491_v55 = vmax.f32 %v12229_v63, %v4273_v27 }
 0x9ad   : > { %v15110_v60 = vrot.slane %v12488_v59, 1 }
 0x9ae   : > { %v4251_v47 = vpop.permute.xlu1 %4250  ;;  %v4229_v1 = vpop.permute.xlu0 %4228 }
 0x9af   : > { %v4269_v62 = vmul.f32 %v7411_v50, %v4251_v47  ;;  %v4258_v45 = vmul.f32 %v7411_v50, %v4229_v1 }
 0x9b1   : > { %v4285_v8 = vmax.f32 %v4221_v43, %v4269_v62  ;;  %v4274_v34 = vmax.f32 %v4210_v33, %v4258_v45  ;;  %v4305_v43 = vrot.slane %v12491_v55, 7 }
 0x9b2   : > { %v4201_v31 = vpop.permute.xlu1 %4200  ;;  %v4183_v22 = vpop.permute.xlu0 %4182 }
 0x9b3   : > { %v12478_v51 = vmax.f32 %v12264_v36, %v4285_v8  ;;  %v12481_v57 = vmax.f32 %v12267_v61, %v4274_v34  ;;  %v4220_v54 = vmul.f32 %v7401_v15, %v4201_v31  ;;  %v4211_v3 = vmul.f32 %v7401_v15, %v4183_v22 }
 0x9b5   : > { %v4365_v62 = vrot.slane %v12478_v51, 1  ;;  %v4306_v45 = vrot.slane %v12481_v57, 7  ;;  %v15109_v33 = vrot.slane %v12478_v51, 7  ;;  %v4354_v12 = vrot.slane %v12481_v57, 1 }
 0x9b6   : > { %v4249_v25 = vpop.permute.xlu1 %4248  ;;  %v4231_v14 = vpop.permute.xlu0 %4230 }
 0x9b7   : > { %v4268_v42 = vmul.f32 %v7411_v50, %v4249_v25  ;;  %v4259_v2 = vmul.f32 %v7411_v50, %v4231_v14  ;;  %v4333_v22 = vsel %vm16107_vm4, %v4305_v43, %v4306_v45  ;;  %vm16121_vm4 = vmmov %vm16083_vm1 }
 0x9b9   : > { %v4284_v36 = vmax.f32 %v4220_v54, %v4268_v42  ;;  %v4275_v47 = vmax.f32 %v4211_v3, %v4259_v2 }
 0x9ba   : > { %v4199_v61 = vpop.permute.xlu1 %4198  ;;  %v4185_v1 = vpop.permute.xlu0 %4184 }
 0x9bb   : > { %v12496_v52 = vmax.f32 %v12302_v56, %v4284_v36  ;;  %v12499_v28 = vmax.f32 %v12305_v58, %v4275_v47  ;;  %v4219_v8 = vmul.f32 %v7401_v15, %v4199_v61  ;;  %v4212_v56 = vmul.f32 %v7401_v15, %v4185_v1 }
 0x9bc   : > { %v4369_v58 = vsel %vm16106_vm11, %v4365_v62, %v15110_v60  ;;  %vm16120_vm11 = vmmov %vm16100_vm0 }
 0x9bd   : > { %v4316_v63 = vrot.slane %v12496_v52, 7  ;;  %v4355_v21 = vrot.slane %v12499_v28, 1  ;;  %v4364_v36 = vrot.slane %v12496_v52, 1 }
 0x9be   : > { %v4247_v34 = vpop.permute.xlu1 %4246  ;;  %v4233_v31 = vpop.permute.xlu0 %4232 }
 0x9bf   : > { %v4267_v17 = vmul.f32 %v7411_v50, %v4247_v34  ;;  %v4260_v27 = vmul.f32 %v7411_v50, %v4233_v31  ;;  %v4322_v25 = vsel %vm16108_vm12, %v4316_v63, %v15109_v33  ;;  %v4380_v14 = vsel %vm16109_vm8, %v4354_v12, %v4355_v21  ;;  %vm16123_vm12 = vmmov %vm16100_vm0 }
 0x9c0   : > { %v4413_v54 = vmax.f32 %v4322_v25, %v4369_v58  ;;  %v4402_v3 = vmax.f32 %v4333_v22, %v4380_v14  ;;  %v4307_v31 = vrot.slane %v12499_v28, 7  ;;  %v4370_v22 = vsel %vm16110_vm13, %v4364_v36, %v4365_v62  ;;  %vm16125_vm8 = vmmov %vm16083_vm1 }
 0x9c1   : > { %v4283_v42 = vmax.f32 %v4219_v8, %v4267_v17  ;;  %v4276_v2 = vmax.f32 %v4212_v56, %v4260_v27  ;;  %vm16126_vm13 = vmmov %vm16083_vm1 }
 0x9c2   : > { %v4197_v47 = vpop.permute.xlu1 %4196  ;;  %v4429_v1 = vmax.f32 %v12478_v51, %v4413_v54  ;;  %v4418_v34 = vmax.f32 %v12481_v57, %v4402_v3  ;;  %v4332_v14 = vsel %vm16111_vm10, %v4306_v45, %v4307_v31  ;;  %vm16127_vm10 = vmmov %vm16100_vm0 }
 0x9c3   : > { %v4187_v61 = vpop.permute.xlu0 %4186  ;;  %v12532_v33 = vmax.f32 %v12342_v23, %v4283_v42  ;;  %v12535_v60 = vmax.f32 %v12345_v7, %v4276_v2  ;;  %v4218_v27 = vmul.f32 %v7401_v15, %v4197_v47 }
 0x9c4   : > { %v12538_v58 = vmul.f32 %v4429_v1, %v16043_v49  ;;  %v12541_v8 = vmul.f32 %v4418_v34, %v16044_v24  ;;  %v4213_v23 = vmul.f32 %v7401_v15, %v4187_v61 }
 0x9c5   : > { %v4315_v56 = vrot.slane %v12532_v33, 7  ;;  %v4356_v17 = vrot.slane %v12535_v60, 1 }
 0x9c6   : > { %v4245_v25 = vpop.permute.xlu1 %4244  ;;  %4474 = vrot.lane.b32.xlu1 %v12538_v58, %s7009_s28  ;;  %4452 = vrot.lane.b32.xlu0 %v12541_v8, %s7009_s28 }
 0x9c7   : > { %v4235_v7 = vpop.permute.xlu0 %4234  ;;  %v4266_v54 = vmul.f32 %v7411_v50, %v4245_v25  ;;  %v4323_v3 = vsel %vm16112_vm7, %v4315_v56, %v4316_v63  ;;  %v4379_v42 = vsel %vm16113_vm5, %v4355_v21, %v4356_v17  ;;  %vm16128_vm7 = vmmov %vm16083_vm1 }
 0x9c8   : > { %v4261_v62 = vmul.f32 %v7411_v50, %v4235_v7  ;;  %v4412_v2 = vmax.f32 %v4323_v3, %v4370_v22  ;;  %v4403_v47 = vmax.f32 %v4332_v14, %v4379_v42  ;;  %v4363_v22 = vrot.slane %v12532_v33, 1  ;;  %vm16129_vm5 = vmmov %vm16100_vm0 }
 0x9c9   : > { %v4282_v61 = vmax.f32 %v4218_v27, %v4266_v54  ;;  %v4308_v27 = vrot.slane %v12535_v60, 7 }
 0x9ca   : > { %v4277_v1 = vmax.f32 %v4213_v23, %v4261_v62  ;;  %v4207_v34 = vpop.permute.xlu1 %4206  ;;  %4522 = vrot.lane.b32.xlu1 %v12538_v58, %s7008_s27  ;;  %4500 = vrot.lane.b32.xlu0 %v12541_v8, %s7008_s27  ;;  %v4428_v25 = vmax.f32 %v12496_v52, %v4412_v2  ;;  %v4419_v7 = vmax.f32 %v12499_v28, %v4403_v47 }
 0x9cb   : > { %v4177_v45 = vpop.permute.xlu0 %4176  ;;  %v12568_v63 = vmax.f32 %v12392_v4, %v4282_v61  ;;  %v4371_v62 = vsel %vm16100_vm0, %v4363_v22, %v4364_v36  ;;  %v4331_v3 = vsel %vm16115_vm14, %v4307_v31, %v4308_v27  ;;  %vm16131_vm14 = vmmov %vm16100_vm0 }
 0x9cc   : > { %v12571_v21 = vmax.f32 %v12395_v0, %v4277_v1  ;;  %v12576_v23 = vmul.f32 %v4428_v25, %v16042_v39  ;;  %v12579_v14 = vmul.f32 %v4419_v7, %v16048_v26  ;;  %v4208_v31 = vmul.f32 %v7401_v15, %v4177_v45 }
 0x9cd   : > { %v4314_v52 = vrot.slane %v12568_v63, 7 }
 0x9ce   : > { %v4357_v28 = vrot.slane %v12571_v21, 1  ;;  %v4255_v54 = vpop.permute.xlu1 %4254  ;;  %4472 = vrot.lane.b32.xlu1 %v12576_v23, %s7009_s28  ;;  %4454 = vrot.lane.b32.xlu0 %v12579_v14, %s7009_s28 }
 0x9cf   : > { %v4225_v4 = vpop.permute.xlu0 %4224  ;;  %v4324_v0 = vsel %vm16114_vm15, %v4314_v52, %v4315_v56  ;;  %vm16130_vm15 = vmmov %vm16083_vm1 }
 0x9d0   : > { %v4378_v42 = vsel %vm16116_vm3, %v4356_v17, %v4357_v28  ;;  %v4411_v2 = vmax.f32 %v4324_v0, %v4371_v62  ;;  %v4256_v61 = vmul.f32 %v7411_v50, %v4225_v4  ;;  %v4271_v4 = vmul.f32 %v7411_v50, %v4255_v54  ;;  %vm16132_vm3 = vmmov %vm16083_vm1 }
 0x9d1   : > { %v4404_v47 = vmax.f32 %v4331_v3, %v4378_v42  ;;  %v4223_v0 = vmul.f32 %v7401_v15, %v4207_v34 }
 0x9d2   : > { %v4195_v1 = vpop.permute.xlu1 %4194  ;;  %4520 = vrot.lane.b32.xlu1 %v12576_v23, %s7008_s27  ;;  %4502 = vrot.lane.b32.xlu0 %v12579_v14, %s7008_s27  ;;  %v4427_v36 = vmax.f32 %v12532_v33, %v4411_v2  ;;  %v4272_v62 = vmax.f32 %v4208_v31, %v4256_v61  ;;  %v15111_v61 = vrot.slane %v12568_v63, 1 }
 0x9d3   : > { %v4189_v56 = vpop.permute.xlu0 %4188  ;;  %v4420_v25 = vmax.f32 %v12535_v60, %v4404_v47  ;;  %v4217_v33 = vmul.f32 %v7401_v15, %v4195_v1  ;;  %v4287_v54 = vmax.f32 %v4223_v0, %v4271_v4 }
 0x9d4   : > { %v12604_v17 = vmul.f32 %v4427_v36, %v16039_v5  ;;  %v4214_v45 = vmul.f32 %v7401_v15, %v4189_v56  ;;  %v12621_v36 = vmax.f32 %v12421_v29, %v4272_v62  ;;  %v4309_v56 = vrot.slane %v12571_v21, 7 }
 0x9d5   : > { %v12607_v7 = vmul.f32 %v4420_v25, %v11939_v37  ;;  %v12633_v0 = vmax.f32 %v12418_v35, %v4287_v54  ;;  %v4372_v62 = vsel %vm16117_vm6, %v15111_v61, %v4363_v22  ;;  %vm16135_vm6 = vmmov %vm16083_vm1 }
 0x9d6   : > { %v4243_v3 = vpop.permute.xlu1 %4242  ;;  %4470 = vrot.lane.b32.xlu1 %v12604_v17, %s7009_s28  ;;  %v4304_v35 = vrot.slane %v12621_v36, 7 }
 0x9d7   : > { %4456 = vrot.lane.b32.xlu0 %v12607_v7, %s7009_s28  ;;  %v4237_v60 = vpop.permute.xlu0 %4236  ;;  %v4265_v42 = vmul.f32 %v7411_v50, %v4243_v3  ;;  %v4367_v61 = vrot.slane %v12633_v0, 1 }
 0x9d8   : > { %v4262_v2 = vmul.f32 %v7411_v50, %v4237_v60 }
 0x9d9   : > { %v4281_v47 = vmax.f32 %v4217_v33, %v4265_v42 }
 0x9da   : > { %v4278_v34 = vmax.f32 %v4214_v45, %v4262_v2  ;;  %4518 = vrot.lane.b32.xlu1 %v12604_v17, %s7008_s27  ;;  %v4193_v25 = vpop.permute.xlu1 %4192 }
 0x9db   : > { %4504 = vrot.lane.b32.xlu0 %v12607_v7, %s7008_s27  ;;  %v4191_v1 = vpop.permute.xlu0 %4190  ;;  %v12629_v31 = vmax.f32 %v12442_v11, %v4281_v47  ;;  %v4216_v60 = vmul.f32 %v7401_v15, %v4193_v25  ;;  %v4353_v25 = vrot.slane %v12491_v55, 1 }
 0x9dc   : > { %v4294_v4 = vmax.f32 %v12445_v48, %v4278_v34  ;;  %v4215_v33 = vmul.f32 %v7401_v15, %v4191_v1  ;;  %v4330_v48 = vsel %vm16118_vm2, %v4308_v27, %v4309_v56  ;;  %vm16136_vm2 = vmmov %vm16083_vm1 }
 0x9dd   : > { %v15112_v29 = vrot.slane %v12629_v31, 7 }
 0x9de   : > { %v4358_v3 = vrot.slane %v4294_v4, 1  ;;  %v4241_v45 = vpop.permute.xlu1 %4240 }
 0x9df   : > { %v4239_v11 = vpop.permute.xlu0 %4238  ;;  %v4264_v42 = vmul.f32 %v7411_v50, %v4241_v45  ;;  %v4325_v22 = vsel %vm16083_vm1, %v15112_v29, %v4314_v52  ;;  %v4381_v52 = vsel %vm16120_vm11, %v4353_v25, %v4354_v12  ;;  %v4318_v29 = vrot.slane %v12488_v59, 7  ;;  %vm16137_vm1 = vmmov %vm16100_vm0 }
 0x9e0   : > { %v4263_v2 = vmul.f32 %v7411_v50, %v4239_v11  ;;  %v4377_v54 = vsel %vm16119_vm9, %v4357_v28, %v4358_v3  ;;  %v4410_v47 = vmax.f32 %v4325_v22, %v4372_v62  ;;  %v4352_v12 = vrot.slane %v12621_v36, 1  ;;  %vm16139_vm9 = vmmov %vm16100_vm0 }
 0x9e1   : > { %v4405_v34 = vmax.f32 %v4330_v48, %v4377_v54  ;;  %v4280_v1 = vmax.f32 %v4216_v60, %v4264_v42  ;;  %v4310_v48 = vrot.slane %v4294_v4, 7  ;;  %v4334_v60 = vsel %vm16121_vm4, %v4304_v35, %v4305_v43  ;;  %vm16140_vm11 = vmmov %vm16136_vm2 }
 0x9e2   : > { %v4279_v27 = vmax.f32 %v4215_v33, %v4263_v2  ;;  %v4426_v45 = vmax.f32 %v12568_v63, %v4410_v47  ;;  %v4319_v33 = vrot.slane %v12633_v0, 7  ;;  %v4401_v43 = vmax.f32 %v4334_v60, %v4381_v52  ;;  %vm16141_vm4 = vmmov %vm16100_vm0 }
 0x9e3   : > { %v4421_v11 = vmax.f32 %v12571_v21, %v4405_v34  ;;  %v4296_v28 = vmax.f32 %v12459_v30, %v4280_v1  ;;  %v16124_v54 = vrot.slane %v12478_v51, 7  ;;  %v4329_v34 = vsel %vm16126_vm13, %v4309_v56, %v4310_v48  ;;  %vm16144_vm13 = vmmov %vm16136_vm2 }
 0x9e4   : > { %v4295_v62 = vmax.f32 %v12456_v44, %v4279_v27  ;;  %v12670_v21 = vmul.f32 %v4426_v45, %v11957_v32  ;;  %v16122_v44 = vrot.slane %v12488_v59, 1  ;;  %v4335_v51 = vsel %vm16130_vm15, %v4319_v33, %v4304_v35  ;;  %vm16149_vm15 = vmmov %vm16136_vm2 }
 0x9e5   : > { %v12673_v57 = vmul.f32 %v4421_v11, %v16041_v6  ;;  %v4360_v2 = vrot.slane %v4296_v28, 1  ;;  %v4321_v47 = vsel %vm16125_vm8, %v16124_v54, %v4318_v29  ;;  %v4383_v60 = vsel %vm16100_vm0, %v4367_v61, %v4352_v12  ;;  %vm16143_vm8 = vmmov %vm16100_vm0 }
 0x9e6   : > { %v4359_v42 = vrot.slane %v4295_v62, 1  ;;  %v4311_v30 = vrot.slane %v4295_v62, 7  ;;  %v4368_v22 = vsel %vm16123_vm12, %v16122_v44, %v4367_v61  ;;  %4468 = vrot.lane.b32.xlu1 %v12670_v21, %s7009_s28  ;;  %v4399_v54 = vmul.f32 %v16093_v16, %v4383_v60  ;;  %vm16142_vm12 = vmmov %vm16136_vm2 }
 0x9e7   : > { %4458 = vrot.lane.b32.xlu0 %v12673_v57, %s7009_s28  ;;  %v4414_v52 = vmax.f32 %v4321_v47, %v4368_v22 }
 0x9e8   : > { %v4376_v1 = vsel %vm16127_vm10, %v4358_v3, %v4359_v42  ;;  %v4328_v27 = vsel %vm16128_vm7, %v4310_v48, %v4311_v30  ;;  %v4375_v45 = vsel %vm16129_vm5, %v4359_v42, %v4360_v2  ;;  %v4417_v48 = vmax.f32 %v12491_v55, %v4401_v43  ;;  %v16133_v43 = vld [vmem:[#allocation12_spill] sm:$0xff]  ;;  %vm16145_vm10 = vmmov %vm16100_vm0 }
 0x9e9   : > { %v4406_v11 = vmax.f32 %v4329_v34, %v4376_v1  ;;  %v4407_v44 = vmax.f32 %v4328_v27, %v4375_v45  ;;  %v4336_v42 = vmul.f32 %v16098_v13, %v4335_v51  ;;  %v4430_v61 = vmax.f32 %v12488_v59, %v4414_v52  ;;  %vm16146_vm7 = vmmov %vm16136_vm2 }
 0x9ea   : > { %4516 = vrot.lane.b32.xlu1 %v12670_v21, %s7008_s27  ;;  %v4382_v55 = vsel %vm16131_vm14, %v4352_v12, %v4353_v25  ;;  %v4312_v1 = vrot.slane %v4296_v28, 7  ;;  %v4361_v25 = vrot.slane %v12629_v31, 1  ;;  %vm16147_vm5 = vmmov %vm16100_vm0 }
 0x9eb   : > { %4506 = vrot.lane.b32.xlu0 %v12673_v57, %s7008_s27  ;;  %v4422_v56 = vmax.f32 %v4294_v4, %v4406_v11  ;;  %v4423_v3 = vmax.f32 %v4295_v62, %v4407_v44  ;;  %v4320_v4 = vsel %vm16132_vm3, %v4318_v29, %v4319_v33  ;;  %v12723_v62 = vmul.f32 %v4417_v48, %v16045_v19  ;;  %vm16151_vm14 = vmmov %vm16136_vm2 }
 0x9ec   : > { %v12726_v47 = vmul.f32 %v4430_v61, %v16133_v43  ;;  %v4400_v59 = vmax.f32 %v4336_v42, %v4382_v55  ;;  %v4415_v34 = vmax.f32 %v4320_v4, %v4399_v54  ;;  %v16134_v33 = vrot.slane %v12629_v31, 7  ;;  %vm16153_vm3 = vmmov %vm16100_vm0 }
 0x9ed   : > { %v12707_v22 = vmul.f32 %v4422_v56, %v16040_v53  ;;  %v12710_v35 = vmul.f32 %v4423_v3, %v16036_v20  ;;  %v4327_v45 = vsel %vm16136_vm2, %v4311_v30, %v4312_v1  ;;  %v4374_v11 = vsel %vm16137_vm1, %v4360_v2, %v4361_v25  ;;  %vm16157_vm1 = vmmov %vm16100_vm0 }
 0x9ee   : > { %v4416_v12 = vmax.f32 %v12621_v36, %v4400_v59  ;;  %v4431_v29 = vmax.f32 %v12633_v0, %v4415_v34  ;;  %v4326_v27 = vsel %vm16135_vm6, %v4312_v1, %v16134_v33  ;;  %v16138_v36 = vrot.slane %v12568_v63, 1  ;;  %vm16154_vm6 = vmmov %vm16136_vm2 }
 0x9ef   : > { %4460 = vrot.lane.b32.xlu0 %v12707_v22, %s7009_s28  ;;  %4462 = vrot.lane.b32.xlu1 %v12710_v35, %s7009_s28  ;;  %v4408_v51 = vmax.f32 %v4327_v45, %v4374_v11  ;;  %vm16155_vm2 = vmmov %vm16100_vm0 }
 0x9f0   : > { %v4373_v0 = vsel %vm16139_vm9, %v4361_v25, %v16138_v36  ;;  %v12752_v44 = vmul.f32 %v4416_v12, %v16047_v38  ;;  %v12755_v52 = vmul.f32 %v4431_v29, %v16046_v46  ;;  %vm16160_vm9 = vmmov %vm16100_vm0 }
 0x9f1   : > { %v4409_v30 = vmax.f32 %v4326_v27, %v4373_v0  ;;  %v4424_v63 = vmax.f32 %v4296_v28, %v4408_v51 }
 0x9f3   : > { %4450 = vrot.lane.b32.xlu0 %v12723_v62, %s7009_s28  ;;  %4476 = vrot.lane.b32.xlu1 %v12726_v47, %s7009_s28  ;;  %v4425_v2 = vmax.f32 %v12629_v31, %v4409_v30  ;;  %v12770_v56 = vmul.f32 %v4424_v63, %v16037_v10 }
 0x9f5   : > { %v12767_v60 = vmul.f32 %v4425_v2, %v16038_v40 }
 0x9f7   : > { %4498 = vrot.lane.b32.xlu0 %v12723_v62, %s7008_s27  ;;  %4524 = vrot.lane.b32.xlu1 %v12726_v47, %s7008_s27 }
 0x9fb   : > { %4448 = vrot.lane.b32.xlu0 %v12752_v44, %s7009_s28  ;;  %4478 = vrot.lane.b32.xlu1 %v12755_v52, %s7009_s28 }
 0x9ff   : > { %4496 = vrot.lane.b32.xlu0 %v12752_v44, %s7008_s27  ;;  %4526 = vrot.lane.b32.xlu1 %v12755_v52, %s7008_s27 }
 0xa03   : > { %4466 = vrot.lane.b32.xlu1 %v12767_v60, %s7009_s28  ;;  %4464 = vrot.lane.b32.xlu0 %v12770_v56, %s7009_s28 }
 0xa07   : > { %4510 = vrot.lane.b32.xlu1 %v12710_v35, %s7008_s27  ;;  %4508 = vrot.lane.b32.xlu0 %v12707_v22, %s7008_s27 }
 0xa0b   : > { %4514 = vrot.lane.b32.xlu1 %v12767_v60, %s7008_s27  ;;  %4512 = vrot.lane.b32.xlu0 %v12770_v56, %s7008_s27 }
 0xa38   : > { %v4475_v31 = vpop.permute.xlu1 %4474  ;;  %v4453_v28 = vpop.permute.xlu0 %4452 }
 0xa39   : > { %v4493_v29 = vmul.f32 %v7401_v15, %v4475_v31  ;;  %v4482_v33 = vmul.f32 %v7401_v15, %v4453_v28 }
 0xa3c   : > { %v4523_v3 = vpop.permute.xlu1 %4522  ;;  %v4501_v48 = vpop.permute.xlu0 %4500 }
 0xa3d   : > { %v4541_v34 = vmul.f32 %v7411_v50, %v4523_v3  ;;  %v4530_v1 = vmul.f32 %v7411_v50, %v4501_v48 }
 0xa3f   : > { %v4557_v0 = vmax.f32 %v4493_v29, %v4541_v34  ;;  %v4546_v30 = vmax.f32 %v4482_v33, %v4530_v1 }
 0xa40   : > { %v4473_v42 = vpop.permute.xlu1 %4472  ;;  %v4455_v61 = vpop.permute.xlu0 %4454 }
 0xa41   : > { %v4492_v25 = vmul.f32 %v7401_v15, %v4473_v42  ;;  %v4483_v12 = vmul.f32 %v7401_v15, %v4455_v61  ;;  %v12803_v61 = vmax.f32 %v12538_v58, %v4557_v0 }
 0xa43   : > { %v15114_v1 = vrot.slane %v12803_v61, 1 }
 0xa44   : > { %v4521_v54 = vpop.permute.xlu1 %4520  ;;  %v4503_v55 = vpop.permute.xlu0 %4502 }
 0xa45   : > { %v4540_v4 = vmul.f32 %v7411_v50, %v4521_v54  ;;  %v4531_v59 = vmul.f32 %v7411_v50, %v4503_v55  ;;  %v12806_v54 = vmax.f32 %v12541_v8, %v4546_v30 }
 0xa47   : > { %v4556_v27 = vmax.f32 %v4492_v25, %v4540_v4  ;;  %v4547_v45 = vmax.f32 %v4483_v12, %v4531_v59  ;;  %v15113_v58 = vrot.slane %v12806_v54, 7 }
 0xa48   : > { %v4471_v11 = vpop.permute.xlu1 %4470 }
 0xa49   : > { %v4457_v36 = vpop.permute.xlu0 %4456  ;;  %v12793_v51 = vmax.f32 %v12576_v23, %v4556_v27  ;;  %v12796_v2 = vmax.f32 %v12579_v14, %v4547_v45  ;;  %v4491_v48 = vmul.f32 %v7401_v15, %v4471_v11 }
 0xa4a   : > { %v4484_v31 = vmul.f32 %v7401_v15, %v4457_v36 }
 0xa4b   : > { %v4636_v59 = vrot.slane %v12793_v51, 1  ;;  %v4579_v34 = vrot.slane %v12796_v2, 7  ;;  %v15119_v8 = vrot.slane %v12793_v51, 7  ;;  %v15118_v12 = vrot.slane %v12796_v2, 1 }
 0xa4c   : > { %v4519_v63 = vpop.permute.xlu1 %4518 }
 0xa4d   : > { %v4505_v3 = vpop.permute.xlu0 %4504  ;;  %v4539_v28 = vmul.f32 %v7411_v50, %v4519_v63  ;;  %v4642_v29 = vsel %vm16141_vm4, %v4636_v59, %v15114_v1  ;;  %v4604_v33 = vsel %vm16142_vm12, %v15113_v58, %v4579_v34  ;;  %vm16164_vm4 = vmmov %vm16154_vm6 }
 0xa4e   : > { %v4532_v42 = vmul.f32 %v7411_v50, %v4505_v3  ;;  %vm16165_vm12 = vmmov %vm16100_vm0 }
 0xa4f   : > { %v4555_v23 = vmax.f32 %v4491_v48, %v4539_v28 }
 0xa50   : > { %v4548_v55 = vmax.f32 %v4484_v31, %v4532_v42 }
 0xa51   : > { %v12809_v14 = vmax.f32 %v12604_v17, %v4555_v23 }
 0xa52   : > { %v12812_v4 = vmax.f32 %v12607_v7, %v4548_v55 }
 0xa53   : > { %v4587_v25 = vrot.slane %v12809_v14, 7 }
 0xa54   : > { %v4628_v17 = vrot.slane %v12812_v4, 1 }
 0xa55   : > { %v4595_v7 = vsel %vm16140_vm11, %v4587_v25, %v15119_v8  ;;  %vm16163_vm11 = vmmov %vm16154_vm6 }
 0xa56   : > { %v4651_v27 = vsel %vm16143_vm8, %v15118_v12, %v4628_v17  ;;  %v4684_v45 = vmax.f32 %v4595_v7, %v4642_v29  ;;  %v15126_v12 = vrot.slane %v12806_v54, 1  ;;  %vm16166_vm8 = vmmov %vm16164_vm4 }
 0xa57   : > { %v4675_v11 = vmax.f32 %v4604_v33, %v4651_v27 }
 0xa58   : > { %v4469_v36 = vpop.permute.xlu1 %4468  ;;  %v4700_v30 = vmax.f32 %v12793_v51, %v4684_v45 }
 0xa59   : > { %v4459_v0 = vpop.permute.xlu0 %4458  ;;  %v4691_v63 = vmax.f32 %v12796_v2, %v4675_v11  ;;  %v4490_v42 = vmul.f32 %v7401_v15, %v4469_v36  ;;  %v15116_v11 = vrot.slane %v12809_v14, 1  ;;  %v4580_v36 = vrot.slane %v12812_v4, 7 }
 0xa5a   : > { %v12841_v3 = vmul.f32 %v4700_v30, %v16042_v39  ;;  %v4485_v23 = vmul.f32 %v7401_v15, %v4459_v0 }
 0xa5b   : > { %v12844_v48 = vmul.f32 %v4691_v63, %v16048_v26 }
 0xa5c   : > { %v4517_v31 = vpop.permute.xlu1 %4516  ;;  %4744 = vrot.lane.b32.xlu1 %v12841_v3, %s7009_s28 }
 0xa5d   : > { %4726 = vrot.lane.b32.xlu0 %v12844_v48, %s7009_s28  ;;  %v4507_v28 = vpop.permute.xlu0 %4506  ;;  %v4538_v55 = vmul.f32 %v7411_v50, %v4517_v31 }
 0xa5e   : > { %v4533_v7 = vmul.f32 %v7411_v50, %v4507_v28 }
 0xa5f   : > { %v4554_v29 = vmax.f32 %v4490_v42, %v4538_v55 }
 0xa60   : > { %v4549_v33 = vmax.f32 %v4485_v23, %v4533_v7  ;;  %4792 = vrot.lane.b32.xlu1 %v12841_v3, %s7008_s27 }
 0xa61   : > { %v4463_v27 = vpop.permute.xlu1 %4462  ;;  %4774 = vrot.lane.b32.xlu0 %v12844_v48, %s7008_s27  ;;  %v4461_v45 = vpop.permute.xlu0 %4460  ;;  %v12861_v0 = vmax.f32 %v12670_v21, %v4554_v29  ;;  %v4643_v21 = vsel %vm16145_vm10, %v15116_v11, %v4636_v59  ;;  %vm16169_vm10 = vmmov %vm16164_vm4 }
 0xa62   : > { %v12864_v30 = vmax.f32 %v12673_v57, %v4549_v33  ;;  %v4603_v57 = vsel %vm16146_vm7, %v4579_v34, %v4580_v36  ;;  %vm16170_vm7 = vmmov %vm16164_vm4 }
 0xa63   : > { %v15115_v63 = vrot.slane %v12861_v0, 7 }
 0xa64   : > { %v15117_v31 = vrot.slane %v12864_v30, 1  ;;  %v4581_v8 = vrot.slane %v12864_v30, 7 }
 0xa65   : > { %v4477_v28 = vpop.permute.xlu1 %4476  ;;  %v4451_v42 = vpop.permute.xlu0 %4450  ;;  %v4596_v23 = vsel %vm16144_vm13, %v15115_v63, %v4587_v25  ;;  %vm16167_vm13 = vmmov %vm16100_vm0 }
 0xa66   : > { %v4650_v55 = vsel %vm16147_vm5, %v4628_v17, %v15117_v31  ;;  %v4683_v7 = vmax.f32 %v4596_v23, %v4643_v21  ;;  %v15127_v31 = vrot.slane %v12803_v61, 7  ;;  %vm16171_vm5 = vmmov %vm16100_vm0 }
 0xa67   : > { %v4676_v29 = vmax.f32 %v4603_v57, %v4650_v55  ;;  %v4494_v57 = vmul.f32 %v7401_v15, %v4477_v28  ;;  %v4481_v55 = vmul.f32 %v7401_v15, %v4451_v42 }
 0xa68   : > { %v4699_v1 = vmax.f32 %v12809_v14, %v4683_v7 }
 0xa69   : > { %v4525_v33 = vpop.permute.xlu1 %4524  ;;  %v4499_v58 = vpop.permute.xlu0 %4498  ;;  %v4692_v25 = vmax.f32 %v12812_v4, %v4676_v29 }
 0xa6a   : > { %v12885_v63 = vmul.f32 %v4699_v1, %v16039_v5  ;;  %v4542_v1 = vmul.f32 %v7411_v50, %v4525_v33  ;;  %v4529_v21 = vmul.f32 %v7411_v50, %v4499_v58  ;;  %v4487_v33 = vmul.f32 %v7401_v15, %v4463_v27 }
 0xa6b   : > { %v12888_v59 = vmul.f32 %v4692_v25, %v11939_v37  ;;  %v4486_v58 = vmul.f32 %v7401_v15, %v4461_v45 }
 0xa6c   : > { %4742 = vrot.lane.b32.xlu1 %v12885_v63, %s7009_s28  ;;  %v4558_v25 = vmax.f32 %v4494_v57, %v4542_v1  ;;  %v4545_v11 = vmax.f32 %v4481_v55, %v4529_v21  ;;  %v16148_v55 = vrot.slane %v12793_v51, 7 }
 0xa6d   : > { %v4479_v34 = vpop.permute.xlu1 %4478  ;;  %4728 = vrot.lane.b32.xlu0 %v12888_v59, %s7009_s28  ;;  %v4449_v17 = vpop.permute.xlu0 %4448 }
 0xa6e   : > { %v12910_v26 = vmax.f32 %v12726_v47, %v4558_v25  ;;  %v12913_v1 = vmax.f32 %v12723_v62, %v4545_v11  ;;  %v12921_v27 = vsel %vm16149_vm15, %v16148_v55, %v15127_v31  ;;  %v4634_v62 = vrot.slane %v12861_v0, 1  ;;  %vm16173_vm15 = vmmov %vm16100_vm0 }
 0xa6f   : > { %v4495_v47 = vmul.f32 %v7401_v15, %v4479_v34  ;;  %v4602_v25 = vsel %vm16151_vm14, %v4580_v36, %v4581_v8 }
 0xa70   : > { %4790 = vrot.lane.b32.xlu1 %v12885_v63, %s7008_s27 }
 0xa71   : > { %v4527_v23 = vpop.permute.xlu1 %4526  ;;  %4776 = vrot.lane.b32.xlu0 %v12888_v59, %s7008_s27  ;;  %v4497_v4 = vpop.permute.xlu0 %4496 }
 0xa72   : > { %v4543_v45 = vmul.f32 %v7411_v50, %v4527_v23 }
 0xa75   : > { %v4467_v7 = vpop.permute.xlu1 %4466  ;;  %v4465_v29 = vpop.permute.xlu0 %4464 }
 0xa76   : > { %v4489_v34 = vmul.f32 %v7401_v15, %v4467_v7  ;;  %v4488_v23 = vmul.f32 %v7401_v15, %v4465_v29 }
 0xa79   : > { %v4511_v18 = vpop.permute.xlu1 %4510  ;;  %v4509_v9 = vpop.permute.xlu0 %4508 }
 0xa7a   : > { %v4535_v28 = vmul.f32 %v7411_v50, %v4511_v18  ;;  %v4534_v42 = vmul.f32 %v7411_v50, %v4509_v9  ;;  %v16150_v18 = vrot.slane %v12796_v2, 1 }
 0xa7c   : > { %v4551_v21 = vmax.f32 %v4487_v33, %v4535_v28  ;;  %v4550_v57 = vmax.f32 %v4486_v58, %v4534_v42  ;;  %v12929_v9 = vsel %vm16100_vm0, %v15126_v12, %v16150_v18  ;;  %v4528_v18 = vmul.f32 %v7411_v50, %v4497_v4  ;;  %vm16175_vm0 = vmmov %vm16164_vm4 }
 0xa7d   : > { %v4515_v11 = vpop.permute.xlu1 %4514  ;;  %v4513_v51 = vpop.permute.xlu0 %4512  ;;  %vm16177_vm14 = vmmov %vm16175_vm0 }
 0xa7e   : > { %v4567_v33 = vmax.f32 %v12710_v35, %v4551_v21  ;;  %v4566_v2 = vmax.f32 %v12707_v22, %v4550_v57  ;;  %v4537_v58 = vmul.f32 %v7411_v50, %v4515_v11  ;;  %v4536_v28 = vmul.f32 %v7411_v50, %v4513_v51 }
 0xa7f   : > { %v4480_v35 = vmul.f32 %v7401_v15, %v4449_v17  ;;  %v4559_v22 = vmax.f32 %v4495_v47, %v4543_v45  ;;  %v16152_v51 = vrot.slane %v12864_v30, 1 }
 0xa80   : > { %v4631_v12 = vrot.slane %v4567_v33, 1  ;;  %v4582_v36 = vrot.slane %v4566_v2, 7  ;;  %v4630_v31 = vrot.slane %v4566_v2, 1  ;;  %v4553_v21 = vmax.f32 %v4489_v34, %v4537_v58 }
 0xa81   : > { %v4552_v57 = vmax.f32 %v4488_v23, %v4536_v28  ;;  %v4583_v11 = vrot.slane %v4567_v33, 7  ;;  %v4544_v45 = vmax.f32 %v4480_v35, %v4528_v18  ;;  %v16156_v58 = vrot.slane %v12809_v14, 1 }
 0xa82   : > { %v4649_v55 = vsel %vm16153_vm3, %v16152_v51, %v4630_v31  ;;  %v4601_v7 = vsel %vm16154_vm6, %v4581_v8, %v4582_v36  ;;  %v4648_v4 = vsel %vm16155_vm2, %v4630_v31, %v4631_v12  ;;  %v4569_v29 = vmax.f32 %v12767_v60, %v4553_v21  ;;  %vm16179_vm3 = vmmov %vm16157_vm1 }
 0xa83   : > { %v4568_v42 = vmax.f32 %v12770_v56, %v4552_v57  ;;  %v4677_v17 = vmax.f32 %v4602_v25, %v4649_v55  ;;  %v4678_v47 = vmax.f32 %v4601_v7, %v4648_v4  ;;  %v4644_v28 = vsel %vm16157_vm1, %v4634_v62, %v16156_v58  ;;  %vm16180_vm6 = vmmov %vm16157_vm1 }
 0xa84   : > { %v16158_v34 = vrot.slane %v12910_v26, 1  ;;  %v16159_v23 = vrot.slane %v12803_v61, 1  ;;  %v16161_v31 = vrot.slane %v12806_v54, 7  ;;  %v16162_v60 = vrot.slane %v12913_v1, 7  ;;  %vm16181_vm2 = vmmov %vm16175_vm0 }
 0xa85   : > { %v4585_v25 = vrot.slane %v4569_v29, 7  ;;  %v4633_v55 = vrot.slane %v4569_v29, 1  ;;  %v4584_v14 = vrot.slane %v4568_v42, 7  ;;  %v4632_v18 = vrot.slane %v4568_v42, 1  ;;  %vm16182_vm1 = vmmov %vm16175_vm0 }
 0xa86   : > { %v4641_v8 = vsel %vm16160_vm9, %v16159_v23, %v16158_v34  ;;  %v4605_v56 = vsel %vm16163_vm11, %v16162_v60, %v16161_v31  ;;  %v12973_v35 = vmax.f32 %v12755_v52, %v4559_v22  ;;  %v4693_v21 = vmax.f32 %v12864_v30, %v4677_v17  ;;  %vm16183_vm9 = vmmov %vm16179_vm3 }
 0xa87   : > { %v4694_v57 = vmax.f32 %v4566_v2, %v4678_v47  ;;  %v4600_v51 = vsel %vm16164_vm4, %v4582_v36, %v4583_v11  ;;  %v4647_v7 = vsel %vm16165_vm12, %v4631_v12, %v4632_v18  ;;  %v4599_v4 = vsel %vm16166_vm8, %v4583_v11, %v4584_v14  ;;  %vm16184_vm11 = vmmov %vm16175_vm0 }
 0xa88   : > { %v4646_v58 = vsel %vm16167_vm13, %v4632_v18, %v4633_v55  ;;  %v16168_v34 = vrot.slane %v12861_v0, 7  ;;  %v12989_v30 = vmul.f32 %v4693_v21, %v16041_v6  ;;  %v4679_v36 = vmax.f32 %v4600_v51, %v4647_v7  ;;  %vm16185_vm4 = vmmov %vm16179_vm3 }
 0xa89   : > { %v12992_v2 = vmul.f32 %v4694_v57, %v16040_v53  ;;  %v4680_v22 = vmax.f32 %v4599_v4, %v4646_v58  ;;  %v4560_v12 = vmax.f32 %v12752_v44, %v4544_v45  ;;  %v4598_v11 = vsel %vm16170_vm7, %v4584_v14, %v4585_v25  ;;  %vm16187_vm12 = vmmov %vm16179_vm3 }
 0xa8a   : > { %v4597_v52 = vsel %vm16169_vm10, %v4585_v25, %v16168_v34  ;;  %v4645_v47 = vsel %vm16171_vm5, %v4633_v55, %v4634_v62  ;;  %4730 = vrot.lane.b32.xlu0 %v12989_v30, %s7009_s28  ;;  %v4695_v23 = vmax.f32 %v4567_v33, %v4679_v36  ;;  %v4685_v18 = vmax.f32 %v12921_v27, %v4641_v8  ;;  %vm16188_vm8 = vmmov %vm16175_vm0 }
 0xa8b   : > { %v4682_v17 = vmax.f32 %v4597_v52, %v4644_v28  ;;  %4732 = vrot.lane.b32.xlu1 %v12992_v2, %s7009_s28  ;;  %v4696_v31 = vmax.f32 %v4568_v42, %v4680_v22  ;;  %v4681_v60 = vmax.f32 %v4598_v11, %v4645_v47  ;;  %v4674_v44 = vmax.f32 %v4605_v56, %v12929_v9  ;;  %vm16189_vm13 = vmmov %vm16179_vm3 }
 0xa8c   : > { %v13006_v45 = vmul.f32 %v4695_v23, %v16036_v20  ;;  %v4639_v55 = vrot.slane %v12973_v35, 1  ;;  %v4576_v14 = vrot.slane %v4560_v12, 7  ;;  %v4590_v27 = vrot.slane %v12910_v26, 7  ;;  %vm16190_vm10 = vmmov %vm16175_vm0 }
 0xa8d   : > { %v13009_v28 = vmul.f32 %v4696_v31, %v16037_v10  ;;  %v4698_v62 = vmax.f32 %v12861_v0, %v4682_v17  ;;  %v4697_v25 = vmax.f32 %v4569_v29, %v4681_v60  ;;  %v4625_v9 = vrot.slane %v12913_v1, 1  ;;  %vm16191_vm7 = vmmov %vm16179_vm3 }
 0xa8e   : > { %4734 = vrot.lane.b32.xlu0 %v13006_v45, %s7009_s28  ;;  %v4701_v0 = vmax.f32 %v12803_v61, %v4685_v18  ;;  %v4690_v29 = vmax.f32 %v12806_v54, %v4674_v44  ;;  %v4591_v8 = vrot.slane %v12973_v35, 7  ;;  %v4624_v56 = vrot.slane %v4560_v12, 1  ;;  %vm16192_vm5 = vmmov %vm16175_vm0 }
 0xa8f   : > { %4736 = vrot.lane.b32.xlu1 %v13009_v28, %s7009_s28  ;;  %v13020_v33 = vmul.f32 %v4698_v62, %v11957_v32  ;;  %v13023_v42 = vmul.f32 %v4697_v25, %v16038_v40  ;;  %v16172_v21 = vrot.slane %v12910_v26, 1  ;;  %v16174_v51 = vrot.slane %v12913_v1, 7 }
 0xa90   : > { %v16176_v4 = vrot.slane %v12803_v61, 7  ;;  %v16178_v34 = vrot.slane %v12806_v54, 1  ;;  %v13049_v36 = vmul.f32 %v4701_v0, %v16043_v49  ;;  %v13052_v22 = vmul.f32 %v4690_v29, %v16044_v24 }
 0xa91   : > { %v4640_v57 = vsel %vm16173_vm15, %v16172_v21, %v4639_v55  ;;  %v4606_v7 = vsel %vm16175_vm0, %v4576_v14, %v16174_v51  ;;  %v4655_v47 = vsel %vm16180_vm6, %v4639_v55, %v4624_v56  ;;  %v4607_v61 = vsel %vm16181_vm2, %v4591_v8, %v4576_v14  ;;  %vm16193_vm15 = vmmov %vm16179_vm3 }
 0xa92   : > { %4738 = vrot.lane.b32.xlu0 %v13023_v42, %s7009_s28  ;;  %v4593_v58 = vsel %vm16177_vm14, %v16176_v4, %v4590_v27  ;;  %v4653_v52 = vsel %vm16179_vm3, %v4625_v9, %v16178_v34  ;;  %v4671_v31 = vmul.f32 %v16093_v16, %v4655_v47  ;;  %v4608_v60 = vmul.f32 %v16098_v13, %v4607_v61  ;;  %vm16194_vm14 = vmmov %vm16179_vm3 }
 0xa93   : > { %4740 = vrot.lane.b32.xlu1 %v13020_v33, %s7009_s28  ;;  %v4686_v17 = vmax.f32 %v4593_v58, %v4640_v57  ;;  %v4673_v11 = vmax.f32 %v4606_v7, %v4653_v52  ;;  %v4592_v18 = vsel %vm16182_vm1, %v4590_v27, %v4591_v8  ;;  %v4654_v44 = vsel %vm16183_vm9, %v4624_v56, %v4625_v9  ;;  %vm16195_vm3 = vmmov %vm16175_vm0 }
 0xa94   : > { %v4687_v62 = vmax.f32 %v4592_v18, %v4671_v31  ;;  %v4672_v25 = vmax.f32 %v4608_v60, %v4654_v44  ;;  %vm16196_vm6 = vmmov %vm16185_vm4 }
 0xa95   : > { %v4702_v54 = vmax.f32 %v12910_v26, %v4686_v17  ;;  %v4689_v23 = vmax.f32 %v12913_v1, %v4673_v11  ;;  %vm16198_vm2 = vmmov %vm16175_vm0 }
 0xa96   : > { %4724 = vrot.lane.b32.xlu0 %v13052_v22, %s7009_s28  ;;  %v4703_v55 = vmax.f32 %v12973_v35, %v4687_v62  ;;  %v4688_v14 = vmax.f32 %v4560_v12, %v4672_v25  ;;  %vm16199_vm1 = vmmov %vm16175_vm0 }
 0xa97   : > { %4746 = vrot.lane.b32.xlu1 %v13049_v36, %s7009_s28  ;;  %v13075_v26 = vmul.f32 %v4702_v54, %v16133_v43  ;;  %v13078_v1 = vmul.f32 %v4689_v23, %v16045_v19  ;;  %vm16201_vm9 = vmmov %vm16185_vm4 }
 0xa98   : > { %v13090_v27 = vmul.f32 %v4703_v55, %v16046_v46  ;;  %v13093_v9 = vmul.f32 %v4688_v14, %v16047_v38 }
 0xa9a   : > { %4772 = vrot.lane.b32.xlu0 %v13052_v22, %s7008_s27 }
 0xa9b   : > { %4794 = vrot.lane.b32.xlu1 %v13049_v36, %s7008_s27 }
 0xa9e   : > { %4722 = vrot.lane.b32.xlu0 %v13078_v1, %s7009_s28 }
 0xa9f   : > { %4748 = vrot.lane.b32.xlu1 %v13075_v26, %s7009_s28 }
 0xaa2   : > { %4770 = vrot.lane.b32.xlu0 %v13078_v1, %s7008_s27 }
 0xaa3   : > { %4796 = vrot.lane.b32.xlu1 %v13075_v26, %s7008_s27 }
 0xaa6   : > { %4720 = vrot.lane.b32.xlu0 %v13093_v9, %s7009_s28 }
 0xaa7   : > { %4750 = vrot.lane.b32.xlu1 %v13090_v27, %s7009_s28 }
 0xaaa   : > { %4768 = vrot.lane.b32.xlu0 %v13093_v9, %s7008_s27 }
 0xaab   : > { %4798 = vrot.lane.b32.xlu1 %v13090_v27, %s7008_s27 }
 0xaae   : > { %4778 = vrot.lane.b32.xlu0 %v12989_v30, %s7008_s27 }
 0xaaf   : > { %4780 = vrot.lane.b32.xlu1 %v12992_v2, %s7008_s27 }
 0xab2   : > { %4782 = vrot.lane.b32.xlu0 %v13006_v45, %s7008_s27 }
 0xab3   : > { %4784 = vrot.lane.b32.xlu1 %v13009_v28, %s7008_s27 }
 0xab6   : > { %4786 = vrot.lane.b32.xlu0 %v13023_v42, %s7008_s27 }
 0xab7   : > { %4788 = vrot.lane.b32.xlu1 %v13020_v33, %s7008_s27 }
 0xace   : > { %v4745_v35 = vpop.permute.xlu1 %4744 }
 0xacf   : > { %v4727_v12 = vpop.permute.xlu0 %4726  ;;  %v4764_v38 = vmul.f32 %v7401_v15, %v4745_v35 }
 0xad0   : > { %v4755_v46 = vmul.f32 %v7401_v15, %v4727_v12 }
 0xad2   : > { %v4793_v0 = vpop.permute.xlu1 %4792 }
 0xad3   : > { %v4775_v29 = vpop.permute.xlu0 %4774  ;;  %v4812_v62 = vmul.f32 %v7411_v50, %v4793_v0 }
 0xad4   : > { %v4803_v25 = vmul.f32 %v7411_v50, %v4775_v29 }
 0xad5   : > { %v4828_v13 = vmax.f32 %v4764_v38, %v4812_v62 }
 0xad6   : > { %v4819_v16 = vmax.f32 %v4755_v46, %v4803_v25 }
 0xad7   : > { %v13146_v35 = vmax.f32 %v12841_v3, %v4828_v13 }
 0xad8   : > { %v13149_v12 = vmax.f32 %v12844_v48, %v4819_v16 }
 0xade   : > { %v4743_v8 = vpop.permute.xlu1 %4742 }
 0xadf   : > { %v4729_v56 = vpop.permute.xlu0 %4728  ;;  %v4763_v55 = vmul.f32 %v7401_v15, %v4743_v8 }
 0xae0   : > { %v4756_v14 = vmul.f32 %v7401_v15, %v4729_v56 }
 0xae2   : > { %v4791_v21 = vpop.permute.xlu1 %4790 }
 0xae3   : > { %v4777_v57 = vpop.permute.xlu0 %4776  ;;  %v4811_v31 = vmul.f32 %v7411_v50, %v4791_v21 }
 0xae4   : > { %v4804_v60 = vmul.f32 %v7411_v50, %v4777_v57 }
 0xae5   : > { %v4827_v19 = vmax.f32 %v4763_v55, %v4811_v31 }
 0xae6   : > { %v4820_v21 = vmax.f32 %v4756_v14, %v4804_v60 }
 0xae7   : > { %v13136_v0 = vmax.f32 %v12885_v63, %v4827_v19  ;;  %v15147_v63 = vrot.slane %v13146_v35, 1 }
 0xae8   : > { %v13139_v29 = vmax.f32 %v12888_v59, %v4820_v21  ;;  %v15140_v59 = vrot.slane %v13149_v12, 7 }
 0xae9   : > { %v15148_v31 = vrot.slane %v13136_v0, 1 }
 0xaea   : > { %v4852_v38 = vrot.slane %v13139_v29, 7 }
 0xaeb   : > { %v13171_v55 = vsel %vm16185_vm4, %v15148_v31, %v15147_v63 }
 0xaec   : > { %v4875_v25 = vsel %vm16184_vm11, %v15140_v59, %v4852_v38  ;;  %vm16203_vm11 = vmmov %vm16185_vm4 }
 0xaed   : > { %vm16205_vm4 = vmmov %vm16175_vm0 }
 0xafc   : > { %v4731_v7 = vpop.permute.xlu0 %4730 }
 0xafd   : > { %v4733_v51 = vpop.permute.xlu1 %4732  ;;  %v4757_v3 = vmul.f32 %v7401_v15, %v4731_v7 }
 0xafe   : > { %v4758_v13 = vmul.f32 %v7401_v15, %v4733_v51 }
 0xb00   : > { %v4735_v58 = vpop.permute.xlu0 %4734 }
 0xb01   : > { %v4737_v4 = vpop.permute.xlu1 %4736  ;;  %v4759_v7 = vmul.f32 %v7401_v15, %v4735_v58 }
 0xb02   : > { %v4760_v51 = vmul.f32 %v7401_v15, %v4737_v4 }
 0xb04   : > { %v4739_v52 = vpop.permute.xlu0 %4738 }
 0xb05   : > { %v4741_v34 = vpop.permute.xlu1 %4740  ;;  %v4761_v59 = vmul.f32 %v7401_v15, %v4739_v52 }
 0xb06   : > { %v4762_v16 = vmul.f32 %v7401_v15, %v4741_v34 }
 0xb08   : > { %v4725_v11 = vpop.permute.xlu0 %4724 }
 0xb09   : > { %v4747_v17 = vpop.permute.xlu1 %4746 }
 0xb0a   : > { %v4765_v49 = vmul.f32 %v7401_v15, %v4747_v17 }
 0xb0c   : > { %v4773_v61 = vpop.permute.xlu0 %4772 }
 0xb0d   : > { %v4795_v47 = vpop.permute.xlu1 %4794 }
 0xb0e   : > { %v4813_v63 = vmul.f32 %v7411_v50, %v4795_v47 }
 0xb10   : > { %v13117_v23 = vpop.permute.xlu0 %4722 }
 0xb11   : > { %v13115_v54 = vpop.permute.xlu1 %4748 }
 0xb14   : > { %v13123_v44 = vpop.permute.xlu0 %4770 }
 0xb15   : > { %v13121_v18 = vpop.permute.xlu1 %4796 }
 0xb18   : > { %v13133_v57 = vpop.permute.xlu0 %4720 }
 0xb19   : > { %v13131_v43 = vpop.permute.xlu1 %4750 }
 0xb1c   : > { %v13143_v56 = vpop.permute.xlu0 %4768 }
 0xb1d   : > { %v13141_v8 = vpop.permute.xlu1 %4798 }
 0xb20   : > { %v4779_v19 = vpop.permute.xlu0 %4778 }
 0xb21   : > { %v4781_v46 = vpop.permute.xlu1 %4780  ;;  %v4805_v62 = vmul.f32 %v7411_v50, %v4779_v19 }
 0xb22   : > { %v4806_v60 = vmul.f32 %v7411_v50, %v4781_v46 }
 0xb23   : > { %v4821_v21 = vmax.f32 %v4757_v3, %v4805_v62  ;;  %v4802_v62 = vmul.f32 %v7411_v50, %v4773_v61 }
 0xb24   : > { %v4822_v14 = vmax.f32 %v4758_v13, %v4806_v60  ;;  %v4783_v19 = vpop.permute.xlu0 %4782  ;;  %v4754_v60 = vmul.f32 %v7401_v15, %v4725_v11  ;;  %v16186_v11 = vrot.slane %v13139_v29, 1 }
 0xb25   : > { %v4785_v46 = vpop.permute.xlu1 %4784  ;;  %v4807_v24 = vmul.f32 %v7411_v50, %v4783_v19  ;;  %v4837_v58 = vmax.f32 %v12989_v30, %v4821_v21 }
 0xb26   : > { %v4808_v48 = vmul.f32 %v7411_v50, %v4785_v46  ;;  %v4838_v4 = vmax.f32 %v12992_v2, %v4822_v14  ;;  %v4829_v14 = vmax.f32 %v4765_v49, %v4813_v63 }
 0xb27   : > { %v4823_v34 = vmax.f32 %v4759_v7, %v4807_v24  ;;  %v4853_v31 = vrot.slane %v4837_v58, 7  ;;  %v4901_v46 = vrot.slane %v4837_v58, 1 }
 0xb28   : > { %v4824_v13 = vmax.f32 %v4760_v51, %v4808_v48  ;;  %v4854_v3 = vrot.slane %v4838_v4, 7  ;;  %v4902_v52 = vrot.slane %v4838_v4, 1  ;;  %v4787_v19 = vpop.permute.xlu0 %4786 }
 0xb29   : > { %v4789_v39 = vpop.permute.xlu1 %4788  ;;  %v4839_v47 = vmax.f32 %v13006_v45, %v4823_v34  ;;  %v4809_v30 = vmul.f32 %v7411_v50, %v4787_v19  ;;  %v4922_v24 = vsel %vm16187_vm12, %v16186_v11, %v4901_v46  ;;  %v4874_v61 = vsel %vm16188_vm8, %v4852_v38, %v4853_v31  ;;  %vm16207_vm12 = vmmov %vm16175_vm0 }
 0xb2a   : > { %v4840_v17 = vmax.f32 %v13009_v28, %v4824_v13  ;;  %v4810_v2 = vmul.f32 %v7411_v50, %v4789_v39  ;;  %v4921_v48 = vsel %vm16189_vm13, %v4901_v46, %v4902_v52  ;;  %v4948_v13 = vmax.f32 %v4875_v25, %v4922_v24  ;;  %vm16209_vm8 = vmmov %vm16196_vm6 }
 0xb2b   : > { %v4855_v7 = vrot.slane %v4839_v47, 7  ;;  %v4903_v45 = vrot.slane %v4839_v47, 1  ;;  %v4825_v39 = vmax.f32 %v4761_v59, %v4809_v30  ;;  %v4949_v34 = vmax.f32 %v4874_v61, %v4921_v48  ;;  %vm16210_vm13 = vmmov %vm16196_vm6 }
 0xb2c   : > { %v4856_v51 = vrot.slane %v4840_v17, 7  ;;  %v4904_v28 = vrot.slane %v4840_v17, 1  ;;  %v4826_v21 = vmax.f32 %v4762_v16, %v4810_v2  ;;  %v4873_v49 = vsel %vm16190_vm10, %v4853_v31, %v4854_v3  ;;  %vm16211_vm10 = vmmov %vm16175_vm0 }
 0xb2d   : > { %v4920_v63 = vsel %vm16191_vm7, %v4902_v52, %v4903_v45  ;;  %v4872_v38 = vsel %vm16192_vm5, %v4854_v3, %v4855_v7  ;;  %v4841_v11 = vmax.f32 %v13023_v42, %v4825_v39  ;;  %v4964_v59 = vmax.f32 %v13139_v29, %v4948_v13  ;;  %vm16212_vm7 = vmmov %vm16175_vm0 }
 0xb2e   : > { %v4919_v46 = vsel %vm16193_vm15, %v4903_v45, %v4904_v28  ;;  %v4842_v19 = vmax.f32 %v13020_v33, %v4826_v21  ;;  %v4965_v16 = vmax.f32 %v4837_v58, %v4949_v34  ;;  %v4818_v25 = vmax.f32 %v4754_v60, %v4802_v62  ;;  %vm16213_vm5 = vmmov %vm16196_vm6 }
 0xb2f   : > { %v4950_v2 = vmax.f32 %v4873_v49, %v4920_v63  ;;  %v4951_v30 = vmax.f32 %v4872_v38, %v4919_v46  ;;  %v4871_v31 = vsel %vm16175_vm0, %v4855_v7, %v4856_v51  ;;  %v4857_v61 = vrot.slane %v4841_v11, 7  ;;  %vm16216_vm15 = vmmov %vm16213_vm5 }
 0xb30   : > { %v4858_v52 = vrot.slane %v4842_v19, 7  ;;  %v4906_v24 = vrot.slane %v4842_v19, 1  ;;  %v4905_v3 = vrot.slane %v4841_v11, 1  ;;  %v13211_v48 = vmul.f32 %v4964_v59, %v11939_v37 }
 0xb31   : > { %v13214_v33 = vmul.f32 %v4965_v16, %v16041_v6  ;;  %v4966_v42 = vmax.f32 %v4838_v4, %v4950_v2  ;;  %v4967_v45 = vmax.f32 %v4839_v47, %v4951_v30  ;;  %v4870_v60 = vsel %vm16195_vm3, %v4856_v51, %v4857_v61  ;;  %vm16218_vm3 = vmmov %vm16213_vm5 }
 0xb32   : > { %v4918_v58 = vsel %vm16194_vm14, %v4904_v28, %v4905_v3  ;;  %v4917_v62 = vsel %vm16196_vm6, %v4905_v3, %v4906_v24  ;;  %v16197_v7 = vrot.slane %v13136_v0, 7  ;;  %5000 = vrot.lane.b32.xlu0 %v13211_v48, %s7009_s28  ;;  %v13237_v28 = vmax.f32 %v13049_v36, %v4829_v14  ;;  %vm16217_vm14 = vmmov %vm16175_vm0 }
 0xb33   : > { %5002 = vrot.lane.b32.xlu1 %v13214_v33, %s7009_s28  ;;  %v13231_v4 = vmul.f32 %v4966_v42, %v16040_v53  ;;  %v13234_v47 = vmul.f32 %v4967_v45, %v16036_v20  ;;  %v4952_v51 = vmax.f32 %v4871_v31, %v4918_v58  ;;  %v4953_v39 = vmax.f32 %v4870_v60, %v4917_v62  ;;  %vm16221_vm6 = vmmov %vm16218_vm3 }
 0xb34   : > { %v4868_v21 = vsel %vm16198_vm2, %v4858_v52, %v16197_v7  ;;  %v4869_v13 = vsel %vm16199_vm1, %v4857_v61, %v4858_v52  ;;  %v16200_v34 = vrot.slane %v13136_v0, 1  ;;  %v13246_v63 = vmax.f32 %v13052_v22, %v4818_v25  ;;  %vm16222_vm2 = vmmov %vm16175_vm0 }
 0xb35   : > { %v4968_v38 = vmax.f32 %v4840_v17, %v4952_v51  ;;  %v4955_v46 = vmax.f32 %v4868_v21, %v13171_v55  ;;  %v4814_v36 = vmul.f32 %v7411_v50, %v13121_v18  ;;  %v4801_v14 = vmul.f32 %v7411_v50, %v13123_v44  ;;  %vm16225_vm1 = vmmov %vm16175_vm0 }
 0xb36   : > { %v4916_v49 = vsel %vm16201_vm9, %v4906_v24, %v16200_v34  ;;  %v4969_v16 = vmax.f32 %v4841_v11, %v4953_v39  ;;  %5004 = vrot.lane.b32.xlu0 %v13231_v4, %s7009_s28  ;;  %v4766_v55 = vmul.f32 %v7401_v15, %v13115_v54  ;;  %v4753_v17 = vmul.f32 %v7401_v15, %v13117_v23  ;;  %vm16226_vm9 = vmmov %vm16218_vm3 }
 0xb37   : > { %v4954_v59 = vmax.f32 %v4869_v13, %v4916_v49  ;;  %5006 = vrot.lane.b32.xlu1 %v13234_v47, %s7009_s28  ;;  %v13258_v22 = vmul.f32 %v4968_v38, %v16037_v10  ;;  %v4909_v44 = vrot.slane %v13237_v28, 1  ;;  %v4850_v11 = vrot.slane %v13246_v63, 7 }
 0xb38   : > { %v13265_v18 = vmul.f32 %v4969_v16, %v16038_v40  ;;  %v4971_v25 = vmax.f32 %v13136_v0, %v4955_v46  ;;  %v4830_v30 = vmax.f32 %v4766_v55, %v4814_v36  ;;  %v4817_v31 = vmax.f32 %v4753_v17, %v4801_v14  ;;  %v16215_v16 = vld [vmem:[#allocation20_spill] sm:$0xff] }
 0xb39   : > { %v4970_v2 = vmax.f32 %v4842_v19, %v4954_v59  ;;  %v4860_v54 = vrot.slane %v13146_v35, 7  ;;  %v4899_v23 = vrot.slane %v13149_v12, 1  ;;  %v16202_v19 = vrot.slane %v13146_v35, 1 }
 0xb3a   : > { %5008 = vrot.lane.b32.xlu0 %v13258_v22, %s7009_s28  ;;  %v13277_v52 = vmul.f32 %v4971_v25, %v16039_v5  ;;  %v16204_v3 = vrot.slane %v13149_v12, 7  ;;  %v13291_v45 = vmax.f32 %v13075_v26, %v4830_v30  ;;  %v13294_v58 = vmax.f32 %v13078_v1, %v4817_v31 }
 0xb3b   : > { %5010 = vrot.lane.b32.xlu1 %v13265_v18, %s7009_s28  ;;  %v13280_v24 = vmul.f32 %v4970_v2, %v11957_v32  ;;  %v4914_v61 = vsel %vm16203_vm11, %v16202_v19, %v4909_v44  ;;  %v4815_v60 = vmul.f32 %v7411_v50, %v13141_v8  ;;  %v4800_v62 = vmul.f32 %v7411_v50, %v13143_v56  ;;  %vm16231_vm11 = vmmov %vm16175_vm0 }
 0xb3c   : > { %v4876_v42 = vsel %vm16205_vm4, %v4850_v11, %v16204_v3  ;;  %v4767_v7 = vmul.f32 %v7401_v15, %v13131_v43  ;;  %v4752_v26 = vmul.f32 %v7401_v15, %v13133_v57  ;;  %v16206_v1 = vrot.slane %v13136_v0, 7  ;;  %vm16232_vm4 = vmmov %vm16218_vm3 }
 0xb3d   : > { %v16208_v21 = vrot.slane %v13139_v29, 1  ;;  %v4910_v13 = vrot.slane %v13291_v45, 1  ;;  %v4849_v34 = vrot.slane %v13294_v58, 7  ;;  %v4861_v57 = vrot.slane %v13237_v28, 7 }
 0xb3e   : > { %5012 = vrot.lane.b32.xlu0 %v13280_v24, %s7009_s28  ;;  %v4867_v8 = vsel %vm16207_vm12, %v16206_v1, %v4860_v54  ;;  %v4831_v43 = vmax.f32 %v4767_v7, %v4815_v60  ;;  %v4816_v49 = vmax.f32 %v4752_v26, %v4800_v62  ;;  %v4898_v0 = vrot.slane %v13246_v63, 1  ;;  %v16220_v62 = vld [vmem:[#allocation92_spill] sm:$0xff]  ;;  %vm16233_vm12 = vmmov %vm16175_vm0 }
 0xb3f   : > { %5014 = vrot.lane.b32.xlu1 %v13277_v52, %s7009_s28  ;;  %v4923_v56 = vsel %vm16209_vm8, %v4899_v23, %v16208_v21  ;;  %v4956_v51 = vmax.f32 %v4867_v8, %v4914_v61  ;;  %v4913_v36 = vsel %vm16210_vm13, %v4909_v44, %v4910_v13  ;;  %v4877_v14 = vsel %vm16211_vm10, %v4849_v34, %v4850_v11  ;;  %vm16234_vm8 = vmmov %vm16218_vm3 }
 0xb40   : > { %v4947_v39 = vmax.f32 %v4876_v42, %v4923_v56  ;;  %v4847_v46 = vmax.f32 %v13090_v27, %v4831_v43  ;;  %v4832_v59 = vmax.f32 %v13093_v9, %v4816_v49  ;;  %v4924_v27 = vsel %vm16213_vm5, %v4898_v0, %v4899_v23  ;;  %vm16235_vm13 = vmmov %vm16175_vm0 }
 0xb41   : > { %v4972_v29 = vmax.f32 %v13146_v35, %v4956_v51  ;;  %v4866_v35 = vsel %vm16212_vm7, %v4860_v54, %v4861_v57  ;;  %v4946_v44 = vmax.f32 %v4877_v14, %v4924_v27  ;;  %v4862_v2 = vrot.slane %v13291_v45, 7  ;;  %v16229_v27 = vld [vmem:[#allocation135_spill] sm:$0xff]  ;;  %vm16236_vm10 = vmmov %vm16218_vm3 }
 0xb42   : > { %5048 = vrot.lane.b32.xlu0 %v13211_v48, %s7008_s27  ;;  %v4963_v38 = vmax.f32 %v13149_v12, %v4947_v39  ;;  %v16214_v12 = vld [vmem:[#allocation123_spill] sm:$0xff]  ;;  %v4957_v17 = vmax.f32 %v4866_v35, %v4913_v36  ;;  %v4911_v11 = vrot.slane %v4847_v46, 1  ;;  %v4848_v25 = vrot.slane %v4832_v59, 7  ;;  %v16223_v39 = vld [vmem:[#allocation10_spill] sm:$0xff]  ;;  %vm16237_vm7 = vmmov %vm16175_vm0 }
 0xb43   : > { %5050 = vrot.lane.b32.xlu1 %v13214_v33, %s7008_s27  ;;  %v13341_v9 = vmul.f32 %v4972_v29, %v16214_v12  ;;  %v4897_v30 = vrot.slane %v13294_v58, 1  ;;  %v4962_v54 = vmax.f32 %v13246_v63, %v4946_v44  ;;  %v4863_v23 = vrot.slane %v4847_v46, 7  ;;  %v16219_v63 = vld [vmem:[#allocation32_spill] sm:$0xff]  ;;  %vm16238_vm5 = vmmov %vm16218_vm3 }
 0xb44   : > { %v13344_v55 = vmul.f32 %v4963_v38, %v16215_v16  ;;  %v4973_v31 = vmax.f32 %v13237_v28, %v4957_v17  ;;  %v4896_v19 = vrot.slane %v4832_v59, 1  ;;  %v4912_v61 = vsel %vm16216_vm15, %v4910_v13, %v4911_v11  ;;  %v16230_v44 = vld [vmem:[#allocation36_spill] sm:$0xff]  ;;  %vm16239_vm15 = vmmov %vm16175_vm0 }
 0xb45   : > { %v4878_v3 = vsel %vm16175_vm0, %v4848_v25, %v4849_v34  ;;  %v4865_v42 = vsel %vm16217_vm14, %v4861_v57, %v4862_v2  ;;  %v4925_v28 = vsel %vm16218_vm3, %v4897_v30, %v4898_v0  ;;  %v13370_v7 = vmul.f32 %v4962_v54, %v16220_v62  ;;  %v16224_v34 = vld [vmem:[#allocation9_spill] sm:$0xff]  ;;  %v16227_v0 = vld [vmem:[#allocation12_spill] sm:$0xff]  ;;  %vm16240_vm0 = vmmov %vm16218_vm3 }
 0xb46   : > { %5052 = vrot.lane.b32.xlu0 %v13231_v4, %s7008_s27  ;;  %v13367_v60 = vmul.f32 %v4973_v31, %v16219_v63  ;;  %v4958_v26 = vmax.f32 %v4865_v42, %v4912_v61  ;;  %v4945_v1 = vmax.f32 %v4878_v3, %v4925_v28  ;;  %v4927_v8 = vsel %vm16221_vm6, %v4911_v11, %v4896_v19  ;;  %vm16241_vm14 = vmmov %vm16225_vm1 }
 0xb47   : > { %5054 = vrot.lane.b32.xlu1 %v13234_v47, %s7008_s27  ;;  %v4879_v21 = vsel %vm16222_vm2, %v4863_v23, %v4848_v25  ;;  %v4943_v13 = vmul.f32 %v16223_v39, %v4927_v8  ;;  %v4864_v49 = vsel %vm16225_vm1, %v4862_v2, %v4863_v23  ;;  %v4926_v57 = vsel %vm16226_vm9, %v4896_v19, %v4897_v30  ;;  %vm16242_vm3 = vmmov %vm16240_vm0 }
 0xb48   : > { %v4974_v56 = vmax.f32 %v13291_v45, %v4958_v26  ;;  %v4961_v51 = vmax.f32 %v13294_v58, %v4945_v1  ;;  %v4880_v43 = vmul.f32 %v16224_v34, %v4879_v21  ;;  %v16228_v58 = vld [vmem:[#allocation136_spill] sm:$0xff]  ;;  %vm16243_vm6 = vmmov %vm16225_vm1 }
 0xb49   : > { %v4959_v38 = vmax.f32 %v4864_v49, %v4943_v13  ;;  %vm16245_vm2 = vmmov %vm16225_vm1 }
 0xb4a   : > { %4998 = vrot.lane.b32.xlu0 %v13344_v55, %s7009_s28  ;;  %v13393_v45 = vmul.f32 %v4974_v56, %v16227_v0  ;;  %v13396_v29 = vmul.f32 %v4961_v51, %v16228_v58  ;;  %v4944_v36 = vmax.f32 %v4880_v43, %v4926_v57  ;;  %vm16247_vm1 = vmmov %vm16240_vm0 }
 0xb4b   : > { %5016 = vrot.lane.b32.xlu1 %v13341_v9, %s7009_s28  ;;  %v4975_v14 = vmax.f32 %v4847_v46, %v4959_v38  ;;  %vm16248_vm9 = vmmov %vm16240_vm0 }
 0xb4c   : > { %v4960_v35 = vmax.f32 %v4832_v59, %v4944_v36 }
 0xb4d   : > { %v13407_v17 = vmul.f32 %v4975_v14, %v16229_v27 }
 0xb4e   : > { %5046 = vrot.lane.b32.xlu0 %v13344_v55, %s7008_s27  ;;  %v13410_v11 = vmul.f32 %v4960_v35, %v16230_v44 }
 0xb4f   : > { %5064 = vrot.lane.b32.xlu1 %v13341_v9, %s7008_s27 }
 0xb52   : > { %4996 = vrot.lane.b32.xlu0 %v13370_v7, %s7009_s28 }
 0xb53   : > { %5018 = vrot.lane.b32.xlu1 %v13367_v60, %s7009_s28 }
 0xb56   : > { %5044 = vrot.lane.b32.xlu0 %v13370_v7, %s7008_s27 }
 0xb57   : > { %5066 = vrot.lane.b32.xlu1 %v13367_v60, %s7008_s27 }
 0xb5a   : > { %4994 = vrot.lane.b32.xlu0 %v13396_v29, %s7009_s28 }
 0xb5b   : > { %5020 = vrot.lane.b32.xlu1 %v13393_v45, %s7009_s28 }
 0xb5e   : > { %5042 = vrot.lane.b32.xlu0 %v13396_v29, %s7008_s27 }
 0xb5f   : > { %5068 = vrot.lane.b32.xlu1 %v13393_v45, %s7008_s27 }
 0xb62   : > { %4992 = vrot.lane.b32.xlu0 %v13410_v11, %s7009_s28 }
 0xb63   : > { %5022 = vrot.lane.b32.xlu1 %v13407_v17, %s7009_s28 }
 0xb66   : > { %5040 = vrot.lane.b32.xlu0 %v13410_v11, %s7008_s27 }
 0xb67   : > { %5070 = vrot.lane.b32.xlu1 %v13407_v17, %s7008_s27 }
 0xb6a   : > { %5056 = vrot.lane.b32.xlu0 %v13258_v22, %s7008_s27 }
 0xb6b   : > { %5058 = vrot.lane.b32.xlu1 %v13265_v18, %s7008_s27 }
 0xb6e   : > { %5060 = vrot.lane.b32.xlu0 %v13280_v24, %s7008_s27 }
 0xb6f   : > { %5062 = vrot.lane.b32.xlu1 %v13277_v52, %s7008_s27 }
 0xba4   : > { %v5001_v59 = vpop.permute.xlu0 %5000 }
 0xba5   : > { %v5003_v46 = vpop.permute.xlu1 %5002  ;;  %v5028_v42 = vmul.f32 %v7401_v15, %v5001_v59 }
 0xba6   : > { %v5029_v3 = vmul.f32 %v7401_v15, %v5003_v46 }
 0xba8   : > { %v5005_v2 = vpop.permute.xlu0 %5004 }
 0xba9   : > { %v5007_v25 = vpop.permute.xlu1 %5006  ;;  %v5030_v49 = vmul.f32 %v7401_v15, %v5005_v2 }
 0xbaa   : > { %v5031_v43 = vmul.f32 %v7401_v15, %v5007_v25 }
 0xbac   : > { %v5009_v31 = vpop.permute.xlu0 %5008 }
 0xbad   : > { %v5011_v30 = vpop.permute.xlu1 %5010 }
 0xbb0   : > { %v13430_v23 = vpop.permute.xlu0 %5012 }
 0xbb1   : > { %v13428_v54 = vpop.permute.xlu1 %5014  ;;  %v5034_v39 = vmul.f32 %v7401_v15, %v13430_v23 }
 0xbb2   : > { %v5035_v58 = vmul.f32 %v7401_v15, %v13428_v54 }
 0xbb4   : > { %v5049_v61 = vpop.permute.xlu0 %5048 }
 0xbb5   : > { %v5051_v19 = vpop.permute.xlu1 %5050  ;;  %v5076_v26 = vmul.f32 %v7411_v50, %v5049_v61 }
 0xbb6   : > { %v5077_v28 = vmul.f32 %v7411_v50, %v5051_v19 }
 0xbb7   : > { %v5092_v8 = vmax.f32 %v5028_v42, %v5076_v26 }
 0xbb8   : > { %v5093_v1 = vmax.f32 %v5029_v3, %v5077_v28  ;;  %v5053_v56 = vpop.permute.xlu0 %5052 }
 0xbb9   : > { %v5055_v21 = vpop.permute.xlu1 %5054  ;;  %v5078_v13 = vmul.f32 %v7411_v50, %v5053_v56  ;;  %v13444_v38 = vmax.f32 %v13211_v48, %v5092_v8 }
 0xbba   : > { %v5079_v51 = vmul.f32 %v7411_v50, %v5055_v21  ;;  %v13441_v57 = vmax.f32 %v13214_v33, %v5093_v1 }
 0xbbb   : > { %v5094_v14 = vmax.f32 %v5030_v49, %v5078_v13  ;;  %v15153_v19 = vrot.slane %v13444_v38, 7 }
 0xbbc   : > { %v5095_v36 = vmax.f32 %v5031_v43, %v5079_v51  ;;  %v4999_v46 = vpop.permute.xlu0 %4998  ;;  %v5125_v59 = vrot.slane %v13441_v57, 7  ;;  %v15152_v33 = vrot.slane %v13441_v57, 1 }
 0xbbd   : > { %v13446_v35 = vpop.permute.xlu1 %5016  ;;  %v5110_v25 = vmax.f32 %v13231_v4, %v5094_v14 }
 0xbbe   : > { %v13451_v61 = vmax.f32 %v13234_v47, %v5095_v36  ;;  %v5146_v26 = vsel %vm16231_vm11, %v15153_v19, %v5125_v59  ;;  %vm16249_vm11 = vmmov %vm16245_vm2 }
 0xbbf   : > { %v5126_v48 = vrot.slane %v5110_v25, 7  ;;  %v5174_v3 = vrot.slane %v5110_v25, 1 }
 0xbc0   : > { %v5175_v2 = vrot.slane %v13451_v61, 1  ;;  %v5047_v28 = vpop.permute.xlu0 %5046  ;;  %v5127_v5 = vrot.slane %v13451_v61, 7 }
 0xbc1   : > { %v13456_v42 = vpop.permute.xlu1 %5064  ;;  %v5193_v47 = vsel %vm16232_vm4, %v15152_v33, %v5174_v3  ;;  %v5145_v4 = vsel %vm16233_vm12, %v5125_v59, %v5126_v48  ;;  %vm16250_vm4 = vmmov %vm16240_vm0 }
 0xbc2   : > { %v5192_v1 = vsel %vm16234_vm8, %v5174_v3, %v5175_v2  ;;  %v5221_v8 = vmax.f32 %v5146_v26, %v5193_v47  ;;  %vm16251_vm12 = vmmov %vm16240_vm0 }
 0xbc3   : > { %v5222_v21 = vmax.f32 %v5145_v4, %v5192_v1  ;;  %vm16252_vm8 = vmmov %vm16245_vm2 }
 0xbc4   : > { %v4997_v51 = vpop.permute.xlu0 %4996  ;;  %v5237_v13 = vmax.f32 %v13441_v57, %v5221_v8 }
 0xbc5   : > { %v13470_v56 = vpop.permute.xlu1 %5018  ;;  %v5238_v43 = vmax.f32 %v5110_v25, %v5222_v21 }
 0xbc6   : > { %v13476_v36 = vmul.f32 %v5237_v13, %v16041_v6  ;;  %v5033_v6 = vmul.f32 %v7401_v15, %v5011_v30  ;;  %v5075_v30 = vmul.f32 %v7411_v50, %v5047_v28 }
 0xbc7   : > { %v13479_v14 = vmul.f32 %v5238_v43, %v16040_v53  ;;  %v5032_v53 = vmul.f32 %v7401_v15, %v5009_v31 }
 0xbc8   : > { %v5045_v59 = vpop.permute.xlu0 %5044  ;;  %5274 = vrot.lane.b32.xlu0 %v13476_v36, %s7009_s28 }
 0xbc9   : > { %v13473_v49 = vpop.permute.xlu1 %5066  ;;  %5276 = vrot.lane.b32.xlu1 %v13479_v14, %s7009_s28 }
 0xbcc   : > { %v13487_v26 = vpop.permute.xlu0 %4994 }
 0xbcd   : > { %v13485_v3 = vpop.permute.xlu1 %5020 }
 0xbd0   : > { %v5043_v47 = vpop.permute.xlu0 %5042 }
 0xbd1   : > { %v5069_v25 = vpop.permute.xlu1 %5068 }
 0xbd4   : > { %v13491_v1 = vpop.permute.xlu0 %4992 }
 0xbd5   : > { %v13489_v4 = vpop.permute.xlu1 %5022 }
 0xbd8   : > { %v13495_v21 = vpop.permute.xlu0 %5040 }
 0xbd9   : > { %v13493_v8 = vpop.permute.xlu1 %5070 }
 0xbdc   : > { %v5057_v43 = vpop.permute.xlu0 %5056 }
 0xbdd   : > { %v5059_v13 = vpop.permute.xlu1 %5058  ;;  %v5080_v19 = vmul.f32 %v7411_v50, %v5057_v43 }
 0xbde   : > { %v5081_v33 = vmul.f32 %v7411_v50, %v5059_v13 }
 0xbdf   : > { %v5096_v27 = vmax.f32 %v5032_v53, %v5080_v19  ;;  %v5074_v53 = vmul.f32 %v7411_v50, %v5045_v59 }
 0xbe0   : > { %v5097_v12 = vmax.f32 %v5033_v6, %v5081_v33  ;;  %v5061_v0 = vpop.permute.xlu0 %5060  ;;  %v5027_v6 = vmul.f32 %v7401_v15, %v4999_v46 }
 0xbe1   : > { %v5063_v44 = vpop.permute.xlu1 %5062  ;;  %v5082_v43 = vmul.f32 %v7411_v50, %v5061_v0  ;;  %v5112_v34 = vmax.f32 %v13258_v22, %v5096_v27  ;;  %v5026_v0 = vmul.f32 %v7401_v15, %v4997_v51 }
 0xbe2   : > { %v5083_v13 = vmul.f32 %v7411_v50, %v5063_v44  ;;  %v5113_v31 = vmax.f32 %v13265_v18, %v5097_v12  ;;  %v5144_v44 = vsel %vm16235_vm13, %v5126_v48, %v5127_v5  ;;  %v5091_v18 = vmax.f32 %v5027_v6, %v5075_v30  ;;  %vm16253_vm13 = vmmov %vm16245_vm2 }
 0xbe3   : > { %v5098_v33 = vmax.f32 %v5034_v39, %v5082_v43  ;;  %v5128_v63 = vrot.slane %v5112_v34, 7  ;;  %v5176_v62 = vrot.slane %v5112_v34, 1  ;;  %v5090_v27 = vmax.f32 %v5026_v0, %v5074_v53 }
 0xbe4   : > { %v5099_v19 = vmax.f32 %v5035_v58, %v5083_v13  ;;  %v5177_v54 = vrot.slane %v5113_v31, 1  ;;  %v5129_v23 = vrot.slane %v5113_v31, 7  ;;  %v5084_v0 = vmul.f32 %v7411_v50, %v13456_v42 }
 0xbe5   : > { %v13520_v22 = vmax.f32 %v13280_v24, %v5098_v33  ;;  %v5191_v12 = vsel %vm16236_vm10, %v5175_v2, %v5176_v62  ;;  %v5143_v39 = vsel %vm16237_vm7, %v5127_v5, %v5128_v63  ;;  %v13548_v53 = vmax.f32 %v13370_v7, %v5090_v27  ;;  %vm16254_vm10 = vmmov %vm16240_vm0 }
 0xbe6   : > { %v13517_v28 = vmax.f32 %v13277_v52, %v5099_v19  ;;  %v5190_v58 = vsel %vm16238_vm5, %v5176_v62, %v5177_v54  ;;  %v5223_v51 = vmax.f32 %v5144_v44, %v5191_v12  ;;  %v5142_v59 = vsel %vm16239_vm15, %v5128_v63, %v5129_v23  ;;  %vm16255_vm7 = vmmov %vm16240_vm0 }
 0xbe7   : > { %v5130_v48 = vrot.slane %v13520_v22, 7  ;;  %v5178_v52 = vrot.slane %v13520_v22, 1  ;;  %v5224_v24 = vmax.f32 %v5143_v39, %v5190_v58  ;;  %v13545_v63 = vmax.f32 %v13344_v55, %v5091_v18  ;;  %vm16256_vm5 = vmmov %vm16245_vm2 }
 0xbe8   : > { %v5179_v46 = vrot.slane %v13517_v28, 1  ;;  %v5239_v13 = vmax.f32 %v13451_v61, %v5223_v51  ;;  %v5086_v61 = vmul.f32 %v7411_v50, %v5069_v25  ;;  %v5038_v25 = vmul.f32 %v7401_v15, %v13485_v3  ;;  %vm16259_vm15 = vmmov %vm16245_vm2 }
 0xbe9   : > { %v5189_v2 = vsel %vm16240_vm0, %v5177_v54, %v5178_v52  ;;  %v5141_v5 = vsel %vm16241_vm14, %v5129_v23, %v5130_v48  ;;  %v5240_v43 = vmax.f32 %v5112_v34, %v5224_v24  ;;  %v5073_v34 = vmul.f32 %v7411_v50, %v5043_v47  ;;  %vm16262_vm14 = vmmov %vm16240_vm0 }
 0xbea   : > { %v5188_v62 = vsel %vm16242_vm3, %v5178_v52, %v5179_v46  ;;  %v5225_v30 = vmax.f32 %v5142_v59, %v5189_v2  ;;  %v13551_v19 = vmul.f32 %v5239_v13, %v16036_v20  ;;  %v5025_v47 = vmul.f32 %v7401_v15, %v13487_v26  ;;  %vm16263_vm3 = vmmov %vm16245_vm2 }
 0xbeb   : > { %v5226_v6 = vmax.f32 %v5141_v5, %v5188_v62  ;;  %v13554_v33 = vmul.f32 %v5240_v43, %v16037_v10  ;;  %v5123_v23 = vrot.slane %v13545_v63, 7  ;;  %v5122_v18 = vrot.slane %v13548_v53, 7 }
 0xbec   : > { %v5241_v54 = vmax.f32 %v5113_v31, %v5225_v30  ;;  %5278 = vrot.lane.b32.xlu0 %v13551_v19, %s7009_s28  ;;  %v5085_v31 = vmul.f32 %v7411_v50, %v13473_v49  ;;  %v5037_v12 = vmul.f32 %v7401_v15, %v13470_v56  ;;  %v5102_v39 = vmax.f32 %v5038_v25, %v5086_v61 }
 0xbed   : > { %v5242_v44 = vmax.f32 %v13520_v22, %v5226_v6  ;;  %5280 = vrot.lane.b32.xlu1 %v13554_v33, %s7009_s28  ;;  %v5089_v58 = vmax.f32 %v5025_v47, %v5073_v34  ;;  %v5172_v49 = vrot.slane %v13444_v38, 1  ;;  %v5036_v3 = vmul.f32 %v7401_v15, %v13446_v35  ;;  %v16269_v22 = vld [vmem:[#allocation36_spill] sm:$0xff] }
 0xbee   : > { %v13564_v55 = vmul.f32 %v5241_v54, %v16038_v40  ;;  %v5171_v42 = vrot.slane %v13545_v63, 1  ;;  %v5101_v26 = vmax.f32 %v5037_v12, %v5085_v31  ;;  %v5148_v56 = vsel %vm16243_vm6, %v5122_v18, %v5123_v23  ;;  %vm16266_vm6 = vmmov %vm16245_vm2 }
 0xbef   : > { %v13567_v7 = vmul.f32 %v5242_v44, %v11957_v32  ;;  %v5100_v27 = vmax.f32 %v5036_v3, %v5084_v0  ;;  %v16244_v52 = vrot.slane %v13444_v38, 7  ;;  %v13596_v35 = vmax.f32 %v13393_v45, %v5102_v39 }
 0xbf0   : > { %5282 = vrot.lane.b32.xlu0 %v13564_v55, %s7009_s28  ;;  %v13599_v24 = vmax.f32 %v13396_v29, %v5089_v58  ;;  %v5087_v59 = vmul.f32 %v7411_v50, %v13493_v8  ;;  %v5072_v2 = vmul.f32 %v7411_v50, %v13495_v21  ;;  %v16246_v5 = vrot.slane %v13441_v57, 1 }
 0xbf1   : > { %5284 = vrot.lane.b32.xlu1 %v13567_v7, %s7009_s28  ;;  %v5147_v51 = vsel %vm16245_vm2, %v5123_v23, %v16244_v52  ;;  %v13614_v29 = vmax.f32 %v13367_v60, %v5101_v26  ;;  %v5039_v8 = vmul.f32 %v7401_v15, %v13489_v4  ;;  %v5024_v21 = vmul.f32 %v7401_v15, %v13491_v1 }
 0xbf2   : > { %v5194_v45 = vsel %vm16247_vm1, %v5172_v49, %v16246_v5  ;;  %v5195_v62 = vsel %vm16248_vm9, %v5171_v42, %v5172_v49  ;;  %v13623_v13 = vmax.f32 %v13341_v9, %v5100_v27  ;;  %v5182_v30 = vrot.slane %v13596_v35, 1  ;;  %v16258_v5 = vld [vmem:[#allocation32_spill] sm:$0xff]  ;;  %vm16267_vm1 = vmmov %vm16240_vm0 }
 0xbf3   : > { %v5219_v43 = vmax.f32 %v5148_v56, %v5195_v62  ;;  %v5220_v57 = vmax.f32 %v5147_v51, %v5194_v45  ;;  %v5121_v6 = vrot.slane %v13599_v24, 7  ;;  %v5103_v60 = vmax.f32 %v5039_v8, %v5087_v59  ;;  %v16257_v59 = vld [vmem:[#allocation92_spill] sm:$0xff]  ;;  %vm16268_vm9 = vmmov %vm16240_vm0 }
 0xbf4   : > { %5322 = vrot.lane.b32.xlu0 %v13476_v36, %s7008_s27  ;;  %v5088_v54 = vmax.f32 %v5024_v21, %v5072_v2  ;;  %v5133_v4 = vrot.slane %v13614_v29, 7  ;;  %v5181_v1 = vrot.slane %v13614_v29, 1  ;;  %v5170_v9 = vrot.slane %v13548_v53, 1 }
 0xbf5   : > { %5324 = vrot.lane.b32.xlu1 %v13479_v14, %s7008_s27  ;;  %v5132_v44 = vrot.slane %v13623_v13, 7  ;;  %v5235_v61 = vmax.f32 %v13545_v63, %v5219_v43  ;;  %v5236_v34 = vmax.f32 %v13444_v38, %v5220_v57  ;;  %v5119_v31 = vmax.f32 %v13407_v17, %v5103_v60 }
 0xbf6   : > { %v5104_v25 = vmax.f32 %v13410_v11, %v5088_v54  ;;  %v5149_v47 = vsel %vm16249_vm11, %v5121_v6, %v5122_v18  ;;  %v5185_v0 = vsel %vm16250_vm4, %v5181_v1, %v5182_v30  ;;  %v5196_v38 = vsel %vm16251_vm12, %v5170_v9, %v5171_v42  ;;  %v16261_v54 = vld [vmem:[#allocation10_spill] sm:$0xff]  ;;  %vm16273_vm11 = vmmov %vm16240_vm0 }
 0xbf7   : > { %v5138_v17 = vsel %vm16252_vm8, %v5132_v44, %v5133_v4  ;;  %v13654_v11 = vmul.f32 %v5235_v61, %v16215_v16  ;;  %v13657_v63 = vmul.f32 %v5236_v34, %v11939_v37  ;;  %v5218_v23 = vmax.f32 %v5149_v47, %v5196_v38  ;;  %v16264_v34 = vld [vmem:[#allocation136_spill] sm:$0xff]  ;;  %vm16274_vm4 = vmmov %vm16245_vm2 }
 0xbf8   : > { %5326 = vrot.lane.b32.xlu0 %v13551_v19, %s7008_s27  ;;  %v5229_v18 = vmax.f32 %v5138_v17, %v5185_v0  ;;  %v5183_v12 = vrot.slane %v5119_v31, 1  ;;  %v5120_v39 = vrot.slane %v5104_v25, 7  ;;  %v5134_v58 = vrot.slane %v13596_v35, 7  ;;  %vm16275_vm12 = vmmov %vm16240_vm0 }
 0xbf9   : > { %5328 = vrot.lane.b32.xlu1 %v13554_v33, %s7008_s27  ;;  %v5169_v49 = vrot.slane %v13599_v24, 1  ;;  %v5234_v3 = vmax.f32 %v13548_v53, %v5218_v23  ;;  %v5135_v26 = vrot.slane %v5119_v31, 7  ;;  %v5168_v27 = vrot.slane %v5104_v25, 1  ;;  %vm16276_vm8 = vmmov %vm16245_vm2 }
 0xbfa   : > { %v5245_v42 = vmax.f32 %v13614_v29, %v5229_v18  ;;  %v5150_v56 = vsel %vm16253_vm13, %v5120_v39, %v5121_v6  ;;  %v5184_v52 = vsel %vm16254_vm10, %v5182_v30, %v5183_v12  ;;  %v5137_v53 = vsel %vm16256_vm5, %v5133_v4, %v5134_v58  ;;  %v16260_v6 = vld [vmem:[#allocation9_spill] sm:$0xff]  ;;  %vm16277_vm13 = vmmov %vm16245_vm2 }
 0xbfb   : > { %v5197_v51 = vsel %vm16255_vm7, %v5169_v49, %v5170_v9  ;;  %v13680_v2 = vmul.f32 %v5234_v3, %v16257_v59  ;;  %v5230_v21 = vmax.f32 %v5137_v53, %v5184_v52  ;;  %v5151_v62 = vsel %vm16259_vm15, %v5135_v26, %v5120_v39  ;;  %vm16278_vm10 = vmmov %vm16240_vm0 }
 0xbfc   : > { %5330 = vrot.lane.b32.xlu0 %v13564_v55, %s7008_s27  ;;  %v13683_v45 = vmul.f32 %v5245_v42, %v16258_v5  ;;  %v5217_v8 = vmax.f32 %v5150_v56, %v5197_v51  ;;  %v5199_v43 = vsel %vm16240_vm0, %v5183_v12, %v5168_v27  ;;  %v5152_v60 = vmul.f32 %v16260_v6, %v5151_v62  ;;  %vm16279_vm7 = vmmov %vm16245_vm2 }
 0xbfd   : > { %5332 = vrot.lane.b32.xlu1 %v13567_v7, %s7008_s27  ;;  %v5246_v30 = vmax.f32 %v13596_v35, %v5230_v21  ;;  %v5215_v4 = vmul.f32 %v16261_v54, %v5199_v43  ;;  %v5198_v9 = vsel %vm16262_vm14, %v5168_v27, %v5169_v49  ;;  %v5136_v61 = vsel %vm16263_vm3, %v5134_v58, %v5135_v26  ;;  %v16265_v35 = vld [vmem:[#allocation12_spill] sm:$0xff]  ;;  %v16272_v27 = vld [vmem:[#allocation19_spill] sm:$0xff]  ;;  %vm16280_vm5 = vmmov %vm16240_vm0 }
 0xbfe   : > { %v5233_v57 = vmax.f32 %v13599_v24, %v5217_v8  ;;  %v5216_v0 = vmax.f32 %v5152_v60, %v5198_v9  ;;  %v5131_v17 = vrot.slane %v13517_v28, 7  ;;  %v5180_v23 = vrot.slane %v13623_v13, 1  ;;  %vm16282_vm15 = vmmov %vm16245_vm2 }
 0xbff   : > { %v13709_v47 = vmul.f32 %v5246_v30, %v16265_v35  ;;  %v5231_v38 = vmax.f32 %v5136_v61, %v5215_v4  ;;  %vm16284_vm14 = vmmov %vm16245_vm2 }
 0xc00   : > { %5270 = vrot.lane.b32.xlu0 %v13654_v11, %s7009_s28  ;;  %v13706_v24 = vmul.f32 %v5233_v57, %v16264_v34  ;;  %v5232_v18 = vmax.f32 %v5104_v25, %v5216_v0  ;;  %v5139_v39 = vsel %vm16266_vm6, %v5131_v17, %v5132_v44  ;;  %v5140_v58 = vsel %vm16245_vm2, %v5130_v48, %v5131_v17  ;;  %v16270_v48 = vld [vmem:[#allocation135_spill] sm:$0xff]  ;;  %vm16285_vm3 = vmmov %vm16240_vm0 }
 0xc01   : > { %5272 = vrot.lane.b32.xlu1 %v13657_v63, %s7009_s28  ;;  %v5247_v12 = vmax.f32 %v5119_v31, %v5231_v38  ;;  %v5187_v49 = vsel %vm16267_vm1, %v5179_v46, %v5180_v23  ;;  %v5186_v44 = vsel %vm16268_vm9, %v5180_v23, %v5181_v1  ;;  %v16271_v1 = vld [vmem:[#allocation123_spill] sm:$0xff]  ;;  %vm16287_vm6 = vmmov %vm16245_vm2 }
 0xc02   : > { %v13736_v31 = vmul.f32 %v5232_v18, %v16269_v22  ;;  %v5228_v3 = vmax.f32 %v5139_v39, %v5186_v44  ;;  %v5227_v42 = vmax.f32 %v5140_v58, %v5187_v49  ;;  %vm16290_vm1 = vmmov %vm16240_vm0 }
 0xc03   : > { %v13739_v25 = vmul.f32 %v5247_v12, %v16270_v48  ;;  %vm16292_vm9 = vmmov %vm16240_vm0 }
 0xc04   : > { %5318 = vrot.lane.b32.xlu0 %v13654_v11, %s7008_s27  ;;  %v5244_v46 = vmax.f32 %v13623_v13, %v5228_v3  ;;  %v5243_v29 = vmax.f32 %v13517_v28, %v5227_v42 }
 0xc05   : > { %5320 = vrot.lane.b32.xlu1 %v13657_v63, %s7008_s27 }
 0xc06   : > { %v13752_v26 = vmul.f32 %v5244_v46, %v16271_v1  ;;  %v13755_v56 = vmul.f32 %v5243_v29, %v16272_v27 }
 0xc08   : > { %5268 = vrot.lane.b32.xlu0 %v13680_v2, %s7009_s28 }
 0xc09   : > { %5290 = vrot.lane.b32.xlu1 %v13683_v45, %s7009_s28 }
 0xc0c   : > { %5316 = vrot.lane.b32.xlu0 %v13680_v2, %s7008_s27 }
 0xc0d   : > { %5338 = vrot.lane.b32.xlu1 %v13683_v45, %s7008_s27 }
 0xc10   : > { %5266 = vrot.lane.b32.xlu0 %v13706_v24, %s7009_s28 }
 0xc11   : > { %5292 = vrot.lane.b32.xlu1 %v13709_v47, %s7009_s28 }
 0xc14   : > { %5314 = vrot.lane.b32.xlu0 %v13706_v24, %s7008_s27 }
 0xc15   : > { %5340 = vrot.lane.b32.xlu1 %v13709_v47, %s7008_s27 }
 0xc18   : > { %5264 = vrot.lane.b32.xlu0 %v13736_v31, %s7009_s28 }
 0xc19   : > { %5294 = vrot.lane.b32.xlu1 %v13739_v25, %s7009_s28 }
 0xc1c   : > { %5312 = vrot.lane.b32.xlu0 %v13736_v31, %s7008_s27 }
 0xc1d   : > { %5342 = vrot.lane.b32.xlu1 %v13739_v25, %s7008_s27 }
 0xc20   : > { %5286 = vrot.lane.b32.xlu0 %v13755_v56, %s7009_s28 }
 0xc21   : > { %5288 = vrot.lane.b32.xlu1 %v13752_v26, %s7009_s28 }
 0xc24   : > { %5334 = vrot.lane.b32.xlu0 %v13755_v56, %s7008_s27 }
 0xc25   : > { %5336 = vrot.lane.b32.xlu1 %v13752_v26, %s7008_s27 }
 0xc3a   : > { %v5275_v13 = vpop.permute.xlu0 %5274 }
 0xc3b   : > { %v5277_v28 = vpop.permute.xlu1 %5276  ;;  %v5301_v57 = vmul.f32 %v7401_v15, %v5275_v13 }
 0xc3c   : > { %v5302_v43 = vmul.f32 %v7401_v15, %v5277_v28 }
 0xc5e   : > { %v5279_v51 = vpop.permute.xlu0 %5278 }
 0xc5f   : > { %v5281_v52 = vpop.permute.xlu1 %5280  ;;  %v5303_v18 = vmul.f32 %v7401_v15, %v5279_v51 }
 0xc60   : > { %v5304_v23 = vmul.f32 %v7401_v15, %v5281_v52 }
 0xc62   : > { %v5283_v8 = vpop.permute.xlu0 %5282 }
 0xc63   : > { %v5285_v53 = vpop.permute.xlu1 %5284  ;;  %v5305_v46 = vmul.f32 %v7401_v15, %v5283_v8 }
 0xc64   : > { %v5306_v42 = vmul.f32 %v7401_v15, %v5285_v53 }
 0xc66   : > { %v5323_v62 = vpop.permute.xlu0 %5322 }
 0xc67   : > { %v5325_v21 = vpop.permute.xlu1 %5324  ;;  %v5349_v60 = vmul.f32 %v7411_v50, %v5323_v62 }
 0xc68   : > { %v5350_v30 = vmul.f32 %v7411_v50, %v5325_v21 }
 0xc69   : > { %v5365_v9 = vmax.f32 %v5301_v57, %v5349_v60 }
 0xc6a   : > { %v5366_v4 = vmax.f32 %v5302_v43, %v5350_v30  ;;  %v5327_v0 = vpop.permute.xlu0 %5326 }
 0xc6b   : > { %v5329_v61 = vpop.permute.xlu1 %5328  ;;  %v5351_v17 = vmul.f32 %v7411_v50, %v5327_v0  ;;  %v13777_v39 = vmax.f32 %v13476_v36, %v5365_v9 }
 0xc6c   : > { %v5352_v38 = vmul.f32 %v7411_v50, %v5329_v61  ;;  %v13774_v12 = vmax.f32 %v13479_v14, %v5366_v4 }
 0xc6d   : > { %v5367_v49 = vmax.f32 %v5303_v18, %v5351_v17  ;;  %v5397_v36 = vrot.slane %v13777_v39, 7 }
 0xc6e   : > { %v5368_v58 = vmax.f32 %v5304_v23, %v5352_v38  ;;  %v5331_v3 = vpop.permute.xlu0 %5330  ;;  %v5398_v52 = vrot.slane %v13774_v12, 7  ;;  %v5446_v62 = vrot.slane %v13774_v12, 1 }
 0xc6f   : > { %v5333_v44 = vpop.permute.xlu1 %5332  ;;  %v5353_v28 = vmul.f32 %v7411_v50, %v5331_v3  ;;  %v5383_v14 = vmax.f32 %v13551_v19, %v5367_v49 }
 0xc70   : > { %v5354_v29 = vmul.f32 %v7411_v50, %v5333_v44  ;;  %v5384_v13 = vmax.f32 %v13554_v33, %v5368_v58 }
 0xc71   : > { %v5369_v21 = vmax.f32 %v5305_v46, %v5353_v28  ;;  %v5399_v53 = vrot.slane %v5383_v14, 7  ;;  %v5447_v57 = vrot.slane %v5383_v14, 1 }
 0xc72   : > { %v5370_v51 = vmax.f32 %v5306_v42, %v5354_v29  ;;  %v5448_v43 = vrot.slane %v5384_v13, 1  ;;  %v5271_v30 = vpop.permute.xlu0 %5270  ;;  %v5400_v60 = vrot.slane %v5384_v13, 7 }
 0xc73   : > { %v5273_v8 = vpop.permute.xlu1 %5272  ;;  %v13792_v33 = vmax.f32 %v13564_v55, %v5369_v21  ;;  %v5464_v19 = vsel %vm16273_vm11, %v5446_v62, %v5447_v57  ;;  %v5416_v9 = vsel %vm16274_vm4, %v5398_v52, %v5399_v53  ;;  %vm16293_vm11 = vmmov %vm16245_vm2 }
 0xc74   : > { %v13789_v4 = vmax.f32 %v13567_v7, %v5370_v51  ;;  %v5463_v61 = vsel %vm16275_vm12, %v5447_v57, %v5448_v43  ;;  %v5417_v7 = vsel %vm16276_vm8, %v5397_v36, %v5398_v52  ;;  %v5300_v55 = vmul.f32 %v7401_v15, %v5273_v8  ;;  %v16281_v8 = vld [vmem:[#allocation27_spill] sm:$0xff]  ;;  %vm16294_vm4 = vmmov %vm16240_vm0 }
 0xc75   : > { %v15164_v38 = vrot.slane %v13792_v33, 7  ;;  %v5449_v17 = vrot.slane %v13792_v33, 1  ;;  %v5494_v58 = vmax.f32 %v5417_v7, %v5464_v19  ;;  %v5495_v49 = vmax.f32 %v5416_v9, %v5463_v61  ;;  %vm16295_vm12 = vmmov %vm16245_vm2 }
 0xc76   : > { %v15163_v0 = vrot.slane %v13789_v4, 1  ;;  %v5319_v18 = vpop.permute.xlu0 %5318  ;;  %v5415_v3 = vsel %vm16277_vm13, %v5399_v53, %v5400_v60  ;;  %vm16296_vm8 = vmmov %vm16245_vm2 }
 0xc77   : > { %v5321_v23 = vpop.permute.xlu1 %5320  ;;  %v5462_v42 = vsel %vm16278_vm10, %v5448_v43, %v5449_v17  ;;  %v5414_v46 = vsel %vm16279_vm7, %v5400_v60, %v15164_v38  ;;  %v5510_v29 = vmax.f32 %v13774_v12, %v5494_v58  ;;  %v5511_v28 = vmax.f32 %v5383_v14, %v5495_v49  ;;  %vm16297_vm13 = vmmov %vm16240_vm0 }
 0xc78   : > { %v5348_v44 = vmul.f32 %v7411_v50, %v5321_v23  ;;  %v5496_v52 = vmax.f32 %v5415_v3, %v5462_v42  ;;  %v5461_v51 = vsel %vm16280_vm5, %v5449_v17, %v15163_v0  ;;  %v5445_v17 = vrot.slane %v13777_v39, 1  ;;  %vm16298_vm10 = vmmov %vm16240_vm0 }
 0xc79   : > { %v5497_v57 = vmax.f32 %v5414_v46, %v5461_v51  ;;  %v13821_v19 = vmul.f32 %v5510_v29, %v16281_v8  ;;  %v13824_v43 = vmul.f32 %v5511_v28, %v16036_v20  ;;  %v5347_v29 = vmul.f32 %v7411_v50, %v5319_v18  ;;  %v16283_v51 = vld [vmem:[#allocation113_spill] sm:$0xff]  ;;  %vm16300_vm7 = vmmov %vm16245_vm2 }
 0xc7a   : > { %v5364_v21 = vmax.f32 %v5300_v55, %v5348_v44  ;;  %v5269_v9 = vpop.permute.xlu0 %5268  ;;  %v5512_v60 = vmax.f32 %v5384_v13, %v5496_v52  ;;  %v5465_v58 = vsel %vm16240_vm0, %v5445_v17, %v5446_v62  ;;  %v5299_v62 = vmul.f32 %v7401_v15, %v5271_v30  ;;  %vm16301_vm5 = vmmov %vm16240_vm0 }
 0xc7b   : > { %v5291_v53 = vpop.permute.xlu1 %5290  ;;  %5548 = vrot.lane.b32.xlu0 %v13821_v19, %s7009_s28  ;;  %5550 = vrot.lane.b32.xlu1 %v13824_v43, %s7009_s28  ;;  %v5513_v61 = vmax.f32 %v13792_v33, %v5497_v57 }
 0xc7c   : > { %v13827_v12 = vmax.f32 %v13657_v63, %v5364_v21  ;;  %v13834_v14 = vmul.f32 %v5512_v60, %v16037_v10  ;;  %v5363_v60 = vmax.f32 %v5299_v62, %v5347_v29 }
 0xc7d   : > { %v13840_v13 = vmul.f32 %v5513_v61, %v16038_v40  ;;  %v5309_v40 = vmul.f32 %v7401_v15, %v5291_v53 }
 0xc7e   : > { %v5396_v7 = vrot.slane %v13827_v12, 7  ;;  %v5317_v63 = vpop.permute.xlu0 %5316  ;;  %v5444_v29 = vrot.slane %v13827_v12, 1 }
 0xc7f   : > { %v5339_v55 = vpop.permute.xlu1 %5338  ;;  %5552 = vrot.lane.b32.xlu0 %v13834_v14, %s7009_s28  ;;  %5554 = vrot.lane.b32.xlu1 %v13840_v13, %s7009_s28  ;;  %v5346_v28 = vmul.f32 %v7411_v50, %v5317_v63 }
 0xc80   : > { %v5418_v23 = vsel %vm16282_vm15, %v5396_v7, %v5397_v36  ;;  %v5357_v62 = vmul.f32 %v7411_v50, %v5339_v55  ;;  %vm16303_vm15 = vmmov %vm16240_vm0 }
 0xc81   : > { %v5493_v3 = vmax.f32 %v5418_v23, %v5465_v58  ;;  %v13869_v58 = vmax.f32 %v13654_v11, %v5363_v60  ;;  %vm16304_vm0 = vmmov %vm16245_vm2 }
 0xc82   : > { %v5267_v44 = vpop.permute.xlu0 %5266 }
 0xc83   : > { %v5293_v49 = vpop.permute.xlu1 %5292  ;;  %5596 = vrot.lane.b32.xlu0 %v13821_v19, %s7008_s27  ;;  %5598 = vrot.lane.b32.xlu1 %v13824_v43, %s7008_s27  ;;  %v5509_v46 = vmax.f32 %v13777_v39, %v5493_v3  ;;  %v5298_v39 = vmul.f32 %v7401_v15, %v5269_v9  ;;  %v5402_v9 = vrot.slane %v13789_v4, 7 }
 0xc85   : > { %v13863_v21 = vmul.f32 %v5509_v46, %v16283_v51  ;;  %v5362_v18 = vmax.f32 %v5298_v39, %v5346_v28  ;;  %v5395_v46 = vrot.slane %v13869_v58, 7 }
 0xc86   : > { %v5315_v36 = vpop.permute.xlu0 %5314 }
 0xc87   : > { %v5341_v42 = vpop.permute.xlu1 %5340  ;;  %5600 = vrot.lane.b32.xlu0 %v13834_v14, %s7008_s27  ;;  %5602 = vrot.lane.b32.xlu1 %v13840_v13, %s7008_s27  ;;  %v13874_v30 = vmax.f32 %v13680_v2, %v5362_v18  ;;  %v5345_v55 = vmul.f32 %v7411_v50, %v5315_v36  ;;  %v5419_v28 = vsel %vm16284_vm14, %v5395_v46, %v5396_v7  ;;  %vm16305_vm14 = vmmov %vm16290_vm1 }
 0xc88   : > { %v5358_v11 = vmul.f32 %v7411_v50, %v5341_v42  ;;  %v5310_v42 = vmul.f32 %v7401_v15, %v5293_v49 }
 0xc89   : > { %v16286_v51 = vrot.slane %v13874_v30, 7 }
 0xc8a   : > { %v5265_v57 = vpop.permute.xlu0 %5264  ;;  %v5374_v36 = vmax.f32 %v5310_v42, %v5358_v11 }
 0xc8b   : > { %v5295_v52 = vpop.permute.xlu1 %5294  ;;  %5546 = vrot.lane.b32.xlu1 %v13863_v21, %s7009_s28  ;;  %v5420_v53 = vsel %vm16287_vm6, %v16286_v51, %v5395_v46  ;;  %vm16307_vm6 = vmmov %vm16304_vm0 }
 0xc8c   : > { %v5311_v7 = vmul.f32 %v7401_v15, %v5295_v52 }
 0xc8e   : > { %v5313_v23 = vpop.permute.xlu0 %5312 }
 0xc8f   : > { %v5343_v61 = vpop.permute.xlu1 %5342  ;;  %5594 = vrot.lane.b32.xlu1 %v13863_v21, %s7008_s27 }
 0xc90   : > { %v5359_v8 = vmul.f32 %v7411_v50, %v5343_v61 }
 0xc92   : > { %v5287_v3 = vpop.permute.xlu0 %5286  ;;  %v5375_v46 = vmax.f32 %v5311_v7, %v5359_v8 }
 0xc93   : > { %v5289_v63 = vpop.permute.xlu1 %5288  ;;  %v5307_v2 = vmul.f32 %v7401_v15, %v5287_v3  ;;  %v5373_v3 = vmax.f32 %v5309_v40, %v5357_v62  ;;  %v5344_v40 = vmul.f32 %v7411_v50, %v5313_v23 }
 0xc94   : > { %v5308_v0 = vmul.f32 %v7401_v15, %v5289_v63  ;;  %v5391_v42 = vmax.f32 %v13739_v25, %v5375_v46 }
 0xc96   : > { %v5335_v39 = vpop.permute.xlu0 %5334 }
 0xc97   : > { %v5337_v60 = vpop.permute.xlu1 %5336  ;;  %v5355_v38 = vmul.f32 %v7411_v50, %v5335_v39  ;;  %v5466_v39 = vsel %vm16285_vm3, %v5444_v29, %v5445_v17  ;;  %vm16306_vm3 = vmmov %vm16304_vm0 }
 0xc98   : > { %v5356_v18 = vmul.f32 %v7411_v50, %v5337_v60  ;;  %v5297_v60 = vmul.f32 %v7401_v15, %v5267_v44  ;;  %v16289_v44 = vrot.slane %v13869_v58, 1 }
 0xc99   : > { %v5371_v10 = vmax.f32 %v5307_v2, %v5355_v38  ;;  %v16288_v38 = vrot.slane %v13792_v33, 7  ;;  %v5390_v33 = vmax.f32 %v13709_v47, %v5374_v36  ;;  %v16291_v2 = vrot.slane %v13789_v4, 1 }
 0xc9a   : > { %v5372_v63 = vmax.f32 %v5308_v0, %v5356_v18  ;;  %v5361_v0 = vmax.f32 %v5297_v60, %v5345_v55  ;;  %v5467_v51 = vsel %vm16290_vm1, %v16289_v44, %v5444_v29 }
 0xc9b   : > { %v5387_v61 = vmax.f32 %v13755_v56, %v5371_v10  ;;  %v5413_v17 = vsel %vm16245_vm2, %v16288_v38, %v5402_v9  ;;  %v5296_v10 = vmul.f32 %v7401_v15, %v5265_v57  ;;  %v5492_v56 = vmax.f32 %v5419_v28, %v5466_v39  ;;  %vm16308_vm2 = vmmov %vm16290_vm1 }
 0xc9c   : > { %v5388_v49 = vmax.f32 %v13752_v26, %v5372_v63  ;;  %v5389_v26 = vmax.f32 %v13683_v45, %v5373_v3  ;;  %v5491_v23 = vmax.f32 %v5420_v53, %v5467_v51  ;;  %v13924_v55 = vmax.f32 %v13706_v24, %v5361_v0  ;;  %vm16309_vm1 = vmmov %vm16304_vm0 }
 0xc9d   : > { %v5403_v52 = vrot.slane %v5387_v61, 7  ;;  %v5451_v11 = vrot.slane %v5387_v61, 1  ;;  %v5360_v45 = vmax.f32 %v5296_v10, %v5344_v40  ;;  %v5508_v60 = vmax.f32 %v13827_v12, %v5492_v56 }
 0xc9e   : > { %v5452_v62 = vrot.slane %v5388_v49, 1  ;;  %v5404_v47 = vrot.slane %v5388_v49, 7  ;;  %v5405_v39 = vrot.slane %v5389_v26, 7  ;;  %v5453_v53 = vrot.slane %v5389_v26, 1 }
 0xc9f   : > { %v5460_v18 = vsel %vm16292_vm9, %v16291_v2, %v5451_v11  ;;  %v5412_v29 = vsel %vm16293_vm11, %v5402_v9, %v5403_v52  ;;  %v5454_v9 = vrot.slane %v5390_v33, 1  ;;  %v5507_v36 = vmax.f32 %v13869_v58, %v5491_v23  ;;  %vm16310_vm9 = vmmov %vm16308_vm2 }
 0xca0   : > { %v5459_v8 = vsel %vm16294_vm4, %v5451_v11, %v5452_v62  ;;  %v5498_v57 = vmax.f32 %v5413_v17, %v5460_v18  ;;  %v5393_v7 = vrot.slane %v13924_v55, 7  ;;  %v5376_v24 = vmax.f32 %v13736_v31, %v5360_v45  ;;  %vm16311_vm11 = vmmov %vm16304_vm0 }
 0xca1   : > { %v5499_v28 = vmax.f32 %v5412_v29, %v5459_v8  ;;  %v5455_v40 = vrot.slane %v5391_v42, 1  ;;  %v5411_v12 = vsel %vm16296_vm8, %v5403_v52, %v5404_v47  ;;  %v5442_v38 = vrot.slane %v13874_v30, 1  ;;  %vm16312_vm4 = vmmov %vm16308_vm2 }
 0xca2   : > { %v5514_v63 = vmax.f32 %v13789_v4, %v5498_v57  ;;  %v5410_v4 = vsel %vm16295_vm12, %v5404_v47, %v5405_v39  ;;  %v5406_v31 = vrot.slane %v5390_v33, 7  ;;  %v13950_v17 = vmul.f32 %v5508_v60, %v11939_v37  ;;  %vm16313_vm12 = vmmov %vm16304_vm0 }
 0xca3   : > { %v5515_v3 = vmax.f32 %v5387_v61, %v5499_v28  ;;  %v5458_v61 = vsel %vm16297_vm13, %v5452_v62, %v5453_v53  ;;  %v5457_v44 = vsel %vm16298_vm10, %v5453_v53, %v5454_v9  ;;  %v13955_v51 = vmul.f32 %v5507_v36, %v16215_v16  ;;  %vm16314_vm8 = vmmov %vm16308_vm2 }
 0xca4   : > { %v13933_v0 = vmul.f32 %v5514_v63, %v11957_v32  ;;  %v5501_v46 = vmax.f32 %v5410_v4, %v5457_v44  ;;  %v5500_v62 = vmax.f32 %v5411_v12, %v5458_v61  ;;  %v16299_v52 = vrot.slane %v13874_v30, 7  ;;  %vm16317_vm13 = vmmov %vm16304_vm0 }
 0xca5   : > { %v13936_v25 = vmul.f32 %v5515_v3, %v16272_v27  ;;  %v5440_v10 = vrot.slane %v5376_v24, 1  ;;  %v5456_v56 = vsel %vm16301_vm5, %v5454_v9, %v5455_v40  ;;  %v16302_v23 = vrot.slane %v13869_v58, 1  ;;  %vm16318_vm10 = vmmov %vm16308_vm2 }
 0xca6   : > { %5556 = vrot.lane.b32.xlu0 %v13933_v0, %s7009_s28  ;;  %v5421_v11 = vsel %vm16300_vm7, %v5393_v7, %v16299_v52  ;;  %v5409_v18 = vsel %vm16304_vm0, %v5405_v39, %v5406_v31  ;;  %v5517_v8 = vmax.f32 %v5389_v26, %v5501_v46  ;;  %v5516_v45 = vmax.f32 %v5388_v49, %v5500_v62  ;;  %vm16319_vm7 = vmmov %vm16308_vm2 }
 0xca7   : > { %5558 = vrot.lane.b32.xlu1 %v13936_v25, %s7009_s28  ;;  %v5468_v2 = vsel %vm16303_vm15, %v5442_v38, %v16302_v23  ;;  %v5502_v57 = vmax.f32 %v5409_v18, %v5456_v56  ;;  %v5392_v28 = vrot.slane %v5376_v24, 7  ;;  %v5471_v47 = vsel %vm16305_vm14, %v5455_v40, %v5440_v10  ;;  %vm16321_vm5 = vmmov %vm16304_vm0 }
 0xca8   : > { %v5490_v29 = vmax.f32 %v5421_v11, %v5468_v2  ;;  %v5441_v58 = vrot.slane %v13924_v55, 1  ;;  %v5407_v63 = vrot.slane %v5391_v42, 7  ;;  %v5487_v60 = vmul.f32 %v16261_v54, %v5471_v47  ;;  %vm16323_vm15 = vmmov %vm16304_vm0 }
 0xca9   : > { %v13983_v49 = vmul.f32 %v5517_v8, %v16258_v5  ;;  %v13986_v26 = vmul.f32 %v5516_v45, %v16271_v1  ;;  %v5518_v39 = vmax.f32 %v5390_v33, %v5502_v57  ;;  %v5422_v53 = vsel %vm16306_vm3, %v5392_v28, %v5393_v7  ;;  %vm16325_vm14 = vmmov %vm16308_vm2 }
 0xcaa   : > { %5544 = vrot.lane.b32.xlu0 %v13950_v17, %s7009_s28  ;;  %v5506_v3 = vmax.f32 %v13874_v30, %v5490_v29  ;;  %v5408_v30 = vsel %vm16307_vm6, %v5406_v31, %v5407_v63  ;;  %v5469_v9 = vsel %vm16308_vm2, %v5441_v58, %v5442_v38  ;;  %v5423_v4 = vsel %vm16309_vm1, %v5407_v63, %v5392_v28  ;;  %vm16327_vm3 = vmmov %vm16308_vm2 }
 0xcab   : > { %5542 = vrot.lane.b32.xlu1 %v13955_v51, %s7009_s28  ;;  %v13999_v36 = vmul.f32 %v5518_v39, %v16265_v35  ;;  %v5503_v40 = vmax.f32 %v5408_v30, %v5487_v60  ;;  %v5489_v7 = vmax.f32 %v5422_v53, %v5469_v9  ;;  %v5424_v12 = vmul.f32 %v16260_v6, %v5423_v4  ;;  %vm16328_vm6 = vmmov %vm16304_vm0 }
 0xcac   : > { %v14002_v33 = vmul.f32 %v5506_v3, %v16257_v59  ;;  %v5470_v31 = vsel %vm16310_vm9, %v5440_v10, %v5441_v58  ;;  %vm16330_vm1 = vmmov %vm16308_vm2 }
 0xcad   : > { %v5519_v61 = vmax.f32 %v5391_v42, %v5503_v40  ;;  %v5505_v38 = vmax.f32 %v13924_v55, %v5489_v7  ;;  %v5488_v62 = vmax.f32 %v5424_v12, %v5470_v31  ;;  %vm16331_vm9 = vmmov %vm16304_vm0 }
 0xcae   : > { %5592 = vrot.lane.b32.xlu0 %v13950_v17, %s7008_s27 }
 0xcaf   : > { %5590 = vrot.lane.b32.xlu1 %v13955_v51, %s7008_s27  ;;  %v14019_v44 = vmul.f32 %v5519_v61, %v16270_v48  ;;  %v14022_v46 = vmul.f32 %v5505_v38, %v16264_v34  ;;  %v5504_v55 = vmax.f32 %v5376_v24, %v5488_v62 }
 0xcb1   : > { %v14033_v42 = vmul.f32 %v5504_v55, %v16269_v22 }
 0xcb2   : > { %5560 = vrot.lane.b32.xlu0 %v13986_v26, %s7009_s28 }
 0xcb3   : > { %5562 = vrot.lane.b32.xlu1 %v13983_v49, %s7009_s28 }
 0xcb6   : > { %5540 = vrot.lane.b32.xlu0 %v14002_v33, %s7009_s28 }
 0xcb7   : > { %5564 = vrot.lane.b32.xlu1 %v13999_v36, %s7009_s28 }
 0xcba   : > { %5588 = vrot.lane.b32.xlu0 %v14002_v33, %s7008_s27 }
 0xcbb   : > { %5612 = vrot.lane.b32.xlu1 %v13999_v36, %s7008_s27 }
 0xcbe   : > { %5538 = vrot.lane.b32.xlu0 %v14022_v46, %s7009_s28 }
 0xcbf   : > { %5566 = vrot.lane.b32.xlu1 %v14019_v44, %s7009_s28 }
 0xcc2   : > { %5586 = vrot.lane.b32.xlu0 %v14022_v46, %s7008_s27 }
 0xcc3   : > { %5614 = vrot.lane.b32.xlu1 %v14019_v44, %s7008_s27 }
 0xcc6   : > { %5536 = vrot.lane.b32.xlu0 %v14033_v42, %s7009_s28 }
 0xcc7   : > { %5606 = vrot.lane.b32.xlu1 %v13936_v25, %s7008_s27 }
 0xcca   : > { %5584 = vrot.lane.b32.xlu0 %v14033_v42, %s7008_s27 }
 0xccb   : > { %5610 = vrot.lane.b32.xlu1 %v13983_v49, %s7008_s27 }
 0xcce   : > { %5604 = vrot.lane.b32.xlu0 %v13933_v0, %s7008_s27 }
 0xcd2   : > { %5608 = vrot.lane.b32.xlu0 %v13986_v26, %s7008_s27 }
 0xced   : > { %v5551_v24 = vpop.permute.xlu1 %5550  ;;  %v5549_v52 = vpop.permute.xlu0 %5548 }
 0xcee   : > { %v5575_v2 = vmul.f32 %v7401_v15, %v5551_v24  ;;  %v5574_v18 = vmul.f32 %v7401_v15, %v5549_v52 }
 0xcf1   : > { %v5555_v11 = vpop.permute.xlu1 %5554  ;;  %v5553_v10 = vpop.permute.xlu0 %5552 }
 0xcf2   : > { %v5577_v3 = vmul.f32 %v7401_v15, %v5555_v11  ;;  %v5576_v60 = vmul.f32 %v7401_v15, %v5553_v10 }
 0xcf5   : > { %v5599_v56 = vpop.permute.xlu1 %5598  ;;  %v5597_v23 = vpop.permute.xlu0 %5596 }
 0xcf6   : > { %v5623_v29 = vmul.f32 %v7411_v50, %v5599_v56  ;;  %v5622_v8 = vmul.f32 %v7411_v50, %v5597_v23 }
 0xcf8   : > { %v5639_v45 = vmax.f32 %v5575_v2, %v5623_v29  ;;  %v5638_v57 = vmax.f32 %v5574_v18, %v5622_v8 }
 0xcf9   : > { %v5603_v28 = vpop.permute.xlu1 %5602  ;;  %v5601_v47 = vpop.permute.xlu0 %5600 }
 0xcfa   : > { %v5625_v58 = vmul.f32 %v7411_v50, %v5603_v28  ;;  %v5624_v63 = vmul.f32 %v7411_v50, %v5601_v47  ;;  %v5655_v39 = vmax.f32 %v13824_v43, %v5639_v45  ;;  %v5654_v53 = vmax.f32 %v13821_v19, %v5638_v57  ;;  %v16316_v47 = vld [vmem:[#allocation42_spill] sm:$0xff] }
 0xcfc   : > { %v5641_v30 = vmax.f32 %v5577_v3, %v5625_v58  ;;  %v5640_v9 = vmax.f32 %v5576_v60, %v5624_v63  ;;  %v5671_v7 = vrot.slane %v5655_v39, 7  ;;  %v5670_v4 = vrot.slane %v5654_v53, 7 }
 0xcfd   : > { %v5547_v40 = vpop.permute.xlu1 %5546  ;;  %v5719_v38 = vrot.slane %v5655_v39, 1  ;;  %v5718_v2 = vrot.slane %v5654_v53, 1 }
 0xcfe   : > { %v14058_v12 = vmax.f32 %v13840_v13, %v5641_v30  ;;  %v14061_v61 = vmax.f32 %v13834_v14, %v5640_v9  ;;  %v5573_v19 = vmul.f32 %v7401_v15, %v5547_v40  ;;  %v5688_v52 = vsel %vm16311_vm11, %v5670_v4, %v5671_v7  ;;  %v16320_v30 = vld [vmem:[#allocation27_spill] sm:$0xff]  ;;  %vm16332_vm11 = vmmov %vm16330_vm1 }
 0xcff   : > { %v5736_v63 = vsel %vm16318_vm10, %v5718_v2, %v5719_v38  ;;  %vm16340_vm10 = vmmov %vm16330_vm1 }
 0xd00   : > { %v15171_v31 = vrot.slane %v14058_v12, 1  ;;  %v15173_v62 = vrot.slane %v14061_v61, 7  ;;  %v5720_v43 = vrot.slane %v14061_v61, 1 }
 0xd01   : > { %v5595_v55 = vpop.permute.xlu1 %5594 }
 0xd02   : > { %v5621_v24 = vmul.f32 %v7411_v50, %v5595_v55  ;;  %v5735_v13 = vsel %vm16312_vm4, %v5719_v38, %v5720_v43  ;;  %v5687_v14 = vsel %vm16313_vm12, %v5671_v7, %v15173_v62  ;;  %v5734_v11 = vsel %vm16314_vm8, %v5720_v43, %v15171_v31  ;;  %vm16333_vm4 = vmmov %vm16304_vm0 }
 0xd03   : > { %v5767_v56 = vmax.f32 %v5688_v52, %v5735_v13  ;;  %v5768_v23 = vmax.f32 %v5687_v14, %v5734_v11  ;;  %vm16336_vm12 = vmmov %vm16304_vm0 }
 0xd04   : > { %v5637_v10 = vmax.f32 %v5573_v19, %v5621_v24  ;;  %vm16337_vm8 = vmmov %vm16304_vm0 }
 0xd05   : > { %v5783_v29 = vmax.f32 %v5655_v39, %v5767_v56  ;;  %v5784_v8 = vmax.f32 %v14061_v61, %v5768_v23 }
 0xd06   : > { %v14081_v18 = vmax.f32 %v13863_v21, %v5637_v10 }
 0xd07   : > { %v14087_v28 = vmul.f32 %v5783_v29, %v16036_v20  ;;  %v14090_v58 = vmul.f32 %v5784_v8, %v16316_v47 }
 0xd08   : > { %v5669_v45 = vrot.slane %v14081_v18, 7  ;;  %v15172_v57 = vrot.slane %v14081_v18, 1 }
 0xd09   : > { %16315 = vst [vmem:[#allocation175_spill] sm:$0xff] %v14087_v28  ;;  %5822 = vrot.lane.b32.xlu0 %v14087_v28, %s7009_s28  ;;  %5824 = vrot.lane.b32.xlu1 %v14090_v58, %s7009_s28 }
 0xd0a   : > { %v5689_v21 = vsel %vm16317_vm13, %v5669_v45, %v5670_v4  ;;  %v5737_v3 = vsel %vm16319_vm7, %v15172_v57, %v5718_v2  ;;  %vm16339_vm13 = vmmov %vm16330_vm1 }
 0xd0b   : > { %v5766_v60 = vmax.f32 %v5689_v21, %v5736_v63  ;;  %vm16341_vm7 = vmmov %vm16330_vm1 }
 0xd0d   : > { %v5782_v39 = vmax.f32 %v5654_v53, %v5766_v60  ;;  %5870 = vrot.lane.b32.xlu0 %v14087_v28, %s7008_s27  ;;  %5872 = vrot.lane.b32.xlu1 %v14090_v58, %s7008_s27  ;;  %v16329_v28 = vld [vmem:[#allocation97_spill] sm:$0xff] }
 0xd0f   : > { %v14109_v9 = vmul.f32 %v5782_v39, %v16320_v30 }
 0xd11   : > { %5820 = vrot.lane.b32.xlu1 %v14109_v9, %s7009_s28 }
 0xd15   : > { %5868 = vrot.lane.b32.xlu1 %v14109_v9, %s7008_s27 }
 0xd18   : > { %v5557_v7 = vpop.permute.xlu0 %5556 }
 0xd19   : > { %v5559_v40 = vpop.permute.xlu1 %5558  ;;  %v5578_v30 = vmul.f32 %v7401_v15, %v5557_v7 }
 0xd1c   : > { %v5545_v38 = vpop.permute.xlu0 %5544 }
 0xd1d   : > { %v5543_v4 = vpop.permute.xlu1 %5542  ;;  %v5572_v55 = vmul.f32 %v7401_v15, %v5545_v38 }
 0xd20   : > { %v5593_v43 = vpop.permute.xlu0 %5592 }
 0xd21   : > { %v5591_v53 = vpop.permute.xlu1 %5590  ;;  %v5620_v19 = vmul.f32 %v7411_v50, %v5593_v43 }
 0xd22   : > { %v5619_v43 = vmul.f32 %v7411_v50, %v5591_v53 }
 0xd23   : > { %v5636_v24 = vmax.f32 %v5572_v55, %v5620_v19  ;;  %v5571_v19 = vmul.f32 %v7401_v15, %v5543_v4 }
 0xd24   : > { %v5561_v13 = vpop.permute.xlu0 %5560 }
 0xd25   : > { %v5563_v52 = vpop.permute.xlu1 %5562  ;;  %v14118_v14 = vmax.f32 %v13950_v17, %v5636_v24  ;;  %v5635_v24 = vmax.f32 %v5571_v19, %v5619_v43 }
 0xd27   : > { %v5668_v11 = vrot.slane %v14118_v14, 7  ;;  %v14137_v57 = vmax.f32 %v13955_v51, %v5635_v24  ;;  %v5580_v51 = vmul.f32 %v7401_v15, %v5561_v13  ;;  %v5581_v24 = vmul.f32 %v7401_v15, %v5563_v52 }
 0xd28   : > { %v5541_v56 = vpop.permute.xlu0 %5540  ;;  %v16326_v13 = vrot.slane %v14058_v12, 1 }
 0xd29   : > { %v14121_v10 = vpop.permute.xlu1 %5564  ;;  %v5690_v23 = vsel %vm16321_vm5, %v5668_v11, %v5669_v45  ;;  %v15177_v43 = vrot.slane %v14137_v57, 7  ;;  %vm16342_vm5 = vmmov %vm16304_vm0 }
 0xd2a   : > { %v5765_v2 = vmax.f32 %v5690_v23, %v5737_v3  ;;  %v5579_v23 = vmul.f32 %v7401_v15, %v5559_v40  ;;  %v15176_v40 = vrot.slane %v14118_v14, 1 }
 0xd2c   : > { %v5589_v8 = vpop.permute.xlu0 %5588  ;;  %v14128_v21 = vmax.f32 %v14081_v18, %v5765_v2 }
 0xd2d   : > { %v14125_v29 = vpop.permute.xlu1 %5612 }
 0xd30   : > { %v5539_v60 = vpop.permute.xlu0 %5538 }
 0xd31   : > { %v14130_v63 = vpop.permute.xlu1 %5566 }
 0xd34   : > { %v5587_v39 = vpop.permute.xlu0 %5586 }
 0xd35   : > { %v5615_v17 = vpop.permute.xlu1 %5614 }
 0xd38   : > { %v5537_v38 = vpop.permute.xlu0 %5536 }
 0xd39   : > { %v5607_v55 = vpop.permute.xlu1 %5606 }
 0xd3a   : > { %v5627_v45 = vmul.f32 %v7411_v50, %v5607_v55  ;;  %v5673_v55 = vrot.slane %v14058_v12, 7 }
 0xd3c   : > { %v5585_v3 = vpop.permute.xlu0 %5584  ;;  %v5643_v31 = vmax.f32 %v5579_v23, %v5627_v45  ;;  %v16322_v23 = vrot.slane %v14061_v61, 7 }
 0xd3d   : > { %v5611_v47 = vpop.permute.xlu1 %5610 }
 0xd3e   : > { %v14142_v53 = vmax.f32 %v13936_v25, %v5643_v31  ;;  %v5629_v45 = vmul.f32 %v7411_v50, %v5611_v47  ;;  %v16324_v47 = vrot.slane %v14081_v18, 1  ;;  %v5617_v18 = vmul.f32 %v7411_v50, %v5587_v39 }
 0xd40   : > { %v5605_v2 = vpop.permute.xlu0 %5604  ;;  %v5723_v25 = vrot.slane %v14142_v53, 1  ;;  %v5645_v52 = vmax.f32 %v5581_v24, %v5629_v45  ;;  %v5570_v45 = vmul.f32 %v7401_v15, %v5541_v56  ;;  %v5569_v24 = vmul.f32 %v7401_v15, %v5539_v60 }
 0xd41   : > { %v5626_v62 = vmul.f32 %v7411_v50, %v5605_v2  ;;  %v5686_v2 = vsel %vm16323_vm15, %v16322_v23, %v5673_v55  ;;  %vm16343_vm15 = vmmov %vm16330_vm1 }
 0xd43   : > { %v5642_v4 = vmax.f32 %v5578_v30, %v5626_v62 }
 0xd44   : > { %v5609_v20 = vpop.permute.xlu0 %5608 }
 0xd45   : > { %v5628_v19 = vmul.f32 %v7411_v50, %v5609_v20  ;;  %v5658_v7 = vmax.f32 %v13933_v0, %v5642_v4  ;;  %v5691_v20 = vsel %vm16304_vm0, %v15177_v43, %v5668_v11  ;;  %v5738_v0 = vsel %vm16325_vm14, %v15176_v40, %v16324_v47  ;;  %vm16344_vm14 = vmmov %vm16304_vm0 }
 0xd46   : > { %v5618_v11 = vmul.f32 %v7411_v50, %v5589_v8  ;;  %v5633_v8 = vmax.f32 %v5569_v24, %v5617_v18 }
 0xd47   : > { %v5674_v31 = vrot.slane %v5658_v7, 7  ;;  %v5722_v62 = vrot.slane %v5658_v7, 1  ;;  %v5644_v30 = vmax.f32 %v5580_v51, %v5628_v19 }
 0xd48   : > { %v5634_v43 = vmax.f32 %v5570_v45, %v5618_v11  ;;  %v5630_v11 = vmul.f32 %v7411_v50, %v14125_v29 }
 0xd49   : > { %v5733_v61 = vsel %vm16327_vm3, %v16326_v13, %v5722_v62  ;;  %v5685_v4 = vsel %vm16328_vm6, %v5673_v55, %v5674_v31  ;;  %v5732_v19 = vsel %vm16308_vm2, %v5722_v62, %v5723_v25  ;;  %v14178_v47 = vmax.f32 %v13986_v26, %v5644_v30  ;;  %vm16345_vm3 = vmmov %vm16304_vm0 }
 0xd4a   : > { %v5769_v51 = vmax.f32 %v5686_v2, %v5733_v61  ;;  %v5770_v23 = vmax.f32 %v5685_v4, %v5732_v19  ;;  %v14184_v55 = vmax.f32 %v13983_v49, %v5645_v52  ;;  %v5764_v62 = vmax.f32 %v5691_v20, %v5738_v0  ;;  %vm16346_vm6 = vmmov %vm16330_vm1 }
 0xd4b   : > { %v5616_v26 = vmul.f32 %v7411_v50, %v5585_v3  ;;  %v5676_v56 = vrot.slane %v14178_v47, 7  ;;  %v5724_v60 = vrot.slane %v14178_v47, 1  ;;  %v5631_v49 = vmul.f32 %v7411_v50, %v5615_v17  ;;  %vm16347_vm2 = vmmov %vm16330_vm1 }
 0xd4c   : > { %v5785_v13 = vmax.f32 %v14058_v12, %v5769_v51  ;;  %v5786_v40 = vmax.f32 %v5658_v7, %v5770_v23  ;;  %v5675_v12 = vrot.slane %v14142_v53, 7  ;;  %v5568_v7 = vmul.f32 %v7401_v15, %v5537_v38 }
 0xd4d   : > { %v5650_v3 = vmax.f32 %v14002_v33, %v5634_v43  ;;  %v5583_v30 = vmul.f32 %v7401_v15, %v14130_v63  ;;  %v14207_v20 = vmax.f32 %v14022_v46, %v5633_v8  ;;  %v5780_v0 = vmax.f32 %v14118_v14, %v5764_v62  ;;  %v16334_v43 = vld [vmem:[#allocation113_spill] sm:$0xff] }
 0xd4e   : > { %v14187_v39 = vmul.f32 %v5785_v13, %v16329_v28  ;;  %v14190_v2 = vmul.f32 %v5786_v40, %v11957_v32  ;;  %v5725_v40 = vrot.slane %v14184_v55, 1  ;;  %v5632_v52 = vmax.f32 %v5568_v7, %v5616_v26 }
 0xd4f   : > { %v5731_v17 = vsel %vm16330_vm1, %v5723_v25, %v5724_v60  ;;  %v5683_v38 = vsel %vm16331_vm9, %v5675_v12, %v5676_v56  ;;  %v5647_v46 = vmax.f32 %v5583_v30, %v5631_v49  ;;  %v5684_v63 = vsel %vm16333_vm4, %v5674_v31, %v5675_v12  ;;  %vm16348_vm1 = vmmov %vm16304_vm0 }
 0xd50   : > { %5826 = vrot.lane.b32.xlu0 %v14187_v39, %s7009_s28  ;;  %5828 = vrot.lane.b32.xlu1 %v14190_v2, %s7009_s28  ;;  %v5730_v33 = vsel %vm16332_vm11, %v5724_v60, %v5725_v40  ;;  %v14228_v25 = vmul.f32 %v14128_v21, %v16334_v43  ;;  %v14231_v61 = vmul.f32 %v5780_v0, %v11939_v37  ;;  %v5666_v18 = vrot.slane %v5650_v3, 7  ;;  %vm16349_vm9 = vmmov %vm16347_vm2 }
 0xd51   : > { %v5771_v4 = vmax.f32 %v5684_v63, %v5731_v17  ;;  %v5772_v19 = vmax.f32 %v5683_v38, %v5730_v33  ;;  %v5665_v51 = vrot.slane %v14207_v20, 7  ;;  %v5648_v23 = vmax.f32 %v14033_v42, %v5632_v52  ;;  %vm16351_vm11 = vmmov %vm16304_vm0 }
 0xd52   : > { %v5715_v21 = vrot.slane %v14137_v57, 1  ;;  %v5582_v31 = vmul.f32 %v7401_v15, %v14121_v10  ;;  %v5714_v45 = vrot.slane %v5650_v3, 1  ;;  %v5663_v24 = vmax.f32 %v14019_v44, %v5647_v46  ;;  %vm16352_vm4 = vmmov %vm16347_vm2 }
 0xd53   : > { %v5787_v29 = vmax.f32 %v14142_v53, %v5771_v4  ;;  %v5788_v13 = vmax.f32 %v14178_v47, %v5772_v19  ;;  %v5712_v42 = vrot.slane %v5648_v23, 1  ;;  %v16335_v8 = vrot.slane %v14137_v57, 7 }
 0xd54   : > { %5874 = vrot.lane.b32.xlu0 %v14187_v39, %s7008_s27  ;;  %5876 = vrot.lane.b32.xlu1 %v14190_v2, %s7008_s27  ;;  %v5646_v62 = vmax.f32 %v5582_v31, %v5630_v11  ;;  %v5693_v60 = vsel %vm16337_vm8, %v5665_v51, %v5666_v18  ;;  %v5727_v44 = vrot.slane %v5663_v24, 1  ;;  %v16338_v10 = vrot.slane %v14118_v14, 1  ;;  %vm16354_vm8 = vmmov %vm16347_vm2 }
 0xd55   : > { %v5692_v26 = vsel %vm16336_vm12, %v5666_v18, %v16335_v8  ;;  %v5740_v49 = vsel %vm16340_vm10, %v5714_v45, %v5715_v21  ;;  %v14264_v12 = vmul.f32 %v5787_v29, %v16272_v27  ;;  %v14267_v7 = vmul.f32 %v5788_v13, %v16271_v1  ;;  %vm16353_vm12 = vmmov %vm16304_vm0 }
 0xd56   : > { %v5739_v53 = vsel %vm16339_vm13, %v5715_v21, %v16338_v10  ;;  %v5762_v0 = vmax.f32 %v5693_v60, %v5740_v49  ;;  %v5662_v52 = vmax.f32 %v13999_v36, %v5646_v62  ;;  %v5664_v17 = vrot.slane %v5648_v23, 7  ;;  %vm16355_vm13 = vmmov %vm16347_vm2 }
 0xd57   : > { %v5763_v30 = vmax.f32 %v5692_v26, %v5739_v53  ;;  %v5743_v14 = vsel %vm16341_vm7, %v5727_v44, %v5712_v42  ;;  %v5679_v38 = vrot.slane %v5663_v24, 7  ;;  %v5713_v33 = vrot.slane %v14207_v20, 1  ;;  %vm16356_vm10 = vmmov %vm16304_vm0 }
 0xd58   : > { %5818 = vrot.lane.b32.xlu0 %v14228_v25, %s7009_s28  ;;  %5816 = vrot.lane.b32.xlu1 %v14231_v61, %s7009_s28  ;;  %v5759_v46 = vmul.f32 %v16261_v54, %v5743_v14  ;;  %v5778_v4 = vmax.f32 %v5650_v3, %v5762_v0  ;;  %v5678_v19 = vrot.slane %v5662_v52, 7  ;;  %v5694_v36 = vsel %vm16342_vm5, %v5664_v17, %v5665_v51  ;;  %vm16357_vm7 = vmmov %vm16347_vm2 }
 0xd59   : > { %v5779_v63 = vmax.f32 %v14137_v57, %v5763_v30  ;;  %v5741_v11 = vsel %vm16343_vm15, %v5713_v33, %v5714_v45  ;;  %v5677_v31 = vrot.slane %v14184_v55, 7  ;;  %v5695_v29 = vsel %vm16344_vm14, %v5679_v38, %v5664_v17  ;;  %vm16360_vm5 = vmmov %vm16304_vm0 }
 0xd5a   : > { %v5680_v18 = vsel %vm16304_vm0, %v5678_v19, %v5679_v38  ;;  %v14293_v57 = vmul.f32 %v5778_v4, %v16257_v59  ;;  %v5761_v3 = vmax.f32 %v5694_v36, %v5741_v11  ;;  %v5696_v45 = vmul.f32 %v16260_v6, %v5695_v29  ;;  %vm16361_vm15 = vmmov %vm16304_vm0 }
 0xd5b   : > { %v14290_v21 = vmul.f32 %v5779_v63, %v16215_v16  ;;  %v5775_v51 = vmax.f32 %v5680_v18, %v5759_v46  ;;  %v5726_v8 = vrot.slane %v5662_v52, 1  ;;  %v5681_v26 = vsel %vm16345_vm3, %v5677_v31, %v5678_v19  ;;  %vm16362_vm0 = vmmov %vm16347_vm2 }
 0xd5c   : > { %5866 = vrot.lane.b32.xlu0 %v14228_v25, %s7008_s27  ;;  %5864 = vrot.lane.b32.xlu1 %v14231_v61, %s7008_s27  ;;  %v5777_v13 = vmax.f32 %v14207_v20, %v5761_v3  ;;  %v5742_v60 = vsel %vm16346_vm6, %v5712_v42, %v5713_v33  ;;  %v5682_v42 = vsel %vm16348_vm1, %v5676_v56, %v5677_v31  ;;  %vm16364_vm14 = vmmov %vm16348_vm1 }
 0xd5d   : > { %v5791_v62 = vmax.f32 %v5663_v24, %v5775_v51  ;;  %v5728_v10 = vsel %vm16347_vm2, %v5726_v8, %v5727_v44  ;;  %v5760_v24 = vmax.f32 %v5696_v45, %v5742_v60  ;;  %v5729_v44 = vsel %vm16349_vm9, %v5725_v40, %v5726_v8  ;;  %vm16366_vm3 = vmmov %vm16348_vm1 }
 0xd5e   : > { %v14315_v53 = vmul.f32 %v5777_v13, %v16264_v34  ;;  %v5774_v49 = vmax.f32 %v5681_v26, %v5728_v10  ;;  %v5773_v47 = vmax.f32 %v5682_v42, %v5729_v44  ;;  %vm16367_vm6 = vmmov %vm16362_vm0 }
 0xd5f   : > { %v14318_v20 = vmul.f32 %v5791_v62, %v16270_v48  ;;  %v5776_v30 = vmax.f32 %v5648_v23, %v5760_v24  ;;  %vm16369_vm2 = vmmov %vm16348_vm1 }
 0xd60   : > { %5830 = vrot.lane.b32.xlu0 %v14264_v12, %s7009_s28  ;;  %5832 = vrot.lane.b32.xlu1 %v14267_v7, %s7009_s28  ;;  %v5790_v0 = vmax.f32 %v5662_v52, %v5774_v49  ;;  %v5789_v56 = vmax.f32 %v14184_v55, %v5773_v47  ;;  %vm16370_vm1 = vmmov %vm16362_vm0 }
 0xd61   : > { %v14337_v17 = vmul.f32 %v5776_v30, %v16269_v22  ;;  %vm16371_vm9 = vmmov %vm16369_vm2 }
 0xd62   : > { %v14340_v23 = vmul.f32 %v5790_v0, %v16265_v35  ;;  %v14352_v40 = vmul.f32 %v5789_v56, %v16258_v5 }
 0xd64   : > { %5878 = vrot.lane.b32.xlu0 %v14264_v12, %s7008_s27  ;;  %5880 = vrot.lane.b32.xlu1 %v14267_v7, %s7008_s27 }
 0xd68   : > { %5814 = vrot.lane.b32.xlu0 %v14290_v21, %s7009_s28  ;;  %5812 = vrot.lane.b32.xlu1 %v14293_v57, %s7009_s28 }
 0xd6c   : > { %5862 = vrot.lane.b32.xlu0 %v14290_v21, %s7008_s27  ;;  %5860 = vrot.lane.b32.xlu1 %v14293_v57, %s7008_s27 }
 0xd70   : > { %5810 = vrot.lane.b32.xlu0 %v14315_v53, %s7009_s28  ;;  %5838 = vrot.lane.b32.xlu1 %v14318_v20, %s7009_s28 }
 0xd74   : > { %5858 = vrot.lane.b32.xlu0 %v14315_v53, %s7008_s27  ;;  %5886 = vrot.lane.b32.xlu1 %v14318_v20, %s7008_s27 }
 0xd78   : > { %5808 = vrot.lane.b32.xlu0 %v14337_v17, %s7009_s28  ;;  %5836 = vrot.lane.b32.xlu1 %v14340_v23, %s7009_s28 }
 0xd7b   : > { %v5825_v52 = vpop.permute.xlu1 %5824  ;;  %v5823_v38 = vpop.permute.xlu0 %5822 }
 0xd7c   : > { %5856 = vrot.lane.b32.xlu0 %v14337_v17, %s7008_s27  ;;  %5884 = vrot.lane.b32.xlu1 %v14340_v23, %s7008_s27  ;;  %v5848_v26 = vmul.f32 %v7401_v15, %v5825_v52  ;;  %v5847_v60 = vmul.f32 %v7401_v15, %v5823_v38  ;;  %v16350_v52 = vld [vmem:[#allocation175_spill] sm:$0xff] }
 0xd7f   : > { %v5873_v14 = vpop.permute.xlu1 %5872  ;;  %v5871_v55 = vpop.permute.xlu0 %5870 }
 0xd80   : > { %5834 = vrot.lane.b32.xlu0 %v14352_v40, %s7009_s28  ;;  %v5896_v51 = vmul.f32 %v7411_v50, %v5873_v14  ;;  %v5895_v31 = vmul.f32 %v7411_v50, %v5871_v55 }
 0xd82   : > { %v5912_v30 = vmax.f32 %v5848_v26, %v5896_v51  ;;  %v5911_v0 = vmax.f32 %v5847_v60, %v5895_v31 }
 0xd83   : > { %v5821_v33 = vpop.permute.xlu1 %5820 }
 0xd84   : > { %5882 = vrot.lane.b32.xlu0 %v14352_v40, %s7008_s27  ;;  %v5846_v29 = vmul.f32 %v7401_v15, %v5821_v33  ;;  %v14372_v33 = vmax.f32 %v14090_v58, %v5912_v30  ;;  %v5927_v55 = vmax.f32 %v16350_v52, %v5911_v0 }
 0xd86   : > { %v5943_v58 = vrot.slane %v5927_v55, 7  ;;  %v5991_v51 = vrot.slane %v5927_v55, 1  ;;  %v5944_v60 = vrot.slane %v14372_v33, 7 }
 0xd87   : > { %v5869_v46 = vpop.permute.xlu1 %5868 }
 0xd88   : > { %v5894_v3 = vmul.f32 %v7411_v50, %v5869_v46 }
 0xd8a   : > { %v5910_v10 = vmax.f32 %v5846_v29, %v5894_v3  ;;  %v5992_v3 = vrot.slane %v14372_v33, 1 }
 0xd8c   : > { %v14369_v14 = vmax.f32 %v14109_v9, %v5910_v10 }
 0xdc2   : > { %v5829_v63 = vpop.permute.xlu1 %5828  ;;  %v5827_v4 = vpop.permute.xlu0 %5826 }
 0xdc3   : > { %v5850_v24 = vmul.f32 %v7401_v15, %v5829_v63  ;;  %v5849_v49 = vmul.f32 %v7401_v15, %v5827_v4 }
 0xdc6   : > { %v5877_v19 = vpop.permute.xlu1 %5876  ;;  %v5875_v36 = vpop.permute.xlu0 %5874 }
 0xdc7   : > { %v5898_v45 = vmul.f32 %v7411_v50, %v5877_v19  ;;  %v5897_v13 = vmul.f32 %v7411_v50, %v5875_v36  ;;  %v5942_v19 = vrot.slane %v14369_v14, 7 }
 0xdc9   : > { %v5914_v42 = vmax.f32 %v5850_v24, %v5898_v45  ;;  %v5913_v44 = vmax.f32 %v5849_v49, %v5897_v13 }
 0xdca   : > { %v5817_v11 = vpop.permute.xlu1 %5816  ;;  %v5819_v18 = vpop.permute.xlu0 %5818 }
 0xdcb   : > { %v14376_v38 = vmax.f32 %v14190_v2, %v5914_v42  ;;  %v14379_v46 = vmax.f32 %v14187_v39, %v5913_v44  ;;  %v5845_v31 = vmul.f32 %v7401_v15, %v5819_v18  ;;  %v5844_v45 = vmul.f32 %v7401_v15, %v5817_v11 }
 0xdcc   : > { %v6007_v18 = vsel %vm16352_vm4, %v5991_v51, %v5992_v3  ;;  %vm16373_vm4 = vmmov %vm16362_vm0 }
 0xdcd   : > { %v15179_v2 = vrot.slane %v14376_v38, 1  ;;  %v15180_v29 = vrot.slane %v14379_v46, 7  ;;  %v5993_v39 = vrot.slane %v14379_v46, 1 }
 0xdce   : > { %v5865_v62 = vpop.permute.xlu1 %5864  ;;  %v5867_v8 = vpop.permute.xlu0 %5866 }
 0xdcf   : > { %v5893_v36 = vmul.f32 %v7411_v50, %v5867_v8  ;;  %v5892_v9 = vmul.f32 %v7411_v50, %v5865_v62  ;;  %v5960_v8 = vsel %vm16351_vm11, %v5942_v19, %v5943_v58  ;;  %v5958_v11 = vsel %vm16353_vm12, %v5944_v60, %v15180_v29  ;;  %vm16372_vm11 = vmmov %vm16369_vm2 }
 0xdd0   : > { %v6039_v30 = vmax.f32 %v5960_v8, %v6007_v18  ;;  %v6005_v0 = vsel %vm16354_vm8, %v5993_v39, %v15179_v2  ;;  %vm16375_vm12 = vmmov %vm16362_vm0 }
 0xdd1   : > { %v5909_v62 = vmax.f32 %v5845_v31, %v5893_v36  ;;  %v5908_v10 = vmax.f32 %v5844_v45, %v5892_v9  ;;  %v6006_v31 = vsel %vm16355_vm13, %v5992_v3, %v5993_v39  ;;  %v6041_v39 = vmax.f32 %v5958_v11, %v6005_v0  ;;  %vm16376_vm8 = vmmov %vm16362_vm0 }
 0xdd2   : > { %v5833_v47 = vpop.permute.xlu1 %5832  ;;  %v5831_v56 = vpop.permute.xlu0 %5830  ;;  %vm16380_vm13 = vmmov %vm16362_vm0 }
 0xdd3   : > { %v5852_v42 = vmul.f32 %v7401_v15, %v5833_v47  ;;  %v14407_v36 = vmax.f32 %v14228_v25, %v5909_v62  ;;  %v14415_v45 = vmax.f32 %v14231_v61, %v5908_v10  ;;  %v5959_v25 = vsel %vm16356_vm10, %v5943_v58, %v5944_v60  ;;  %v16358_v60 = vld [vmem:[#allocation89_spill] sm:$0xff]  ;;  %vm16381_vm10 = vmmov %vm16369_vm2 }
 0xdd4   : > { %v6040_v3 = vmax.f32 %v5959_v25, %v6006_v31 }
 0xdd5   : > { %v5941_v61 = vrot.slane %v14407_v36, 7 }
 0xdd6   : > { %v5881_v63 = vpop.permute.xlu1 %5880  ;;  %v5879_v4 = vpop.permute.xlu0 %5878 }
 0xdd7   : > { %v5900_v24 = vmul.f32 %v7411_v50, %v5881_v63  ;;  %v5899_v49 = vmul.f32 %v7411_v50, %v5879_v4  ;;  %v5851_v63 = vmul.f32 %v7401_v15, %v5831_v56  ;;  %v5990_v56 = vrot.slane %v14369_v14, 1 }
 0xdd9   : > { %v5916_v62 = vmax.f32 %v5852_v42, %v5900_v24  ;;  %v5915_v18 = vmax.f32 %v5851_v63, %v5899_v49  ;;  %v6056_v42 = vmax.f32 %v14372_v33, %v6040_v3  ;;  %v16365_v3 = vld [vmem:[#allocation167_spill] sm:$0xff] }
 0xdda   : > { %v5813_v13 = vpop.permute.xlu1 %5812  ;;  %v5815_v26 = vpop.permute.xlu0 %5814 }
 0xddb   : > { %v5842_v8 = vmul.f32 %v7401_v15, %v5813_v13  ;;  %v5843_v47 = vmul.f32 %v7401_v15, %v5815_v26  ;;  %v5940_v13 = vrot.slane %v14415_v45, 7  ;;  %v5989_v26 = vrot.slane %v14407_v36, 1 }
 0xddc   : > { %v14426_v10 = vmax.f32 %v14267_v7, %v5916_v62  ;;  %v14429_v58 = vmax.f32 %v14264_v12, %v5915_v18  ;;  %v5946_v7 = vrot.slane %v14376_v38, 7  ;;  %v6057_v12 = vmax.f32 %v14379_v46, %v6041_v39 }
 0xddd   : > { %v5962_v63 = vsel %vm16361_vm15, %v5940_v13, %v5941_v61  ;;  %vm16384_vm15 = vmmov %vm16362_vm0 }
 0xdde   : > { %v5861_v44 = vpop.permute.xlu1 %5860  ;;  %v5863_v52 = vpop.permute.xlu0 %5862  ;;  %v5995_v33 = vrot.slane %v14429_v58, 1 }
 0xddf   : > { %v5890_v4 = vmul.f32 %v7411_v50, %v5861_v44  ;;  %v5891_v9 = vmul.f32 %v7411_v50, %v5863_v52  ;;  %v6055_v44 = vmax.f32 %v5927_v55, %v6039_v30  ;;  %v6008_v55 = vsel %vm16357_vm7, %v5990_v56, %v5991_v51  ;;  %vm16382_vm7 = vmmov %vm16369_vm2 }
 0xde0   : > { %v5961_v51 = vsel %vm16360_vm5, %v5941_v61, %v5942_v19  ;;  %v5988_v61 = vrot.slane %v14415_v45, 1  ;;  %vm16383_vm5 = vmmov %vm16362_vm0 }
 0xde1   : > { %v5906_v2 = vmax.f32 %v5842_v8, %v5890_v4  ;;  %v5907_v52 = vmax.f32 %v5843_v47, %v5891_v9  ;;  %v14434_v9 = vmul.f32 %v6055_v44, %v16358_v60   ;;  %v15182_v4 = vrot.slane %v14426_v10, 1 }
 0xde2   : > { %v5839_v29 = vpop.permute.xlu1 %5838  ;;  %v5811_v35 = vpop.permute.xlu0 %5810  ;;  %v14467_v44 = vmul.f32 %v6057_v12, %v16329_v28   ;;  %v16368_v12 = vld [vmem:[#allocation42_spill] sm:$0xff] }
 0xde3   : > { %v16359_v24 = vmov %v14434_v9  ;;  %v14437_v49 = vmax.f32 %v14293_v57, %v5906_v2  ;;  %v14440_v30 = vmax.f32 %v14290_v21, %v5907_v52  ;;  %v6009_v57 = vsel %vm16362_vm0, %v5989_v26, %v5990_v56  ;;  %vm16386_vm0 = vmmov %vm16369_vm2 }
 0xde4   : > { %v5841_v21 = vmul.f32 %v7401_v15, %v5811_v35  ;;  %v15183_v9 = vrot.slane %v14429_v58, 7  ;;  %v16363_v35 = vrot.slane %v14379_v46, 7  ;;  %v5855_v52 = vmul.f32 %v7401_v15, %v5839_v29 }
 0xde5   : > { %v5938_v19 = vrot.slane %v14437_v49, 7  ;;  %v5939_v8 = vrot.slane %v14440_v30, 7  ;;  %v5987_v47 = vrot.slane %v14440_v30, 1  ;;  %v6037_v60 = vmax.f32 %v5962_v63, %v6009_v57 }
 0xde6   : > { %v5887_v11 = vpop.permute.xlu1 %5886  ;;  %v5859_v0 = vpop.permute.xlu0 %5858  ;;  %v14464_v56 = vsel %vm16364_vm14, %v16363_v35, %v5946_v7  ;;  %v5956_v46 = vsel %vm16366_vm3, %v5946_v7, %v15183_v9  ;;  %v6003_v28 = vsel %vm16367_vm6, %v5995_v33, %v15182_v4  ;;  %vm16392_vm14 = vmmov %vm16386_vm0 }
 0xde7   : > { %v5889_v2 = vmul.f32 %v7411_v50, %v5859_v0  ;;  %v5903_v31 = vmul.f32 %v7411_v50, %v5887_v11  ;;  %v6038_v11 = vmax.f32 %v5961_v51, %v6008_v55  ;;  %v5964_v55 = vsel %vm16369_vm2, %v5938_v19, %v5939_v8  ;;  %vm16399_vm3 = vmmov %vm16370_vm1 }
 0xde8   : > { %v6053_v35 = vmax.f32 %v14407_v36, %v6037_v60  ;;  %v5963_v4 = vsel %vm16372_vm11, %v5939_v8, %v5940_v13  ;;  %vm16402_vm6 = vmmov %vm16386_vm0 }
 0xde9   : > { %v5905_v25 = vmax.f32 %v5841_v21, %v5889_v2  ;;  %v5919_v29 = vmax.f32 %v5855_v52, %v5903_v31  ;;  %v14483_v21 = vmul.f32 %v6056_v42, %v16368_v12   ;;  %v5986_v2 = vrot.slane %v14437_v49, 1  ;;  %vm16403_vm2 = vmmov %vm16386_vm0 }
 0xdea   : > { %v5837_v62 = vpop.permute.xlu1 %5836  ;;  %v5809_v18 = vpop.permute.xlu0 %5808  ;;  %v6054_v52 = vmax.f32 %v14369_v14, %v6038_v11  ;;  %v6043_v12 = vmax.f32 %v5956_v46, %v6003_v28 }
 0xdeb   : > { %v5921_v0 = vmax.f32 %v14315_v53, %v5905_v25  ;;  %v6011_v53 = vsel %vm16370_vm1, %v5987_v47, %v5988_v61  ;;  %v5854_v57 = vmul.f32 %v7401_v15, %v5837_v62  ;;  %v5840_v25 = vmul.f32 %v7401_v15, %v5809_v18 }
 0xdec   : > { %v14501_v9 = vmax.f32 %v14318_v20, %v5919_v29  ;;  %v6012_v36 = vsel %vm16376_vm8, %v5986_v2, %v5987_v47  ;;  %v6059_v29 = vmax.f32 %v14429_v58, %v6043_v12 }
 0xded   : > { %v5937_v51 = vrot.slane %v5921_v0, 7  ;;  %v5985_v11 = vrot.slane %v5921_v0, 1 }
 0xdee   : > { %v5885_v63 = vpop.permute.xlu1 %5884  ;;  %v5857_v7 = vpop.permute.xlu0 %5856 }
 0xdef   : > { %v5902_v31 = vmul.f32 %v7411_v50, %v5885_v63  ;;  %v5888_v42 = vmul.f32 %v7411_v50, %v5857_v7  ;;  %v5965_v39 = vsel %vm16371_vm9, %v5937_v51, %v5938_v19  ;;  %v6010_v63 = vsel %vm16373_vm4, %v5988_v61, %v5989_v26  ;;  %v16378_v61 = vld [vmem:[#allocation27_spill] sm:$0xff]  ;;  %vm16405_vm9 = vmmov %vm16370_vm1 }
 0xdf0   : > { %v16374_v7 = vrot.slane %v14376_v38, 1  ;;  %v6035_v19 = vmax.f32 %v5964_v55, %v6011_v53  ;;  %v6034_v13 = vmax.f32 %v5965_v39, %v6012_v36  ;;  %v14516_v55 = vmul.f32 %v6053_v35, %v16334_v43  }
 0xdf1   : > { %v5918_v62 = vmax.f32 %v5854_v57, %v5902_v31  ;;  %v5904_v18 = vmax.f32 %v5840_v25, %v5888_v42  ;;  %v6036_v28 = vmax.f32 %v5963_v4, %v6010_v63  ;;  %v5951_v39 = vrot.slane %v14501_v9, 7 }
 0xdf2   : > { %v6004_v14 = vsel %vm16375_vm12, %v16374_v7, %v5995_v33  ;;  %v5835_v60 = vpop.permute.xlu0 %5834  ;;  %v16377_v26 = vmov %v14516_v55  ;;  %v5948_v33 = vrot.slane %v14426_v10, 7  ;;  %v6013_v25 = vsel %vm16380_vm13, %v5985_v11, %v5986_v2 }
 0xdf3   : > { %v14512_v20 = vmax.f32 %v14340_v23, %v5918_v62  ;;  %v5920_v8 = vmax.f32 %v14337_v17, %v5904_v18  ;;  %v14519_v62 = vmul.f32 %v6054_v52, %v16378_v61   ;;  %v6042_v47 = vmax.f32 %v14464_v56, %v6004_v14 }
 0xdf4   : > { %v6051_v23 = vmax.f32 %v14440_v30, %v6035_v19  ;;  %v5999_v17 = vrot.slane %v14501_v9, 1  ;;  %v6050_v4 = vmax.f32 %v14437_v49, %v6034_v13  ;;  %v6052_v42 = vmax.f32 %v14415_v45, %v6036_v28 }
 0xdf5   : > { %v16379_v46 = vmov %v14519_v62  ;;  %v5936_v53 = vrot.slane %v5920_v8, 7  ;;  %v5950_v43 = vrot.slane %v14512_v20, 7  ;;  %v5984_v55 = vrot.slane %v5920_v8, 1 }
 0xdf6   : > { %v5883_v57 = vpop.permute.xlu0 %5882  ;;  %v5853_v49 = vmul.f32 %v7401_v15, %v5835_v60  ;;  %v14545_v16 = vmul.f32 %v6051_v23, %v16215_v16   ;;  %v6058_v18 = vmax.f32 %v14376_v38, %v6042_v47  ;;  %v14551_v7 = vmul.f32 %v6050_v4, %v16257_v59   ;;  %v16393_v47 = vld [vmem:[#allocation168_spill] sm:$0xff] }
 0xdf7   : > { %v5966_v56 = vsel %vm16381_vm10, %v5936_v53, %v5937_v51  ;;  %v5967_v31 = vsel %vm16382_vm7, %v5951_v39, %v5936_v53  ;;  %v6015_v35 = vsel %vm16383_vm5, %v5999_v17, %v5984_v55  ;;  %v6014_v12 = vsel %vm16384_vm15, %v5984_v55, %v5985_v11 }
 0xdf8   : > { %v5968_v30 = vmul.f32 %v16260_v6, %v5967_v31  ;;  %v6033_v52 = vmax.f32 %v5966_v56, %v6013_v25  ;;  %v6031_v2 = vmul.f32 %v16261_v54, %v6015_v35  ;;  %v5901_v51 = vmul.f32 %v7411_v50, %v5883_v57  ;;  %v16397_v25 = vld [vmem:[#allocation173_spill] sm:$0xff] }
 0xdf9   : > { %v16385_v63 = vmov %v14545_v16  ;;  %v5952_v45 = vsel %vm16386_vm0, %v5950_v43, %v5951_v39  ;;  %v16387_v14 = vmov %v14551_v7  ;;  %v14554_v7 = vmul.f32 %v6052_v42, %v11939_v37   ;;  %v16390_v16 = vld [vmem:[#allocation169_spill] sm:$0xff] }
 0xdfa   : > { %v6032_v6 = vmax.f32 %v5968_v30, %v6014_v12  ;;  %v6049_v62 = vmax.f32 %v5921_v0, %v6033_v52  ;;  %v6047_v36 = vmax.f32 %v5952_v45, %v6031_v2  ;;  %v5917_v19 = vmax.f32 %v5853_v49, %v5901_v51 }
 0xdfb   : > { %v16388_v54 = vmov %v14554_v7  ;;  %v5998_v60 = vrot.slane %v14512_v20, 1  ;;  %v6085_v13 = vsub.f32 %v16377_v26, %v16390_v16  ;;  %v16391_v0 = vrot.slane %v14429_v58, 7  ;;  %v16409_v16 = vld [vmem:[#allocation163_spill] sm:$0xff] }
 0xdfc   : > { %v6048_v11 = vmax.f32 %v5920_v8, %v6032_v6  ;;  %v14558_v59 = vmul.f32 %v6049_v62, %v16264_v34   ;;  %v5933_v28 = vmax.f32 %v14352_v40, %v5917_v19  ;;  %v6086_v39 = vsub.f32 %v16379_v46, %v16393_v47  ;;  %v16395_v8 = vld [vmem:[#allocation171_spill] sm:$0xff]  ;;  %v16398_v40 = vld [vmem:[#allocation172_spill] sm:$0xff] }
 0xdfd   : > { %v5955_v38 = vsel %vm16392_vm14, %v16391_v0, %v5948_v33  ;;  %v14570_v34 = vmul.f32 %v6059_v29, %v16272_v27   ;;  %v6083_v23 = vsub.f32 %v16385_v63, %v16395_v8  ;;  %v6063_v55 = vmax.f32 %v14501_v9, %v6047_v36 }
 0xdfe   : > { %v16389_v61 = vmov %v14558_v59  ;;  %v14575_v59 = vmul.f32 %v6048_v11, %v16269_v22   ;;  %v5949_v58 = vrot.slane %v5933_v28, 7  ;;  %v5997_v57 = vrot.slane %v5933_v28, 1  ;;  %v16401_v22 = vld [vmem:[#allocation170_spill] sm:$0xff] }
 0xdff   : > { %v16394_v53 = vmov %v14570_v34  ;;  %v6081_v56 = vsub.f32 %v16389_v61, %v16397_v25  ;;  %v6082_v31 = vsub.f32 %v16387_v14, %v16398_v40  ;;  %v6000_v27 = vsel %vm16399_vm3, %v5998_v60, %v5999_v17  ;;  %v16400_v34 = vld [vmem:[#allocation174_spill] sm:$0xff] }
 0xe00   : > { %v16396_v4 = vmov %v14575_v59  ;;  %v14587_v42 = vmul.f32 %v6058_v18, %v11957_v32   ;;  %v6084_v9 = vsub.f32 %v16388_v54, %v16401_v22  ;;  %v5953_v30 = vsel %vm16402_vm6, %v5949_v58, %v5950_v43 }
 0xe01   : > { %v6080_v29 = vsub.f32 %v16396_v4, %v16400_v34  ;;  %v5954_v35 = vsel %vm16403_vm2, %v5948_v33, %v5949_v58  ;;  %v6001_v52 = vsel %vm16370_vm1, %v5997_v57, %v5998_v60  ;;  %v16404_v17 = vrot.slane %v14426_v10, 1  ;;  %v16416_v58 = vld [vmem:[#allocation162_spill] sm:$0xff] }
 0xe02   : > { %v6045_v49 = vmax.f32 %v5954_v35, %v6001_v52  ;;  %v6046_v51 = vmax.f32 %v5953_v30, %v6000_v27  ;;  %v14602_v45 = vmul.f32 %v6063_v55, %v16270_v48   ;;  %v6097_v62 = vmax.f32 %v6081_v56, %v6085_v13  ;;  %v16410_v48 = vld [vmem:[#allocation166_spill] sm:$0xff]  ;;  %v16417_v56 = vld [vmem:[#allocation161_spill] sm:$0xff] }
 0xe03   : > { %v6002_v12 = vsel %vm16405_vm9, %v16404_v17, %v5997_v57  ;;  %v6098_v18 = vmax.f32 %v6082_v31, %v6086_v39  ;;  %v16407_v43 = vsub.f32 %v16359_v24, %v16365_v3  ;;  %v6096_v60 = vmax.f32 %v6080_v29, %v6084_v9  ;;  %v16415_v39 = vld [vmem:[#allocation159_spill] sm:$0xff] }
 0xe04   : > { %v6044_v2 = vmax.f32 %v5955_v38, %v6002_v12  ;;  %v16406_v6 = vmov %v14602_v45  ;;  %v6061_v7 = vmax.f32 %v5933_v28, %v6045_v49  ;;  %v6062_v19 = vmax.f32 %v14512_v20, %v6046_v51  ;;  %v16411_v38 = vld [vmem:[#allocation164_spill] sm:$0xff]  ;;  %v16413_v20 = vld [vmem:[#allocation12_spill] sm:$0xff] }
 0xe05   : > { %v6099_v33 = vmax.f32 %v6083_v23, %v16407_v43  ;;  %v6089_v11 = vsub.f32 %v14467_v44, %v16408_v41  ;;  %v6091_v0 = vsub.f32 %v16394_v53, %v16409_v16  ;;  %v6088_v13 = vsub.f32 %v14483_v21, %v16410_v48 }
 0xe06   : > { %v6060_v36 = vmax.f32 %v14426_v10, %v6044_v2  ;;  %v6090_v47 = vsub.f32 %v14587_v42, %v16411_v38  ;;  %v14618_v25 = vmul.f32 %v6061_v7, %v16258_v5   ;;  %v14624_v17 = vmul.f32 %v6062_v19, %v16413_v20  }
 0xe07   : > { %v6095_v8 = vsub.f32 %v16406_v6, %v16415_v39  ;;  %v6101_v23 = vmax.f32 %v6097_v62, %v6089_v11  ;;  %v6103_v55 = vmax.f32 %v6099_v33, %v6091_v0  ;;  %v6100_v40 = vmax.f32 %v6096_v60, %v6088_v13 }
 0xe08   : > { %v16412_v3 = vmov %v14618_v25  ;;  %v14621_v10 = vmul.f32 %v6060_v36, %v16271_v1   ;;  %v16414_v28 = vmov %v14624_v17  ;;  %v6102_v59 = vmax.f32 %v6098_v18, %v6090_v47  ;;  %v16418_v25 = vld [vmem:[#allocation160_spill] sm:$0xff] }
 0xe09   : > { %v6093_v5 = vsub.f32 %v16412_v3, %v16417_v56  ;;  %v6094_v1 = vsub.f32 %v16414_v28, %v16418_v25  ;;  %v6107_v29 = vmax.f32 %v6103_v55, %v6095_v8  ;;  %v16420_v13 = vmov %v16406_v6 }
 0xe0a   : > { %v6092_v57 = vsub.f32 %v14621_v10, %v16416_v58  ;;  %v16422_v25 = vmov %v16412_v3  ;;  %v16423_v47 = vmov %v14621_v10  ;;  %v16427_v18 = vmov %v14483_v21 }
 0xe0b   : > { %v6105_v27 = vmax.f32 %v6101_v23, %v6093_v5  ;;  %v6106_v34 = vmax.f32 %v6102_v59, %v6094_v1  ;;  %v16429_v62 = vmov %v16379_v46  ;;  %v16430_v55 = vmov %v16377_v26 }
 0xe0c   : > { %v6104_v31 = vmax.f32 %v6100_v40, %v6092_v57  ;;  %v16426_v57 = vmov %v14467_v44  ;;  %v16431_v7 = vmov %v16388_v54  ;;  %v16432_v16 = vmov %v16385_v63 }
 0xe0d   : > { %v6109_v9 = vmax.f32 %v6106_v34, %v6107_v29  ;;  %v16424_v34 = vmov %v16394_v53  ;;  %v16425_v29 = vmov %v14587_v42  ;;  %v16433_v45 = vmov %v16387_v14 }
 0xe0e   : > { %v6108_v22 = vmax.f32 %v6104_v31, %v6105_v27  ;;  %v16434_v59 = vmov %v16389_v61  ;;  %v16435_v33 = vmov %v16396_v4 }
 0xe10   : > { %v6110_v30 = vmax.f32 %v6108_v22, %v6109_v9  ;;  %v16428_v9 = vmov %v16359_v24 }
 0xe12   : > { %6111 = vmax.xlane.f32.xlu0 %v6110_v30 }
 0xe9f   : > { %v6112_v35 = vpop.xlane.xlu0 %6111 }
 0xea0   : > { %v6113_v52 = vrot.slane %v6112_v35, 4 }
 0xea2   : > { %v6114_v17 = vmax.f32 %v6112_v35, %v6113_v52 }
 0xea4   : > { %v6115_v12 = vrot.slane %v6114_v17, 2 }
 0xea6   : > { %v6116_v2 = vmax.f32 %v6114_v17, %v6115_v12  ;;  %v16421_v17 = vmov %v16414_v28 }
 0xea8   : > { %v6117_v49 = vrot.slane %v6116_v2, 1 }
 0xeaa   : > { %v6118_v51 = vmax.f32 %v6116_v2, %v6117_v49 }
 0xeac   : > { %6395 = vpush %v6118_v51 }
 0xedd   : > { %s6396_s29 = spop %6395 }
 0xede   : > { %p6120_p11 = scmp.gt.f32.partialorder %s6396_s29, 0.5 }
 0xee0   : > { %p14635_p13 = pnand %p6120_p11, %p3899_p12 }
 0xee1   :  { %v6122_v43 = vsub.f32 (%p14635_p13), 1.0, %v16396_v4  ;;  %v6123_v33 = vsub.f32 (%p14635_p13), 1.0, %v16389_v61  ;;  %v6124_v36 = vsub.f32 (%p14635_p13), 1.0, %v16387_v14  ;;  %v6125_v19 = vsub.f32 (%p14635_p13), 1.0, %v16385_v63  ;;  %v16436_v48 = vld [vmem:[#allocation91_spill] sm:$0xff] (%p14635_p13)  ;;  %v16440_v61 = vld [vmem:[#allocation88_spill] sm:$0xff] (%p14635_p13) }
 0xee2   :  { %3903 = sbr.rel (!%p14635_p13) target bundleno = 2201 (0x899), region = 53  ;;  %v6126_v60 = vsub.f32 (%p14635_p13), 1.0, %v16388_v54  ;;  %v6127_v41 = vsub.f32 (%p14635_p13), 1.0, %v16377_v26  ;;  %v6128_v11 = vsub.f32 (%p14635_p13), 1.0, %v16379_v46  ;;  %v6129_v0 = vsub.f32 (%p14635_p13), 1.0, %v16359_v24  ;;  %v16437_v20 = vld [vmem:[#allocation11_spill] sm:$0xff] (%p14635_p13) }
 0xee3   :  { %v6138_v38 = vmul.f32 (%p14635_p13), %v6122_v43, %v16436_v48  ;;  %v6139_v39 = vmul.f32 (%p14635_p13), %v6123_v33, %v16437_v20  ;;  %v16438_v15 = vld [vmem:[#allocation23_spill] sm:$0xff] (%p14635_p13)  ;;  %v16442_v45 = vld [vmem:[#allocation85_spill] sm:$0xff] (%p14635_p13)  ;;  %v16443_v62 = vld [vmem:[#allocation104_spill] sm:$0xff] (%p14635_p13)  ;;  %v6130_v31 = vsub.f32 (%p14635_p13), 1.0, %v14483_v21  ;;  %v6131_v27 = vsub.f32 (%p14635_p13), 1.0, %v14467_v44  ;;  %s7010_s2 = smov (%p14635_p13), [#allocation5]  }
 0xee4   :  { %v6140_v50 = vmul.f32 (%p14635_p13), %v6124_v36, %v16438_v15  ;;  %v16439_v37 = vld [vmem:[#allocation47_spill] sm:$0xff] (%p14635_p13)  ;;  %v6142_v14 = vmul.f32 (%p14635_p13), %v6126_v60, %v16440_v61  ;;  %v6144_v54 = vmul.f32 (%p14635_p13), %v6128_v11, %v16442_v45  ;;  %v6145_v26 = vmul.f32 (%p14635_p13), %v6129_v0, %v16443_v62  ;;  %v16444_v35 = vld [vmem:[#allocation84_spill] sm:$0xff] (%p14635_p13)  ;;  %v16446_v51 = vld [vmem:[#allocation94_spill] sm:$0xff] (%p14635_p13)  ;;  %s6235_s3 = sshll.u32 (%p14635_p13), %s7010_s2, 4  ;;  %s6236_s3 = int_to_ptr.vmem [resolvable:$true] %s6235_s3 }
 0xee5   :  { %v6141_v32 = vmul.f32 (%p14635_p13), %v6125_v19, %v16439_v37  ;;  %v16441_v4 = vld [vmem:[#allocation107_spill] sm:$0xff] (%p14635_p13)  ;;  %v6154_v18 = vmul.f32 (%p14635_p13), 255.0, %v6138_v38  ;;  %v6155_v46 = vmul.f32 (%p14635_p13), 255.0, %v6139_v39  ;;  %v6132_v22 = vsub.f32 (%p14635_p13), 1.0, %v14587_v42  ;;  %v16447_v33 = vld [vmem:[#allocation28_spill] sm:$0xff] (%p14635_p13)  ;;  %v16448_v11 = vld [vmem:[#allocation22_spill] sm:$0xff] (%p14635_p13)  ;;  %p6707_p1 = scmp.lt.s32.totalorder (%p14635_p13), %s6236_s3, %s6236_s3 }
 0xee6   :  { %v6143_v63 = vmul.f32 (%p14635_p13), %v6127_v41, %v16441_v4  ;;  %v6156_v7 = vmul.f32 (%p14635_p13), 255.0, %v6140_v50  ;;  %v6158_v16 = vmul.f32 (%p14635_p13), 255.0, %v6142_v14  ;;  %v6160_v47 = vmul.f32 (%p14635_p13), 255.0, %v6144_v54  ;;  %v16445_v17 = vld [vmem:[#allocation83_spill] sm:$0xff] (%p14635_p13)  ;;  %v16451_v50 = vld [vmem:[#allocation17_spill] sm:$0xff] (%p14635_p13)  ;;  %s6702_s4 = scalar_lea.vmem (%p14635_p13), %s6236_s3, 512 }
 0xee7   :  { %v6157_v24 = vmul.f32 (%p14635_p13), 255.0, %v6141_v32  ;;  %v6161_v8 = vmul.f32 (%p14635_p13), 255.0, %v6145_v26  ;;  %v6170_v23 = vtrunc.f32 (%p14635_p13), %v6154_v18  ;;  %v6171_v59 = vtrunc.f32 (%p14635_p13), %v6155_v46  ;;  %v16450_v39 = vld [vmem:[#allocation95_spill] sm:$0xff] (%p14635_p13)  ;;  %p6703_p0 = scmp.ne.s32.totalorder (%p14635_p13), %s6236_s3, %s6702_s4  ;;  %p6708_p2 = scmp.lt.s32.totalorder (%p14635_p13), %s6702_s4, %s6702_s4 }
 0xee8   :  { %v6159_v13 = vmul.f32 (%p14635_p13), 255.0, %v6143_v63  ;;  %v6172_v55 = vtrunc.f32 (%p14635_p13), %v6156_v7  ;;  %v6174_v57 = vtrunc.f32 (%p14635_p13), %v6158_v16  ;;  %v6176_v5 = vtrunc.f32 (%p14635_p13), %v6160_v47 }
 0xee9   :  { %v6173_v58 = vtrunc.f32 %v6157_v24  ;;  %v6177_v25 = vtrunc.f32 %v6161_v8  ;;  %v6186_v1 = vpack.c.f32.eXmY %v6170_v23, %v6171_v59, 56  ;;  %v6133_v9 = vsub.f32 1.0, %v16394_v53  ;;  %p6709_p3 = por %p6708_p2, %p6707_p1 }
 0xeea   :  { %v6175_v56 = vtrunc.f32 %v6159_v13  ;;  %v6146_v52 = vmul.f32 %v6130_v31, %v16444_v35  ;;  %v6147_v12 = vmul.f32 %v6131_v27, %v16445_v17  ;;  %v6134_v2 = vsub.f32 1.0, %v14621_v10  ;;  %v16449_v10 = vld [vmem:[#allocation122_spill] sm:$0xff] }
 0xeeb   :  { %v6190_v40 = vpack.c.f32.eXmY %v6172_v55, %v6173_v58, 56  ;;  %v6200_v29 = vpack.c.f32.eXmY %v6176_v5, %v6177_v25, 56  ;;  %v6148_v43 = vmul.f32 %v6132_v22, %v16446_v51  ;;  %v6149_v21 = vmul.f32 %v6133_v9, %v16447_v33  ;;  %p6710_p4 = pnand %p6709_p3, %p6703_p0 }
 0xeec   :  { %v6196_v34 = vpack.c.f32.eXmY %v6174_v57, %v6175_v56, 56  ;;  %v6135_v44 = vsub.f32 1.0, %v16412_v3  ;;  %v6162_v36 = vmul.f32 255.0, %v6146_v52  ;;  %v6163_v19 = vmul.f32 255.0, %v6147_v12 }
 0xeed   :  { %v6194_v30 = vpack.c.b8 %v6190_v40, %v6186_v1  ;;  %v6136_v42 = vsub.f32 1.0, %v16414_v28  ;;  %v6137_v53 = vsub.f32 1.0, %v16406_v6  ;;  %v6164_v60 = vmul.f32 255.0, %v6148_v43 }
 0xeee   :  { %v6204_v49 = vpack.c.b8 %v6200_v29, %v6196_v34  ;;  %v6165_v41 = vmul.f32 255.0, %v6149_v21  ;;  %v6150_v0 = vmul.f32 %v6134_v2, %v16448_v11  ;;  %v6151_v48 = vmul.f32 %v6135_v44, %v16449_v10 }
 0xeef   :  { %6226 = vst [vmem:[#allocation5] sm:$0xff] %v6194_v30  ;;  %v6178_v38 = vtrunc.f32 %v6162_v36  ;;  %v6179_v20 = vtrunc.f32 %v6163_v19  ;;  %v6152_v15 = vmul.f32 %v6136_v42, %v16450_v39  ;;  %v6153_v3 = vmul.f32 %v6137_v53, %v16451_v50 }
 0xef0   :  { %6227 = vst [vmem:[#allocation5 + $0x8] sm:$0xff] %v6204_v49  ;;  %v6180_v37 = vtrunc.f32 %v6164_v60  ;;  %v6181_v32 = vtrunc.f32 %v6165_v41  ;;  %v6166_v61 = vmul.f32 255.0, %v6150_v0  ;;  %v6167_v14 = vmul.f32 255.0, %v6151_v48 }
 0xef1   :  { %v6206_v28 = vpack.c.f32.eXmY %v6178_v38, %v6179_v20, 56  ;;  %v6168_v4 = vmul.f32 255.0, %v6152_v15  ;;  %v6169_v6 = vmul.f32 255.0, %v6153_v3 }
 0xef2   :  { %v6210_v63 = vpack.c.f32.eXmY %v6180_v37, %v6181_v32, 56  ;;  %v6182_v45 = vtrunc.f32 %v6166_v61  ;;  %v6183_v54 = vtrunc.f32 %v6167_v14 }
 0xef3   :  { %v6184_v62 = vtrunc.f32 %v6168_v4  ;;  %v6185_v26 = vtrunc.f32 %v6169_v6 }
 0xef4   :  { %v6214_v18 = vpack.c.b8 %v6210_v63, %v6206_v28  ;;  %v6216_v46 = vpack.c.f32.eXmY %v6182_v45, %v6183_v54, 56 }
 0xef5   :  { %v6220_v7 = vpack.c.f32.eXmY %v6184_v62, %v6185_v26, 56 }
 0xef6   :  { %6228 = vst [vmem:[#allocation5 + $0x10] sm:$0xff] %v6214_v18 }
 0xef7   :  { %v6224_v24 = vpack.c.b8 %v6220_v7, %v6216_v46 }
 0xef9   :  { %6229 = vst [vmem:[#allocation5 + $0x18] sm:$0xff] %v6224_v24 }
 0xefa   :  { %6713 = shalt.err (!%p6710_p4)
}
 0xefb   :  { %s6714_s7 = scalar_lea.hbm %s14739_s1, 512 }
 0xefc   :  { %p6715_p5 = scmp.ne.s32.totalorder %s14739_s1, %s6714_s7  ;;  %p6718_p6 = scmp.lt.u32.totalorder %s6714_s7, %s14739_s1 }
 0xefe   :  { %p6720_p7 = pnand %p6718_p6, %p6715_p5 }
 0xf00   :  { %6723 = shalt.err (!%p6720_p7)
}
 0xf01   :  { %6241 = dma.vmem_to_hbm [thread:$0]  %s6236_s3, 512, %s14739_s1, [#allocation4], %s7001_s16, %s7001_s16, %s7002_s17  }
 0xf02   :  { %6862 = dma.done.wait [#allocation4], 512  }
 0xf03   :  { %6863 = vsyncadd [#allocation4], 4294966784 }
 0xf04   :  { %6245 = vsyncpa [#allocation3], 1 }
 0xf05   :  { %6246 = vsyncpa [#allocation4], 1 }

</bundles_post_ra>
